<compile_context>
chip_gen: v5e
topology: v5e:2x2
jax: 0.10.0
libtpu: 0.0.40
codegen_flags: <defaults>
</compile_context>

<pallas_src>
import functools

import jax
import jax.numpy as jnp
from jax import lax
from jax.experimental import pallas as pl
from jax.experimental.pallas import tpu as pltpu

K = 5
C1_IN, C1_OUT = 1, 6
C2_IN, C2_OUT = 6, 12


def _pool_cols(rm, pw, bt):
    """Column half of the 2x2 / stride-2 max pool.

    rm:  (C, 2*pw*bt) row-pair max, lane index = ow*bt + b (w-major packing).
    out: (C, pw*bt),  lane index = j*bt + b, value = max(ow=2j, ow=2j+1).
    """
    n = rm.shape[-1]
    if n % 128 == 0:
        # Pair columns with one XLU lane roll (rides an otherwise idle slot):
        # shifted[:, i] = rm[:, (i + bt) % n]; then keep only the even blocks.
        shifted = pltpu.roll(rm, shift=n - bt, axis=1)
        m = jnp.maximum(rm, shifted)
        return jnp.concatenate(
            [m[:, (2 * j) * bt:(2 * j) * bt + bt] for j in range(pw)], axis=1)
    # Fallback for unaligned lane widths: even/odd block slices + max (VPU).
    even = jnp.concatenate(
        [rm[:, (2 * j) * bt:(2 * j + 1) * bt] for j in range(pw)], axis=1)
    odd = jnp.concatenate(
        [rm[:, (2 * j + 1) * bt:(2 * j + 2) * bt] for j in range(pw)], axis=1)
    return jnp.maximum(even, odd)


def encoder_kernel(x_ref, w1_ref, b1_ref, w2_ref, b2_ref, out_ref,
                   xs1_ref, cols2_ref, *, H, W, BT):
    OH1, OW1 = H - K + 1, W - K + 1          # 24, 24
    PH1, PW1 = OH1 // 2, OW1 // 2            # 12, 12
    OH2, OW2 = PH1 - K + 1, PW1 - K + 1      # 8, 8
    PH2, PW2 = OH2 // 2, OW2 // 2            # 4, 4
    KC = K * C2_IN                           # conv2 im2col rows per pooled row (30)

    # Resident weights + hoisted bias broadcasts (no per-iteration broadcasts).
    w1p = w1_ref[...]                                            # (12, 30)  bf16
    w2p = w2_ref[...]                                            # (24, 180) bf16
    b1b = jnp.broadcast_to(b1_ref[...], (2 * C1_OUT, OW1 * BT))  # f32
    b2b = jnp.broadcast_to(b2_ref[...], (2 * C2_OUT, OW2 * BT))  # f32

    # Hoist the K kw lane-shifts of the input: built once into VMEM.
    for kw in range(K):
        xs1_ref[kw] = x_ref[0, :, kw * BT: kw * BT + OW1 * BT]

    # ---- conv1 + ReLU + 2x2 maxpool, fused per output-row pair --------------
    # One (12, 30) x (30, OW1*BT) matmul yields BOTH rows of a pool pair
    # (weights zero-padded over the 6-row input window).  The pooled row is
    # written straight into the conv2 im2col slab.
    for i in range(PH1):
        pieces = [xs1_ref[kw, 2 * i: 2 * i + K + 1, :] for kw in range(K)]
        colp = jnp.concatenate(pieces, axis=0)                   # (30, OW1*BT)
        acc = jnp.dot(w1p, colp, preferred_element_type=jnp.float32)
        rows = jnp.maximum(acc + b1b, 0.0)                       # (12, OW1*BT)
        rm = jnp.maximum(rows[:C1_OUT], rows[C1_OUT:])           # row-pair max
        pooled = _pool_cols(rm, PW1, BT).astype(jnp.bfloat16)    # (6, PW1*BT)
        # Scatter the K kw-shifted views of this pooled row into the slab, so
        # each conv2 contraction window is one contiguous sublane run.
        for kw in range(K):
            cols2_ref[(i * K + kw) * C2_IN:(i * K + kw + 1) * C2_IN, :] = (
                pooled[:, kw * BT: kw * BT + OW2 * BT])

    # ---- conv2 + ReLU + 2x2 maxpool, fused per output-row pair --------------
    # One contiguous (180, OW2*BT) slab load + one (24, 180) matmul per pair.
    parts = []
    for j in range(PH2):
        col = cols2_ref[2 * j * KC: 2 * j * KC + (K + 1) * KC, :]
        acc = jnp.dot(w2p, col, preferred_element_type=jnp.float32)
        rows = jnp.maximum(acc + b2b, 0.0)                       # (24, OW2*BT)
        rm = jnp.maximum(rows[:C2_OUT], rows[C2_OUT:])
        parts.append(_pool_cols(rm, PW2, BT))                    # (12, PW2*BT)

    # Single lane-dense store of the whole encoder output tile.
    out_ref[0] = jnp.concatenate(parts, axis=1)                  # (12, PH2*PW2*BT)


def _auto_block_batch(B):
    """Batch tile: multiple of 16 when possible (128-lane-aligned conv/pool
    runs) while keeping >= 2 grid steps so both v7x TensorCores get work."""
    if B >= 32:
        return min(64, max(16, (B // 32) * 16))
    return 8


@functools.partial(jax.jit, static_argnames="block_batch")
def encoder_forward(x_nchw, w1, b1, w2, b2, *, block_batch=None):
    B, cin, H, W = x_nchw.shape
    assert cin == C1_IN
    BT = _auto_block_batch(B) if block_batch is None else block_batch

    OH1, OW1 = H - K + 1, W - K + 1
    PH1, PW1 = OH1 // 2, OW1 // 2
    OH2, OW2 = PH1 - K + 1, PW1 - K + 1
    PH2, PW2 = OH2 // 2, OW2 // 2
    assert OH1 % 2 == 0 and OW1 % 2 == 0 and OH2 % 2 == 0 and OW2 % 2 == 0

    # Pad batch to a multiple of the batch tile.
    Bp = ((B + BT - 1) // BT) * BT
    if Bp != B:
        x_nchw = jnp.pad(x_nchw, ((0, Bp - B), (0, 0), (0, 0), (0, 0)))
    T = Bp // BT

    # Pack input (bf16, halves DMA bytes): (B,1,H,W) -> (T, H, W*BT),
    # lane index = w*BT + b.
    xp = x_nchw[:, 0].astype(jnp.bfloat16)
    xp = xp.reshape(T, BT, H, W).transpose(0, 2, 3, 1).reshape(T, H, W * BT)

    # conv1 pair weights (12, K*(K+1)): rows [0:6] produce the even output row
    # of a pool pair, rows [6:12] the odd one; columns are (kw, s) where s is
    # the row offset inside the 6-row input window (zero-padded taps).
    w1t = jnp.transpose(w1.reshape(C1_OUT, K, K), (0, 2, 1))        # [oc, kw, kh]
    z1 = jnp.zeros((C1_OUT, K, 1), w1.dtype)
    w1p = jnp.concatenate(
        [jnp.concatenate([w1t, z1], axis=2),     # even row: s = kh
         jnp.concatenate([z1, w1t], axis=2)],    # odd  row: s = kh + 1
        axis=0).reshape(2 * C1_OUT, K * (K + 1)).astype(jnp.bfloat16)

    # conv2 pair weights (24, (K+1)*K*Cin): columns are (s, kw, ci).
    w2t = jnp.transpose(w2, (0, 2, 3, 1))                           # [oc, kh, kw, ci]
    z2 = jnp.zeros((C2_OUT, 1, K, C2_IN), w2.dtype)
    w2p = jnp.concatenate(
        [jnp.concatenate([w2t, z2], axis=1),     # even row: s = kh
         jnp.concatenate([z2, w2t], axis=1)],    # odd  row: s = kh + 1
        axis=0).reshape(2 * C2_OUT, (K + 1) * K * C2_IN).astype(jnp.bfloat16)

    # Biases duplicated for the stacked even/odd output rows.
    b1p = jnp.tile(b1.reshape(C1_OUT, 1).astype(jnp.float32), (2, 1))
    b2p = jnp.tile(b2.reshape(C2_OUT, 1).astype(jnp.float32), (2, 1))

    kernel = functools.partial(encoder_kernel, H=H, W=W, BT=BT)
    out_packed = pl.pallas_call(
        kernel,
        out_shape=jax.ShapeDtypeStruct((T, C2_OUT, PH2 * PW2 * BT), jnp.float32),
        grid=(T,),
        in_specs=[
            pl.BlockSpec((1, H, W * BT), lambda t: (t, 0, 0)),
            pl.BlockSpec((2 * C1_OUT, K * (K + 1)), lambda t: (0, 0)),
            pl.BlockSpec((2 * C1_OUT, 1), lambda t: (0, 0)),
            pl.BlockSpec((2 * C2_OUT, (K + 1) * K * C2_IN), lambda t: (0, 0)),
            pl.BlockSpec((2 * C2_OUT, 1), lambda t: (0, 0)),
        ],
        out_specs=pl.BlockSpec((1, C2_OUT, PH2 * PW2 * BT), lambda t: (t, 0, 0)),
        scratch_shapes=[
            pltpu.VMEM((K, H, OW1 * BT), jnp.bfloat16),             # kw-shifted input
            pltpu.VMEM((PH1 * K * C2_IN, OW2 * BT), jnp.bfloat16),  # conv2 im2col slab
        ],
        compiler_params=pltpu.CompilerParams(
            dimension_semantics=("parallel",)),
    )(xp, w1p, b1p, w2p, b2p)

    # Unpack (T, 12, PH2*PW2*BT) -> NCHW.
    out = out_packed.reshape(T, C2_OUT, PH2, PW2, BT)
    out = out.transpose(0, 4, 1, 2, 3).reshape(Bp, C2_OUT, PH2, PW2)
    return out[:B]


def encoder_ref(x, w1, b1, w2, b2):
    """Plain-JAX f32 reference (matches PyTorch semantics)."""
    dn = ('NCHW', 'OIHW', 'NCHW')
    y = lax.conv_general_dilated(x, w1, (1, 1), 'VALID', dimension_numbers=dn,
                                 precision=lax.Precision.HIGHEST)
    y = jnp.maximum(y + b1[None, :, None, None], 0.0)
    y = lax.reduce_window(y, -jnp.inf, lax.max, (1, 1, 2, 2), (1, 1, 2, 2), 'VALID')
    y = lax.conv_general_dilated(y, w2, (1, 1), 'VALID', dimension_numbers=dn,
                                 precision=lax.Precision.HIGHEST)
    y = jnp.maximum(y + b2[None, :, None, None], 0.0)
    y = lax.reduce_window(y, -jnp.inf, lax.max, (1, 1, 2, 2), (1, 1, 2, 2), 'VALID')
    return y


if __name__ == "__main__":
    key = jax.random.PRNGKey(0)
    kx, k1, k2, k3, k4 = jax.random.split(key, 5)
    # MNIST-sized single-channel input implied by the module; B=32 so the
    # auto batch tile is BT=16 (128-lane-aligned) with T=2 parallel grid steps.
    B, H, W = 32, 28, 28

    x = jax.random.normal(kx, (B, C1_IN, H, W), dtype=jnp.float32)
    w1 = 0.1 * jax.random.normal(k1, (C1_OUT, C1_IN, K, K), dtype=jnp.float32)
    b1 = 0.1 * jax.random.normal(k2, (C1_OUT,), dtype=jnp.float32)
    w2 = 0.1 * jax.random.normal(k3, (C2_OUT, C2_IN, K, K), dtype=jnp.float32)
    b2 = 0.1 * jax.random.normal(k4, (C2_OUT,), dtype=jnp.float32)

    out = jax.block_until_ready(encoder_forward(x, w1, b1, w2, b2))
    ref = jax.block_until_ready(encoder_ref(x, w1, b1, w2, b2))

    assert out.shape == (B, C2_OUT, 4, 4), out.shape
    # Kernel uses bf16 MXU operands with f32 accumulation (per perf feedback);
    # tolerance sized for bf16 rounding vs. the f32 Precision.HIGHEST reference.
    max_err = float(jnp.max(jnp.abs(out - ref)))
    assert jnp.allclose(out, ref, atol=2e-2, rtol=2e-2), max_err
    print("KERNEL_OK")
</pallas_src>

<mosaic_0001>
module attributes {stable_mosaic.version = 11 : i64} {
  func.func @encoder_kernel(%arg0: i32, %arg1: memref<1x28x448xbf16, #tpu.memory_space<vmem>>, %arg2: memref<12x30xbf16, #tpu.memory_space<vmem>>, %arg3: memref<12x1xf32, #tpu.memory_space<vmem>>, %arg4: memref<24x180xbf16, #tpu.memory_space<vmem>>, %arg5: memref<24x1xf32, #tpu.memory_space<vmem>>, %arg6: memref<1x12x256xf32, #tpu.memory_space<vmem>>, %arg7: memref<5x28x384xbf16, #tpu.memory_space<vmem>>, %arg8: memref<360x128xbf16, #tpu.memory_space<vmem>>) attributes {dimension_semantics = [#tpu.dimension_semantics<parallel>], iteration_bounds = array<i64: 2>, scalar_prefetch = 0 : i64, scratch_operands = 2 : i64, tpu.core_type = #tpu.core_type<tc>, window_params = [{transform_indices = @transform_0, window_bounds = array<i64: 1, 28, 448>}, {pipeline_mode = #tpu.pipeline_mode<synchronous>, transform_indices = @transform_1, window_bounds = array<i64: 12, 30>}, {pipeline_mode = #tpu.pipeline_mode<synchronous>, transform_indices = @transform_2, window_bounds = array<i64: 12, 1>}, {pipeline_mode = #tpu.pipeline_mode<synchronous>, transform_indices = @transform_3, window_bounds = array<i64: 24, 180>}, {pipeline_mode = #tpu.pipeline_mode<synchronous>, transform_indices = @transform_4, window_bounds = array<i64: 24, 1>}, {transform_indices = @transform_5, window_bounds = array<i64: 1, 12, 256>}]} {
    %c0 = arith.constant 0 : index
    %c0_0 = arith.constant 0 : index
    %0 = vector.load %arg2[%c0, %c0_0] : memref<12x30xbf16, #tpu.memory_space<vmem>>, vector<12x30xbf16>
    %c0_1 = arith.constant 0 : index
    %c0_2 = arith.constant 0 : index
    %1 = vector.load %arg4[%c0_1, %c0_2] : memref<24x180xbf16, #tpu.memory_space<vmem>>, vector<24x180xbf16>
    %c0_3 = arith.constant 0 : index
    %c0_4 = arith.constant 0 : index
    %2 = vector.load %arg3[%c0_3, %c0_4] : memref<12x1xf32, #tpu.memory_space<vmem>>, vector<12x1xf32>
    %3 = vector.shape_cast %2 : vector<12x1xf32> to vector<12x1xf32>
    %4 = vector.broadcast %3 : vector<12x1xf32> to vector<12x384xf32>
    %c0_5 = arith.constant 0 : index
    %c0_6 = arith.constant 0 : index
    %5 = vector.load %arg5[%c0_5, %c0_6] : memref<24x1xf32, #tpu.memory_space<vmem>>, vector<24x1xf32>
    %6 = vector.shape_cast %5 : vector<24x1xf32> to vector<24x1xf32>
    %7 = vector.broadcast %6 : vector<24x1xf32> to vector<24x128xf32>
    %c0_7 = arith.constant 0 : index
    %c0_8 = arith.constant 0 : index
    %c0_9 = arith.constant 0 : index
    %8 = vector.load %arg1[%c0_7, %c0_8, %c0_9] : memref<1x28x448xbf16, #tpu.memory_space<vmem>>, vector<1x28x384xbf16>
    %9 = vector.shape_cast %8 : vector<1x28x384xbf16> to vector<28x384xbf16>
    %c0_10 = arith.constant 0 : index
    %c0_11 = arith.constant 0 : index
    %c0_12 = arith.constant 0 : index
    %10 = vector.load %arg7[%c0_10, %c0_11, %c0_12] : memref<5x28x384xbf16, #tpu.memory_space<vmem>>, vector<1x28x384xbf16>
    %11 = vector.shape_cast %10 : vector<1x28x384xbf16> to vector<28x384xbf16>
    %12 = vector.shape_cast %9 : vector<28x384xbf16> to vector<1x28x384xbf16>
    tpu.vector_store %arg7[%c0_10, %c0_11, %c0_12], %12 {strides = array<i32>} : memref<5x28x384xbf16, #tpu.memory_space<vmem>>, vector<1x28x384xbf16>,
    %c0_13 = arith.constant 0 : index
    %c0_14 = arith.constant 0 : index
    %c16 = arith.constant 16 : index
    %13 = vector.load %arg1[%c0_13, %c0_14, %c16] : memref<1x28x448xbf16, #tpu.memory_space<vmem>>, vector<1x28x384xbf16>
    %14 = vector.shape_cast %13 : vector<1x28x384xbf16> to vector<28x384xbf16>
    %c1 = arith.constant 1 : index
    %c0_15 = arith.constant 0 : index
    %c0_16 = arith.constant 0 : index
    %15 = vector.load %arg7[%c1, %c0_15, %c0_16] : memref<5x28x384xbf16, #tpu.memory_space<vmem>>, vector<1x28x384xbf16>
    %16 = vector.shape_cast %15 : vector<1x28x384xbf16> to vector<28x384xbf16>
    %17 = vector.shape_cast %14 : vector<28x384xbf16> to vector<1x28x384xbf16>
    tpu.vector_store %arg7[%c1, %c0_15, %c0_16], %17 {strides = array<i32>} : memref<5x28x384xbf16, #tpu.memory_space<vmem>>, vector<1x28x384xbf16>,
    %c0_17 = arith.constant 0 : index
    %c0_18 = arith.constant 0 : index
    %c32 = arith.constant 32 : index
    %18 = vector.load %arg1[%c0_17, %c0_18, %c32] : memref<1x28x448xbf16, #tpu.memory_space<vmem>>, vector<1x28x384xbf16>
    %19 = vector.shape_cast %18 : vector<1x28x384xbf16> to vector<28x384xbf16>
    %c2 = arith.constant 2 : index
    %c0_19 = arith.constant 0 : index
    %c0_20 = arith.constant 0 : index
    %20 = vector.load %arg7[%c2, %c0_19, %c0_20] : memref<5x28x384xbf16, #tpu.memory_space<vmem>>, vector<1x28x384xbf16>
    %21 = vector.shape_cast %20 : vector<1x28x384xbf16> to vector<28x384xbf16>
    %22 = vector.shape_cast %19 : vector<28x384xbf16> to vector<1x28x384xbf16>
    tpu.vector_store %arg7[%c2, %c0_19, %c0_20], %22 {strides = array<i32>} : memref<5x28x384xbf16, #tpu.memory_space<vmem>>, vector<1x28x384xbf16>,
    %c0_21 = arith.constant 0 : index
    %c0_22 = arith.constant 0 : index
    %c48 = arith.constant 48 : index
    %23 = vector.load %arg1[%c0_21, %c0_22, %c48] : memref<1x28x448xbf16, #tpu.memory_space<vmem>>, vector<1x28x384xbf16>
    %24 = vector.shape_cast %23 : vector<1x28x384xbf16> to vector<28x384xbf16>
    %c3 = arith.constant 3 : index
    %c0_23 = arith.constant 0 : index
    %c0_24 = arith.constant 0 : index
    %25 = vector.load %arg7[%c3, %c0_23, %c0_24] : memref<5x28x384xbf16, #tpu.memory_space<vmem>>, vector<1x28x384xbf16>
    %26 = vector.shape_cast %25 : vector<1x28x384xbf16> to vector<28x384xbf16>
    %27 = vector.shape_cast %24 : vector<28x384xbf16> to vector<1x28x384xbf16>
    tpu.vector_store %arg7[%c3, %c0_23, %c0_24], %27 {strides = array<i32>} : memref<5x28x384xbf16, #tpu.memory_space<vmem>>, vector<1x28x384xbf16>,
    %c0_25 = arith.constant 0 : index
    %c0_26 = arith.constant 0 : index
    %c64 = arith.constant 64 : index
    %28 = vector.load %arg1[%c0_25, %c0_26, %c64] : memref<1x28x448xbf16, #tpu.memory_space<vmem>>, vector<1x28x384xbf16>
    %29 = vector.shape_cast %28 : vector<1x28x384xbf16> to vector<28x384xbf16>
    %c4 = arith.constant 4 : index
    %c0_27 = arith.constant 0 : index
    %c0_28 = arith.constant 0 : index
    %30 = vector.load %arg7[%c4, %c0_27, %c0_28] : memref<5x28x384xbf16, #tpu.memory_space<vmem>>, vector<1x28x384xbf16>
    %31 = vector.shape_cast %30 : vector<1x28x384xbf16> to vector<28x384xbf16>
    %32 = vector.shape_cast %29 : vector<28x384xbf16> to vector<1x28x384xbf16>
    tpu.vector_store %arg7[%c4, %c0_27, %c0_28], %32 {strides = array<i32>} : memref<5x28x384xbf16, #tpu.memory_space<vmem>>, vector<1x28x384xbf16>,
    %c0_29 = arith.constant 0 : index
    %c0_30 = arith.constant 0 : index
    %c0_31 = arith.constant 0 : index
    %33 = vector.load %arg7[%c0_29, %c0_30, %c0_31] : memref<5x28x384xbf16, #tpu.memory_space<vmem>>, vector<1x6x384xbf16>
    %34 = vector.shape_cast %33 : vector<1x6x384xbf16> to vector<6x384xbf16>
    %c1_32 = arith.constant 1 : index
    %c0_33 = arith.constant 0 : index
    %c0_34 = arith.constant 0 : index
    %35 = vector.load %arg7[%c1_32, %c0_33, %c0_34] : memref<5x28x384xbf16, #tpu.memory_space<vmem>>, vector<1x6x384xbf16>
    %36 = vector.shape_cast %35 : vector<1x6x384xbf16> to vector<6x384xbf16>
    %c2_35 = arith.constant 2 : index
    %c0_36 = arith.constant 0 : index
    %c0_37 = arith.constant 0 : index
    %37 = vector.load %arg7[%c2_35, %c0_36, %c0_37] : memref<5x28x384xbf16, #tpu.memory_space<vmem>>, vector<1x6x384xbf16>
    %38 = vector.shape_cast %37 : vector<1x6x384xbf16> to vector<6x384xbf16>
    %c3_38 = arith.constant 3 : index
    %c0_39 = arith.constant 0 : index
    %c0_40 = arith.constant 0 : index
    %39 = vector.load %arg7[%c3_38, %c0_39, %c0_40] : memref<5x28x384xbf16, #tpu.memory_space<vmem>>, vector<1x6x384xbf16>
    %40 = vector.shape_cast %39 : vector<1x6x384xbf16> to vector<6x384xbf16>
    %c4_41 = arith.constant 4 : index
    %c0_42 = arith.constant 0 : index
    %c0_43 = arith.constant 0 : index
    %41 = vector.load %arg7[%c4_41, %c0_42, %c0_43] : memref<5x28x384xbf16, #tpu.memory_space<vmem>>, vector<1x6x384xbf16>
    %42 = vector.shape_cast %41 : vector<1x6x384xbf16> to vector<6x384xbf16>
    %43 = tpu.concatenate %34, %36, %38, %40, %42 in 0 : vector<6x384xbf16>, vector<6x384xbf16>, vector<6x384xbf16>, vector<6x384xbf16>, vector<6x384xbf16> -> vector<30x384xbf16>
    %cst = arith.constant dense<0.000000e+00> : vector<12x384xf32>
    %44 = tpu.matmul %0, %43, %cst {dimension_numbers = #tpu.dot_dimension_numbers<[1], [0], [0], [1], [0, 0, 1, 1], [], []>} : vector<12x30xbf16>, vector<30x384xbf16>, vector<12x384xf32> -> vector<12x384xf32>
    %45 = arith.addf %44, %4 : vector<12x384xf32>
    %cst_44 = arith.constant 0.000000e+00 : f32
    %46 = vector.broadcast %cst_44 : f32 to vector<12x384xf32>
    %47 = arith.maximumf %45, %46 : vector<12x384xf32>
    %48 = vector.extract_strided_slice %47 {offsets = [0, 0], sizes = [6, 384], strides = [1, 1]} : vector<12x384xf32> to vector<6x384xf32>
    %49 = vector.extract_strided_slice %47 {offsets = [6, 0], sizes = [6, 384], strides = [1, 1]} : vector<12x384xf32> to vector<6x384xf32>
    %50 = arith.maximumf %48, %49 : vector<6x384xf32>
    %c368_i32 = arith.constant 368 : i32
    %51 = tpu.dynamic_rotate %50 by %c368_i32 dim 1 : vector<6x384xf32>, i32 -> vector<6x384xf32>
    %52 = arith.maximumf %50, %51 : vector<6x384xf32>
    %53 = vector.extract_strided_slice %52 {offsets = [0, 0], sizes = [6, 16], strides = [1, 1]} : vector<6x384xf32> to vector<6x16xf32>
    %54 = vector.extract_strided_slice %52 {offsets = [0, 32], sizes = [6, 16], strides = [1, 1]} : vector<6x384xf32> to vector<6x16xf32>
    %55 = vector.extract_strided_slice %52 {offsets = [0, 64], sizes = [6, 16], strides = [1, 1]} : vector<6x384xf32> to vector<6x16xf32>
    %56 = vector.extract_strided_slice %52 {offsets = [0, 96], sizes = [6, 16], strides = [1, 1]} : vector<6x384xf32> to vector<6x16xf32>
    %57 = vector.extract_strided_slice %52 {offsets = [0, 128], sizes = [6, 16], strides = [1, 1]} : vector<6x384xf32> to vector<6x16xf32>
    %58 = vector.extract_strided_slice %52 {offsets = [0, 160], sizes = [6, 16], strides = [1, 1]} : vector<6x384xf32> to vector<6x16xf32>
    %59 = vector.extract_strided_slice %52 {offsets = [0, 192], sizes = [6, 16], strides = [1, 1]} : vector<6x384xf32> to vector<6x16xf32>
    %60 = vector.extract_strided_slice %52 {offsets = [0, 224], sizes = [6, 16], strides = [1, 1]} : vector<6x384xf32> to vector<6x16xf32>
    %61 = vector.extract_strided_slice %52 {offsets = [0, 256], sizes = [6, 16], strides = [1, 1]} : vector<6x384xf32> to vector<6x16xf32>
    %62 = vector.extract_strided_slice %52 {offsets = [0, 288], sizes = [6, 16], strides = [1, 1]} : vector<6x384xf32> to vector<6x16xf32>
    %63 = vector.extract_strided_slice %52 {offsets = [0, 320], sizes = [6, 16], strides = [1, 1]} : vector<6x384xf32> to vector<6x16xf32>
    %64 = vector.extract_strided_slice %52 {offsets = [0, 352], sizes = [6, 16], strides = [1, 1]} : vector<6x384xf32> to vector<6x16xf32>
    %65 = tpu.concatenate %53, %54, %55, %56, %57, %58, %59, %60, %61, %62, %63, %64 in 1 : vector<6x16xf32>, vector<6x16xf32>, vector<6x16xf32>, vector<6x16xf32>, vector<6x16xf32>, vector<6x16xf32>, vector<6x16xf32>, vector<6x16xf32>, vector<6x16xf32>, vector<6x16xf32>, vector<6x16xf32>, vector<6x16xf32> -> vector<6x192xf32>
    %66 = arith.truncf %65 : vector<6x192xf32> to vector<6x192xbf16>
    %67 = vector.extract_strided_slice %66 {offsets = [0, 0], sizes = [6, 128], strides = [1, 1]} : vector<6x192xbf16> to vector<6x128xbf16>
    %c0_45 = arith.constant 0 : index
    %c0_46 = arith.constant 0 : index
    %68 = vector.load %arg8[%c0_45, %c0_46] : memref<360x128xbf16, #tpu.memory_space<vmem>>, vector<6x128xbf16>
    tpu.vector_store %arg8[%c0_45, %c0_46], %67 {strides = array<i32>} : memref<360x128xbf16, #tpu.memory_space<vmem>>, vector<6x128xbf16>,
    %69 = vector.extract_strided_slice %66 {offsets = [0, 16], sizes = [6, 128], strides = [1, 1]} : vector<6x192xbf16> to vector<6x128xbf16>
    %c6 = arith.constant 6 : index
    %c0_47 = arith.constant 0 : index
    %70 = vector.load %arg8[%c6, %c0_47] : memref<360x128xbf16, #tpu.memory_space<vmem>>, vector<6x128xbf16>
    tpu.vector_store %arg8[%c6, %c0_47], %69 {strides = array<i32>} : memref<360x128xbf16, #tpu.memory_space<vmem>>, vector<6x128xbf16>,
    %71 = vector.extract_strided_slice %66 {offsets = [0, 32], sizes = [6, 128], strides = [1, 1]} : vector<6x192xbf16> to vector<6x128xbf16>
    %c12 = arith.constant 12 : index
    %c0_48 = arith.constant 0 : index
    %72 = vector.load %arg8[%c12, %c0_48] : memref<360x128xbf16, #tpu.memory_space<vmem>>, vector<6x128xbf16>
    tpu.vector_store %arg8[%c12, %c0_48], %71 {strides = array<i32>} : memref<360x128xbf16, #tpu.memory_space<vmem>>, vector<6x128xbf16>,
    %73 = vector.extract_strided_slice %66 {offsets = [0, 48], sizes = [6, 128], strides = [1, 1]} : vector<6x192xbf16> to vector<6x128xbf16>
    %c18 = arith.constant 18 : index
    %c0_49 = arith.constant 0 : index
    %74 = vector.load %arg8[%c18, %c0_49] : memref<360x128xbf16, #tpu.memory_space<vmem>>, vector<6x128xbf16>
    tpu.vector_store %arg8[%c18, %c0_49], %73 {strides = array<i32>} : memref<360x128xbf16, #tpu.memory_space<vmem>>, vector<6x128xbf16>,
    %75 = vector.extract_strided_slice %66 {offsets = [0, 64], sizes = [6, 128], strides = [1, 1]} : vector<6x192xbf16> to vector<6x128xbf16>
    %c24 = arith.constant 24 : index
    %c0_50 = arith.constant 0 : index
    %76 = vector.load %arg8[%c24, %c0_50] : memref<360x128xbf16, #tpu.memory_space<vmem>>, vector<6x128xbf16>
    tpu.vector_store %arg8[%c24, %c0_50], %75 {strides = array<i32>} : memref<360x128xbf16, #tpu.memory_space<vmem>>, vector<6x128xbf16>,
    %c0_51 = arith.constant 0 : index
    %c2_52 = arith.constant 2 : index
    %c0_53 = arith.constant 0 : index
    %77 = vector.load %arg7[%c0_51, %c2_52, %c0_53] : memref<5x28x384xbf16, #tpu.memory_space<vmem>>, vector<1x6x384xbf16>
    %78 = vector.shape_cast %77 : vector<1x6x384xbf16> to vector<6x384xbf16>
    %c1_54 = arith.constant 1 : index
    %c2_55 = arith.constant 2 : index
    %c0_56 = arith.constant 0 : index
    %79 = vector.load %arg7[%c1_54, %c2_55, %c0_56] : memref<5x28x384xbf16, #tpu.memory_space<vmem>>, vector<1x6x384xbf16>
    %80 = vector.shape_cast %79 : vector<1x6x384xbf16> to vector<6x384xbf16>
    %c2_57 = arith.constant 2 : index
    %c2_58 = arith.constant 2 : index
    %c0_59 = arith.constant 0 : index
    %81 = vector.load %arg7[%c2_57, %c2_58, %c0_59] : memref<5x28x384xbf16, #tpu.memory_space<vmem>>, vector<1x6x384xbf16>
    %82 = vector.shape_cast %81 : vector<1x6x384xbf16> to vector<6x384xbf16>
    %c3_60 = arith.constant 3 : index
    %c2_61 = arith.constant 2 : index
    %c0_62 = arith.constant 0 : index
    %83 = vector.load %arg7[%c3_60, %c2_61, %c0_62] : memref<5x28x384xbf16, #tpu.memory_space<vmem>>, vector<1x6x384xbf16>
    %84 = vector.shape_cast %83 : vector<1x6x384xbf16> to vector<6x384xbf16>
    %c4_63 = arith.constant 4 : index
    %c2_64 = arith.constant 2 : index
    %c0_65 = arith.constant 0 : index
    %85 = vector.load %arg7[%c4_63, %c2_64, %c0_65] : memref<5x28x384xbf16, #tpu.memory_space<vmem>>, vector<1x6x384xbf16>
    %86 = vector.shape_cast %85 : vector<1x6x384xbf16> to vector<6x384xbf16>
    %87 = tpu.concatenate %78, %80, %82, %84, %86 in 0 : vector<6x384xbf16>, vector<6x384xbf16>, vector<6x384xbf16>, vector<6x384xbf16>, vector<6x384xbf16> -> vector<30x384xbf16>
    %cst_66 = arith.constant dense<0.000000e+00> : vector<12x384xf32>
    %88 = tpu.matmul %0, %87, %cst_66 {dimension_numbers = #tpu.dot_dimension_numbers<[1], [0], [0], [1], [0, 0, 1, 1], [], []>} : vector<12x30xbf16>, vector<30x384xbf16>, vector<12x384xf32> -> vector<12x384xf32>
    %89 = arith.addf %88, %4 : vector<12x384xf32>
    %cst_67 = arith.constant 0.000000e+00 : f32
    %90 = vector.broadcast %cst_67 : f32 to vector<12x384xf32>
    %91 = arith.maximumf %89, %90 : vector<12x384xf32>
    %92 = vector.extract_strided_slice %91 {offsets = [0, 0], sizes = [6, 384], strides = [1, 1]} : vector<12x384xf32> to vector<6x384xf32>
    %93 = vector.extract_strided_slice %91 {offsets = [6, 0], sizes = [6, 384], strides = [1, 1]} : vector<12x384xf32> to vector<6x384xf32>
    %94 = arith.maximumf %92, %93 : vector<6x384xf32>
    %c368_i32_68 = arith.constant 368 : i32
    %95 = tpu.dynamic_rotate %94 by %c368_i32_68 dim 1 : vector<6x384xf32>, i32 -> vector<6x384xf32>
    %96 = arith.maximumf %94, %95 : vector<6x384xf32>
    %97 = vector.extract_strided_slice %96 {offsets = [0, 0], sizes = [6, 16], strides = [1, 1]} : vector<6x384xf32> to vector<6x16xf32>
    %98 = vector.extract_strided_slice %96 {offsets = [0, 32], sizes = [6, 16], strides = [1, 1]} : vector<6x384xf32> to vector<6x16xf32>
    %99 = vector.extract_strided_slice %96 {offsets = [0, 64], sizes = [6, 16], strides = [1, 1]} : vector<6x384xf32> to vector<6x16xf32>
    %100 = vector.extract_strided_slice %96 {offsets = [0, 96], sizes = [6, 16], strides = [1, 1]} : vector<6x384xf32> to vector<6x16xf32>
    %101 = vector.extract_strided_slice %96 {offsets = [0, 128], sizes = [6, 16], strides = [1, 1]} : vector<6x384xf32> to vector<6x16xf32>
    %102 = vector.extract_strided_slice %96 {offsets = [0, 160], sizes = [6, 16], strides = [1, 1]} : vector<6x384xf32> to vector<6x16xf32>
    %103 = vector.extract_strided_slice %96 {offsets = [0, 192], sizes = [6, 16], strides = [1, 1]} : vector<6x384xf32> to vector<6x16xf32>
    %104 = vector.extract_strided_slice %96 {offsets = [0, 224], sizes = [6, 16], strides = [1, 1]} : vector<6x384xf32> to vector<6x16xf32>
    %105 = vector.extract_strided_slice %96 {offsets = [0, 256], sizes = [6, 16], strides = [1, 1]} : vector<6x384xf32> to vector<6x16xf32>
    %106 = vector.extract_strided_slice %96 {offsets = [0, 288], sizes = [6, 16], strides = [1, 1]} : vector<6x384xf32> to vector<6x16xf32>
    %107 = vector.extract_strided_slice %96 {offsets = [0, 320], sizes = [6, 16], strides = [1, 1]} : vector<6x384xf32> to vector<6x16xf32>
    %108 = vector.extract_strided_slice %96 {offsets = [0, 352], sizes = [6, 16], strides = [1, 1]} : vector<6x384xf32> to vector<6x16xf32>
    %109 = tpu.concatenate %97, %98, %99, %100, %101, %102, %103, %104, %105, %106, %107, %108 in 1 : vector<6x16xf32>, vector<6x16xf32>, vector<6x16xf32>, vector<6x16xf32>, vector<6x16xf32>, vector<6x16xf32>, vector<6x16xf32>, vector<6x16xf32>, vector<6x16xf32>, vector<6x16xf32>, vector<6x16xf32>, vector<6x16xf32> -> vector<6x192xf32>
    %110 = arith.truncf %109 : vector<6x192xf32> to vector<6x192xbf16>
    %111 = vector.extract_strided_slice %110 {offsets = [0, 0], sizes = [6, 128], strides = [1, 1]} : vector<6x192xbf16> to vector<6x128xbf16>
    %c30 = arith.constant 30 : index
    %c0_69 = arith.constant 0 : index
    %112 = vector.load %arg8[%c30, %c0_69] : memref<360x128xbf16, #tpu.memory_space<vmem>>, vector<6x128xbf16>
    tpu.vector_store %arg8[%c30, %c0_69], %111 {strides = array<i32>} : memref<360x128xbf16, #tpu.memory_space<vmem>>, vector<6x128xbf16>,
    %113 = vector.extract_strided_slice %110 {offsets = [0, 16], sizes = [6, 128], strides = [1, 1]} : vector<6x192xbf16> to vector<6x128xbf16>
    %c36 = arith.constant 36 : index
    %c0_70 = arith.constant 0 : index
    %114 = vector.load %arg8[%c36, %c0_70] : memref<360x128xbf16, #tpu.memory_space<vmem>>, vector<6x128xbf16>
    tpu.vector_store %arg8[%c36, %c0_70], %113 {strides = array<i32>} : memref<360x128xbf16, #tpu.memory_space<vmem>>, vector<6x128xbf16>,
    %115 = vector.extract_strided_slice %110 {offsets = [0, 32], sizes = [6, 128], strides = [1, 1]} : vector<6x192xbf16> to vector<6x128xbf16>
    %c42 = arith.constant 42 : index
    %c0_71 = arith.constant 0 : index
    %116 = vector.load %arg8[%c42, %c0_71] : memref<360x128xbf16, #tpu.memory_space<vmem>>, vector<6x128xbf16>
    tpu.vector_store %arg8[%c42, %c0_71], %115 {strides = array<i32>} : memref<360x128xbf16, #tpu.memory_space<vmem>>, vector<6x128xbf16>,
    %117 = vector.extract_strided_slice %110 {offsets = [0, 48], sizes = [6, 128], strides = [1, 1]} : vector<6x192xbf16> to vector<6x128xbf16>
    %c48_72 = arith.constant 48 : index
    %c0_73 = arith.constant 0 : index
    %118 = vector.load %arg8[%c48_72, %c0_73] : memref<360x128xbf16, #tpu.memory_space<vmem>>, vector<6x128xbf16>
    tpu.vector_store %arg8[%c48_72, %c0_73], %117 {strides = array<i32>} : memref<360x128xbf16, #tpu.memory_space<vmem>>, vector<6x128xbf16>,
    %119 = vector.extract_strided_slice %110 {offsets = [0, 64], sizes = [6, 128], strides = [1, 1]} : vector<6x192xbf16> to vector<6x128xbf16>
    %c54 = arith.constant 54 : index
    %c0_74 = arith.constant 0 : index
    %120 = vector.load %arg8[%c54, %c0_74] : memref<360x128xbf16, #tpu.memory_space<vmem>>, vector<6x128xbf16>
    tpu.vector_store %arg8[%c54, %c0_74], %119 {strides = array<i32>} : memref<360x128xbf16, #tpu.memory_space<vmem>>, vector<6x128xbf16>,
    %c0_75 = arith.constant 0 : index
    %c4_76 = arith.constant 4 : index
    %c0_77 = arith.constant 0 : index
    %121 = vector.load %arg7[%c0_75, %c4_76, %c0_77] : memref<5x28x384xbf16, #tpu.memory_space<vmem>>, vector<1x6x384xbf16>
    %122 = vector.shape_cast %121 : vector<1x6x384xbf16> to vector<6x384xbf16>
    %c1_78 = arith.constant 1 : index
    %c4_79 = arith.constant 4 : index
    %c0_80 = arith.constant 0 : index
    %123 = vector.load %arg7[%c1_78, %c4_79, %c0_80] : memref<5x28x384xbf16, #tpu.memory_space<vmem>>, vector<1x6x384xbf16>
    %124 = vector.shape_cast %123 : vector<1x6x384xbf16> to vector<6x384xbf16>
    %c2_81 = arith.constant 2 : index
    %c4_82 = arith.constant 4 : index
    %c0_83 = arith.constant 0 : index
    %125 = vector.load %arg7[%c2_81, %c4_82, %c0_83] : memref<5x28x384xbf16, #tpu.memory_space<vmem>>, vector<1x6x384xbf16>
    %126 = vector.shape_cast %125 : vector<1x6x384xbf16> to vector<6x384xbf16>
    %c3_84 = arith.constant 3 : index
    %c4_85 = arith.constant 4 : index
    %c0_86 = arith.constant 0 : index
    %127 = vector.load %arg7[%c3_84, %c4_85, %c0_86] : memref<5x28x384xbf16, #tpu.memory_space<vmem>>, vector<1x6x384xbf16>
    %128 = vector.shape_cast %127 : vector<1x6x384xbf16> to vector<6x384xbf16>
    %c4_87 = arith.constant 4 : index
    %c4_88 = arith.constant 4 : index
    %c0_89 = arith.constant 0 : index
    %129 = vector.load %arg7[%c4_87, %c4_88, %c0_89] : memref<5x28x384xbf16, #tpu.memory_space<vmem>>, vector<1x6x384xbf16>
    %130 = vector.shape_cast %129 : vector<1x6x384xbf16> to vector<6x384xbf16>
    %131 = tpu.concatenate %122, %124, %126, %128, %130 in 0 : vector<6x384xbf16>, vector<6x384xbf16>, vector<6x384xbf16>, vector<6x384xbf16>, vector<6x384xbf16> -> vector<30x384xbf16>
    %cst_90 = arith.constant dense<0.000000e+00> : vector<12x384xf32>
    %132 = tpu.matmul %0, %131, %cst_90 {dimension_numbers = #tpu.dot_dimension_numbers<[1], [0], [0], [1], [0, 0, 1, 1], [], []>} : vector<12x30xbf16>, vector<30x384xbf16>, vector<12x384xf32> -> vector<12x384xf32>
    %133 = arith.addf %132, %4 : vector<12x384xf32>
    %cst_91 = arith.constant 0.000000e+00 : f32
    %134 = vector.broadcast %cst_91 : f32 to vector<12x384xf32>
    %135 = arith.maximumf %133, %134 : vector<12x384xf32>
    %136 = vector.extract_strided_slice %135 {offsets = [0, 0], sizes = [6, 384], strides = [1, 1]} : vector<12x384xf32> to vector<6x384xf32>
    %137 = vector.extract_strided_slice %135 {offsets = [6, 0], sizes = [6, 384], strides = [1, 1]} : vector<12x384xf32> to vector<6x384xf32>
    %138 = arith.maximumf %136, %137 : vector<6x384xf32>
    %c368_i32_92 = arith.constant 368 : i32
    %139 = tpu.dynamic_rotate %138 by %c368_i32_92 dim 1 : vector<6x384xf32>, i32 -> vector<6x384xf32>
    %140 = arith.maximumf %138, %139 : vector<6x384xf32>
    %141 = vector.extract_strided_slice %140 {offsets = [0, 0], sizes = [6, 16], strides = [1, 1]} : vector<6x384xf32> to vector<6x16xf32>
    %142 = vector.extract_strided_slice %140 {offsets = [0, 32], sizes = [6, 16], strides = [1, 1]} : vector<6x384xf32> to vector<6x16xf32>
    %143 = vector.extract_strided_slice %140 {offsets = [0, 64], sizes = [6, 16], strides = [1, 1]} : vector<6x384xf32> to vector<6x16xf32>
    %144 = vector.extract_strided_slice %140 {offsets = [0, 96], sizes = [6, 16], strides = [1, 1]} : vector<6x384xf32> to vector<6x16xf32>
    %145 = vector.extract_strided_slice %140 {offsets = [0, 128], sizes = [6, 16], strides = [1, 1]} : vector<6x384xf32> to vector<6x16xf32>
    %146 = vector.extract_strided_slice %140 {offsets = [0, 160], sizes = [6, 16], strides = [1, 1]} : vector<6x384xf32> to vector<6x16xf32>
    %147 = vector.extract_strided_slice %140 {offsets = [0, 192], sizes = [6, 16], strides = [1, 1]} : vector<6x384xf32> to vector<6x16xf32>
    %148 = vector.extract_strided_slice %140 {offsets = [0, 224], sizes = [6, 16], strides = [1, 1]} : vector<6x384xf32> to vector<6x16xf32>
    %149 = vector.extract_strided_slice %140 {offsets = [0, 256], sizes = [6, 16], strides = [1, 1]} : vector<6x384xf32> to vector<6x16xf32>
    %150 = vector.extract_strided_slice %140 {offsets = [0, 288], sizes = [6, 16], strides = [1, 1]} : vector<6x384xf32> to vector<6x16xf32>
    %151 = vector.extract_strided_slice %140 {offsets = [0, 320], sizes = [6, 16], strides = [1, 1]} : vector<6x384xf32> to vector<6x16xf32>
    %152 = vector.extract_strided_slice %140 {offsets = [0, 352], sizes = [6, 16], strides = [1, 1]} : vector<6x384xf32> to vector<6x16xf32>
    %153 = tpu.concatenate %141, %142, %143, %144, %145, %146, %147, %148, %149, %150, %151, %152 in 1 : vector<6x16xf32>, vector<6x16xf32>, vector<6x16xf32>, vector<6x16xf32>, vector<6x16xf32>, vector<6x16xf32>, vector<6x16xf32>, vector<6x16xf32>, vector<6x16xf32>, vector<6x16xf32>, vector<6x16xf32>, vector<6x16xf32> -> vector<6x192xf32>
    %154 = arith.truncf %153 : vector<6x192xf32> to vector<6x192xbf16>
    %155 = vector.extract_strided_slice %154 {offsets = [0, 0], sizes = [6, 128], strides = [1, 1]} : vector<6x192xbf16> to vector<6x128xbf16>
    %c60 = arith.constant 60 : index
    %c0_93 = arith.constant 0 : index
    %156 = vector.load %arg8[%c60, %c0_93] : memref<360x128xbf16, #tpu.memory_space<vmem>>, vector<6x128xbf16>
    tpu.vector_store %arg8[%c60, %c0_93], %155 {strides = array<i32>} : memref<360x128xbf16, #tpu.memory_space<vmem>>, vector<6x128xbf16>,
    %157 = vector.extract_strided_slice %154 {offsets = [0, 16], sizes = [6, 128], strides = [1, 1]} : vector<6x192xbf16> to vector<6x128xbf16>
    %c66 = arith.constant 66 : index
    %c0_94 = arith.constant 0 : index
    %158 = vector.load %arg8[%c66, %c0_94] : memref<360x128xbf16, #tpu.memory_space<vmem>>, vector<6x128xbf16>
    tpu.vector_store %arg8[%c66, %c0_94], %157 {strides = array<i32>} : memref<360x128xbf16, #tpu.memory_space<vmem>>, vector<6x128xbf16>,
    %159 = vector.extract_strided_slice %154 {offsets = [0, 32], sizes = [6, 128], strides = [1, 1]} : vector<6x192xbf16> to vector<6x128xbf16>
    %c72 = arith.constant 72 : index
    %c0_95 = arith.constant 0 : index
    %160 = vector.load %arg8[%c72, %c0_95] : memref<360x128xbf16, #tpu.memory_space<vmem>>, vector<6x128xbf16>
    tpu.vector_store %arg8[%c72, %c0_95], %159 {strides = array<i32>} : memref<360x128xbf16, #tpu.memory_space<vmem>>, vector<6x128xbf16>,
    %161 = vector.extract_strided_slice %154 {offsets = [0, 48], sizes = [6, 128], strides = [1, 1]} : vector<6x192xbf16> to vector<6x128xbf16>
    %c78 = arith.constant 78 : index
    %c0_96 = arith.constant 0 : index
    %162 = vector.load %arg8[%c78, %c0_96] : memref<360x128xbf16, #tpu.memory_space<vmem>>, vector<6x128xbf16>
    tpu.vector_store %arg8[%c78, %c0_96], %161 {strides = array<i32>} : memref<360x128xbf16, #tpu.memory_space<vmem>>, vector<6x128xbf16>,
    %163 = vector.extract_strided_slice %154 {offsets = [0, 64], sizes = [6, 128], strides = [1, 1]} : vector<6x192xbf16> to vector<6x128xbf16>
    %c84 = arith.constant 84 : index
    %c0_97 = arith.constant 0 : index
    %164 = vector.load %arg8[%c84, %c0_97] : memref<360x128xbf16, #tpu.memory_space<vmem>>, vector<6x128xbf16>
    tpu.vector_store %arg8[%c84, %c0_97], %163 {strides = array<i32>} : memref<360x128xbf16, #tpu.memory_space<vmem>>, vector<6x128xbf16>,
    %c0_98 = arith.constant 0 : index
    %c6_99 = arith.constant 6 : index
    %c0_100 = arith.constant 0 : index
    %165 = vector.load %arg7[%c0_98, %c6_99, %c0_100] : memref<5x28x384xbf16, #tpu.memory_space<vmem>>, vector<1x6x384xbf16>
    %166 = vector.shape_cast %165 : vector<1x6x384xbf16> to vector<6x384xbf16>
    %c1_101 = arith.constant 1 : index
    %c6_102 = arith.constant 6 : index
    %c0_103 = arith.constant 0 : index
    %167 = vector.load %arg7[%c1_101, %c6_102, %c0_103] : memref<5x28x384xbf16, #tpu.memory_space<vmem>>, vector<1x6x384xbf16>
    %168 = vector.shape_cast %167 : vector<1x6x384xbf16> to vector<6x384xbf16>
    %c2_104 = arith.constant 2 : index
    %c6_105 = arith.constant 6 : index
    %c0_106 = arith.constant 0 : index
    %169 = vector.load %arg7[%c2_104, %c6_105, %c0_106] : memref<5x28x384xbf16, #tpu.memory_space<vmem>>, vector<1x6x384xbf16>
    %170 = vector.shape_cast %169 : vector<1x6x384xbf16> to vector<6x384xbf16>
    %c3_107 = arith.constant 3 : index
    %c6_108 = arith.constant 6 : index
    %c0_109 = arith.constant 0 : index
    %171 = vector.load %arg7[%c3_107, %c6_108, %c0_109] : memref<5x28x384xbf16, #tpu.memory_space<vmem>>, vector<1x6x384xbf16>
    %172 = vector.shape_cast %171 : vector<1x6x384xbf16> to vector<6x384xbf16>
    %c4_110 = arith.constant 4 : index
    %c6_111 = arith.constant 6 : index
    %c0_112 = arith.constant 0 : index
    %173 = vector.load %arg7[%c4_110, %c6_111, %c0_112] : memref<5x28x384xbf16, #tpu.memory_space<vmem>>, vector<1x6x384xbf16>
    %174 = vector.shape_cast %173 : vector<1x6x384xbf16> to vector<6x384xbf16>
    %175 = tpu.concatenate %166, %168, %170, %172, %174 in 0 : vector<6x384xbf16>, vector<6x384xbf16>, vector<6x384xbf16>, vector<6x384xbf16>, vector<6x384xbf16> -> vector<30x384xbf16>
    %cst_113 = arith.constant dense<0.000000e+00> : vector<12x384xf32>
    %176 = tpu.matmul %0, %175, %cst_113 {dimension_numbers = #tpu.dot_dimension_numbers<[1], [0], [0], [1], [0, 0, 1, 1], [], []>} : vector<12x30xbf16>, vector<30x384xbf16>, vector<12x384xf32> -> vector<12x384xf32>
    %177 = arith.addf %176, %4 : vector<12x384xf32>
    %cst_114 = arith.constant 0.000000e+00 : f32
    %178 = vector.broadcast %cst_114 : f32 to vector<12x384xf32>
    %179 = arith.maximumf %177, %178 : vector<12x384xf32>
    %180 = vector.extract_strided_slice %179 {offsets = [0, 0], sizes = [6, 384], strides = [1, 1]} : vector<12x384xf32> to vector<6x384xf32>
    %181 = vector.extract_strided_slice %179 {offsets = [6, 0], sizes = [6, 384], strides = [1, 1]} : vector<12x384xf32> to vector<6x384xf32>
    %182 = arith.maximumf %180, %181 : vector<6x384xf32>
    %c368_i32_115 = arith.constant 368 : i32
    %183 = tpu.dynamic_rotate %182 by %c368_i32_115 dim 1 : vector<6x384xf32>, i32 -> vector<6x384xf32>
    %184 = arith.maximumf %182, %183 : vector<6x384xf32>
    %185 = vector.extract_strided_slice %184 {offsets = [0, 0], sizes = [6, 16], strides = [1, 1]} : vector<6x384xf32> to vector<6x16xf32>
    %186 = vector.extract_strided_slice %184 {offsets = [0, 32], sizes = [6, 16], strides = [1, 1]} : vector<6x384xf32> to vector<6x16xf32>
    %187 = vector.extract_strided_slice %184 {offsets = [0, 64], sizes = [6, 16], strides = [1, 1]} : vector<6x384xf32> to vector<6x16xf32>
    %188 = vector.extract_strided_slice %184 {offsets = [0, 96], sizes = [6, 16], strides = [1, 1]} : vector<6x384xf32> to vector<6x16xf32>
    %189 = vector.extract_strided_slice %184 {offsets = [0, 128], sizes = [6, 16], strides = [1, 1]} : vector<6x384xf32> to vector<6x16xf32>
    %190 = vector.extract_strided_slice %184 {offsets = [0, 160], sizes = [6, 16], strides = [1, 1]} : vector<6x384xf32> to vector<6x16xf32>
    %191 = vector.extract_strided_slice %184 {offsets = [0, 192], sizes = [6, 16], strides = [1, 1]} : vector<6x384xf32> to vector<6x16xf32>
    %192 = vector.extract_strided_slice %184 {offsets = [0, 224], sizes = [6, 16], strides = [1, 1]} : vector<6x384xf32> to vector<6x16xf32>
    %193 = vector.extract_strided_slice %184 {offsets = [0, 256], sizes = [6, 16], strides = [1, 1]} : vector<6x384xf32> to vector<6x16xf32>
    %194 = vector.extract_strided_slice %184 {offsets = [0, 288], sizes = [6, 16], strides = [1, 1]} : vector<6x384xf32> to vector<6x16xf32>
    %195 = vector.extract_strided_slice %184 {offsets = [0, 320], sizes = [6, 16], strides = [1, 1]} : vector<6x384xf32> to vector<6x16xf32>
    %196 = vector.extract_strided_slice %184 {offsets = [0, 352], sizes = [6, 16], strides = [1, 1]} : vector<6x384xf32> to vector<6x16xf32>
    %197 = tpu.concatenate %185, %186, %187, %188, %189, %190, %191, %192, %193, %194, %195, %196 in 1 : vector<6x16xf32>, vector<6x16xf32>, vector<6x16xf32>, vector<6x16xf32>, vector<6x16xf32>, vector<6x16xf32>, vector<6x16xf32>, vector<6x16xf32>, vector<6x16xf32>, vector<6x16xf32>, vector<6x16xf32>, vector<6x16xf32> -> vector<6x192xf32>
    %198 = arith.truncf %197 : vector<6x192xf32> to vector<6x192xbf16>
    %199 = vector.extract_strided_slice %198 {offsets = [0, 0], sizes = [6, 128], strides = [1, 1]} : vector<6x192xbf16> to vector<6x128xbf16>
    %c90 = arith.constant 90 : index
    %c0_116 = arith.constant 0 : index
    %200 = vector.load %arg8[%c90, %c0_116] : memref<360x128xbf16, #tpu.memory_space<vmem>>, vector<6x128xbf16>
    tpu.vector_store %arg8[%c90, %c0_116], %199 {strides = array<i32>} : memref<360x128xbf16, #tpu.memory_space<vmem>>, vector<6x128xbf16>,
    %201 = vector.extract_strided_slice %198 {offsets = [0, 16], sizes = [6, 128], strides = [1, 1]} : vector<6x192xbf16> to vector<6x128xbf16>
    %c96 = arith.constant 96 : index
    %c0_117 = arith.constant 0 : index
    %202 = vector.load %arg8[%c96, %c0_117] : memref<360x128xbf16, #tpu.memory_space<vmem>>, vector<6x128xbf16>
    tpu.vector_store %arg8[%c96, %c0_117], %201 {strides = array<i32>} : memref<360x128xbf16, #tpu.memory_space<vmem>>, vector<6x128xbf16>,
    %203 = vector.extract_strided_slice %198 {offsets = [0, 32], sizes = [6, 128], strides = [1, 1]} : vector<6x192xbf16> to vector<6x128xbf16>
    %c102 = arith.constant 102 : index
    %c0_118 = arith.constant 0 : index
    %204 = vector.load %arg8[%c102, %c0_118] : memref<360x128xbf16, #tpu.memory_space<vmem>>, vector<6x128xbf16>
    tpu.vector_store %arg8[%c102, %c0_118], %203 {strides = array<i32>} : memref<360x128xbf16, #tpu.memory_space<vmem>>, vector<6x128xbf16>,
    %205 = vector.extract_strided_slice %198 {offsets = [0, 48], sizes = [6, 128], strides = [1, 1]} : vector<6x192xbf16> to vector<6x128xbf16>
    %c108 = arith.constant 108 : index
    %c0_119 = arith.constant 0 : index
    %206 = vector.load %arg8[%c108, %c0_119] : memref<360x128xbf16, #tpu.memory_space<vmem>>, vector<6x128xbf16>
    tpu.vector_store %arg8[%c108, %c0_119], %205 {strides = array<i32>} : memref<360x128xbf16, #tpu.memory_space<vmem>>, vector<6x128xbf16>,
    %207 = vector.extract_strided_slice %198 {offsets = [0, 64], sizes = [6, 128], strides = [1, 1]} : vector<6x192xbf16> to vector<6x128xbf16>
    %c114 = arith.constant 114 : index
    %c0_120 = arith.constant 0 : index
    %208 = vector.load %arg8[%c114, %c0_120] : memref<360x128xbf16, #tpu.memory_space<vmem>>, vector<6x128xbf16>
    tpu.vector_store %arg8[%c114, %c0_120], %207 {strides = array<i32>} : memref<360x128xbf16, #tpu.memory_space<vmem>>, vector<6x128xbf16>,
    %c0_121 = arith.constant 0 : index
    %c8 = arith.constant 8 : index
    %c0_122 = arith.constant 0 : index
    %209 = vector.load %arg7[%c0_121, %c8, %c0_122] : memref<5x28x384xbf16, #tpu.memory_space<vmem>>, vector<1x6x384xbf16>
    %210 = vector.shape_cast %209 : vector<1x6x384xbf16> to vector<6x384xbf16>
    %c1_123 = arith.constant 1 : index
    %c8_124 = arith.constant 8 : index
    %c0_125 = arith.constant 0 : index
    %211 = vector.load %arg7[%c1_123, %c8_124, %c0_125] : memref<5x28x384xbf16, #tpu.memory_space<vmem>>, vector<1x6x384xbf16>
    %212 = vector.shape_cast %211 : vector<1x6x384xbf16> to vector<6x384xbf16>
    %c2_126 = arith.constant 2 : index
    %c8_127 = arith.constant 8 : index
    %c0_128 = arith.constant 0 : index
    %213 = vector.load %arg7[%c2_126, %c8_127, %c0_128] : memref<5x28x384xbf16, #tpu.memory_space<vmem>>, vector<1x6x384xbf16>
    %214 = vector.shape_cast %213 : vector<1x6x384xbf16> to vector<6x384xbf16>
    %c3_129 = arith.constant 3 : index
    %c8_130 = arith.constant 8 : index
    %c0_131 = arith.constant 0 : index
    %215 = vector.load %arg7[%c3_129, %c8_130, %c0_131] : memref<5x28x384xbf16, #tpu.memory_space<vmem>>, vector<1x6x384xbf16>
    %216 = vector.shape_cast %215 : vector<1x6x384xbf16> to vector<6x384xbf16>
    %c4_132 = arith.constant 4 : index
    %c8_133 = arith.constant 8 : index
    %c0_134 = arith.constant 0 : index
    %217 = vector.load %arg7[%c4_132, %c8_133, %c0_134] : memref<5x28x384xbf16, #tpu.memory_space<vmem>>, vector<1x6x384xbf16>
    %218 = vector.shape_cast %217 : vector<1x6x384xbf16> to vector<6x384xbf16>
    %219 = tpu.concatenate %210, %212, %214, %216, %218 in 0 : vector<6x384xbf16>, vector<6x384xbf16>, vector<6x384xbf16>, vector<6x384xbf16>, vector<6x384xbf16> -> vector<30x384xbf16>
    %cst_135 = arith.constant dense<0.000000e+00> : vector<12x384xf32>
    %220 = tpu.matmul %0, %219, %cst_135 {dimension_numbers = #tpu.dot_dimension_numbers<[1], [0], [0], [1], [0, 0, 1, 1], [], []>} : vector<12x30xbf16>, vector<30x384xbf16>, vector<12x384xf32> -> vector<12x384xf32>
    %221 = arith.addf %220, %4 : vector<12x384xf32>
    %cst_136 = arith.constant 0.000000e+00 : f32
    %222 = vector.broadcast %cst_136 : f32 to vector<12x384xf32>
    %223 = arith.maximumf %221, %222 : vector<12x384xf32>
    %224 = vector.extract_strided_slice %223 {offsets = [0, 0], sizes = [6, 384], strides = [1, 1]} : vector<12x384xf32> to vector<6x384xf32>
    %225 = vector.extract_strided_slice %223 {offsets = [6, 0], sizes = [6, 384], strides = [1, 1]} : vector<12x384xf32> to vector<6x384xf32>
    %226 = arith.maximumf %224, %225 : vector<6x384xf32>
    %c368_i32_137 = arith.constant 368 : i32
    %227 = tpu.dynamic_rotate %226 by %c368_i32_137 dim 1 : vector<6x384xf32>, i32 -> vector<6x384xf32>
    %228 = arith.maximumf %226, %227 : vector<6x384xf32>
    %229 = vector.extract_strided_slice %228 {offsets = [0, 0], sizes = [6, 16], strides = [1, 1]} : vector<6x384xf32> to vector<6x16xf32>
    %230 = vector.extract_strided_slice %228 {offsets = [0, 32], sizes = [6, 16], strides = [1, 1]} : vector<6x384xf32> to vector<6x16xf32>
    %231 = vector.extract_strided_slice %228 {offsets = [0, 64], sizes = [6, 16], strides = [1, 1]} : vector<6x384xf32> to vector<6x16xf32>
    %232 = vector.extract_strided_slice %228 {offsets = [0, 96], sizes = [6, 16], strides = [1, 1]} : vector<6x384xf32> to vector<6x16xf32>
    %233 = vector.extract_strided_slice %228 {offsets = [0, 128], sizes = [6, 16], strides = [1, 1]} : vector<6x384xf32> to vector<6x16xf32>
    %234 = vector.extract_strided_slice %228 {offsets = [0, 160], sizes = [6, 16], strides = [1, 1]} : vector<6x384xf32> to vector<6x16xf32>
    %235 = vector.extract_strided_slice %228 {offsets = [0, 192], sizes = [6, 16], strides = [1, 1]} : vector<6x384xf32> to vector<6x16xf32>
    %236 = vector.extract_strided_slice %228 {offsets = [0, 224], sizes = [6, 16], strides = [1, 1]} : vector<6x384xf32> to vector<6x16xf32>
    %237 = vector.extract_strided_slice %228 {offsets = [0, 256], sizes = [6, 16], strides = [1, 1]} : vector<6x384xf32> to vector<6x16xf32>
    %238 = vector.extract_strided_slice %228 {offsets = [0, 288], sizes = [6, 16], strides = [1, 1]} : vector<6x384xf32> to vector<6x16xf32>
    %239 = vector.extract_strided_slice %228 {offsets = [0, 320], sizes = [6, 16], strides = [1, 1]} : vector<6x384xf32> to vector<6x16xf32>
    %240 = vector.extract_strided_slice %228 {offsets = [0, 352], sizes = [6, 16], strides = [1, 1]} : vector<6x384xf32> to vector<6x16xf32>
    %241 = tpu.concatenate %229, %230, %231, %232, %233, %234, %235, %236, %237, %238, %239, %240 in 1 : vector<6x16xf32>, vector<6x16xf32>, vector<6x16xf32>, vector<6x16xf32>, vector<6x16xf32>, vector<6x16xf32>, vector<6x16xf32>, vector<6x16xf32>, vector<6x16xf32>, vector<6x16xf32>, vector<6x16xf32>, vector<6x16xf32> -> vector<6x192xf32>
    %242 = arith.truncf %241 : vector<6x192xf32> to vector<6x192xbf16>
    %243 = vector.extract_strided_slice %242 {offsets = [0, 0], sizes = [6, 128], strides = [1, 1]} : vector<6x192xbf16> to vector<6x128xbf16>
    %c120 = arith.constant 120 : index
    %c0_138 = arith.constant 0 : index
    %244 = vector.load %arg8[%c120, %c0_138] : memref<360x128xbf16, #tpu.memory_space<vmem>>, vector<6x128xbf16>
    tpu.vector_store %arg8[%c120, %c0_138], %243 {strides = array<i32>} : memref<360x128xbf16, #tpu.memory_space<vmem>>, vector<6x128xbf16>,
    %245 = vector.extract_strided_slice %242 {offsets = [0, 16], sizes = [6, 128], strides = [1, 1]} : vector<6x192xbf16> to vector<6x128xbf16>
    %c126 = arith.constant 126 : index
    %c0_139 = arith.constant 0 : index
    %246 = vector.load %arg8[%c126, %c0_139] : memref<360x128xbf16, #tpu.memory_space<vmem>>, vector<6x128xbf16>
    tpu.vector_store %arg8[%c126, %c0_139], %245 {strides = array<i32>} : memref<360x128xbf16, #tpu.memory_space<vmem>>, vector<6x128xbf16>,
    %247 = vector.extract_strided_slice %242 {offsets = [0, 32], sizes = [6, 128], strides = [1, 1]} : vector<6x192xbf16> to vector<6x128xbf16>
    %c132 = arith.constant 132 : index
    %c0_140 = arith.constant 0 : index
    %248 = vector.load %arg8[%c132, %c0_140] : memref<360x128xbf16, #tpu.memory_space<vmem>>, vector<6x128xbf16>
    tpu.vector_store %arg8[%c132, %c0_140], %247 {strides = array<i32>} : memref<360x128xbf16, #tpu.memory_space<vmem>>, vector<6x128xbf16>,
    %249 = vector.extract_strided_slice %242 {offsets = [0, 48], sizes = [6, 128], strides = [1, 1]} : vector<6x192xbf16> to vector<6x128xbf16>
    %c138 = arith.constant 138 : index
    %c0_141 = arith.constant 0 : index
    %250 = vector.load %arg8[%c138, %c0_141] : memref<360x128xbf16, #tpu.memory_space<vmem>>, vector<6x128xbf16>
    tpu.vector_store %arg8[%c138, %c0_141], %249 {strides = array<i32>} : memref<360x128xbf16, #tpu.memory_space<vmem>>, vector<6x128xbf16>,
    %251 = vector.extract_strided_slice %242 {offsets = [0, 64], sizes = [6, 128], strides = [1, 1]} : vector<6x192xbf16> to vector<6x128xbf16>
    %c144 = arith.constant 144 : index
    %c0_142 = arith.constant 0 : index
    %252 = vector.load %arg8[%c144, %c0_142] : memref<360x128xbf16, #tpu.memory_space<vmem>>, vector<6x128xbf16>
    tpu.vector_store %arg8[%c144, %c0_142], %251 {strides = array<i32>} : memref<360x128xbf16, #tpu.memory_space<vmem>>, vector<6x128xbf16>,
    %c0_143 = arith.constant 0 : index
    %c10 = arith.constant 10 : index
    %c0_144 = arith.constant 0 : index
    %253 = vector.load %arg7[%c0_143, %c10, %c0_144] : memref<5x28x384xbf16, #tpu.memory_space<vmem>>, vector<1x6x384xbf16>
    %254 = vector.shape_cast %253 : vector<1x6x384xbf16> to vector<6x384xbf16>
    %c1_145 = arith.constant 1 : index
    %c10_146 = arith.constant 10 : index
    %c0_147 = arith.constant 0 : index
    %255 = vector.load %arg7[%c1_145, %c10_146, %c0_147] : memref<5x28x384xbf16, #tpu.memory_space<vmem>>, vector<1x6x384xbf16>
    %256 = vector.shape_cast %255 : vector<1x6x384xbf16> to vector<6x384xbf16>
    %c2_148 = arith.constant 2 : index
    %c10_149 = arith.constant 10 : index
    %c0_150 = arith.constant 0 : index
    %257 = vector.load %arg7[%c2_148, %c10_149, %c0_150] : memref<5x28x384xbf16, #tpu.memory_space<vmem>>, vector<1x6x384xbf16>
    %258 = vector.shape_cast %257 : vector<1x6x384xbf16> to vector<6x384xbf16>
    %c3_151 = arith.constant 3 : index
    %c10_152 = arith.constant 10 : index
    %c0_153 = arith.constant 0 : index
    %259 = vector.load %arg7[%c3_151, %c10_152, %c0_153] : memref<5x28x384xbf16, #tpu.memory_space<vmem>>, vector<1x6x384xbf16>
    %260 = vector.shape_cast %259 : vector<1x6x384xbf16> to vector<6x384xbf16>
    %c4_154 = arith.constant 4 : index
    %c10_155 = arith.constant 10 : index
    %c0_156 = arith.constant 0 : index
    %261 = vector.load %arg7[%c4_154, %c10_155, %c0_156] : memref<5x28x384xbf16, #tpu.memory_space<vmem>>, vector<1x6x384xbf16>
    %262 = vector.shape_cast %261 : vector<1x6x384xbf16> to vector<6x384xbf16>
    %263 = tpu.concatenate %254, %256, %258, %260, %262 in 0 : vector<6x384xbf16>, vector<6x384xbf16>, vector<6x384xbf16>, vector<6x384xbf16>, vector<6x384xbf16> -> vector<30x384xbf16>
    %cst_157 = arith.constant dense<0.000000e+00> : vector<12x384xf32>
    %264 = tpu.matmul %0, %263, %cst_157 {dimension_numbers = #tpu.dot_dimension_numbers<[1], [0], [0], [1], [0, 0, 1, 1], [], []>} : vector<12x30xbf16>, vector<30x384xbf16>, vector<12x384xf32> -> vector<12x384xf32>
    %265 = arith.addf %264, %4 : vector<12x384xf32>
    %cst_158 = arith.constant 0.000000e+00 : f32
    %266 = vector.broadcast %cst_158 : f32 to vector<12x384xf32>
    %267 = arith.maximumf %265, %266 : vector<12x384xf32>
    %268 = vector.extract_strided_slice %267 {offsets = [0, 0], sizes = [6, 384], strides = [1, 1]} : vector<12x384xf32> to vector<6x384xf32>
    %269 = vector.extract_strided_slice %267 {offsets = [6, 0], sizes = [6, 384], strides = [1, 1]} : vector<12x384xf32> to vector<6x384xf32>
    %270 = arith.maximumf %268, %269 : vector<6x384xf32>
    %c368_i32_159 = arith.constant 368 : i32
    %271 = tpu.dynamic_rotate %270 by %c368_i32_159 dim 1 : vector<6x384xf32>, i32 -> vector<6x384xf32>
    %272 = arith.maximumf %270, %271 : vector<6x384xf32>
    %273 = vector.extract_strided_slice %272 {offsets = [0, 0], sizes = [6, 16], strides = [1, 1]} : vector<6x384xf32> to vector<6x16xf32>
    %274 = vector.extract_strided_slice %272 {offsets = [0, 32], sizes = [6, 16], strides = [1, 1]} : vector<6x384xf32> to vector<6x16xf32>
    %275 = vector.extract_strided_slice %272 {offsets = [0, 64], sizes = [6, 16], strides = [1, 1]} : vector<6x384xf32> to vector<6x16xf32>
    %276 = vector.extract_strided_slice %272 {offsets = [0, 96], sizes = [6, 16], strides = [1, 1]} : vector<6x384xf32> to vector<6x16xf32>
    %277 = vector.extract_strided_slice %272 {offsets = [0, 128], sizes = [6, 16], strides = [1, 1]} : vector<6x384xf32> to vector<6x16xf32>
    %278 = vector.extract_strided_slice %272 {offsets = [0, 160], sizes = [6, 16], strides = [1, 1]} : vector<6x384xf32> to vector<6x16xf32>
    %279 = vector.extract_strided_slice %272 {offsets = [0, 192], sizes = [6, 16], strides = [1, 1]} : vector<6x384xf32> to vector<6x16xf32>
    %280 = vector.extract_strided_slice %272 {offsets = [0, 224], sizes = [6, 16], strides = [1, 1]} : vector<6x384xf32> to vector<6x16xf32>
    %281 = vector.extract_strided_slice %272 {offsets = [0, 256], sizes = [6, 16], strides = [1, 1]} : vector<6x384xf32> to vector<6x16xf32>
    %282 = vector.extract_strided_slice %272 {offsets = [0, 288], sizes = [6, 16], strides = [1, 1]} : vector<6x384xf32> to vector<6x16xf32>
    %283 = vector.extract_strided_slice %272 {offsets = [0, 320], sizes = [6, 16], strides = [1, 1]} : vector<6x384xf32> to vector<6x16xf32>
    %284 = vector.extract_strided_slice %272 {offsets = [0, 352], sizes = [6, 16], strides = [1, 1]} : vector<6x384xf32> to vector<6x16xf32>
    %285 = tpu.concatenate %273, %274, %275, %276, %277, %278, %279, %280, %281, %282, %283, %284 in 1 : vector<6x16xf32>, vector<6x16xf32>, vector<6x16xf32>, vector<6x16xf32>, vector<6x16xf32>, vector<6x16xf32>, vector<6x16xf32>, vector<6x16xf32>, vector<6x16xf32>, vector<6x16xf32>, vector<6x16xf32>, vector<6x16xf32> -> vector<6x192xf32>
    %286 = arith.truncf %285 : vector<6x192xf32> to vector<6x192xbf16>
    %287 = vector.extract_strided_slice %286 {offsets = [0, 0], sizes = [6, 128], strides = [1, 1]} : vector<6x192xbf16> to vector<6x128xbf16>
    %c150 = arith.constant 150 : index
    %c0_160 = arith.constant 0 : index
    %288 = vector.load %arg8[%c150, %c0_160] : memref<360x128xbf16, #tpu.memory_space<vmem>>, vector<6x128xbf16>
    tpu.vector_store %arg8[%c150, %c0_160], %287 {strides = array<i32>} : memref<360x128xbf16, #tpu.memory_space<vmem>>, vector<6x128xbf16>,
    %289 = vector.extract_strided_slice %286 {offsets = [0, 16], sizes = [6, 128], strides = [1, 1]} : vector<6x192xbf16> to vector<6x128xbf16>
    %c156 = arith.constant 156 : index
    %c0_161 = arith.constant 0 : index
    %290 = vector.load %arg8[%c156, %c0_161] : memref<360x128xbf16, #tpu.memory_space<vmem>>, vector<6x128xbf16>
    tpu.vector_store %arg8[%c156, %c0_161], %289 {strides = array<i32>} : memref<360x128xbf16, #tpu.memory_space<vmem>>, vector<6x128xbf16>,
    %291 = vector.extract_strided_slice %286 {offsets = [0, 32], sizes = [6, 128], strides = [1, 1]} : vector<6x192xbf16> to vector<6x128xbf16>
    %c162 = arith.constant 162 : index
    %c0_162 = arith.constant 0 : index
    %292 = vector.load %arg8[%c162, %c0_162] : memref<360x128xbf16, #tpu.memory_space<vmem>>, vector<6x128xbf16>
    tpu.vector_store %arg8[%c162, %c0_162], %291 {strides = array<i32>} : memref<360x128xbf16, #tpu.memory_space<vmem>>, vector<6x128xbf16>,
    %293 = vector.extract_strided_slice %286 {offsets = [0, 48], sizes = [6, 128], strides = [1, 1]} : vector<6x192xbf16> to vector<6x128xbf16>
    %c168 = arith.constant 168 : index
    %c0_163 = arith.constant 0 : index
    %294 = vector.load %arg8[%c168, %c0_163] : memref<360x128xbf16, #tpu.memory_space<vmem>>, vector<6x128xbf16>
    tpu.vector_store %arg8[%c168, %c0_163], %293 {strides = array<i32>} : memref<360x128xbf16, #tpu.memory_space<vmem>>, vector<6x128xbf16>,
    %295 = vector.extract_strided_slice %286 {offsets = [0, 64], sizes = [6, 128], strides = [1, 1]} : vector<6x192xbf16> to vector<6x128xbf16>
    %c174 = arith.constant 174 : index
    %c0_164 = arith.constant 0 : index
    %296 = vector.load %arg8[%c174, %c0_164] : memref<360x128xbf16, #tpu.memory_space<vmem>>, vector<6x128xbf16>
    tpu.vector_store %arg8[%c174, %c0_164], %295 {strides = array<i32>} : memref<360x128xbf16, #tpu.memory_space<vmem>>, vector<6x128xbf16>,
    %c0_165 = arith.constant 0 : index
    %c12_166 = arith.constant 12 : index
    %c0_167 = arith.constant 0 : index
    %297 = vector.load %arg7[%c0_165, %c12_166, %c0_167] : memref<5x28x384xbf16, #tpu.memory_space<vmem>>, vector<1x6x384xbf16>
    %298 = vector.shape_cast %297 : vector<1x6x384xbf16> to vector<6x384xbf16>
    %c1_168 = arith.constant 1 : index
    %c12_169 = arith.constant 12 : index
    %c0_170 = arith.constant 0 : index
    %299 = vector.load %arg7[%c1_168, %c12_169, %c0_170] : memref<5x28x384xbf16, #tpu.memory_space<vmem>>, vector<1x6x384xbf16>
    %300 = vector.shape_cast %299 : vector<1x6x384xbf16> to vector<6x384xbf16>
    %c2_171 = arith.constant 2 : index
    %c12_172 = arith.constant 12 : index
    %c0_173 = arith.constant 0 : index
    %301 = vector.load %arg7[%c2_171, %c12_172, %c0_173] : memref<5x28x384xbf16, #tpu.memory_space<vmem>>, vector<1x6x384xbf16>
    %302 = vector.shape_cast %301 : vector<1x6x384xbf16> to vector<6x384xbf16>
    %c3_174 = arith.constant 3 : index
    %c12_175 = arith.constant 12 : index
    %c0_176 = arith.constant 0 : index
    %303 = vector.load %arg7[%c3_174, %c12_175, %c0_176] : memref<5x28x384xbf16, #tpu.memory_space<vmem>>, vector<1x6x384xbf16>
    %304 = vector.shape_cast %303 : vector<1x6x384xbf16> to vector<6x384xbf16>
    %c4_177 = arith.constant 4 : index
    %c12_178 = arith.constant 12 : index
    %c0_179 = arith.constant 0 : index
    %305 = vector.load %arg7[%c4_177, %c12_178, %c0_179] : memref<5x28x384xbf16, #tpu.memory_space<vmem>>, vector<1x6x384xbf16>
    %306 = vector.shape_cast %305 : vector<1x6x384xbf16> to vector<6x384xbf16>
    %307 = tpu.concatenate %298, %300, %302, %304, %306 in 0 : vector<6x384xbf16>, vector<6x384xbf16>, vector<6x384xbf16>, vector<6x384xbf16>, vector<6x384xbf16> -> vector<30x384xbf16>
    %cst_180 = arith.constant dense<0.000000e+00> : vector<12x384xf32>
    %308 = tpu.matmul %0, %307, %cst_180 {dimension_numbers = #tpu.dot_dimension_numbers<[1], [0], [0], [1], [0, 0, 1, 1], [], []>} : vector<12x30xbf16>, vector<30x384xbf16>, vector<12x384xf32> -> vector<12x384xf32>
    %309 = arith.addf %308, %4 : vector<12x384xf32>
    %cst_181 = arith.constant 0.000000e+00 : f32
    %310 = vector.broadcast %cst_181 : f32 to vector<12x384xf32>
    %311 = arith.maximumf %309, %310 : vector<12x384xf32>
    %312 = vector.extract_strided_slice %311 {offsets = [0, 0], sizes = [6, 384], strides = [1, 1]} : vector<12x384xf32> to vector<6x384xf32>
    %313 = vector.extract_strided_slice %311 {offsets = [6, 0], sizes = [6, 384], strides = [1, 1]} : vector<12x384xf32> to vector<6x384xf32>
    %314 = arith.maximumf %312, %313 : vector<6x384xf32>
    %c368_i32_182 = arith.constant 368 : i32
    %315 = tpu.dynamic_rotate %314 by %c368_i32_182 dim 1 : vector<6x384xf32>, i32 -> vector<6x384xf32>
    %316 = arith.maximumf %314, %315 : vector<6x384xf32>
    %317 = vector.extract_strided_slice %316 {offsets = [0, 0], sizes = [6, 16], strides = [1, 1]} : vector<6x384xf32> to vector<6x16xf32>
    %318 = vector.extract_strided_slice %316 {offsets = [0, 32], sizes = [6, 16], strides = [1, 1]} : vector<6x384xf32> to vector<6x16xf32>
    %319 = vector.extract_strided_slice %316 {offsets = [0, 64], sizes = [6, 16], strides = [1, 1]} : vector<6x384xf32> to vector<6x16xf32>
    %320 = vector.extract_strided_slice %316 {offsets = [0, 96], sizes = [6, 16], strides = [1, 1]} : vector<6x384xf32> to vector<6x16xf32>
    %321 = vector.extract_strided_slice %316 {offsets = [0, 128], sizes = [6, 16], strides = [1, 1]} : vector<6x384xf32> to vector<6x16xf32>
    %322 = vector.extract_strided_slice %316 {offsets = [0, 160], sizes = [6, 16], strides = [1, 1]} : vector<6x384xf32> to vector<6x16xf32>
    %323 = vector.extract_strided_slice %316 {offsets = [0, 192], sizes = [6, 16], strides = [1, 1]} : vector<6x384xf32> to vector<6x16xf32>
    %324 = vector.extract_strided_slice %316 {offsets = [0, 224], sizes = [6, 16], strides = [1, 1]} : vector<6x384xf32> to vector<6x16xf32>
    %325 = vector.extract_strided_slice %316 {offsets = [0, 256], sizes = [6, 16], strides = [1, 1]} : vector<6x384xf32> to vector<6x16xf32>
    %326 = vector.extract_strided_slice %316 {offsets = [0, 288], sizes = [6, 16], strides = [1, 1]} : vector<6x384xf32> to vector<6x16xf32>
    %327 = vector.extract_strided_slice %316 {offsets = [0, 320], sizes = [6, 16], strides = [1, 1]} : vector<6x384xf32> to vector<6x16xf32>
    %328 = vector.extract_strided_slice %316 {offsets = [0, 352], sizes = [6, 16], strides = [1, 1]} : vector<6x384xf32> to vector<6x16xf32>
    %329 = tpu.concatenate %317, %318, %319, %320, %321, %322, %323, %324, %325, %326, %327, %328 in 1 : vector<6x16xf32>, vector<6x16xf32>, vector<6x16xf32>, vector<6x16xf32>, vector<6x16xf32>, vector<6x16xf32>, vector<6x16xf32>, vector<6x16xf32>, vector<6x16xf32>, vector<6x16xf32>, vector<6x16xf32>, vector<6x16xf32> -> vector<6x192xf32>
    %330 = arith.truncf %329 : vector<6x192xf32> to vector<6x192xbf16>
    %331 = vector.extract_strided_slice %330 {offsets = [0, 0], sizes = [6, 128], strides = [1, 1]} : vector<6x192xbf16> to vector<6x128xbf16>
    %c180 = arith.constant 180 : index
    %c0_183 = arith.constant 0 : index
    %332 = vector.load %arg8[%c180, %c0_183] : memref<360x128xbf16, #tpu.memory_space<vmem>>, vector<6x128xbf16>
    tpu.vector_store %arg8[%c180, %c0_183], %331 {strides = array<i32>} : memref<360x128xbf16, #tpu.memory_space<vmem>>, vector<6x128xbf16>,
    %333 = vector.extract_strided_slice %330 {offsets = [0, 16], sizes = [6, 128], strides = [1, 1]} : vector<6x192xbf16> to vector<6x128xbf16>
    %c186 = arith.constant 186 : index
    %c0_184 = arith.constant 0 : index
    %334 = vector.load %arg8[%c186, %c0_184] : memref<360x128xbf16, #tpu.memory_space<vmem>>, vector<6x128xbf16>
    tpu.vector_store %arg8[%c186, %c0_184], %333 {strides = array<i32>} : memref<360x128xbf16, #tpu.memory_space<vmem>>, vector<6x128xbf16>,
    %335 = vector.extract_strided_slice %330 {offsets = [0, 32], sizes = [6, 128], strides = [1, 1]} : vector<6x192xbf16> to vector<6x128xbf16>
    %c192 = arith.constant 192 : index
    %c0_185 = arith.constant 0 : index
    %336 = vector.load %arg8[%c192, %c0_185] : memref<360x128xbf16, #tpu.memory_space<vmem>>, vector<6x128xbf16>
    tpu.vector_store %arg8[%c192, %c0_185], %335 {strides = array<i32>} : memref<360x128xbf16, #tpu.memory_space<vmem>>, vector<6x128xbf16>,
    %337 = vector.extract_strided_slice %330 {offsets = [0, 48], sizes = [6, 128], strides = [1, 1]} : vector<6x192xbf16> to vector<6x128xbf16>
    %c198 = arith.constant 198 : index
    %c0_186 = arith.constant 0 : index
    %338 = vector.load %arg8[%c198, %c0_186] : memref<360x128xbf16, #tpu.memory_space<vmem>>, vector<6x128xbf16>
    tpu.vector_store %arg8[%c198, %c0_186], %337 {strides = array<i32>} : memref<360x128xbf16, #tpu.memory_space<vmem>>, vector<6x128xbf16>,
    %339 = vector.extract_strided_slice %330 {offsets = [0, 64], sizes = [6, 128], strides = [1, 1]} : vector<6x192xbf16> to vector<6x128xbf16>
    %c204 = arith.constant 204 : index
    %c0_187 = arith.constant 0 : index
    %340 = vector.load %arg8[%c204, %c0_187] : memref<360x128xbf16, #tpu.memory_space<vmem>>, vector<6x128xbf16>
    tpu.vector_store %arg8[%c204, %c0_187], %339 {strides = array<i32>} : memref<360x128xbf16, #tpu.memory_space<vmem>>, vector<6x128xbf16>,
    %c0_188 = arith.constant 0 : index
    %c14 = arith.constant 14 : index
    %c0_189 = arith.constant 0 : index
    %341 = vector.load %arg7[%c0_188, %c14, %c0_189] : memref<5x28x384xbf16, #tpu.memory_space<vmem>>, vector<1x6x384xbf16>
    %342 = vector.shape_cast %341 : vector<1x6x384xbf16> to vector<6x384xbf16>
    %c1_190 = arith.constant 1 : index
    %c14_191 = arith.constant 14 : index
    %c0_192 = arith.constant 0 : index
    %343 = vector.load %arg7[%c1_190, %c14_191, %c0_192] : memref<5x28x384xbf16, #tpu.memory_space<vmem>>, vector<1x6x384xbf16>
    %344 = vector.shape_cast %343 : vector<1x6x384xbf16> to vector<6x384xbf16>
    %c2_193 = arith.constant 2 : index
    %c14_194 = arith.constant 14 : index
    %c0_195 = arith.constant 0 : index
    %345 = vector.load %arg7[%c2_193, %c14_194, %c0_195] : memref<5x28x384xbf16, #tpu.memory_space<vmem>>, vector<1x6x384xbf16>
    %346 = vector.shape_cast %345 : vector<1x6x384xbf16> to vector<6x384xbf16>
    %c3_196 = arith.constant 3 : index
    %c14_197 = arith.constant 14 : index
    %c0_198 = arith.constant 0 : index
    %347 = vector.load %arg7[%c3_196, %c14_197, %c0_198] : memref<5x28x384xbf16, #tpu.memory_space<vmem>>, vector<1x6x384xbf16>
    %348 = vector.shape_cast %347 : vector<1x6x384xbf16> to vector<6x384xbf16>
    %c4_199 = arith.constant 4 : index
    %c14_200 = arith.constant 14 : index
    %c0_201 = arith.constant 0 : index
    %349 = vector.load %arg7[%c4_199, %c14_200, %c0_201] : memref<5x28x384xbf16, #tpu.memory_space<vmem>>, vector<1x6x384xbf16>
    %350 = vector.shape_cast %349 : vector<1x6x384xbf16> to vector<6x384xbf16>
    %351 = tpu.concatenate %342, %344, %346, %348, %350 in 0 : vector<6x384xbf16>, vector<6x384xbf16>, vector<6x384xbf16>, vector<6x384xbf16>, vector<6x384xbf16> -> vector<30x384xbf16>
    %cst_202 = arith.constant dense<0.000000e+00> : vector<12x384xf32>
    %352 = tpu.matmul %0, %351, %cst_202 {dimension_numbers = #tpu.dot_dimension_numbers<[1], [0], [0], [1], [0, 0, 1, 1], [], []>} : vector<12x30xbf16>, vector<30x384xbf16>, vector<12x384xf32> -> vector<12x384xf32>
    %353 = arith.addf %352, %4 : vector<12x384xf32>
    %cst_203 = arith.constant 0.000000e+00 : f32
    %354 = vector.broadcast %cst_203 : f32 to vector<12x384xf32>
    %355 = arith.maximumf %353, %354 : vector<12x384xf32>
    %356 = vector.extract_strided_slice %355 {offsets = [0, 0], sizes = [6, 384], strides = [1, 1]} : vector<12x384xf32> to vector<6x384xf32>
    %357 = vector.extract_strided_slice %355 {offsets = [6, 0], sizes = [6, 384], strides = [1, 1]} : vector<12x384xf32> to vector<6x384xf32>
    %358 = arith.maximumf %356, %357 : vector<6x384xf32>
    %c368_i32_204 = arith.constant 368 : i32
    %359 = tpu.dynamic_rotate %358 by %c368_i32_204 dim 1 : vector<6x384xf32>, i32 -> vector<6x384xf32>
    %360 = arith.maximumf %358, %359 : vector<6x384xf32>
    %361 = vector.extract_strided_slice %360 {offsets = [0, 0], sizes = [6, 16], strides = [1, 1]} : vector<6x384xf32> to vector<6x16xf32>
    %362 = vector.extract_strided_slice %360 {offsets = [0, 32], sizes = [6, 16], strides = [1, 1]} : vector<6x384xf32> to vector<6x16xf32>
    %363 = vector.extract_strided_slice %360 {offsets = [0, 64], sizes = [6, 16], strides = [1, 1]} : vector<6x384xf32> to vector<6x16xf32>
    %364 = vector.extract_strided_slice %360 {offsets = [0, 96], sizes = [6, 16], strides = [1, 1]} : vector<6x384xf32> to vector<6x16xf32>
    %365 = vector.extract_strided_slice %360 {offsets = [0, 128], sizes = [6, 16], strides = [1, 1]} : vector<6x384xf32> to vector<6x16xf32>
    %366 = vector.extract_strided_slice %360 {offsets = [0, 160], sizes = [6, 16], strides = [1, 1]} : vector<6x384xf32> to vector<6x16xf32>
    %367 = vector.extract_strided_slice %360 {offsets = [0, 192], sizes = [6, 16], strides = [1, 1]} : vector<6x384xf32> to vector<6x16xf32>
    %368 = vector.extract_strided_slice %360 {offsets = [0, 224], sizes = [6, 16], strides = [1, 1]} : vector<6x384xf32> to vector<6x16xf32>
    %369 = vector.extract_strided_slice %360 {offsets = [0, 256], sizes = [6, 16], strides = [1, 1]} : vector<6x384xf32> to vector<6x16xf32>
    %370 = vector.extract_strided_slice %360 {offsets = [0, 288], sizes = [6, 16], strides = [1, 1]} : vector<6x384xf32> to vector<6x16xf32>
    %371 = vector.extract_strided_slice %360 {offsets = [0, 320], sizes = [6, 16], strides = [1, 1]} : vector<6x384xf32> to vector<6x16xf32>
    %372 = vector.extract_strided_slice %360 {offsets = [0, 352], sizes = [6, 16], strides = [1, 1]} : vector<6x384xf32> to vector<6x16xf32>
    %373 = tpu.concatenate %361, %362, %363, %364, %365, %366, %367, %368, %369, %370, %371, %372 in 1 : vector<6x16xf32>, vector<6x16xf32>, vector<6x16xf32>, vector<6x16xf32>, vector<6x16xf32>, vector<6x16xf32>, vector<6x16xf32>, vector<6x16xf32>, vector<6x16xf32>, vector<6x16xf32>, vector<6x16xf32>, vector<6x16xf32> -> vector<6x192xf32>
    %374 = arith.truncf %373 : vector<6x192xf32> to vector<6x192xbf16>
    %375 = vector.extract_strided_slice %374 {offsets = [0, 0], sizes = [6, 128], strides = [1, 1]} : vector<6x192xbf16> to vector<6x128xbf16>
    %c210 = arith.constant 210 : index
    %c0_205 = arith.constant 0 : index
    %376 = vector.load %arg8[%c210, %c0_205] : memref<360x128xbf16, #tpu.memory_space<vmem>>, vector<6x128xbf16>
    tpu.vector_store %arg8[%c210, %c0_205], %375 {strides = array<i32>} : memref<360x128xbf16, #tpu.memory_space<vmem>>, vector<6x128xbf16>,
    %377 = vector.extract_strided_slice %374 {offsets = [0, 16], sizes = [6, 128], strides = [1, 1]} : vector<6x192xbf16> to vector<6x128xbf16>
    %c216 = arith.constant 216 : index
    %c0_206 = arith.constant 0 : index
    %378 = vector.load %arg8[%c216, %c0_206] : memref<360x128xbf16, #tpu.memory_space<vmem>>, vector<6x128xbf16>
    tpu.vector_store %arg8[%c216, %c0_206], %377 {strides = array<i32>} : memref<360x128xbf16, #tpu.memory_space<vmem>>, vector<6x128xbf16>,
    %379 = vector.extract_strided_slice %374 {offsets = [0, 32], sizes = [6, 128], strides = [1, 1]} : vector<6x192xbf16> to vector<6x128xbf16>
    %c222 = arith.constant 222 : index
    %c0_207 = arith.constant 0 : index
    %380 = vector.load %arg8[%c222, %c0_207] : memref<360x128xbf16, #tpu.memory_space<vmem>>, vector<6x128xbf16>
    tpu.vector_store %arg8[%c222, %c0_207], %379 {strides = array<i32>} : memref<360x128xbf16, #tpu.memory_space<vmem>>, vector<6x128xbf16>,
    %381 = vector.extract_strided_slice %374 {offsets = [0, 48], sizes = [6, 128], strides = [1, 1]} : vector<6x192xbf16> to vector<6x128xbf16>
    %c228 = arith.constant 228 : index
    %c0_208 = arith.constant 0 : index
    %382 = vector.load %arg8[%c228, %c0_208] : memref<360x128xbf16, #tpu.memory_space<vmem>>, vector<6x128xbf16>
    tpu.vector_store %arg8[%c228, %c0_208], %381 {strides = array<i32>} : memref<360x128xbf16, #tpu.memory_space<vmem>>, vector<6x128xbf16>,
    %383 = vector.extract_strided_slice %374 {offsets = [0, 64], sizes = [6, 128], strides = [1, 1]} : vector<6x192xbf16> to vector<6x128xbf16>
    %c234 = arith.constant 234 : index
    %c0_209 = arith.constant 0 : index
    %384 = vector.load %arg8[%c234, %c0_209] : memref<360x128xbf16, #tpu.memory_space<vmem>>, vector<6x128xbf16>
    tpu.vector_store %arg8[%c234, %c0_209], %383 {strides = array<i32>} : memref<360x128xbf16, #tpu.memory_space<vmem>>, vector<6x128xbf16>,
    %c0_210 = arith.constant 0 : index
    %c16_211 = arith.constant 16 : index
    %c0_212 = arith.constant 0 : index
    %385 = vector.load %arg7[%c0_210, %c16_211, %c0_212] : memref<5x28x384xbf16, #tpu.memory_space<vmem>>, vector<1x6x384xbf16>
    %386 = vector.shape_cast %385 : vector<1x6x384xbf16> to vector<6x384xbf16>
    %c1_213 = arith.constant 1 : index
    %c16_214 = arith.constant 16 : index
    %c0_215 = arith.constant 0 : index
    %387 = vector.load %arg7[%c1_213, %c16_214, %c0_215] : memref<5x28x384xbf16, #tpu.memory_space<vmem>>, vector<1x6x384xbf16>
    %388 = vector.shape_cast %387 : vector<1x6x384xbf16> to vector<6x384xbf16>
    %c2_216 = arith.constant 2 : index
    %c16_217 = arith.constant 16 : index
    %c0_218 = arith.constant 0 : index
    %389 = vector.load %arg7[%c2_216, %c16_217, %c0_218] : memref<5x28x384xbf16, #tpu.memory_space<vmem>>, vector<1x6x384xbf16>
    %390 = vector.shape_cast %389 : vector<1x6x384xbf16> to vector<6x384xbf16>
    %c3_219 = arith.constant 3 : index
    %c16_220 = arith.constant 16 : index
    %c0_221 = arith.constant 0 : index
    %391 = vector.load %arg7[%c3_219, %c16_220, %c0_221] : memref<5x28x384xbf16, #tpu.memory_space<vmem>>, vector<1x6x384xbf16>
    %392 = vector.shape_cast %391 : vector<1x6x384xbf16> to vector<6x384xbf16>
    %c4_222 = arith.constant 4 : index
    %c16_223 = arith.constant 16 : index
    %c0_224 = arith.constant 0 : index
    %393 = vector.load %arg7[%c4_222, %c16_223, %c0_224] : memref<5x28x384xbf16, #tpu.memory_space<vmem>>, vector<1x6x384xbf16>
    %394 = vector.shape_cast %393 : vector<1x6x384xbf16> to vector<6x384xbf16>
    %395 = tpu.concatenate %386, %388, %390, %392, %394 in 0 : vector<6x384xbf16>, vector<6x384xbf16>, vector<6x384xbf16>, vector<6x384xbf16>, vector<6x384xbf16> -> vector<30x384xbf16>
    %cst_225 = arith.constant dense<0.000000e+00> : vector<12x384xf32>
    %396 = tpu.matmul %0, %395, %cst_225 {dimension_numbers = #tpu.dot_dimension_numbers<[1], [0], [0], [1], [0, 0, 1, 1], [], []>} : vector<12x30xbf16>, vector<30x384xbf16>, vector<12x384xf32> -> vector<12x384xf32>
    %397 = arith.addf %396, %4 : vector<12x384xf32>
    %cst_226 = arith.constant 0.000000e+00 : f32
    %398 = vector.broadcast %cst_226 : f32 to vector<12x384xf32>
    %399 = arith.maximumf %397, %398 : vector<12x384xf32>
    %400 = vector.extract_strided_slice %399 {offsets = [0, 0], sizes = [6, 384], strides = [1, 1]} : vector<12x384xf32> to vector<6x384xf32>
    %401 = vector.extract_strided_slice %399 {offsets = [6, 0], sizes = [6, 384], strides = [1, 1]} : vector<12x384xf32> to vector<6x384xf32>
    %402 = arith.maximumf %400, %401 : vector<6x384xf32>
    %c368_i32_227 = arith.constant 368 : i32
    %403 = tpu.dynamic_rotate %402 by %c368_i32_227 dim 1 : vector<6x384xf32>, i32 -> vector<6x384xf32>
    %404 = arith.maximumf %402, %403 : vector<6x384xf32>
    %405 = vector.extract_strided_slice %404 {offsets = [0, 0], sizes = [6, 16], strides = [1, 1]} : vector<6x384xf32> to vector<6x16xf32>
    %406 = vector.extract_strided_slice %404 {offsets = [0, 32], sizes = [6, 16], strides = [1, 1]} : vector<6x384xf32> to vector<6x16xf32>
    %407 = vector.extract_strided_slice %404 {offsets = [0, 64], sizes = [6, 16], strides = [1, 1]} : vector<6x384xf32> to vector<6x16xf32>
    %408 = vector.extract_strided_slice %404 {offsets = [0, 96], sizes = [6, 16], strides = [1, 1]} : vector<6x384xf32> to vector<6x16xf32>
    %409 = vector.extract_strided_slice %404 {offsets = [0, 128], sizes = [6, 16], strides = [1, 1]} : vector<6x384xf32> to vector<6x16xf32>
    %410 = vector.extract_strided_slice %404 {offsets = [0, 160], sizes = [6, 16], strides = [1, 1]} : vector<6x384xf32> to vector<6x16xf32>
    %411 = vector.extract_strided_slice %404 {offsets = [0, 192], sizes = [6, 16], strides = [1, 1]} : vector<6x384xf32> to vector<6x16xf32>
    %412 = vector.extract_strided_slice %404 {offsets = [0, 224], sizes = [6, 16], strides = [1, 1]} : vector<6x384xf32> to vector<6x16xf32>
    %413 = vector.extract_strided_slice %404 {offsets = [0, 256], sizes = [6, 16], strides = [1, 1]} : vector<6x384xf32> to vector<6x16xf32>
    %414 = vector.extract_strided_slice %404 {offsets = [0, 288], sizes = [6, 16], strides = [1, 1]} : vector<6x384xf32> to vector<6x16xf32>
    %415 = vector.extract_strided_slice %404 {offsets = [0, 320], sizes = [6, 16], strides = [1, 1]} : vector<6x384xf32> to vector<6x16xf32>
    %416 = vector.extract_strided_slice %404 {offsets = [0, 352], sizes = [6, 16], strides = [1, 1]} : vector<6x384xf32> to vector<6x16xf32>
    %417 = tpu.concatenate %405, %406, %407, %408, %409, %410, %411, %412, %413, %414, %415, %416 in 1 : vector<6x16xf32>, vector<6x16xf32>, vector<6x16xf32>, vector<6x16xf32>, vector<6x16xf32>, vector<6x16xf32>, vector<6x16xf32>, vector<6x16xf32>, vector<6x16xf32>, vector<6x16xf32>, vector<6x16xf32>, vector<6x16xf32> -> vector<6x192xf32>
    %418 = arith.truncf %417 : vector<6x192xf32> to vector<6x192xbf16>
    %419 = vector.extract_strided_slice %418 {offsets = [0, 0], sizes = [6, 128], strides = [1, 1]} : vector<6x192xbf16> to vector<6x128xbf16>
    %c240 = arith.constant 240 : index
    %c0_228 = arith.constant 0 : index
    %420 = vector.load %arg8[%c240, %c0_228] : memref<360x128xbf16, #tpu.memory_space<vmem>>, vector<6x128xbf16>
    tpu.vector_store %arg8[%c240, %c0_228], %419 {strides = array<i32>} : memref<360x128xbf16, #tpu.memory_space<vmem>>, vector<6x128xbf16>,
    %421 = vector.extract_strided_slice %418 {offsets = [0, 16], sizes = [6, 128], strides = [1, 1]} : vector<6x192xbf16> to vector<6x128xbf16>
    %c246 = arith.constant 246 : index
    %c0_229 = arith.constant 0 : index
    %422 = vector.load %arg8[%c246, %c0_229] : memref<360x128xbf16, #tpu.memory_space<vmem>>, vector<6x128xbf16>
    tpu.vector_store %arg8[%c246, %c0_229], %421 {strides = array<i32>} : memref<360x128xbf16, #tpu.memory_space<vmem>>, vector<6x128xbf16>,
    %423 = vector.extract_strided_slice %418 {offsets = [0, 32], sizes = [6, 128], strides = [1, 1]} : vector<6x192xbf16> to vector<6x128xbf16>
    %c252 = arith.constant 252 : index
    %c0_230 = arith.constant 0 : index
    %424 = vector.load %arg8[%c252, %c0_230] : memref<360x128xbf16, #tpu.memory_space<vmem>>, vector<6x128xbf16>
    tpu.vector_store %arg8[%c252, %c0_230], %423 {strides = array<i32>} : memref<360x128xbf16, #tpu.memory_space<vmem>>, vector<6x128xbf16>,
    %425 = vector.extract_strided_slice %418 {offsets = [0, 48], sizes = [6, 128], strides = [1, 1]} : vector<6x192xbf16> to vector<6x128xbf16>
    %c258 = arith.constant 258 : index
    %c0_231 = arith.constant 0 : index
    %426 = vector.load %arg8[%c258, %c0_231] : memref<360x128xbf16, #tpu.memory_space<vmem>>, vector<6x128xbf16>
    tpu.vector_store %arg8[%c258, %c0_231], %425 {strides = array<i32>} : memref<360x128xbf16, #tpu.memory_space<vmem>>, vector<6x128xbf16>,
    %427 = vector.extract_strided_slice %418 {offsets = [0, 64], sizes = [6, 128], strides = [1, 1]} : vector<6x192xbf16> to vector<6x128xbf16>
    %c264 = arith.constant 264 : index
    %c0_232 = arith.constant 0 : index
    %428 = vector.load %arg8[%c264, %c0_232] : memref<360x128xbf16, #tpu.memory_space<vmem>>, vector<6x128xbf16>
    tpu.vector_store %arg8[%c264, %c0_232], %427 {strides = array<i32>} : memref<360x128xbf16, #tpu.memory_space<vmem>>, vector<6x128xbf16>,
    %c0_233 = arith.constant 0 : index
    %c18_234 = arith.constant 18 : index
    %c0_235 = arith.constant 0 : index
    %429 = vector.load %arg7[%c0_233, %c18_234, %c0_235] : memref<5x28x384xbf16, #tpu.memory_space<vmem>>, vector<1x6x384xbf16>
    %430 = vector.shape_cast %429 : vector<1x6x384xbf16> to vector<6x384xbf16>
    %c1_236 = arith.constant 1 : index
    %c18_237 = arith.constant 18 : index
    %c0_238 = arith.constant 0 : index
    %431 = vector.load %arg7[%c1_236, %c18_237, %c0_238] : memref<5x28x384xbf16, #tpu.memory_space<vmem>>, vector<1x6x384xbf16>
    %432 = vector.shape_cast %431 : vector<1x6x384xbf16> to vector<6x384xbf16>
    %c2_239 = arith.constant 2 : index
    %c18_240 = arith.constant 18 : index
    %c0_241 = arith.constant 0 : index
    %433 = vector.load %arg7[%c2_239, %c18_240, %c0_241] : memref<5x28x384xbf16, #tpu.memory_space<vmem>>, vector<1x6x384xbf16>
    %434 = vector.shape_cast %433 : vector<1x6x384xbf16> to vector<6x384xbf16>
    %c3_242 = arith.constant 3 : index
    %c18_243 = arith.constant 18 : index
    %c0_244 = arith.constant 0 : index
    %435 = vector.load %arg7[%c3_242, %c18_243, %c0_244] : memref<5x28x384xbf16, #tpu.memory_space<vmem>>, vector<1x6x384xbf16>
    %436 = vector.shape_cast %435 : vector<1x6x384xbf16> to vector<6x384xbf16>
    %c4_245 = arith.constant 4 : index
    %c18_246 = arith.constant 18 : index
    %c0_247 = arith.constant 0 : index
    %437 = vector.load %arg7[%c4_245, %c18_246, %c0_247] : memref<5x28x384xbf16, #tpu.memory_space<vmem>>, vector<1x6x384xbf16>
    %438 = vector.shape_cast %437 : vector<1x6x384xbf16> to vector<6x384xbf16>
    %439 = tpu.concatenate %430, %432, %434, %436, %438 in 0 : vector<6x384xbf16>, vector<6x384xbf16>, vector<6x384xbf16>, vector<6x384xbf16>, vector<6x384xbf16> -> vector<30x384xbf16>
    %cst_248 = arith.constant dense<0.000000e+00> : vector<12x384xf32>
    %440 = tpu.matmul %0, %439, %cst_248 {dimension_numbers = #tpu.dot_dimension_numbers<[1], [0], [0], [1], [0, 0, 1, 1], [], []>} : vector<12x30xbf16>, vector<30x384xbf16>, vector<12x384xf32> -> vector<12x384xf32>
    %441 = arith.addf %440, %4 : vector<12x384xf32>
    %cst_249 = arith.constant 0.000000e+00 : f32
    %442 = vector.broadcast %cst_249 : f32 to vector<12x384xf32>
    %443 = arith.maximumf %441, %442 : vector<12x384xf32>
    %444 = vector.extract_strided_slice %443 {offsets = [0, 0], sizes = [6, 384], strides = [1, 1]} : vector<12x384xf32> to vector<6x384xf32>
    %445 = vector.extract_strided_slice %443 {offsets = [6, 0], sizes = [6, 384], strides = [1, 1]} : vector<12x384xf32> to vector<6x384xf32>
    %446 = arith.maximumf %444, %445 : vector<6x384xf32>
    %c368_i32_250 = arith.constant 368 : i32
    %447 = tpu.dynamic_rotate %446 by %c368_i32_250 dim 1 : vector<6x384xf32>, i32 -> vector<6x384xf32>
    %448 = arith.maximumf %446, %447 : vector<6x384xf32>
    %449 = vector.extract_strided_slice %448 {offsets = [0, 0], sizes = [6, 16], strides = [1, 1]} : vector<6x384xf32> to vector<6x16xf32>
    %450 = vector.extract_strided_slice %448 {offsets = [0, 32], sizes = [6, 16], strides = [1, 1]} : vector<6x384xf32> to vector<6x16xf32>
    %451 = vector.extract_strided_slice %448 {offsets = [0, 64], sizes = [6, 16], strides = [1, 1]} : vector<6x384xf32> to vector<6x16xf32>
    %452 = vector.extract_strided_slice %448 {offsets = [0, 96], sizes = [6, 16], strides = [1, 1]} : vector<6x384xf32> to vector<6x16xf32>
    %453 = vector.extract_strided_slice %448 {offsets = [0, 128], sizes = [6, 16], strides = [1, 1]} : vector<6x384xf32> to vector<6x16xf32>
    %454 = vector.extract_strided_slice %448 {offsets = [0, 160], sizes = [6, 16], strides = [1, 1]} : vector<6x384xf32> to vector<6x16xf32>
    %455 = vector.extract_strided_slice %448 {offsets = [0, 192], sizes = [6, 16], strides = [1, 1]} : vector<6x384xf32> to vector<6x16xf32>
    %456 = vector.extract_strided_slice %448 {offsets = [0, 224], sizes = [6, 16], strides = [1, 1]} : vector<6x384xf32> to vector<6x16xf32>
    %457 = vector.extract_strided_slice %448 {offsets = [0, 256], sizes = [6, 16], strides = [1, 1]} : vector<6x384xf32> to vector<6x16xf32>
    %458 = vector.extract_strided_slice %448 {offsets = [0, 288], sizes = [6, 16], strides = [1, 1]} : vector<6x384xf32> to vector<6x16xf32>
    %459 = vector.extract_strided_slice %448 {offsets = [0, 320], sizes = [6, 16], strides = [1, 1]} : vector<6x384xf32> to vector<6x16xf32>
    %460 = vector.extract_strided_slice %448 {offsets = [0, 352], sizes = [6, 16], strides = [1, 1]} : vector<6x384xf32> to vector<6x16xf32>
    %461 = tpu.concatenate %449, %450, %451, %452, %453, %454, %455, %456, %457, %458, %459, %460 in 1 : vector<6x16xf32>, vector<6x16xf32>, vector<6x16xf32>, vector<6x16xf32>, vector<6x16xf32>, vector<6x16xf32>, vector<6x16xf32>, vector<6x16xf32>, vector<6x16xf32>, vector<6x16xf32>, vector<6x16xf32>, vector<6x16xf32> -> vector<6x192xf32>
    %462 = arith.truncf %461 : vector<6x192xf32> to vector<6x192xbf16>
    %463 = vector.extract_strided_slice %462 {offsets = [0, 0], sizes = [6, 128], strides = [1, 1]} : vector<6x192xbf16> to vector<6x128xbf16>
    %c270 = arith.constant 270 : index
    %c0_251 = arith.constant 0 : index
    %464 = vector.load %arg8[%c270, %c0_251] : memref<360x128xbf16, #tpu.memory_space<vmem>>, vector<6x128xbf16>
    tpu.vector_store %arg8[%c270, %c0_251], %463 {strides = array<i32>} : memref<360x128xbf16, #tpu.memory_space<vmem>>, vector<6x128xbf16>,
    %465 = vector.extract_strided_slice %462 {offsets = [0, 16], sizes = [6, 128], strides = [1, 1]} : vector<6x192xbf16> to vector<6x128xbf16>
    %c276 = arith.constant 276 : index
    %c0_252 = arith.constant 0 : index
    %466 = vector.load %arg8[%c276, %c0_252] : memref<360x128xbf16, #tpu.memory_space<vmem>>, vector<6x128xbf16>
    tpu.vector_store %arg8[%c276, %c0_252], %465 {strides = array<i32>} : memref<360x128xbf16, #tpu.memory_space<vmem>>, vector<6x128xbf16>,
    %467 = vector.extract_strided_slice %462 {offsets = [0, 32], sizes = [6, 128], strides = [1, 1]} : vector<6x192xbf16> to vector<6x128xbf16>
    %c282 = arith.constant 282 : index
    %c0_253 = arith.constant 0 : index
    %468 = vector.load %arg8[%c282, %c0_253] : memref<360x128xbf16, #tpu.memory_space<vmem>>, vector<6x128xbf16>
    tpu.vector_store %arg8[%c282, %c0_253], %467 {strides = array<i32>} : memref<360x128xbf16, #tpu.memory_space<vmem>>, vector<6x128xbf16>,
    %469 = vector.extract_strided_slice %462 {offsets = [0, 48], sizes = [6, 128], strides = [1, 1]} : vector<6x192xbf16> to vector<6x128xbf16>
    %c288 = arith.constant 288 : index
    %c0_254 = arith.constant 0 : index
    %470 = vector.load %arg8[%c288, %c0_254] : memref<360x128xbf16, #tpu.memory_space<vmem>>, vector<6x128xbf16>
    tpu.vector_store %arg8[%c288, %c0_254], %469 {strides = array<i32>} : memref<360x128xbf16, #tpu.memory_space<vmem>>, vector<6x128xbf16>,
    %471 = vector.extract_strided_slice %462 {offsets = [0, 64], sizes = [6, 128], strides = [1, 1]} : vector<6x192xbf16> to vector<6x128xbf16>
    %c294 = arith.constant 294 : index
    %c0_255 = arith.constant 0 : index
    %472 = vector.load %arg8[%c294, %c0_255] : memref<360x128xbf16, #tpu.memory_space<vmem>>, vector<6x128xbf16>
    tpu.vector_store %arg8[%c294, %c0_255], %471 {strides = array<i32>} : memref<360x128xbf16, #tpu.memory_space<vmem>>, vector<6x128xbf16>,
    %c0_256 = arith.constant 0 : index
    %c20 = arith.constant 20 : index
    %c0_257 = arith.constant 0 : index
    %473 = vector.load %arg7[%c0_256, %c20, %c0_257] : memref<5x28x384xbf16, #tpu.memory_space<vmem>>, vector<1x6x384xbf16>
    %474 = vector.shape_cast %473 : vector<1x6x384xbf16> to vector<6x384xbf16>
    %c1_258 = arith.constant 1 : index
    %c20_259 = arith.constant 20 : index
    %c0_260 = arith.constant 0 : index
    %475 = vector.load %arg7[%c1_258, %c20_259, %c0_260] : memref<5x28x384xbf16, #tpu.memory_space<vmem>>, vector<1x6x384xbf16>
    %476 = vector.shape_cast %475 : vector<1x6x384xbf16> to vector<6x384xbf16>
    %c2_261 = arith.constant 2 : index
    %c20_262 = arith.constant 20 : index
    %c0_263 = arith.constant 0 : index
    %477 = vector.load %arg7[%c2_261, %c20_262, %c0_263] : memref<5x28x384xbf16, #tpu.memory_space<vmem>>, vector<1x6x384xbf16>
    %478 = vector.shape_cast %477 : vector<1x6x384xbf16> to vector<6x384xbf16>
    %c3_264 = arith.constant 3 : index
    %c20_265 = arith.constant 20 : index
    %c0_266 = arith.constant 0 : index
    %479 = vector.load %arg7[%c3_264, %c20_265, %c0_266] : memref<5x28x384xbf16, #tpu.memory_space<vmem>>, vector<1x6x384xbf16>
    %480 = vector.shape_cast %479 : vector<1x6x384xbf16> to vector<6x384xbf16>
    %c4_267 = arith.constant 4 : index
    %c20_268 = arith.constant 20 : index
    %c0_269 = arith.constant 0 : index
    %481 = vector.load %arg7[%c4_267, %c20_268, %c0_269] : memref<5x28x384xbf16, #tpu.memory_space<vmem>>, vector<1x6x384xbf16>
    %482 = vector.shape_cast %481 : vector<1x6x384xbf16> to vector<6x384xbf16>
    %483 = tpu.concatenate %474, %476, %478, %480, %482 in 0 : vector<6x384xbf16>, vector<6x384xbf16>, vector<6x384xbf16>, vector<6x384xbf16>, vector<6x384xbf16> -> vector<30x384xbf16>
    %cst_270 = arith.constant dense<0.000000e+00> : vector<12x384xf32>
    %484 = tpu.matmul %0, %483, %cst_270 {dimension_numbers = #tpu.dot_dimension_numbers<[1], [0], [0], [1], [0, 0, 1, 1], [], []>} : vector<12x30xbf16>, vector<30x384xbf16>, vector<12x384xf32> -> vector<12x384xf32>
    %485 = arith.addf %484, %4 : vector<12x384xf32>
    %cst_271 = arith.constant 0.000000e+00 : f32
    %486 = vector.broadcast %cst_271 : f32 to vector<12x384xf32>
    %487 = arith.maximumf %485, %486 : vector<12x384xf32>
    %488 = vector.extract_strided_slice %487 {offsets = [0, 0], sizes = [6, 384], strides = [1, 1]} : vector<12x384xf32> to vector<6x384xf32>
    %489 = vector.extract_strided_slice %487 {offsets = [6, 0], sizes = [6, 384], strides = [1, 1]} : vector<12x384xf32> to vector<6x384xf32>
    %490 = arith.maximumf %488, %489 : vector<6x384xf32>
    %c368_i32_272 = arith.constant 368 : i32
    %491 = tpu.dynamic_rotate %490 by %c368_i32_272 dim 1 : vector<6x384xf32>, i32 -> vector<6x384xf32>
    %492 = arith.maximumf %490, %491 : vector<6x384xf32>
    %493 = vector.extract_strided_slice %492 {offsets = [0, 0], sizes = [6, 16], strides = [1, 1]} : vector<6x384xf32> to vector<6x16xf32>
    %494 = vector.extract_strided_slice %492 {offsets = [0, 32], sizes = [6, 16], strides = [1, 1]} : vector<6x384xf32> to vector<6x16xf32>
    %495 = vector.extract_strided_slice %492 {offsets = [0, 64], sizes = [6, 16], strides = [1, 1]} : vector<6x384xf32> to vector<6x16xf32>
    %496 = vector.extract_strided_slice %492 {offsets = [0, 96], sizes = [6, 16], strides = [1, 1]} : vector<6x384xf32> to vector<6x16xf32>
    %497 = vector.extract_strided_slice %492 {offsets = [0, 128], sizes = [6, 16], strides = [1, 1]} : vector<6x384xf32> to vector<6x16xf32>
    %498 = vector.extract_strided_slice %492 {offsets = [0, 160], sizes = [6, 16], strides = [1, 1]} : vector<6x384xf32> to vector<6x16xf32>
    %499 = vector.extract_strided_slice %492 {offsets = [0, 192], sizes = [6, 16], strides = [1, 1]} : vector<6x384xf32> to vector<6x16xf32>
    %500 = vector.extract_strided_slice %492 {offsets = [0, 224], sizes = [6, 16], strides = [1, 1]} : vector<6x384xf32> to vector<6x16xf32>
    %501 = vector.extract_strided_slice %492 {offsets = [0, 256], sizes = [6, 16], strides = [1, 1]} : vector<6x384xf32> to vector<6x16xf32>
    %502 = vector.extract_strided_slice %492 {offsets = [0, 288], sizes = [6, 16], strides = [1, 1]} : vector<6x384xf32> to vector<6x16xf32>
    %503 = vector.extract_strided_slice %492 {offsets = [0, 320], sizes = [6, 16], strides = [1, 1]} : vector<6x384xf32> to vector<6x16xf32>
    %504 = vector.extract_strided_slice %492 {offsets = [0, 352], sizes = [6, 16], strides = [1, 1]} : vector<6x384xf32> to vector<6x16xf32>
    %505 = tpu.concatenate %493, %494, %495, %496, %497, %498, %499, %500, %501, %502, %503, %504 in 1 : vector<6x16xf32>, vector<6x16xf32>, vector<6x16xf32>, vector<6x16xf32>, vector<6x16xf32>, vector<6x16xf32>, vector<6x16xf32>, vector<6x16xf32>, vector<6x16xf32>, vector<6x16xf32>, vector<6x16xf32>, vector<6x16xf32> -> vector<6x192xf32>
    %506 = arith.truncf %505 : vector<6x192xf32> to vector<6x192xbf16>
    %507 = vector.extract_strided_slice %506 {offsets = [0, 0], sizes = [6, 128], strides = [1, 1]} : vector<6x192xbf16> to vector<6x128xbf16>
    %c300 = arith.constant 300 : index
    %c0_273 = arith.constant 0 : index
    %508 = vector.load %arg8[%c300, %c0_273] : memref<360x128xbf16, #tpu.memory_space<vmem>>, vector<6x128xbf16>
    tpu.vector_store %arg8[%c300, %c0_273], %507 {strides = array<i32>} : memref<360x128xbf16, #tpu.memory_space<vmem>>, vector<6x128xbf16>,
    %509 = vector.extract_strided_slice %506 {offsets = [0, 16], sizes = [6, 128], strides = [1, 1]} : vector<6x192xbf16> to vector<6x128xbf16>
    %c306 = arith.constant 306 : index
    %c0_274 = arith.constant 0 : index
    %510 = vector.load %arg8[%c306, %c0_274] : memref<360x128xbf16, #tpu.memory_space<vmem>>, vector<6x128xbf16>
    tpu.vector_store %arg8[%c306, %c0_274], %509 {strides = array<i32>} : memref<360x128xbf16, #tpu.memory_space<vmem>>, vector<6x128xbf16>,
    %511 = vector.extract_strided_slice %506 {offsets = [0, 32], sizes = [6, 128], strides = [1, 1]} : vector<6x192xbf16> to vector<6x128xbf16>
    %c312 = arith.constant 312 : index
    %c0_275 = arith.constant 0 : index
    %512 = vector.load %arg8[%c312, %c0_275] : memref<360x128xbf16, #tpu.memory_space<vmem>>, vector<6x128xbf16>
    tpu.vector_store %arg8[%c312, %c0_275], %511 {strides = array<i32>} : memref<360x128xbf16, #tpu.memory_space<vmem>>, vector<6x128xbf16>,
    %513 = vector.extract_strided_slice %506 {offsets = [0, 48], sizes = [6, 128], strides = [1, 1]} : vector<6x192xbf16> to vector<6x128xbf16>
    %c318 = arith.constant 318 : index
    %c0_276 = arith.constant 0 : index
    %514 = vector.load %arg8[%c318, %c0_276] : memref<360x128xbf16, #tpu.memory_space<vmem>>, vector<6x128xbf16>
    tpu.vector_store %arg8[%c318, %c0_276], %513 {strides = array<i32>} : memref<360x128xbf16, #tpu.memory_space<vmem>>, vector<6x128xbf16>,
    %515 = vector.extract_strided_slice %506 {offsets = [0, 64], sizes = [6, 128], strides = [1, 1]} : vector<6x192xbf16> to vector<6x128xbf16>
    %c324 = arith.constant 324 : index
    %c0_277 = arith.constant 0 : index
    %516 = vector.load %arg8[%c324, %c0_277] : memref<360x128xbf16, #tpu.memory_space<vmem>>, vector<6x128xbf16>
    tpu.vector_store %arg8[%c324, %c0_277], %515 {strides = array<i32>} : memref<360x128xbf16, #tpu.memory_space<vmem>>, vector<6x128xbf16>,
    %c0_278 = arith.constant 0 : index
    %c22 = arith.constant 22 : index
    %c0_279 = arith.constant 0 : index
    %517 = vector.load %arg7[%c0_278, %c22, %c0_279] : memref<5x28x384xbf16, #tpu.memory_space<vmem>>, vector<1x6x384xbf16>
    %518 = vector.shape_cast %517 : vector<1x6x384xbf16> to vector<6x384xbf16>
    %c1_280 = arith.constant 1 : index
    %c22_281 = arith.constant 22 : index
    %c0_282 = arith.constant 0 : index
    %519 = vector.load %arg7[%c1_280, %c22_281, %c0_282] : memref<5x28x384xbf16, #tpu.memory_space<vmem>>, vector<1x6x384xbf16>
    %520 = vector.shape_cast %519 : vector<1x6x384xbf16> to vector<6x384xbf16>
    %c2_283 = arith.constant 2 : index
    %c22_284 = arith.constant 22 : index
    %c0_285 = arith.constant 0 : index
    %521 = vector.load %arg7[%c2_283, %c22_284, %c0_285] : memref<5x28x384xbf16, #tpu.memory_space<vmem>>, vector<1x6x384xbf16>
    %522 = vector.shape_cast %521 : vector<1x6x384xbf16> to vector<6x384xbf16>
    %c3_286 = arith.constant 3 : index
    %c22_287 = arith.constant 22 : index
    %c0_288 = arith.constant 0 : index
    %523 = vector.load %arg7[%c3_286, %c22_287, %c0_288] : memref<5x28x384xbf16, #tpu.memory_space<vmem>>, vector<1x6x384xbf16>
    %524 = vector.shape_cast %523 : vector<1x6x384xbf16> to vector<6x384xbf16>
    %c4_289 = arith.constant 4 : index
    %c22_290 = arith.constant 22 : index
    %c0_291 = arith.constant 0 : index
    %525 = vector.load %arg7[%c4_289, %c22_290, %c0_291] : memref<5x28x384xbf16, #tpu.memory_space<vmem>>, vector<1x6x384xbf16>
    %526 = vector.shape_cast %525 : vector<1x6x384xbf16> to vector<6x384xbf16>
    %527 = tpu.concatenate %518, %520, %522, %524, %526 in 0 : vector<6x384xbf16>, vector<6x384xbf16>, vector<6x384xbf16>, vector<6x384xbf16>, vector<6x384xbf16> -> vector<30x384xbf16>
    %cst_292 = arith.constant dense<0.000000e+00> : vector<12x384xf32>
    %528 = tpu.matmul %0, %527, %cst_292 {dimension_numbers = #tpu.dot_dimension_numbers<[1], [0], [0], [1], [0, 0, 1, 1], [], []>} : vector<12x30xbf16>, vector<30x384xbf16>, vector<12x384xf32> -> vector<12x384xf32>
    %529 = arith.addf %528, %4 : vector<12x384xf32>
    %cst_293 = arith.constant 0.000000e+00 : f32
    %530 = vector.broadcast %cst_293 : f32 to vector<12x384xf32>
    %531 = arith.maximumf %529, %530 : vector<12x384xf32>
    %532 = vector.extract_strided_slice %531 {offsets = [0, 0], sizes = [6, 384], strides = [1, 1]} : vector<12x384xf32> to vector<6x384xf32>
    %533 = vector.extract_strided_slice %531 {offsets = [6, 0], sizes = [6, 384], strides = [1, 1]} : vector<12x384xf32> to vector<6x384xf32>
    %534 = arith.maximumf %532, %533 : vector<6x384xf32>
    %c368_i32_294 = arith.constant 368 : i32
    %535 = tpu.dynamic_rotate %534 by %c368_i32_294 dim 1 : vector<6x384xf32>, i32 -> vector<6x384xf32>
    %536 = arith.maximumf %534, %535 : vector<6x384xf32>
    %537 = vector.extract_strided_slice %536 {offsets = [0, 0], sizes = [6, 16], strides = [1, 1]} : vector<6x384xf32> to vector<6x16xf32>
    %538 = vector.extract_strided_slice %536 {offsets = [0, 32], sizes = [6, 16], strides = [1, 1]} : vector<6x384xf32> to vector<6x16xf32>
    %539 = vector.extract_strided_slice %536 {offsets = [0, 64], sizes = [6, 16], strides = [1, 1]} : vector<6x384xf32> to vector<6x16xf32>
    %540 = vector.extract_strided_slice %536 {offsets = [0, 96], sizes = [6, 16], strides = [1, 1]} : vector<6x384xf32> to vector<6x16xf32>
    %541 = vector.extract_strided_slice %536 {offsets = [0, 128], sizes = [6, 16], strides = [1, 1]} : vector<6x384xf32> to vector<6x16xf32>
    %542 = vector.extract_strided_slice %536 {offsets = [0, 160], sizes = [6, 16], strides = [1, 1]} : vector<6x384xf32> to vector<6x16xf32>
    %543 = vector.extract_strided_slice %536 {offsets = [0, 192], sizes = [6, 16], strides = [1, 1]} : vector<6x384xf32> to vector<6x16xf32>
    %544 = vector.extract_strided_slice %536 {offsets = [0, 224], sizes = [6, 16], strides = [1, 1]} : vector<6x384xf32> to vector<6x16xf32>
    %545 = vector.extract_strided_slice %536 {offsets = [0, 256], sizes = [6, 16], strides = [1, 1]} : vector<6x384xf32> to vector<6x16xf32>
    %546 = vector.extract_strided_slice %536 {offsets = [0, 288], sizes = [6, 16], strides = [1, 1]} : vector<6x384xf32> to vector<6x16xf32>
    %547 = vector.extract_strided_slice %536 {offsets = [0, 320], sizes = [6, 16], strides = [1, 1]} : vector<6x384xf32> to vector<6x16xf32>
    %548 = vector.extract_strided_slice %536 {offsets = [0, 352], sizes = [6, 16], strides = [1, 1]} : vector<6x384xf32> to vector<6x16xf32>
    %549 = tpu.concatenate %537, %538, %539, %540, %541, %542, %543, %544, %545, %546, %547, %548 in 1 : vector<6x16xf32>, vector<6x16xf32>, vector<6x16xf32>, vector<6x16xf32>, vector<6x16xf32>, vector<6x16xf32>, vector<6x16xf32>, vector<6x16xf32>, vector<6x16xf32>, vector<6x16xf32>, vector<6x16xf32>, vector<6x16xf32> -> vector<6x192xf32>
    %550 = arith.truncf %549 : vector<6x192xf32> to vector<6x192xbf16>
    %551 = vector.extract_strided_slice %550 {offsets = [0, 0], sizes = [6, 128], strides = [1, 1]} : vector<6x192xbf16> to vector<6x128xbf16>
    %c330 = arith.constant 330 : index
    %c0_295 = arith.constant 0 : index
    %552 = vector.load %arg8[%c330, %c0_295] : memref<360x128xbf16, #tpu.memory_space<vmem>>, vector<6x128xbf16>
    tpu.vector_store %arg8[%c330, %c0_295], %551 {strides = array<i32>} : memref<360x128xbf16, #tpu.memory_space<vmem>>, vector<6x128xbf16>,
    %553 = vector.extract_strided_slice %550 {offsets = [0, 16], sizes = [6, 128], strides = [1, 1]} : vector<6x192xbf16> to vector<6x128xbf16>
    %c336 = arith.constant 336 : index
    %c0_296 = arith.constant 0 : index
    %554 = vector.load %arg8[%c336, %c0_296] : memref<360x128xbf16, #tpu.memory_space<vmem>>, vector<6x128xbf16>
    tpu.vector_store %arg8[%c336, %c0_296], %553 {strides = array<i32>} : memref<360x128xbf16, #tpu.memory_space<vmem>>, vector<6x128xbf16>,
    %555 = vector.extract_strided_slice %550 {offsets = [0, 32], sizes = [6, 128], strides = [1, 1]} : vector<6x192xbf16> to vector<6x128xbf16>
    %c342 = arith.constant 342 : index
    %c0_297 = arith.constant 0 : index
    %556 = vector.load %arg8[%c342, %c0_297] : memref<360x128xbf16, #tpu.memory_space<vmem>>, vector<6x128xbf16>
    tpu.vector_store %arg8[%c342, %c0_297], %555 {strides = array<i32>} : memref<360x128xbf16, #tpu.memory_space<vmem>>, vector<6x128xbf16>,
    %557 = vector.extract_strided_slice %550 {offsets = [0, 48], sizes = [6, 128], strides = [1, 1]} : vector<6x192xbf16> to vector<6x128xbf16>
    %c348 = arith.constant 348 : index
    %c0_298 = arith.constant 0 : index
    %558 = vector.load %arg8[%c348, %c0_298] : memref<360x128xbf16, #tpu.memory_space<vmem>>, vector<6x128xbf16>
    tpu.vector_store %arg8[%c348, %c0_298], %557 {strides = array<i32>} : memref<360x128xbf16, #tpu.memory_space<vmem>>, vector<6x128xbf16>,
    %559 = vector.extract_strided_slice %550 {offsets = [0, 64], sizes = [6, 128], strides = [1, 1]} : vector<6x192xbf16> to vector<6x128xbf16>
    %c354 = arith.constant 354 : index
    %c0_299 = arith.constant 0 : index
    %560 = vector.load %arg8[%c354, %c0_299] : memref<360x128xbf16, #tpu.memory_space<vmem>>, vector<6x128xbf16>
    tpu.vector_store %arg8[%c354, %c0_299], %559 {strides = array<i32>} : memref<360x128xbf16, #tpu.memory_space<vmem>>, vector<6x128xbf16>,
    %c0_300 = arith.constant 0 : index
    %c0_301 = arith.constant 0 : index
    %561 = vector.load %arg8[%c0_300, %c0_301] : memref<360x128xbf16, #tpu.memory_space<vmem>>, vector<180x128xbf16>
    %cst_302 = arith.constant dense<0.000000e+00> : vector<24x128xf32>
    %562 = tpu.matmul %1, %561, %cst_302 {dimension_numbers = #tpu.dot_dimension_numbers<[1], [0], [0], [1], [0, 0, 1, 1], [], []>} : vector<24x180xbf16>, vector<180x128xbf16>, vector<24x128xf32> -> vector<24x128xf32>
    %563 = arith.addf %562, %7 : vector<24x128xf32>
    %cst_303 = arith.constant 0.000000e+00 : f32
    %564 = vector.broadcast %cst_303 : f32 to vector<24x128xf32>
    %565 = arith.maximumf %563, %564 : vector<24x128xf32>
    %566 = vector.extract_strided_slice %565 {offsets = [0, 0], sizes = [12, 128], strides = [1, 1]} : vector<24x128xf32> to vector<12x128xf32>
    %567 = vector.extract_strided_slice %565 {offsets = [12, 0], sizes = [12, 128], strides = [1, 1]} : vector<24x128xf32> to vector<12x128xf32>
    %568 = arith.maximumf %566, %567 : vector<12x128xf32>
    %c112_i32 = arith.constant 112 : i32
    %569 = tpu.dynamic_rotate %568 by %c112_i32 dim 1 : vector<12x128xf32>, i32 -> vector<12x128xf32>
    %570 = arith.maximumf %568, %569 : vector<12x128xf32>
    %571 = vector.extract_strided_slice %570 {offsets = [0, 0], sizes = [12, 16], strides = [1, 1]} : vector<12x128xf32> to vector<12x16xf32>
    %572 = vector.extract_strided_slice %570 {offsets = [0, 32], sizes = [12, 16], strides = [1, 1]} : vector<12x128xf32> to vector<12x16xf32>
    %573 = vector.extract_strided_slice %570 {offsets = [0, 64], sizes = [12, 16], strides = [1, 1]} : vector<12x128xf32> to vector<12x16xf32>
    %574 = vector.extract_strided_slice %570 {offsets = [0, 96], sizes = [12, 16], strides = [1, 1]} : vector<12x128xf32> to vector<12x16xf32>
    %575 = tpu.concatenate %571, %572, %573, %574 in 1 : vector<12x16xf32>, vector<12x16xf32>, vector<12x16xf32>, vector<12x16xf32> -> vector<12x64xf32>
    %c60_304 = arith.constant 60 : index
    %c0_305 = arith.constant 0 : index
    %576 = vector.load %arg8[%c60_304, %c0_305] : memref<360x128xbf16, #tpu.memory_space<vmem>>, vector<180x128xbf16>
    %cst_306 = arith.constant dense<0.000000e+00> : vector<24x128xf32>
    %577 = tpu.matmul %1, %576, %cst_306 {dimension_numbers = #tpu.dot_dimension_numbers<[1], [0], [0], [1], [0, 0, 1, 1], [], []>} : vector<24x180xbf16>, vector<180x128xbf16>, vector<24x128xf32> -> vector<24x128xf32>
    %578 = arith.addf %577, %7 : vector<24x128xf32>
    %cst_307 = arith.constant 0.000000e+00 : f32
    %579 = vector.broadcast %cst_307 : f32 to vector<24x128xf32>
    %580 = arith.maximumf %578, %579 : vector<24x128xf32>
    %581 = vector.extract_strided_slice %580 {offsets = [0, 0], sizes = [12, 128], strides = [1, 1]} : vector<24x128xf32> to vector<12x128xf32>
    %582 = vector.extract_strided_slice %580 {offsets = [12, 0], sizes = [12, 128], strides = [1, 1]} : vector<24x128xf32> to vector<12x128xf32>
    %583 = arith.maximumf %581, %582 : vector<12x128xf32>
    %c112_i32_308 = arith.constant 112 : i32
    %584 = tpu.dynamic_rotate %583 by %c112_i32_308 dim 1 : vector<12x128xf32>, i32 -> vector<12x128xf32>
    %585 = arith.maximumf %583, %584 : vector<12x128xf32>
    %586 = vector.extract_strided_slice %585 {offsets = [0, 0], sizes = [12, 16], strides = [1, 1]} : vector<12x128xf32> to vector<12x16xf32>
    %587 = vector.extract_strided_slice %585 {offsets = [0, 32], sizes = [12, 16], strides = [1, 1]} : vector<12x128xf32> to vector<12x16xf32>
    %588 = vector.extract_strided_slice %585 {offsets = [0, 64], sizes = [12, 16], strides = [1, 1]} : vector<12x128xf32> to vector<12x16xf32>
    %589 = vector.extract_strided_slice %585 {offsets = [0, 96], sizes = [12, 16], strides = [1, 1]} : vector<12x128xf32> to vector<12x16xf32>
    %590 = tpu.concatenate %586, %587, %588, %589 in 1 : vector<12x16xf32>, vector<12x16xf32>, vector<12x16xf32>, vector<12x16xf32> -> vector<12x64xf32>
    %c120_309 = arith.constant 120 : index
    %c0_310 = arith.constant 0 : index
    %591 = vector.load %arg8[%c120_309, %c0_310] : memref<360x128xbf16, #tpu.memory_space<vmem>>, vector<180x128xbf16>
    %cst_311 = arith.constant dense<0.000000e+00> : vector<24x128xf32>
    %592 = tpu.matmul %1, %591, %cst_311 {dimension_numbers = #tpu.dot_dimension_numbers<[1], [0], [0], [1], [0, 0, 1, 1], [], []>} : vector<24x180xbf16>, vector<180x128xbf16>, vector<24x128xf32> -> vector<24x128xf32>
    %593 = arith.addf %592, %7 : vector<24x128xf32>
    %cst_312 = arith.constant 0.000000e+00 : f32
    %594 = vector.broadcast %cst_312 : f32 to vector<24x128xf32>
    %595 = arith.maximumf %593, %594 : vector<24x128xf32>
    %596 = vector.extract_strided_slice %595 {offsets = [0, 0], sizes = [12, 128], strides = [1, 1]} : vector<24x128xf32> to vector<12x128xf32>
    %597 = vector.extract_strided_slice %595 {offsets = [12, 0], sizes = [12, 128], strides = [1, 1]} : vector<24x128xf32> to vector<12x128xf32>
    %598 = arith.maximumf %596, %597 : vector<12x128xf32>
    %c112_i32_313 = arith.constant 112 : i32
    %599 = tpu.dynamic_rotate %598 by %c112_i32_313 dim 1 : vector<12x128xf32>, i32 -> vector<12x128xf32>
    %600 = arith.maximumf %598, %599 : vector<12x128xf32>
    %601 = vector.extract_strided_slice %600 {offsets = [0, 0], sizes = [12, 16], strides = [1, 1]} : vector<12x128xf32> to vector<12x16xf32>
    %602 = vector.extract_strided_slice %600 {offsets = [0, 32], sizes = [12, 16], strides = [1, 1]} : vector<12x128xf32> to vector<12x16xf32>
    %603 = vector.extract_strided_slice %600 {offsets = [0, 64], sizes = [12, 16], strides = [1, 1]} : vector<12x128xf32> to vector<12x16xf32>
    %604 = vector.extract_strided_slice %600 {offsets = [0, 96], sizes = [12, 16], strides = [1, 1]} : vector<12x128xf32> to vector<12x16xf32>
    %605 = tpu.concatenate %601, %602, %603, %604 in 1 : vector<12x16xf32>, vector<12x16xf32>, vector<12x16xf32>, vector<12x16xf32> -> vector<12x64xf32>
    %c180_314 = arith.constant 180 : index
    %c0_315 = arith.constant 0 : index
    %606 = vector.load %arg8[%c180_314, %c0_315] : memref<360x128xbf16, #tpu.memory_space<vmem>>, vector<180x128xbf16>
    %cst_316 = arith.constant dense<0.000000e+00> : vector<24x128xf32>
    %607 = tpu.matmul %1, %606, %cst_316 {dimension_numbers = #tpu.dot_dimension_numbers<[1], [0], [0], [1], [0, 0, 1, 1], [], []>} : vector<24x180xbf16>, vector<180x128xbf16>, vector<24x128xf32> -> vector<24x128xf32>
    %608 = arith.addf %607, %7 : vector<24x128xf32>
    %cst_317 = arith.constant 0.000000e+00 : f32
    %609 = vector.broadcast %cst_317 : f32 to vector<24x128xf32>
    %610 = arith.maximumf %608, %609 : vector<24x128xf32>
    %611 = vector.extract_strided_slice %610 {offsets = [0, 0], sizes = [12, 128], strides = [1, 1]} : vector<24x128xf32> to vector<12x128xf32>
    %612 = vector.extract_strided_slice %610 {offsets = [12, 0], sizes = [12, 128], strides = [1, 1]} : vector<24x128xf32> to vector<12x128xf32>
    %613 = arith.maximumf %611, %612 : vector<12x128xf32>
    %c112_i32_318 = arith.constant 112 : i32
    %614 = tpu.dynamic_rotate %613 by %c112_i32_318 dim 1 : vector<12x128xf32>, i32 -> vector<12x128xf32>
    %615 = arith.maximumf %613, %614 : vector<12x128xf32>
    %616 = vector.extract_strided_slice %615 {offsets = [0, 0], sizes = [12, 16], strides = [1, 1]} : vector<12x128xf32> to vector<12x16xf32>
    %617 = vector.extract_strided_slice %615 {offsets = [0, 32], sizes = [12, 16], strides = [1, 1]} : vector<12x128xf32> to vector<12x16xf32>
    %618 = vector.extract_strided_slice %615 {offsets = [0, 64], sizes = [12, 16], strides = [1, 1]} : vector<12x128xf32> to vector<12x16xf32>
    %619 = vector.extract_strided_slice %615 {offsets = [0, 96], sizes = [12, 16], strides = [1, 1]} : vector<12x128xf32> to vector<12x16xf32>
    %620 = tpu.concatenate %616, %617, %618, %619 in 1 : vector<12x16xf32>, vector<12x16xf32>, vector<12x16xf32>, vector<12x16xf32> -> vector<12x64xf32>
    %621 = tpu.concatenate %575, %590, %605, %620 in 1 : vector<12x64xf32>, vector<12x64xf32>, vector<12x64xf32>, vector<12x64xf32> -> vector<12x256xf32>
    %c0_319 = arith.constant 0 : index
    %c0_320 = arith.constant 0 : index
    %c0_321 = arith.constant 0 : index
    %622 = vector.load %arg6[%c0_319, %c0_320, %c0_321] : memref<1x12x256xf32, #tpu.memory_space<vmem>>, vector<1x12x256xf32>
    %623 = vector.shape_cast %622 : vector<1x12x256xf32> to vector<12x256xf32>
    %624 = vector.shape_cast %621 : vector<12x256xf32> to vector<1x12x256xf32>
    tpu.vector_store %arg6[%c0_319, %c0_320, %c0_321], %624 {strides = array<i32>} : memref<1x12x256xf32, #tpu.memory_space<vmem>>, vector<1x12x256xf32>,
    return
  }
  func.func @transform_0(%arg0: i32) -> (i32, i32, i32) {
    %c0_i32 = arith.constant 0 : i32
    %c0_i32_0 = arith.constant 0 : i32
    %c0_i32_1 = arith.constant 0 : i32
    return %arg0, %c0_i32, %c0_i32_0 : i32, i32, i32
  }
  func.func @transform_1(%arg0: i32) -> (i32, i32) {
    %c0_i32 = arith.constant 0 : i32
    %c0_i32_0 = arith.constant 0 : i32
    %c0_i32_1 = arith.constant 0 : i32
    return %c0_i32, %c0_i32_0 : i32, i32
  }
  func.func @transform_2(%arg0: i32) -> (i32, i32) {
    %c0_i32 = arith.constant 0 : i32
    %c0_i32_0 = arith.constant 0 : i32
    %c0_i32_1 = arith.constant 0 : i32
    return %c0_i32, %c0_i32_0 : i32, i32
  }
  func.func @transform_3(%arg0: i32) -> (i32, i32) {
    %c0_i32 = arith.constant 0 : i32
    %c0_i32_0 = arith.constant 0 : i32
    %c0_i32_1 = arith.constant 0 : i32
    return %c0_i32, %c0_i32_0 : i32, i32
  }
  func.func @transform_4(%arg0: i32) -> (i32, i32) {
    %c0_i32 = arith.constant 0 : i32
    %c0_i32_0 = arith.constant 0 : i32
    %c0_i32_1 = arith.constant 0 : i32
    return %c0_i32, %c0_i32_0 : i32, i32
  }
  func.func @transform_5(%arg0: i32) -> (i32, i32, i32) {
    %c0_i32 = arith.constant 0 : i32
    %c0_i32_0 = arith.constant 0 : i32
    %c0_i32_1 = arith.constant 0 : i32
    return %arg0, %c0_i32, %c0_i32_0 : i32, i32, i32
  }
}

</mosaic_0001>

<bundles_post_ra>
// kernel: encoder_forward.1
= control target key start
LH: loop header
LB: loop body
LE: loop exit
PB: predicated region body
PF: predicated region fallthrough
CT: control target
= control target key end

     0   :  { %s5955_s18 = smov 0   ;;  %s8282_s0 = inlined_call_operand.vmem [shape: bf16[2,28,448], index: 0, kind: input, shape index: {}]   ;;  %s8283_s1 = inlined_call_operand.vmem [shape: bf16[12,30], index: 1, kind: input, shape index: {}]   ;;  %s8284_s2 = inlined_call_operand.vmem [shape: f32[12,1], index: 2, kind: input, shape index: {}]   ;;  %s8285_s3 = inlined_call_operand.vmem [shape: bf16[24,180], index: 3, kind: input, shape index: {}]   ;;  %s8286_s4 = inlined_call_operand.vmem [shape: f32[24,1], index: 4, kind: input, shape index: {}]   ;;  %s8287_s5 = inlined_call_operand.vmem [shape: f32[2,12,256], index: 5, kind: output, shape index: {}]  }
   0x1 LB: > { %s4863_s19 = sadd.s32 4294967295, %s5915_s18   ;;  %p4867_p0 = scmp.ge.s32.totalorder %s5915_s18, 1  ;;  %s5915_s18 = sphi %s5955_s18, %s15_s18  }
   0x2   : > { %p187_p1 = scmp.lt.s32.totalorder %s5915_s18, 3 }
   0x4   : > { %p188_p2 = pnand %p4867_p0, %p187_p1 }
   0x6   : > { %191 = sbr.rel (%p188_p2) target bundleno = 2479 (0x9af), region = 40 }
   0xb   : > { %v243_v0 = vld [vmem:[%s8286_s4] sm:$0xff]  ;;  %p215_p3 = scmp.lt.s32.totalorder %s4863_s19, 1  ;;  %v5917_v2 = vmov 0   ;;  %v245_v3 = vld [vmem:[%s8286_s4 + $0x10] sm:$0xff]  ;;  %v244_v5 = vld [vmem:[%s8286_s4 + $0x8] sm:$0xff]  ;;  %s5918_s9 = smov 112  }
   0xc   : > { %v231_v1 = vld [vmem:[%s8284_s2] sm:$0xff]  ;;  %5577 = vset.pattern.permute.xlu1 %v5917_v2  ;;  %5576 = vset.pattern.permute.xlu0 %v5917_v2  ;;  %v232_v6 = vld [vmem:[%s8284_s2 + $0x8] sm:$0xf]  ;;  %s5919_s10 = smov 96   ;;  %s5920_s11 = smov 80   ;;  %vm319_vm0 = vcmask 916480  }
   0xd   : > { %248 = vperm.xlu1 %5577, %v243_v0   ;;  %235 = vperm.xlu0 %5576, %v231_v1   ;;  %s8357_s19 = smov (!%p215_p3, %s4863_s19), 1  ;;  %s5921_s12 = smov 64   ;;  %vm389_vm1 = vcmask 785408   ;;  %vm317_vm2 = vcmask 1043456   ;;  %vm459_vm3 = vcmask 654336   ;;  %vm617_vm4 = vcmask 1042432  }
   0xe   : > { %5578 = vset.pattern.permute.xlu2 %v5917_v2  ;;  %s5430_s26 = sshll.u32 %s8357_s19, 6  ;;  %vm627_vm5 = vcmask 1045504   ;;  %vm529_vm6 = vcmask 523264   ;;  %vm637_vm7 = vcmask 1040384   ;;  %vm660_vm8 = vcmask 1046528   ;;  %s5922_s17 = smov 16  }
   0xf   : > { %258 = vperm.xlu2 %5578, %v245_v3   ;;  %s5978_s29 = scalar_lea.vmem %s8282_s0, %s5430_s26  ;;  %vm656_vm9 = vcmask 244736   ;;  %vm721_vm10 = vcmask 1041408   ;;  %s5923_s20 = smov 32   ;;  %vm785_vm12 = vcmask 130048   ;;  %vm787_vm13 = vcmask 261120  }
  0x10   : > { %v277_v4 = vld [vmem:[%s5978_s29] sm:$0xff]  ;;  %v279_v7 = vld [vmem:[%s5978_s29 + $0x10] sm:$0xff]  ;;  %v278_v8 = vld [vmem:[%s5978_s29 + $0x8] sm:$0xff]  ;;  %s5924_s21 = smov 48   ;;  %vm789_vm14 = vcmask 392192   ;;  %vm4122_vm15 = vcmask 424960  }
  0x11   : > { %269 = vst [vmem:[#allocation2] sm:$0xff] %v277_v4  ;;  %v280_v9 = vld [vmem:[%s5978_s29 + $0x18] sm:$0xff]  ;;  %v282_v10 = vld [vmem:[%s5978_s29 + $0x28] sm:$0xff]  ;;  %v281_v11 = vld [vmem:[%s5978_s29 + $0x20] sm:$0xff]  ;;  %s5431_s7 = sshll.u32 %s8357_s19, 5 }
  0x12   : > { %271 = vst [vmem:[#allocation2 + $0xc] sm:$0xff] %v279_v7  ;;  %v283_v12 = vld [vmem:[%s5978_s29 + $0x30] sm:$0x33]  ;;  %v284_v13 = vld [vmem:[%s5978_s29 + $0x38] sm:$0x33]  ;;  %v265_v47 = vld [vmem:[%s5978_s29 + $0x20] sm:$0xff] }
  0x13   : > { %v354_v14 = vld [vmem:[%s5978_s29 + $0x30] sm:$0x33]  ;;  %v355_v15 = vld [vmem:[%s5978_s29 + $0x38] sm:$0x33]  ;;  %v262_v22 = vld [vmem:[%s5978_s29 + $0x8] sm:$0xf] }
  0x14   : > { %v425_v16 = vld [vmem:[%s5978_s29 + $0x38] sm:$0x33]  ;;  %v424_v17 = vld [vmem:[%s5978_s29 + $0x30] sm:$0x33]  ;;  %270 = vst [vmem:[#allocation2 + $0x8] sm:$0xf] %v262_v22 }
  0x15   : > { %253 = vperm.xlu1 %5577, %v244_v5   ;;  %240 = vperm.xlu0 %5576, %v232_v6   ;;  %v494_v18 = vld [vmem:[%s5978_s29 + $0x30] sm:$0x33]  ;;  %v495_v20 = vld [vmem:[%s5978_s29 + $0x38] sm:$0x33]  ;;  %273 = vst [vmem:[#allocation2 + $0x18] sm:$0xff] %v265_v47 }
  0x16   : > { %v264_v25 = vld [vmem:[%s5978_s29 + $0x18] sm:$0xf] }
  0x17   : > { %293 = vrot.lane.b32.xlu2 %v277_v4, %s5918_s9  ;;  %272 = vst [vmem:[#allocation2 + $0x14] sm:$0xf] %v264_v25 }
  0x18   : > { %v846_v46 = vld [vmem:[#allocation2] sm:$0xee] }
  0x19   : > { %v858_v53 = vunpack.c.l.b16 %v846_v46  ;;  %v4884_v59 = vld [vmem:[#allocation2] sm:$0xc]  ;;  %v5436_v60 = vld [vmem:[#allocation2 + $0x8] sm:$0x10]  ;;  %v5435_v25 = vld [vmem:[#allocation2 + $0x4] sm:$0xc] }
  0x1a   : > { %v558_v0 = vld [vmem:[#allocation2] sm:$0x77]  ;;  %v4885_v3 = vor.u32 %v5436_v60, %v4884_v59 }
  0x1b   : > { %v847_v54 = vld [vmem:[#allocation2 + $0x8] sm:$0xe]  ;;  %v6070_v1 = vpack.c.b16 %v858_v53, %v858_v53 }
  0x1c   : > { %v860_v62 = vunpack.c.l.b16 %v847_v54  ;;  %v559_v63 = vld [vmem:[#allocation2 + $0x8] sm:$0x7] }
  0x1d   : > { %297 = vrot.lane.b32.xlu1 %v279_v7, %s5918_s9  ;;  %295 = vrot.lane.b32.xlu0 %v278_v8, %s5918_s9 }
  0x1e   : > { %v5449_v5 = vld [vmem:[#allocation2 + $0x10] sm:$0x30] }
  0x1f   : > { %299 = vrot.lane.b32.xlu2 %v280_v9, %s5918_s9  ;;  %v1728_v47 = vld [vmem:[#allocation2 + $0x14] sm:$0x7] }
  0x25   : > { %303 = vrot.lane.b32.xlu1 %v282_v10, %s5918_s9  ;;  %301 = vrot.lane.b32.xlu0 %v281_v11, %s5918_s9 }
  0x27   : > { %305 = vrot.lane.b32.xlu2 %v283_v12, %s5918_s9  ;;  %v6073_v12 = vpack.c.b16 %v860_v62, %v860_v62  ;;  %v6100_v62 = vld [vmem:[#allocation2 + $0xc] sm:$0xee] }
  0x28   : > { %8317 = vst [vmem:[#allocation9_spill] sm:$0xff] %v6100_v62 }
  0x2d   : > { %364 = vrot.lane.b32.xlu1 %v277_v4, %s5919_s10  ;;  %307 = vrot.lane.b32.xlu0 %v284_v13, %s5918_s9  ;;  %v5447_v13 = vld [vmem:[#allocation2 + $0x4] sm:$0x8] }
  0x2f   : > { %366 = vrot.lane.b32.xlu2 %v278_v8, %s5919_s10 }
  0x35   : > { %370 = vrot.lane.b32.xlu1 %v280_v9, %s5919_s10  ;;  %368 = vrot.lane.b32.xlu0 %v279_v7, %s5919_s10 }
  0x37   : > { %372 = vrot.lane.b32.xlu2 %v281_v11, %s5919_s10 }
  0x3d   : > { %376 = vrot.lane.b32.xlu1 %v354_v14, %s5919_s10  ;;  %374 = vrot.lane.b32.xlu0 %v282_v10, %s5919_s10  ;;  %v4937_v14 = vld [vmem:[#allocation2 + $0xc] sm:$0x30] }
  0x3f   : > { %378 = vrot.lane.b32.xlu2 %v355_v15, %s5919_s10 }
  0x45   : > { %436 = vrot.lane.b32.xlu1 %v278_v8, %s5920_s11  ;;  %434 = vrot.lane.b32.xlu0 %v277_v4, %s5920_s11 }
  0x47   : > { %438 = vrot.lane.b32.xlu2 %v279_v7, %s5920_s11 }
  0x4d   : > { %442 = vrot.lane.b32.xlu1 %v281_v11, %s5920_s11  ;;  %440 = vrot.lane.b32.xlu0 %v280_v9, %s5920_s11 }
  0x4f   : > { %444 = vrot.lane.b32.xlu2 %v282_v10, %s5920_s11 }
  0x55   : > { %448 = vrot.lane.b32.xlu1 %v425_v16, %s5920_s11  ;;  %446 = vrot.lane.b32.xlu0 %v424_v17, %s5920_s11  ;;  %v570_v16 = vunpack.c.l.b16 %v558_v0  ;;  %v571_v17 = vunpack.c.h.b16 %v558_v0 }
  0x57   : > { %504 = vrot.lane.b32.xlu2 %v277_v4, %s5921_s12  ;;  %v4943_v4 = vld [vmem:[#allocation2 + $0x8] sm:$0x8] }
  0x5d   : > { %508 = vrot.lane.b32.xlu1 %v279_v7, %s5921_s12  ;;  %506 = vrot.lane.b32.xlu0 %v278_v8, %s5921_s12  ;;  %v859_v8 = vunpack.c.h.b16 %v846_v46  ;;  %v5448_v46 = vld [vmem:[#allocation2 + $0x8] sm:$0x30] }
  0x5f   : > { %510 = vrot.lane.b32.xlu2 %v280_v9, %s5921_s12 }
  0x65   : > { %514 = vrot.lane.b32.xlu1 %v282_v10, %s5921_s12  ;;  %512 = vrot.lane.b32.xlu0 %v281_v11, %s5921_s12  ;;  %v572_v11 = vunpack.c.l.b16 %v559_v63 }
  0x67   : > { %516 = vrot.lane.b32.xlu2 %v494_v18, %s5921_s12  ;;  %v864_v18 = vrot.slane %v6070_v1, 1 }
  0x69   : > { %v6030_v19 = vpop.permute.xlu2 %258 }
  0x6a   : > { %8312 = vst [vmem:[#allocation4_spill] sm:$0xff] %v6030_v19 }
  0x6d   : > { %518 = vrot.lane.b32.xlu0 %v495_v20, %s5921_s12  ;;  %v4944_v20 = vor.u32 %v5449_v5, %v4943_v4  ;;  %v1741_v4 = vunpack.c.l.b16 %v1728_v47 }
  0x71   : > { %v294_v21 = vpop.permute.xlu2 %293 }
  0x72   : > { %v309_v35 = vrot.slane %v294_v21, 4 }
  0x79   : > { %v300_v23 = vpop.permute.xlu2 %299 }
  0x7a   : > { %v312_v24 = vrot.slane %v300_v23, 4 }
  0x7c   : > { %v324_v26 = vsel %vm319_vm0, %v300_v23, %v312_v24 }
  0x7d   : > { %343 = vst [vmem:[#allocation2 + $0x44] sm:$0xf] %v324_v26 }
  0x7f   : > { %v6037_v27 = vpop.permute.xlu1 %248  ;;  %v6039_v28 = vpop.permute.xlu0 %235 }
  0x80   : > { %8313 = vst [vmem:[#allocation5_spill] sm:$0xff] %v6037_v27 }
  0x81   : > { %8314 = vst [vmem:[#allocation6_spill] sm:$0xff] %v6039_v28  ;;  %v6041_v29 = vpop.permute.xlu2 %305 }
  0x82   : > { %v315_v2 = vrot.slane %v6041_v29, 4 }
  0x87   : > { %v6043_v30 = vpop.permute.xlu1 %253  ;;  %v6045_v31 = vpop.permute.xlu0 %240 }
  0x88   : > { %8315 = vst [vmem:[#allocation7_spill] sm:$0xff] %v6043_v30 }
  0x89   : > { %8316 = vst [vmem:[#allocation8_spill] sm:$0xff] %v6045_v31  ;;  %v6047_v32 = vpop.permute.xlu2 %366 }
  0x8a   : > { %v381_v33 = vrot.slane %v6047_v32, 4 }
  0x8c   : > { %v391_v34 = vsel %vm389_vm1, %v6047_v32, %v381_v33 }
  0x8d   : > { %411 = vst [vmem:[#allocation2 + $0x68] sm:$0xf] %v391_v34  ;;  %v6086_v34 = vpack.c.b16 %v859_v8, %v859_v8 }
  0x8f   : > { %v298_v36 = vpop.permute.xlu1 %297  ;;  %v296_v37 = vpop.permute.xlu0 %295 }
  0x90   : > { %v311_v38 = vrot.slane %v298_v36, 4  ;;  %v310_v39 = vrot.slane %v296_v37, 4 }
  0x91   : > { %v6052_v40 = vpop.permute.xlu2 %372 }
  0x92   : > { %v322_v41 = vsel %vm317_vm2, %v311_v38, %v312_v24  ;;  %v318_v42 = vsel %vm317_vm2, %v309_v35, %v310_v39  ;;  %v321_v43 = vsel %vm319_vm0, %v296_v37, %v310_v39  ;;  %v6081_v24 = vrot.slane %v4885_v3, 2  ;;  %v4886_v35 = vld [vmem:[#allocation2 + $0xc] sm:$0x10]  ;;  %v1730_v37 = vld [vmem:[#allocation2 + $0x44] sm:$0x7] }
  0x93   : > { %v323_v44 = vsel %vm319_vm0, %v298_v36, %v322_v41  ;;  %v320_v45 = vsel %vm319_vm0, %v294_v21, %v318_v42  ;;  %341 = vst [vmem:[#allocation2 + $0x38] sm:$0xf] %v321_v43  ;;  %v4940_v36 = vor.u32 %v5447_v13, %v4937_v14  ;;  %v4892_v38 = vld [vmem:[#allocation2 + $0x8] sm:$0xc]  ;;  %v5437_v39 = vld [vmem:[#allocation2 + $0x10] sm:$0x10]  ;;  %v4889_v53 = vor.u32 %v5435_v25, %v4886_v35 }
  0x94   : > { %342 = vst [vmem:[#allocation2 + $0x3c] sm:$0xff] %v323_v44  ;;  %v4935_v42 = vld [vmem:[#allocation2] sm:$0x8]  ;;  %v563_v43 = vld [vmem:[#allocation2 + $0x68] sm:$0x7]  ;;  %v6089_v44 = vpack.c.b16 %v572_v11, %v572_v11  ;;  %v2002_v14 = vunpack.c.l.b16 %v6100_v62  ;;  %v384_v25 = vrot.slane %v6052_v40, 4 }
  0x95   : > { %340 = vst [vmem:[#allocation2 + $0x30] sm:$0xff] %v320_v45  ;;  %v6091_v45 = vpack.c.b16 %v570_v16, %v570_v16  ;;  %v6096_v54 = vrot.slane %v4940_v36, 3  ;;  %v851_v60 = vld [vmem:[#allocation2 + $0x68] sm:$0xe]  ;;  %v591_v0 = vunpack.c.l.b16 %v563_v43  ;;  %v4936_v3 = vor.u32 %v5448_v46, %v4935_v42  ;;  %v1727_v13 = vld [vmem:[#allocation2 + $0xc] sm:$0x77] }
  0x96   : > { %v6108_v11 = vrot.slane %v4889_v53, 2  ;;  %v1740_v42 = vunpack.c.h.b16 %v1727_v13  ;;  %v6124_v53 = vpack.c.b16 %v2002_v14, %v2002_v14 }
  0x97   : > { %v304_v48 = vpop.permute.xlu1 %303  ;;  %v302_v49 = vpop.permute.xlu0 %301  ;;  %v6120_v35 = vrot.slane %v4936_v3, 3 }
  0x98   : > { %v314_v50 = vrot.slane %v304_v48, 4  ;;  %v313_v51 = vrot.slane %v302_v49, 4  ;;  %8318 = vst [vmem:[#allocation10_spill] sm:$0xff] %v6124_v53 }
  0x99   : > { %v6060_v52 = vpop.permute.xlu2 %378 }
  0x9a   : > { %v327_v55 = vsel %vm319_vm0, %v304_v48, %v314_v50  ;;  %v325_v56 = vsel %vm317_vm2, %v313_v51, %v314_v50  ;;  %v387_v57 = vrot.slane %v6060_v52, 4  ;;  %v561_v41 = vld [vmem:[#allocation2 + $0x38] sm:$0x7]  ;;  %v1749_v48 = vunpack.c.l.b16 %v1730_v37 }
  0x9b   : > { %345 = vst [vmem:[#allocation2 + $0x50] sm:$0xf] %v327_v55  ;;  %v326_v58 = vsel %vm319_vm0, %v302_v49, %v325_v56  ;;  %v865_v51 = vrot.slane %v6086_v34, 1  ;;  %v6098_v55 = vrot.slane %v4944_v20, 3  ;;  %v580_v59 = vunpack.c.l.b16 %v561_v41  ;;  %v5439_v37 = vld [vmem:[#allocation2 + $0x38] sm:$0x10] }
  0x9c   : > { %344 = vst [vmem:[#allocation2 + $0x48] sm:$0xff] %v326_v58  ;;  %v400_v61 = vsel %vm389_vm1, %v6060_v52, %v387_v57  ;;  %v1752_v8 = vpack.c.b16 %v1749_v48, %v1749_v48  ;;  %v4896_v36 = vld [vmem:[#allocation2 + $0x30] sm:$0xc]  ;;  %v1739_v41 = vunpack.c.l.b16 %v1727_v13 }
  0x9d   : > { %417 = vst [vmem:[#allocation2 + $0x8c] sm:$0x3] %v400_v61  ;;  %v4893_v61 = vor.u32 %v5437_v39, %v4892_v38  ;;  %v1744_v38 = vpack.c.b16 %v1741_v4, %v1741_v4  ;;  %v4897_v3 = vor.u32 %v5439_v37, %v4896_v36 }
  0x9e   : > { %v1755_v39 = vrot.slane %v1752_v8, 5  ;;  %v6140_v52 = vpack.c.b16 %v1739_v41, %v1739_v41  ;;  %v1729_v41 = vld [vmem:[#allocation2 + $0x3c] sm:$0x77] }
  0x9f   : > { %v365_v6 = vpop.permute.xlu1 %364  ;;  %v308_v7 = vpop.permute.xlu0 %307 }
  0xa0   : > { %v380_v9 = vrot.slane %v365_v6, 4  ;;  %v316_v10 = vrot.slane %v308_v7, 4 }
  0xa1   : > { %v6075_v15 = vpop.permute.xlu2 %438 }
  0xa2   : > { %v388_v21 = vsel %vm317_vm2, %v380_v9, %v381_v33  ;;  %v328_v22 = vsel %vm317_vm2, %v315_v2, %v316_v10  ;;  %v330_v23 = vsel %vm319_vm0, %v308_v7, %v316_v10  ;;  %v866_v33 = vrot.slane %v6073_v12, 1  ;;  %v560_v2 = vld [vmem:[#allocation2 + $0x30] sm:$0x77] }
  0xa3   : > { %v390_v26 = vsel %vm389_vm1, %v365_v6, %v388_v21  ;;  %v329_v32 = vsel %vm319_vm0, %v6041_v29, %v328_v22  ;;  %347 = vst [vmem:[#allocation2 + $0x5c] sm:$0x3] %v330_v23  ;;  %v6093_v29 = vpack.c.b16 %v571_v17, %v571_v17  ;;  %v882_v10 = vunpack.c.l.b16 %v851_v60  ;;  %v848_v21 = vld [vmem:[#allocation2 + $0x30] sm:$0xee]  ;;  %v1124_v22 = vld [vmem:[#allocation2 + $0x68] sm:$0xc] }
  0xa4   : > { %410 = vst [vmem:[#allocation2 + $0x60] sm:$0xff] %v390_v26  ;;  %v583_v17 = vpack.c.b16 %v580_v59, %v580_v59  ;;  %v578_v20 = vunpack.c.l.b16 %v560_v2  ;;  %v6115_v23 = vrot.slane %v4893_v61, 2  ;;  %v6118_v26 = vpack.c.b16 %v591_v0, %v591_v0 }
  0xa5   : > { %346 = vst [vmem:[#allocation2 + $0x54] sm:$0x33] %v329_v32  ;;  %v579_v32 = vunpack.c.h.b16 %v560_v2  ;;  %v6122_v47 = vpack.c.b16 %v882_v10, %v882_v10  ;;  %v869_v48 = vunpack.c.l.b16 %v848_v21  ;;  %v870_v4 = vunpack.c.h.b16 %v848_v21  ;;  %v5440_v10 = vld [vmem:[#allocation2 + $0x40] sm:$0x10] }
  0xa6   : > { %v586_v59 = vrot.slane %v583_v17, 5  ;;  %v581_v60 = vpack.c.b16 %v578_v20, %v578_v20  ;;  %v8291_v0 = vrot.slane %v6118_v26, 2  ;;  %v4898_v17 = vld [vmem:[#allocation2 + $0x3c] sm:$0x10]  ;;  %v6138_v20 = vsel %vm617_vm4, %v1744_v38, %v1755_v39 }
  0xa7   : > { %v371_v49 = vpop.permute.xlu1 %370  ;;  %v369_v50 = vpop.permute.xlu0 %368  ;;  %v582_v2 = vpack.c.b16 %v579_v32, %v579_v32  ;;  %v6144_v32 = vpack.c.b16 %v1740_v42, %v1740_v42  ;;  %v873_v37 = vpack.c.b16 %v870_v4, %v870_v4  ;;  %v8289_v38 = vrot.slane %v6122_v47, 3  ;;  %v4949_v4 = vld [vmem:[#allocation2 + $0x3c] sm:$0x30] }
  0xa8   : > { %v383_v56 = vrot.slane %v371_v49, 4  ;;  %v382_v58 = vrot.slane %v369_v50, 4  ;;  %v584_v21 = vrot.slane %v581_v60, 5 }
  0xa9   : > { %v6102_v63 = vpop.permute.xlu2 %444  ;;  %v585_v36 = vrot.slane %v582_v2, 5 }
  0xaa   : > { %v394_v5 = vsel %vm389_vm1, %v371_v49, %v383_v56  ;;  %v392_v6 = vsel %vm317_vm2, %v382_v58, %v383_v56  ;;  %v455_v7 = vrot.slane %v6102_v63, 4  ;;  %v849_v49 = vld [vmem:[#allocation2 + $0x38] sm:$0xe]  ;;  %v6158_v2 = vsel %vm617_vm4, %v6091_v45, %v584_v21 }
  0xab   : > { %413 = vst [vmem:[#allocation2 + $0x74] sm:$0xf] %v394_v5  ;;  %v393_v9 = vsel %vm389_vm1, %v369_v50, %v392_v6  ;;  %v1173_v50 = vunpack.c.l.b16 %v1124_v22  ;;  %v872_v22 = vpack.c.b16 %v869_v48, %v869_v48  ;;  %v1747_v45 = vunpack.c.l.b16 %v1729_v41  ;;  %v850_v21 = vld [vmem:[#allocation2 + $0x60] sm:$0xee] }
  0xac   : > { %412 = vst [vmem:[#allocation2 + $0x6c] sm:$0xff] %v393_v9  ;;  %v467_v16 = vsel %vm459_vm3, %v6102_v63, %v455_v7  ;;  %v871_v9 = vunpack.c.l.b16 %v849_v49 }
  0xad   : > { %485 = vst [vmem:[#allocation2 + $0xb0] sm:$0xf] %v467_v16  ;;  %v5438_v16 = vld [vmem:[#allocation2 + $0x34] sm:$0xc] }
  0xae   : > { %v874_v39 = vpack.c.b16 %v871_v9, %v871_v9 }
  0xaf   : > { %v377_v43 = vpop.permute.xlu1 %376  ;;  %v375_v46 = vpop.permute.xlu0 %374 }
  0xb0   : > { %v386_v56 = vrot.slane %v377_v43, 4  ;;  %v385_v58 = vrot.slane %v375_v46, 4 }
  0xb1   : > { %v6126_v61 = vpop.permute.xlu2 %504 }
  0xb2   : > { %v398_v5 = vsel %vm317_vm2, %v386_v56, %v387_v57  ;;  %v395_v6 = vsel %vm317_vm2, %v384_v25, %v385_v58  ;;  %v397_v8 = vsel %vm389_vm1, %v375_v46, %v385_v58  ;;  %v626_v57 = vsel %vm617_vm4, %v6089_v44, %v586_v59  ;;  %v4904_v25 = vld [vmem:[#allocation2 + $0x38] sm:$0xc]  ;;  %v5450_v58 = vld [vmem:[#allocation2 + $0x34] sm:$0x8] }
  0xb3   : > { %v399_v13 = vsel %vm389_vm1, %v377_v43, %v398_v5  ;;  %v396_v14 = vsel %vm389_vm1, %v6052_v40, %v395_v6  ;;  %415 = vst [vmem:[#allocation2 + $0x80] sm:$0xf] %v397_v8  ;;  %v1164_v40 = vrot.slane %v4897_v3, 7  ;;  %v6146_v43 = vpack.c.b16 %v1173_v50, %v1173_v50  ;;  %v562_v6 = vld [vmem:[#allocation2 + $0x60] sm:$0x77] }
  0xb4   : > { %416 = vst [vmem:[#allocation2 + $0x84] sm:$0x33] %v399_v13  ;;  %v452_v44 = vrot.slane %v6075_v15, 4  ;;  %v6154_v42 = vsel %vm627_vm5, %v626_v57, %v8291_v0  ;;  %v4901_v56 = vor.u32 %v5438_v16, %v4898_v17  ;;  %v4905_v50 = vor.u32 %v5440_v10, %v4904_v25  ;;  %v6170_v13 = vld [vmem:[#allocation2 + $0x30] sm:$0x8] }
  0xb5   : > { %414 = vst [vmem:[#allocation2 + $0x78] sm:$0xff] %v396_v14  ;;  %v875_v3 = vrot.slane %v872_v22, 6  ;;  %v6164_v8 = vsel %vm617_vm4, %v6093_v29, %v585_v36  ;;  %v6168_v9 = vsel %vm617_vm4, %v6081_v24, %v1164_v40  ;;  %v876_v10 = vrot.slane %v873_v37, 6  ;;  %v6172_v14 = vld [vmem:[#allocation2 + $0x40] sm:$0x30] }
  0xb6   : > { %v877_v22 = vrot.slane %v874_v39, 6  ;;  %v5451_v29 = vld [vmem:[#allocation2 + $0x38] sm:$0x30]  ;;  %v1165_v24 = vrot.slane %v4901_v56, 7  ;;  %v4952_v36 = vor.u32 %v5450_v58, %v4949_v4  ;;  %v1166_v40 = vrot.slane %v4905_v50, 7 }
  0xb7   : > { %v437_v49 = vpop.permute.xlu1 %436  ;;  %v435_v48 = vpop.permute.xlu0 %434  ;;  %v4955_v37 = vld [vmem:[#allocation2 + $0x38] sm:$0x8]  ;;  %v589_v46 = vunpack.c.l.b16 %v562_v6  ;;  %v1123_v39 = vld [vmem:[#allocation2 + $0x60] sm:$0xcc]  ;;  %v880_v56 = vunpack.c.l.b16 %v850_v21  ;;  %v6190_v58 = vsel %vm617_vm4, %v865_v51, %v876_v10  ;;  %v1750_v50 = vpack.c.b16 %v1747_v45, %v1747_v45 }
  0xb8   : > { %v451_v59 = vrot.slane %v437_v49, 4  ;;  %v450_v60 = vrot.slane %v435_v48, 4  ;;  %v881_v4 = vunpack.c.h.b16 %v850_v21  ;;  %v4948_v1 = vor.u32 %v5451_v29, %v6170_v13  ;;  %v5453_v29 = vld [vmem:[#allocation2 + $0x64] sm:$0x8] }
  0xb9   : > { %v6160_v5 = vpop.permute.xlu2 %510  ;;  %v6203_v34 = vsel %vm617_vm4, %v6096_v54, %v4952_v36  ;;  %v1223_v12 = vsel %vm617_vm4, %v6115_v23, %v1166_v40  ;;  %v6207_v10 = vpack.c.b16 %v589_v46, %v589_v46  ;;  %v6213_v45 = vpack.c.b16 %v880_v56, %v880_v56  ;;  %v4959_v40 = vld [vmem:[#allocation2 + $0x60] sm:$0x8] }
  0xba   : > { %v461_v16 = vsel %vm459_vm3, %v437_v49, %v451_v59  ;;  %v458_v17 = vsel %vm317_vm2, %v450_v60, %v451_v59  ;;  %v523_v57 = vrot.slane %v6160_v5, 4  ;;  %v6185_v59 = vsel %vm617_vm4, %v864_v18, %v875_v3 }
  0xbb   : > { %481 = vst [vmem:[#allocation2 + $0x98] sm:$0xf] %v461_v16  ;;  %v460_v25 = vsel %vm459_vm3, %v435_v48, %v458_v17  ;;  %v1748_v60 = vunpack.c.h.b16 %v1729_v41  ;;  %v590_v48 = vunpack.c.h.b16 %v562_v6  ;;  %v916_v16 = vsel %vm617_vm4, %v866_v33, %v877_v22 }
  0xbc   : > { %480 = vst [vmem:[#allocation2 + $0x90] sm:$0xff] %v460_v25  ;;  %v534_v49 = vsel %vm529_vm6, %v6160_v5, %v523_v57  ;;  %v4956_v18 = vor.u32 %v6172_v14, %v4955_v37  ;;  %v1171_v17 = vunpack.c.l.b16 %v1123_v39  ;;  %v6199_v6 = vsel %vm617_vm4, %v6108_v11, %v1165_v24  ;;  %v6224_v25 = vld [vmem:[#allocation2 + $0x3c] sm:$0xee] }
  0xbd   : > { %553 = vst [vmem:[#allocation2 + $0xd4] sm:$0xf] %v534_v49  ;;  %v6209_v13 = vpack.c.b16 %v1748_v60, %v1748_v60  ;;  %v6211_v14 = vpack.c.b16 %v590_v48, %v590_v48  ;;  %v1172_v21 = vunpack.c.h.b16 %v1123_v39  ;;  %v1753_v11 = vrot.slane %v1750_v50, 5  ;;  %v5454_v49 = vld [vmem:[#allocation2 + $0x68] sm:$0x30] }
  0xbe   : > { %v6222_v46 = vpack.c.b16 %v881_v4, %v881_v4  ;;  %8319 = vst [vmem:[#allocation11_spill] sm:$0xff] %v6224_v25  ;;  %v1177_v63 = vpack.c.b16 %v1171_v17, %v1171_v17  ;;  %v8288_v37 = vrot.slane %v6207_v10, 2  ;;  %v6237_v39 = vsel %vm627_vm5, %v1223_v12, %v6146_v43  ;;  %v1732_v48 = vld [vmem:[#allocation2 + $0x74] sm:$0x7]  ;;  %v1125_v4 = vld [vmem:[#allocation2 + $0x6c] sm:$0x11] }
  0xbf   : > { %v443_v3 = vpop.permute.xlu1 %442  ;;  %v441_v41 = vpop.permute.xlu0 %440  ;;  %v6245_v60 = vsel %vm617_vm4, %v6098_v55, %v4956_v18  ;;  %v8290_v56 = vrot.slane %v6211_v14, 2  ;;  %v8293_v50 = vrot.slane %v6213_v45, 3  ;;  %v6254_v55 = vsel %vm617_vm4, %v6140_v52, %v1753_v11  ;;  %v4967_v11 = vld [vmem:[#allocation2 + $0x68] sm:$0x8] }
  0xc0   : > { %v454_v51 = vrot.slane %v443_v3, 4  ;;  %v453_v33 = vrot.slane %v441_v41, 4  ;;  %v6265_v52 = vsel %vm627_vm5, %v6158_v2, %v8288_v37 }
  0xc1   : > { %v6343_v31 = vpop.permute.xlu2 %516 }
  0xc2   : > { %v465_v54 = vsel %vm317_vm2, %v454_v51, %v455_v7  ;;  %v462_v23 = vsel %vm317_vm2, %v452_v44, %v453_v33  ;;  %v464_v22 = vsel %vm459_vm3, %v441_v41, %v453_v33  ;;  %v6232_v7 = vsel %vm627_vm5, %v916_v16, %v8289_v38  ;;  %v4961_v44 = vld [vmem:[#allocation2 + $0x6c] sm:$0x30]  ;;  %v1126_v33 = vld [vmem:[#allocation2 + $0x74] sm:$0x1]  ;;  %v853_v37 = vld [vmem:[#allocation2 + $0x98] sm:$0xe] }
  0xc3   : > { %v466_v24 = vsel %vm459_vm3, %v443_v3, %v465_v54  ;;  %v463_v36 = vsel %vm459_vm3, %v6075_v15, %v462_v23  ;;  %483 = vst [vmem:[#allocation2 + $0xa4] sm:$0xf] %v464_v22  ;;  %v6241_v15 = vsel %vm617_vm4, %v6120_v35, %v4948_v1  ;;  %v8292_v3 = vrot.slane %v6222_v46, 3  ;;  %v5455_v1 = vld [vmem:[#allocation2 + $0x70] sm:$0x30] }
  0xc4   : > { %484 = vst [vmem:[#allocation2 + $0xa8] sm:$0xff] %v466_v24  ;;  %v4964_v41 = vor.u32 %v5453_v29, %v4961_v44  ;;  %v1178_v35 = vpack.c.b16 %v1172_v21, %v1172_v21  ;;  %v6259_v51 = vsel %vm627_vm5, %v6168_v9, %v1177_v63  ;;  %v4960_v54 = vor.u32 %v5454_v49, %v4959_v40  ;;  %v565_v29 = vld [vmem:[#allocation2 + $0x98] sm:$0x7]  ;;  %v6279_v40 = vld [vmem:[#allocation2 + $0x6c] sm:$0x77] }
  0xc5   : > { %482 = vst [vmem:[#allocation2 + $0x9c] sm:$0xff] %v463_v36  ;;  %v1760_v23 = vunpack.c.l.b16 %v1732_v48  ;;  %v1174_v21 = vunpack.c.l.b16 %v1125_v4  ;;  %v6271_v9 = vsel %vm627_vm5, %v6164_v8, %v8290_v56  ;;  %v6277_v36 = vsel %vm627_vm5, %v6185_v59, %v8293_v50  ;;  %v564_v48 = vld [vmem:[#allocation2 + $0x90] sm:$0x77] }
  0xc6   : > { %v1175_v63 = vunpack.c.h.b16 %v1125_v4  ;;  %v4968_v44 = vor.u32 %v5455_v1, %v4967_v11  ;;  %v6283_v38 = vrot.slane %v4964_v41, 5  ;;  %v1176_v8 = vunpack.c.l.b16 %v1126_v33  ;;  %v852_v43 = vld [vmem:[#allocation2 + $0x90] sm:$0xee] }
  0xc7   : > { %v449_v17 = vpop.permute.xlu1 %448  ;;  %v447_v12 = vpop.permute.xlu0 %446  ;;  %v602_v0 = vunpack.c.l.b16 %v565_v29  ;;  %v6286_v59 = vrot.slane %v4960_v54, 5  ;;  %v6288_v4 = vpack.c.b16 %v1760_v23, %v1760_v23  ;;  %v6290_v1 = vpack.c.b16 %v1174_v21, %v1174_v21 }
  0xc8   : > { %v457_v22 = vrot.slane %v449_v17, 4  ;;  %v456_v24 = vrot.slane %v447_v12, 4  ;;  %v6300_v41 = vsel %vm627_vm5, %v6199_v6, %v1178_v35  ;;  %v600_v33 = vunpack.c.l.b16 %v564_v48 }
  0xc9   : > { %v601_v54 = vunpack.c.h.b16 %v564_v48  ;;  %v6303_v23 = vrot.slane %v4968_v44, 5  ;;  %v6307_v29 = vpack.c.b16 %v1176_v8, %v1176_v8  ;;  %v605_v21 = vpack.c.b16 %v602_v0, %v602_v0  ;;  %v6320_v44 = vld [vmem:[#allocation2 + $0x6c] sm:$0xee]  ;;  %v4916_v48 = vld [vmem:[#allocation2 + $0x98] sm:$0xc] }
  0xca   : > { %v470_v2 = vsel %vm459_vm3, %v449_v17, %v457_v22  ;;  %v468_v49 = vsel %vm317_vm2, %v456_v24, %v457_v22  ;;  %v6296_v17 = vsel %vm627_vm5, %v6190_v58, %v8292_v3  ;;  %v893_v22 = vunpack.c.l.b16 %v853_v37  ;;  %v4979_v8 = vld [vmem:[#allocation2 + $0x98] sm:$0x8]  ;;  %v5443_v18 = vld [vmem:[#allocation2 + $0xa0] sm:$0x10] }
  0xcb   : > { %487 = vst [vmem:[#allocation2 + $0xbc] sm:$0x3] %v470_v2  ;;  %v469_v56 = vsel %vm459_vm3, %v447_v12, %v468_v49  ;;  %v1758_v12 = vunpack.c.l.b16 %v6279_v40  ;;  %v6305_v24 = vpack.c.b16 %v1175_v63, %v1175_v63  ;;  %v6312_v58 = vsel %vm627_vm5, %v6203_v34, %v6283_v38  ;;  %v266_v63 = vld [vmem:[%s5978_s29 + $0x28] sm:$0xf] }
  0xcc   : > { %486 = vst [vmem:[#allocation2 + $0xb4] sm:$0x33] %v469_v56  ;;  %v891_v56 = vunpack.c.l.b16 %v852_v43  ;;  %v892_v11 = vunpack.c.h.b16 %v852_v43  ;;  %v6317_v37 = vsel %vm627_vm5, %v6241_v15, %v6286_v59  ;;  %v1759_v3 = vunpack.c.h.b16 %v6279_v40  ;;  %v5442_v50 = vld [vmem:[#allocation2 + $0x98] sm:$0x10]  ;;  %v4910_v30 = vld [vmem:[#allocation2 + $0x9c] sm:$0x10] }
  0xcd   : > { %v6322_v34 = vpack.c.b16 %v1758_v12, %v1758_v12  ;;  %v603_v0 = vpack.c.b16 %v600_v33, %v600_v33  ;;  %v6325_v43 = vpack.c.b16 %v601_v54, %v601_v54  ;;  %v896_v16 = vpack.c.b16 %v893_v22, %v893_v22  ;;  %v5458_v22 = vld [vmem:[#allocation2 + $0xa0] sm:$0x30]  ;;  %274 = vst [vmem:[#allocation2 + $0x20] sm:$0xf] %v266_v63 }
  0xce   : > { %v6330_v15 = vsel %vm627_vm5, %v6245_v60, %v6303_v23  ;;  %v8321_v12 = vrot.slane %v6126_v61, 4  ;;  %v894_v54 = vpack.c.b16 %v891_v56, %v891_v56  ;;  %v608_v5 = vrot.slane %v605_v21, 7 }
  0xcf   : > { %v509_v6 = vpop.permute.xlu1 %508  ;;  %v507_v35 = vpop.permute.xlu0 %506  ;;  %8320 = vst [vmem:[#allocation12_spill] sm:$0xff] %v6330_v15  ;;  %v6346_v56 = vpack.c.b16 %v1759_v3, %v1759_v3  ;;  %v607_v21 = vrot.slane %v6325_v43, 7  ;;  %v8323_v3 = vunpack.c.l.b16 %v6224_v25 }
  0xd0   : > { %v522_v2 = vrot.slane %v509_v6, 4  ;;  %v521_v49 = vrot.slane %v507_v35, 4 }
  0xd2   : > { %v532_v19 = vsel %vm317_vm2, %v522_v2, %v523_v57  ;;  %v528_v40 = vsel %vm317_vm2, %v8321_v12, %v521_v49  ;;  %v531_v33 = vsel %vm529_vm6, %v507_v35, %v521_v49  ;;  %v4908_v57 = vld [vmem:[#allocation2 + $0x90] sm:$0xc]  ;;  %v895_v2 = vpack.c.b16 %v892_v11, %v892_v11  ;;  %v5441_v12 = vld [vmem:[#allocation2 + $0x94] sm:$0xc]  ;;  %v4973_v49 = vld [vmem:[#allocation2 + $0x9c] sm:$0x30] }
  0xd3   : > { %v533_v27 = vsel %vm529_vm6, %v509_v6, %v532_v19  ;;  %v530_v60 = vsel %vm529_vm6, %v6126_v61, %v528_v40  ;;  %551 = vst [vmem:[#allocation2 + $0xc8] sm:$0xf] %v531_v33  ;;  %v4909_v28 = vor.u32 %v5442_v50, %v4908_v57  ;;  %v606_v19 = vrot.slane %v603_v0, 7  ;;  %v5456_v11 = vld [vmem:[#allocation2 + $0x94] sm:$0x8] }
  0xd4   : > { %552 = vst [vmem:[#allocation2 + $0xcc] sm:$0xff] %v533_v27  ;;  %v4913_v6 = vor.u32 %v5441_v12, %v4910_v30  ;;  %v4917_v61 = vor.u32 %v5443_v18, %v4916_v48  ;;  %v4980_v40 = vor.u32 %v5458_v22, %v4979_v8  ;;  %v8322_v27 = vrot.slane %v6209_v13, 5 }
  0xd5   : > { %550 = vst [vmem:[#allocation2 + $0xc0] sm:$0xff] %v530_v60  ;;  %v6360_v60 = vpack.c.b16 %v8323_v3, %v8323_v3  ;;  %v8324_v18 = vrot.slane %v6118_v26, 2  ;;  %v8325_v8 = vrot.slane %v6213_v45, 3  ;;  %v8327_v22 = vrot.slane %v6122_v47, 3  ;;  %v4874_v26 = vld [vmem:[%s8283_s1] sm:$0xf] }
  0xd6   : > { %v6355_v50 = vsel %vm617_vm4, %v6144_v32, %v8322_v27  ;;  %v8326_v32 = vrot.slane %v6222_v46, 3  ;;  %v5432_v45 = vld [vmem:[%s8283_s1] sm:$0x30]  ;;  %v1196_v12 = vrot.slane %v4909_v28, 1  ;;  %v8328_v47 = vrot.slane %v6207_v10, 2 }
  0xd7   : > { %v515_v30 = vpop.permute.xlu1 %514  ;;  %v513_v0 = vpop.permute.xlu0 %512  ;;  %v643_v48 = vsel %vm637_vm7, %v8324_v18, %v608_v5  ;;  %v6368_v13 = vsel %vm637_vm7, %v8325_v8, %v894_v54  ;;  %v6378_v57 = vsel %vm637_vm7, %v8327_v22, %v896_v16  ;;  %v6386_v54 = vld [vmem:[#allocation2 + $0xd0] sm:$0x10]  ;;  %v6388_v27 = vld [vmem:[#allocation2 + $0xa4] sm:$0x7]  ;;  %v6393_v3 = vrot.slane %v4913_v6, 1 }
  0xd8   : > { %v6373_v43 = vsel %vm637_vm7, %v8326_v32, %v895_v2  ;;  %v525_v5 = vrot.slane %v515_v30, 4  ;;  %v524_v46 = vrot.slane %v513_v0, 4  ;;  %v4976_v2 = vor.u32 %v5456_v11, %v4973_v49  ;;  %v6397_v8 = vld [vmem:[#allocation2 + $0x90] sm:$0x8]  ;;  %v6399_v32 = vld [vmem:[#allocation2 + $0x98] sm:$0x30] }
  0xd9   : > { %v639_v16 = vsel %vm637_vm7, %v8328_v47, %v606_v19  ;;  %v6395_v18 = vrot.slane %v4917_v61, 1  ;;  %v6401_v22 = vrot.slane %v4980_v40, 2  ;;  %v8329_v11 = vrot.slane %v6211_v14, 2 }
  0xda   : > { %v537_v63 = vsel %vm529_vm6, %v515_v30, %v525_v5  ;;  %v535_v28 = vsel %vm317_vm2, %v524_v46, %v525_v5  ;;  %v567_v49 = vld [vmem:[#allocation2 + $0xc8] sm:$0x7]  ;;  %v6408_v6 = vor.u32 %v5432_v45, %v4874_v26  ;;  %v1235_v14 = vsel %vm637_vm7, %v6290_v1, %v1196_v12 }
  0xdb   : > { %v641_v10 = vsel %vm637_vm7, %v8329_v11, %v607_v21  ;;  %v855_v19 = vld [vmem:[#allocation2 + $0xc8] sm:$0xe]  ;;  %555 = vst [vmem:[#allocation2 + $0xe0] sm:$0xf] %v537_v63  ;;  %v536_v47 = vsel %vm529_vm6, %v513_v0, %v535_v28  ;;  %v613_v35 = vunpack.c.l.b16 %v567_v49  ;;  %v5445_v40 = vld [vmem:[#allocation2 + $0xc8] sm:$0x10]  ;;  %v4972_v63 = vor.u32 %v6399_v32, %v6397_v8 }
  0xdc   : > { %v6410_v61 = vld [vmem:[#allocation2 + $0xc8] sm:$0xc]  ;;  %v901_v33 = vunpack.c.l.b16 %v855_v19  ;;  %v4922_v25 = vld [vmem:[#allocation2 + $0xcc] sm:$0x10]  ;;  %554 = vst [vmem:[#allocation2 + $0xd8] sm:$0xff] %v536_v47  ;;  %v6416_v21 = vrot.slane %v4976_v2, 2 }
  0xdd   : > { %v566_v5 = vld [vmem:[#allocation2 + $0xc0] sm:$0x77]  ;;  %v4929_v26 = vor.u32 %v6386_v54, %v6410_v61  ;;  %v616_v0 = vpack.c.b16 %v613_v35, %v613_v35 }
  0xde   : > { %v854_v46 = vld [vmem:[#allocation2 + $0xc0] sm:$0xee]  ;;  %v611_v45 = vunpack.c.l.b16 %v566_v5  ;;  %v612_v28 = vunpack.c.h.b16 %v566_v5  ;;  %v904_v62 = vpack.c.b16 %v901_v33, %v901_v33 }
  0xdf   : > { %v899_v49 = vunpack.c.l.b16 %v854_v46  ;;  %v4920_v11 = vld [vmem:[#allocation2 + $0xc0] sm:$0xc]  ;;  %v5444_v19 = vld [vmem:[#allocation2 + $0xc4] sm:$0xc]  ;;  %v900_v30 = vunpack.c.h.b16 %v854_v46  ;;  %v519_v1 = vpop.permute.xlu0 %518  ;;  %v650_v12 = vsel %vm317_vm2, %v643_v48, %v616_v0  ;;  %v8330_v48 = vrot.slane %v6343_v31, 4 }
  0xe0   : > { %v4921_v47 = vor.u32 %v5445_v40, %v4920_v11  ;;  %v4925_v53 = vor.u32 %v5444_v19, %v4922_v25  ;;  %v614_v2 = vpack.c.b16 %v611_v45, %v611_v45  ;;  %v615_v15 = vpack.c.b16 %v612_v28, %v612_v28  ;;  %v5459_v11 = vld [vmem:[#allocation2 + $0xc4] sm:$0x8]  ;;  %v5461_v25 = vld [vmem:[#allocation2 + $0xd0] sm:$0x30] }
  0xe1   : > { %v902_v54 = vpack.c.b16 %v899_v49, %v899_v49  ;;  %v527_v61 = vrot.slane %v519_v1, 4  ;;  %v665_v8 = vsel %vm660_vm8, %v650_v12, 0  ;;  %v903_v32 = vpack.c.b16 %v900_v30, %v900_v30  ;;  %v4985_v30 = vld [vmem:[#allocation2 + $0xcc] sm:$0x30]  ;;  %v4983_v49 = vld [vmem:[#allocation2 + $0xc0] sm:$0x8] }
  0xe2   : > { %v1212_v35 = vrot.slane %v4921_v47, 6  ;;  %701 = vmatpush.bf16.msra.mxu2 %v665_v8  ;;  %v646_v5 = vsel %vm317_vm2, %v639_v16, %v614_v2  ;;  %v648_v40 = vsel %vm317_vm2, %v641_v10, %v615_v15  ;;  %v907_v33 = vrot.slane %v904_v62, 5  ;;  %v5460_v10 = vld [vmem:[#allocation2 + $0xc8] sm:$0x30]  ;;  %v4991_v47 = vld [vmem:[#allocation2 + $0xc8] sm:$0x8] }
  0xe3   : > { %v905_v46 = vrot.slane %v902_v54, 5  ;;  %v540_v19 = vsel %vm529_vm6, %v519_v1, %v527_v61  ;;  %v538_v0 = vsel %vm317_vm2, %v8330_v48, %v527_v61  ;;  %v661_v45 = vsel %vm660_vm8, %v646_v5, 0 }
  0xe4   : > { %v663_v28 = vsel %vm660_vm8, %v648_v40, 0  ;;  %557 = vst [vmem:[#allocation2 + $0xec] sm:$0x3] %v540_v19  ;;  %v539_v15 = vsel %vm529_vm6, %v6343_v31, %v538_v0  ;;  %673 = vmatpush.bf16.msra.mxu0 %v661_v45  ;;  %v1243_v16 = vsel %vm317_vm2, %v1235_v14, %v1212_v35  ;;  %v906_v12 = vrot.slane %v903_v32, 5  ;;  %v1736_v40 = vld [vmem:[#allocation2 + $0xd4] sm:$0x7] }
  0xe5   : > { %687 = vmatpush.bf16.msra.mxu1 %v663_v28  ;;  %v933_v62 = vsel %vm317_vm2, %v6368_v13, %v905_v46  ;;  %556 = vst [vmem:[#allocation2 + $0xe4] sm:$0x33] %v539_v15  ;;  %v937_v2 = vsel %vm317_vm2, %v6378_v57, %v907_v33  ;;  %v1503_v54 = vrot.slane %v4972_v63, 2  ;;  %v1248_v31 = vsel %vm660_vm8, %v1243_v16, 0  ;;  %v1733_v57 = vld [vmem:[#allocation2 + $0x9c] sm:$0x77] }
  0xe6   : > { %v938_v1 = vsel %vm660_vm8, %v933_v62, 0  ;;  %702 = vmatpush.bf16.msra.mxu2 %v6154_v42  ;;  %v1213_v61 = vrot.slane %v4925_v53, 6  ;;  %v1238_v13 = vsel %vm637_vm7, %v6305_v24, %v6393_v3  ;;  %v4988_v14 = vor.u32 %v5459_v11, %v4985_v30  ;;  %v6474_v19 = vld [vmem:[#allocation2 + $0xcc] sm:$0xee]  ;;  %v1995_v28 = vld [vmem:[#allocation2 + $0x74] sm:$0xe] }
  0xe7   : > { %950 = vmatpush.bf16.msra.mxu3 %v938_v1  ;;  %v935_v8 = vsel %vm317_vm2, %v6373_v43, %v906_v12  ;;  %v1214_v35 = vrot.slane %v4929_v26, 6  ;;  %v4984_v32 = vor.u32 %v5460_v10, %v4983_v49  ;;  %v4992_v5 = vor.u32 %v5461_v25, %v4991_v47 }
  0xe8   : > { %674 = vmatpush.bf16.msra.mxu0 %v6265_v52  ;;  %v940_v42 = vsel %vm660_vm8, %v935_v8, 0  ;;  %v942_v53 = vsel %vm660_vm8, %v937_v2, 0  ;;  %v1245_v63 = vsel %vm317_vm2, %v1238_v13, %v1213_v61  ;;  %v1520_v24 = vrot.slane %v4988_v14, 7  ;;  %v1999_v2 = vld [vmem:[#allocation2 + $0xd4] sm:$0xe] }
  0xe9   : > { %688 = vmatpush.bf16.msra.mxu1 %v6271_v9  ;;  %v1543_v43 = vsel %vm637_vm7, %v6283_v38, %v6416_v21  ;;  %v1519_v3 = vrot.slane %v4984_v32, 7  ;;  %v1521_v26 = vrot.slane %v4992_v5, 7  ;;  %v8331_v52 = vunpack.c.l.b16 %v6388_v27  ;;  %4878 = vmatmul.msk.bf16.vlgmr.msra.gmra.mxu2 %vm656_vm9, %v6408_v6 }
  0xea   : > { %1260 = vmatpush.bf16.msrb.mxu2 %v1248_v31  ;;  %v1549_v46 = vsel %vm317_vm2, %v1543_v43, %v1520_v24  ;;  %v1241_v33 = vsel %vm637_vm7, %v6307_v29, %v6395_v18  ;;  %v1541_v38 = vsel %vm637_vm7, %v6286_v59, %v1503_v54  ;;  %v1769_v21 = vunpack.c.l.b16 %v1733_v57  ;;  %v6476_v29 = vld [vmem:[#allocation2 + $0x78] sm:$0x11] }
  0xeb   : > { %v1774_v9 = vpack.c.b16 %v8331_v52, %v8331_v52  ;;  %951 = vmatpush.bf16.msra.mxu3 %v6277_v36  ;;  %4876 = vmatmul.msk.bf16.vlgmr.msra.gmra.mxu0 %vm656_vm9, %v6408_v6  ;;  %v1250_v27 = vsel %vm660_vm8, %v1245_v63, 0  ;;  %v1247_v36 = vsel %vm317_vm2, %v1241_v33, %v1214_v35  ;;  %v1547_v11 = vsel %vm317_vm2, %v1541_v38, %v1519_v3  ;;  %v5469_v63 = vld [vmem:[#allocation2 + $0xa4] sm:$0x10]  ;;  %v267_v38 = vld [vmem:[%s5978_s29 + $0x30] sm:$0x33] }
  0xec   : > { %964 = vmatpush.bf16.msrb.mxu0 %v940_v42  ;;  %4877 = vmatmul.msk.bf16.vlgmr.msra.gmra.mxu1 %vm656_vm9, %v6408_v6  ;;  %v1770_v25 = vunpack.c.h.b16 %v1733_v57  ;;  %v1545_v59 = vsel %vm637_vm7, %v6303_v23, %v6401_v22  ;;  %v1782_v18 = vunpack.c.l.b16 %v1736_v40  ;;  %v1765_v48 = vrot.slane %v6346_v56, 2  ;;  %v1735_v22 = vld [vmem:[#allocation2 + $0xcc] sm:$0x77]  ;;  %275 = vst [vmem:[#allocation2 + $0x24] sm:$0x33] %v267_v38 }
  0xed   : > { %978 = vmatpush.bf16.msrb.mxu1 %v942_v53  ;;  %v8332_v0 = vrot.slane %v6288_v4, 2  ;;  %v1551_v30 = vsel %vm317_vm2, %v1545_v59, %v1521_v26  ;;  %v1777_v23 = vrot.slane %v1774_v9, 7  ;;  %v8333_v49 = vrot.slane %v6322_v34, 2  ;;  %v6520_v42 = vld [vmem:[#allocation2 + $0xc] sm:$0xc] }
  0xee   : > { %1261 = vmatpush.bf16.msrb.mxu2 %v6259_v51  ;;  %4879 = vmatmul.msk.bf16.vlgmr.msra.gmra.mxu3 %vm656_vm9, %v6408_v6  ;;  %v1554_v51 = vsel %vm660_vm8, %v1549_v46, 0  ;;  %v1552_v62 = vsel %vm660_vm8, %v1547_v11, 0  ;;  %v2043_v16 = vunpack.c.l.b16 %v6474_v19  ;;  %v2318_v10 = vunpack.c.l.b16 %v6476_v29  ;;  %v6522_v53 = vld [vmem:[#allocation2 + $0x14] sm:$0x10]  ;;  %v5028_v4 = vld [vmem:[#allocation2 + $0x9c] sm:$0xc] }
  0xef   : > { %1274 = vmatpush.bf16.msrb.mxu3 %v1250_v27  ;;  %v6487_v45 = vsel %vm627_vm5, %v6138_v20, %v8332_v0  ;;  %v6498_v15 = vsel %vm627_vm5, %v6254_v55, %v8333_v49  ;;  %v1252_v20 = vsel %vm660_vm8, %v1247_v36, 0  ;;  %v1772_v47 = vpack.c.b16 %v1769_v21, %v1769_v21  ;;  %v5472_v9 = vld [vmem:[#allocation2 + $0xd4] sm:$0x10]  ;;  %v8336_v21 = vld [vmem:[#allocation12_spill] sm:$0xff]  ;;  %v5468_v36 = vld [vmem:[#allocation2 + $0xa0] sm:$0xc] }
  0xf0   : > { %965 = vmatpush.bf16.msrb.mxu0 %v6296_v17  ;;  %v6503_v17 = vld [vmem:[#allocation2 + $0x9c] sm:$0xee]  ;;  %v1773_v1 = vpack.c.b16 %v1770_v25, %v1770_v25  ;;  %v8334_v55 = vunpack.c.l.b16 %v6320_v44  ;;  %v2026_v54 = vunpack.c.l.b16 %v1995_v28  ;;  %v1556_v31 = vsel %vm660_vm8, %v1551_v30, 0  ;;  %v5030_v11 = vld [vmem:[#allocation2 + $0xa8] sm:$0x10] }
  0xf1   : > { %979 = vmatpush.bf16.msrb.mxu1 %v6232_v7  ;;  %v1997_v7 = vld [vmem:[#allocation2 + $0xa4] sm:$0xe]  ;;  %v1785_v61 = vpack.c.b16 %v1782_v18, %v1782_v18  ;;  %v1780_v13 = vunpack.c.l.b16 %v1735_v22  ;;  %v2019_v14 = vrot.slane %v6360_v60, 6  ;;  %v8335_v8 = vmov %v8332_v0  ;;  %v8337_v18 = vld [vmem:[#allocation10_spill] sm:$0xff] }
  0xf2   : > { %1578 = vmatpush.bf16.msra.mxu2 %v1554_v51  ;;  %v6510_v12 = vpack.c.b16 %v8334_v55, %v8334_v55  ;;  %v1809_v35 = vsel %vm637_vm7, %v8335_v8, %v1777_v23  ;;  %v1781_v32 = vunpack.c.h.b16 %v1735_v22  ;;  %v2035_v5 = vunpack.c.l.b16 %v6503_v17  ;;  %v5471_v23 = vld [vmem:[#allocation2 + $0xd0] sm:$0xc]  ;;  %v5042_v22 = vld [vmem:[#allocation2 + $0xd8] sm:$0x10]  ;;  %v1993_v8 = vld [vmem:[#allocation2 + $0x44] sm:$0xe] }
  0xf3   : > { %1275 = vmatpush.bf16.msrb.mxu3 %v6300_v41  ;;  %v2025_v57 = vunpack.c.h.b16 %v6320_v44  ;;  %v2046_v41 = vpack.c.b16 %v2043_v16, %v2043_v16  ;;  %v6529_v60 = vsel %vm627_vm5, %v6355_v50, %v1765_v48  ;;  %v2037_v24 = vunpack.c.l.b16 %v1997_v7  ;;  %v5040_v50 = vld [vmem:[#allocation2 + $0xcc] sm:$0xc] }
  0xf4   : > { %1288 = vmatpush.bf16.msra.mxu0 %v1252_v20  ;;  %v2045_v43 = vunpack.c.l.b16 %v1999_v2  ;;  %v1775_v44 = vrot.slane %v1772_v47, 7  ;;  %v1776_v3 = vrot.slane %v1773_v1, 7  ;;  %v6534_v26 = vpack.c.b16 %v2026_v54, %v2026_v54 }
  0xf5   : > { %1564 = vmatpush.bf16.msra.mxu1 %v1552_v62  ;;  %v1815_v40 = vsel %vm317_vm2, %v1809_v35, %v1785_v61  ;;  %v1783_v52 = vpack.c.b16 %v1780_v13, %v1780_v13  ;;  %v2324_v46 = vpack.c.b16 %v2318_v10, %v2318_v10  ;;  %v5005_v33 = vor.u32 %v6522_v53, %v6520_v42  ;;  %v5466_v42 = vld [vmem:[#allocation2 + $0x44] sm:$0x10]  ;;  %v8340_v53 = vld [vmem:[#allocation11_spill] sm:$0xff] }
  0xf6   : > { %1579 = vmatpush.bf16.msra.mxu2 %v6312_v58  ;;  %v2030_v58 = vrot.slane %v6510_v12, 3  ;;  %v5029_v27 = vor.u32 %v5469_v63, %v5028_v4  ;;  %v2319_v25 = vunpack.c.h.b16 %v6476_v29  ;;  %v2049_v59 = vrot.slane %v2046_v41, 5 }
  0xf7   : > { %1592 = vmatpush.bf16.msra.mxu3 %v1556_v31  ;;  %v8338_v0 = vrot.slane %v8337_v18, 1  ;;  %v2040_v51 = vpack.c.b16 %v2037_v24, %v2037_v24  ;;  %v2048_v30 = vpack.c.b16 %v2045_v43, %v2045_v43  ;;  %v1805_v20 = vsel %vm637_vm7, %v8333_v49, %v1775_v44  ;;  %v1991_v31 = vld [vmem:[#allocation2 + $0x14] sm:$0xe]  ;;  %v6577_v24 = vld [vmem:[#allocation2 + $0x6c] sm:$0xcc] }
  0xf8   : > { %1289 = vmatpush.bf16.msra.mxu0 %v6237_v39  ;;  %v1784_v39 = vpack.c.b16 %v1781_v32, %v1781_v32  ;;  %v5041_v62 = vor.u32 %v5472_v9, %v5040_v50  ;;  %v6550_v16 = vpack.c.b16 %v2025_v57, %v2025_v57  ;;  %v2032_v29 = vrot.slane %v6534_v26, 3  ;;  %v5016_v57 = vld [vmem:[#allocation2 + $0x3c] sm:$0xc]  ;;  %v5462_v50 = vld [vmem:[#allocation2 + $0x10] sm:$0xc] }
  0xf9   : > { %1565 = vmatpush.bf16.msra.mxu1 %v6317_v37  ;;  %v2038_v37 = vpack.c.b16 %v2035_v5, %v2035_v5  ;;  %v6545_v28 = vsel %vm617_vm4, %v8338_v0, %v2019_v14  ;;  %v1820_v10 = vsel %vm660_vm8, %v1815_v40, 0  ;;  %v1811_v47 = vsel %vm317_vm2, %v1805_v20, %v1783_v52  ;;  %4930 = vmatmul.msk.bf16.vlgmr.msrb.gmra.mxu2 %vm656_vm9, %v6408_v6  ;;  %v5006_v9 = vld [vmem:[#allocation2 + $0x18] sm:$0x10] }
  0xfa   : > { %v1807_v1 = vsel %vm637_vm7, %v1765_v48, %v1776_v3  ;;  %v5033_v55 = vor.u32 %v5468_v36, %v5030_v11  ;;  %v2340_v2 = vrot.slane %v5029_v27, 1  ;;  %v5045_v54 = vor.u32 %v5471_v23, %v5042_v22  ;;  %v8339_v48 = vld [vmem:[#allocation9_spill] sm:$0xff]  ;;  %1856 = vmatpush.bf16.msrb.mxu2 %v1820_v10 }
  0xfb   : > { %1593 = vmatpush.bf16.msra.mxu3 %v8336_v21  ;;  %v1813_v7 = vsel %vm317_vm2, %v1807_v1, %v1784_v39  ;;  %v2071_v34 = vsel %vm637_vm7, %v2030_v58, %v2038_v37  ;;  %v2051_v13 = vrot.slane %v2048_v30, 5  ;;  %v2075_v56 = vsel %vm637_vm7, %v2032_v29, %v2040_v51  ;;  %4880 = vmatmul.msk.bf16.vlgmr.msrb.gmra.mxu0 %vm656_vm9, %v6408_v6  ;;  %v5465_v37 = vld [vmem:[#allocation2 + $0x40] sm:$0xc]  ;;  %v5018_v27 = vld [vmem:[#allocation2 + $0x48] sm:$0x10] }
  0xfc   : > { %v2077_v61 = vsel %vm317_vm2, %v2071_v34, %v2049_v59  ;;  %v2003_v14 = vunpack.c.h.b16 %v8339_v48  ;;  %v1816_v35 = vsel %vm660_vm8, %v1811_v47, 0  ;;  %v2356_v32 = vrot.slane %v5041_v62, 6  ;;  %4881 = vmatmul.msk.bf16.vlgmr.msrb.gmra.mxu1 %vm656_vm9, %v6408_v6  ;;  %v6613_v34 = vld [vmem:[#allocation2 + $0x74] sm:$0x30]  ;;  %v5093_v48 = vld [vmem:[#allocation2 + $0xa8] sm:$0x30] }
  0xfd   : > { %v2044_v5 = vunpack.c.h.b16 %v6474_v19  ;;  %v2014_v41 = vunpack.c.h.b16 %v8340_v53  ;;  %1828 = vmatpush.bf16.msrb.mxu0 %v1816_v35  ;;  %v1818_v4 = vsel %vm660_vm8, %v1813_v7, 0  ;;  %v2341_v63 = vrot.slane %v5033_v55, 1  ;;  %v6625_v35 = vld [vmem:[#allocation2 + $0xa4] sm:$0xc] }
  0xfe   : > { %v6579_v43 = vrot.slane %v5005_v33, 2  ;;  %v2004_v44 = vunpack.c.l.b16 %v1991_v31  ;;  %1842 = vmatpush.bf16.msrb.mxu1 %v1818_v4  ;;  %4931 = vmatmul.msk.bf16.vlgmr.msrb.gmra.mxu3 %vm656_vm9, %v6408_v6  ;;  %v2082_v19 = vsel %vm660_vm8, %v2077_v61, 0  ;;  %v2325_v3 = vpack.c.b16 %v2319_v25, %v2319_v25 }
  0xff   : > { %v2357_v40 = vrot.slane %v5045_v54, 6  ;;  %v2015_v52 = vunpack.c.l.b16 %v1993_v8  ;;  %2094 = vmatpush.bf16.msrb.mxu3 %v2082_v19  ;;  %v2379_v38 = vsel %vm637_vm7, %v2324_v46, %v2340_v2  ;;  %v2036_v21 = vunpack.c.h.b16 %v6503_v17  ;;  %1857 = vmatpush.bf16.msrb.mxu2 %v6487_v45  ;;  %v6617_v2 = vld [vmem:[#allocation2 + $0x7c] sm:$0x30]  ;;  %v6623_v8 = vld [vmem:[#allocation2 + $0xd8] sm:$0x30] }
 0x100   : > { %v2081_v33 = vsel %vm317_vm2, %v2075_v56, %v2051_v13  ;;  %v5017_v39 = vor.u32 %v5466_v42, %v5016_v57  ;;  %v2387_v36 = vsel %vm317_vm2, %v2379_v38, %v2356_v32  ;;  %v2047_v11 = vpack.c.b16 %v2044_v5, %v2044_v5  ;;  %v5480_v13 = vld [vmem:[#allocation2 + $0x70] sm:$0x8]  ;;  %v5483_v56 = vld [vmem:[#allocation2 + $0xa0] sm:$0x8]  ;;  %v6627_v5 = vld [vmem:[#allocation2 + $0x6c] sm:$0x8] }
 0x101   : > { %v2006_v25 = vpack.c.b16 %v2003_v14, %v2003_v14  ;;  %v2017_v59 = vpack.c.b16 %v2014_v41, %v2014_v41  ;;  %1829 = vmatpush.bf16.msrb.mxu0 %v6498_v15  ;;  %v2382_v18 = vsel %vm637_vm7, %v2325_v3, %v2341_v63  ;;  %v2315_v46 = vunpack.c.l.b16 %v6577_v24  ;;  %v6621_v14 = vld [vmem:[#allocation2 + $0xd0] sm:$0x8]  ;;  %v6631_v42 = vld [vmem:[#allocation2 + $0x18] sm:$0x30]  ;;  %v5470_v63 = vld [vmem:[#allocation2 + $0xac] sm:$0x10] }
 0x102   : > { %v6592_v0 = vpack.c.b16 %v2004_v44, %v2004_v44  ;;  %v5009_v17 = vor.u32 %v5462_v50, %v5006_v9  ;;  %1843 = vmatpush.bf16.msrb.mxu1 %v6529_v60  ;;  %v2062_v45 = vsel %vm627_vm5, %v6545_v28, %v2030_v58  ;;  %v2389_v51 = vsel %vm317_vm2, %v2382_v18, %v2357_v40  ;;  %v2270_v60 = vld [vmem:[#allocation2 + $0x80] sm:$0x1]  ;;  %v6607_v58 = vld [vmem:[#allocation2 + $0x78] sm:$0x30]  ;;  %v6629_v57 = vld [vmem:[#allocation2 + $0x10] sm:$0x8] }
 0x103   : > { %v6600_v30 = vpack.c.b16 %v2015_v52, %v2015_v52  ;;  %v5021_v23 = vor.u32 %v5465_v37, %v5018_v27  ;;  %2095 = vmatpush.bf16.msrb.mxu3 %v2062_v45  ;;  %v2392_v15 = vsel %vm660_vm8, %v2387_v36, 0  ;;  %v2031_v22 = vrot.slane %v6550_v16, 3  ;;  %v6615_v16 = vld [vmem:[#allocation2 + $0x74] sm:$0x8]  ;;  %v5473_v44 = vld [vmem:[#allocation2 + $0xdc] sm:$0x10] }
 0x104   : > { %v2039_v49 = vpack.c.b16 %v2036_v21, %v2036_v21  ;;  %v6605_v20 = vsel %vm660_vm8, %v2081_v33, 0  ;;  %v2050_v62 = vrot.slane %v2047_v11, 5  ;;  %v2308_v12 = vrot.slane %v5017_v39, 7  ;;  %v6637_v19 = vld [vmem:[#allocation2 + $0x40] sm:$0x8] }
 0x105   : > { %v2009_v10 = vrot.slane %v2006_v25, 1  ;;  %v2020_v47 = vrot.slane %v2017_v59, 6  ;;  %v6610_v28 = vsel %vm660_vm8, %v2389_v51, 0  ;;  %v2321_v1 = vpack.c.b16 %v2315_v46, %v2315_v46  ;;  %v6639_v3 = vld [vmem:[#allocation2 + $0x48] sm:$0x30] }
 0x106   : > { %v2010_v55 = vrot.slane %v6592_v0, 1  ;;  %v2293_v7 = vrot.slane %v5009_v17, 2  ;;  %v2021_v54 = vrot.slane %v6600_v30, 6  ;;  %v2309_v31 = vrot.slane %v5021_v23, 7  ;;  %v5091_v38 = vld [vmem:[#allocation2 + $0x9c] sm:$0x8] }
 0x107   : > { %v2316_v61 = vunpack.c.h.b16 %v6577_v24  ;;  %v2320_v32 = vunpack.c.l.b16 %v2270_v60  ;;  %v2073_v53 = vsel %vm637_vm7, %v2031_v22, %v2039_v49  ;;  %v2361_v41 = vsel %vm617_vm4, %v6579_v43, %v2308_v12  ;;  %v5048_v24 = vld [vmem:[#allocation2 + $0xd4] sm:$0xc]  ;;  %v5484_v21 = vld [vmem:[#allocation2 + $0xa4] sm:$0x30]  ;;  %v268_v33 = vld [vmem:[%s5978_s29 + $0x38] sm:$0x3] }
 0x108   : > { %v2057_v4 = vsel %vm617_vm4, %v2009_v10, %v2020_v47  ;;  %v2079_v40 = vsel %vm317_vm2, %v2073_v53, %v2050_v62  ;;  %v2369_v52 = vsel %vm627_vm5, %v2361_v41, %v2321_v1  ;;  %v5084_v9 = vor.u32 %v5480_v13, %v6607_v58  ;;  %v5012_v43 = vld [vmem:[#allocation2 + $0x14] sm:$0xc]  ;;  %v5103_v27 = vld [vmem:[#allocation2 + $0xcc] sm:$0x8]  ;;  %v5487_v36 = vld [vmem:[#allocation2 + $0xd4] sm:$0x30] }
 0x109   : > { %v2065_v50 = vsel %vm627_vm5, %v2057_v4, %v2031_v22  ;;  %v2322_v39 = vpack.c.b16 %v2316_v61, %v2316_v61  ;;  %v5096_v37 = vor.u32 %v5483_v56, %v5093_v48  ;;  %v5080_v11 = vor.u32 %v6613_v34, %v6627_v5  ;;  %276 = vst [vmem:[#allocation2 + $0x2c] sm:$0x3] %v268_v33  ;;  %v5464_v17 = vld [vmem:[#allocation2 + $0x1c] sm:$0x10]  ;;  %v5024_v45 = vld [vmem:[#allocation2 + $0x44] sm:$0xc] }
 0x10a   : > { %v5088_v25 = vor.u32 %v6617_v2, %v6615_v16  ;;  %4994 = vmatmul.msk.bf16.vlgmr.msra.gmra.mxu2 %vm656_vm9, %v6408_v6  ;;  %v2364_v59 = vsel %vm617_vm4, %v2293_v7, %v2309_v31  ;;  %v5108_v18 = vor.u32 %v6621_v14, %v6623_v8  ;;  %v2326_v46 = vpack.c.b16 %v2320_v32, %v2320_v32  ;;  %v5467_v51 = vld [vmem:[#allocation2 + $0x4c] sm:$0x10]  ;;  %v2268_v30 = vld [vmem:[#allocation2 + $0x74] sm:$0xc]  ;;  %v5099_v60 = vld [vmem:[#allocation2 + $0xa4] sm:$0x8] }
 0x10b   : > { %v5037_v0 = vor.u32 %v5470_v63, %v6625_v35  ;;  %2404 = vmatpush.bf16.msra.mxu2 %v2392_v15  ;;  %4932 = vmatmul.msk.bf16.vlgmr.msra.gmra.mxu0 %vm656_vm9, %v6408_v6  ;;  %v2084_v23 = vsel %vm660_vm8, %v2079_v40, 0  ;;  %v5049_v22 = vor.u32 %v5473_v44, %v5048_v24  ;;  %v5092_v49 = vor.u32 %v5484_v21, %v5091_v38  ;;  %v5485_v62 = vld [vmem:[#allocation2 + $0xac] sm:$0x30]  ;;  %v5111_v58 = vld [vmem:[#allocation2 + $0xd4] sm:$0x8] }
 0x10c   : > { %v5060_v12 = vor.u32 %v6629_v57, %v6631_v42  ;;  %4993 = vmatmul.msk.bf16.vlgmr.msra.gmra.mxu1 %vm656_vm9, %v6408_v6  ;;  %2108 = vmatpush.bf16.msra.mxu0 %v2084_v23  ;;  %v2060_v10 = vsel %vm617_vm4, %v2010_v55, %v2021_v54  ;;  %v2632_v47 = vrot.slane %v5084_v9, 5  ;;  %v5104_v15 = vor.u32 %v5487_v36, %v5103_v27  ;;  %v5488_v1 = vld [vmem:[#allocation2 + $0xdc] sm:$0x30]  ;;  %v5055_v61 = vld [vmem:[#allocation2 + $0xc] sm:$0x8] }
 0x10d   : > { %v5072_v7 = vor.u32 %v6637_v19, %v6639_v3  ;;  %2122 = vmatpush.bf16.msra.mxu1 %v6605_v20  ;;  %v2372_v34 = vsel %vm627_vm5, %v2364_v59, %v2322_v39  ;;  %v2648_v16 = vrot.slane %v5096_v37, 2  ;;  %v5013_v2 = vor.u32 %v5464_v17, %v5012_v43  ;;  %v5475_v13 = vld [vmem:[#allocation2 + $0x14] sm:$0x30]  ;;  %v5063_v14 = vld [vmem:[#allocation2 + $0x14] sm:$0x8] }
 0x10e   : > { %4995 = vmatmul.msk.bf16.vlgmr.msra.gmra.mxu3 %vm656_vm9, %v6408_v6  ;;  %v5025_v31 = vor.u32 %v5467_v51, %v5024_v45  ;;  %v2664_v55 = vrot.slane %v5108_v18, 7  ;;  %v2342_v54 = vrot.slane %v5037_v0, 1  ;;  %v5100_v56 = vor.u32 %v5485_v62, %v5099_v60  ;;  %v5476_v8 = vld [vmem:[#allocation2 + $0x1c] sm:$0x30]  ;;  %v2878_v19 = vld [vmem:[#allocation2 + $0xb0] sm:$0x7] }
 0x10f   : > { %2418 = vmatpush.bf16.msra.mxu3 %v6610_v28  ;;  %v2317_v48 = vunpack.c.l.b16 %v2268_v30  ;;  %2405 = vmatpush.bf16.msra.mxu2 %v2369_v52  ;;  %v2068_v20 = vsel %vm627_vm5, %v2060_v10, %v2032_v29  ;;  %v2358_v35 = vrot.slane %v5049_v22, 6  ;;  %v2647_v32 = vrot.slane %v5092_v49, 2  ;;  %v2876_v44 = vld [vmem:[#allocation2 + $0x80] sm:$0x7]  ;;  %v5067_v52 = vld [vmem:[#allocation2 + $0x3c] sm:$0x8] }
 0x110   : > { %v5112_v5 = vor.u32 %v5488_v1, %v5111_v58  ;;  %2109 = vmatpush.bf16.msra.mxu0 %v2065_v50  ;;  %v2631_v57 = vrot.slane %v5080_v11, 5  ;;  %v2663_v42 = vrot.slane %v5104_v15, 7  ;;  %v6674_v53 = vrot.slane %v5088_v25, 5  ;;  %v5478_v50 = vld [vmem:[#allocation2 + $0x44] sm:$0x30] }
 0x111   : > { %v2603_v28 = vrot.slane %v5060_v12, 3  ;;  %2123 = vmatpush.bf16.msra.mxu1 %v2068_v20  ;;  %v2687_v41 = vsel %vm637_vm7, %v2632_v47, %v2648_v16  ;;  %v2294_v4 = vrot.slane %v5013_v2, 2  ;;  %v5056_v63 = vor.u32 %v5475_v13, %v5055_v61  ;;  %v2877_v33 = vld [vmem:[#allocation2 + $0xa8] sm:$0x77]  ;;  %v2875_v18 = vld [vmem:[#allocation2 + $0x78] sm:$0x77] }
 0x112   : > { %v5064_v24 = vor.u32 %v5476_v8, %v5063_v14  ;;  %v2693_v26 = vsel %vm317_vm2, %v2687_v41, %v2664_v55  ;;  %v2385_v29 = vsel %vm637_vm7, %v2326_v46, %v2342_v54  ;;  %v2649_v3 = vrot.slane %v5100_v56, 2  ;;  %v5479_v45 = vld [vmem:[#allocation2 + $0x4c] sm:$0x30]  ;;  %v2880_v51 = vld [vmem:[#allocation2 + $0xe0] sm:$0x7] }
 0x113   : > { %2419 = vmatpush.bf16.msra.mxu3 %v2372_v34  ;;  %v2323_v40 = vpack.c.b16 %v2317_v48, %v2317_v48  ;;  %v2391_v9 = vsel %vm317_vm2, %v2385_v29, %v2358_v35  ;;  %v2685_v38 = vsel %vm637_vm7, %v2631_v57, %v2647_v32  ;;  %v2665_v21 = vrot.slane %v5112_v5, 7  ;;  %v5075_v60 = vld [vmem:[#allocation2 + $0x44] sm:$0x8]  ;;  %v2874_v12 = vld [vmem:[#allocation2 + $0x50] sm:$0x7] }
 0x114   : > { %v2310_v43 = vrot.slane %v5025_v31, 7  ;;  %v2691_v39 = vsel %vm317_vm2, %v2685_v38, %v2663_v42  ;;  %v2671_v37 = vsel %vm617_vm4, %v2603_v28, %v5072_v7  ;;  %v2904_v27 = vunpack.c.l.b16 %v2876_v44  ;;  %v2879_v58 = vld [vmem:[#allocation2 + $0xd8] sm:$0x77]  ;;  %v2872_v34 = vld [vmem:[#allocation2 + $0x20] sm:$0x7] }
 0x115   : > { %v2915_v36 = vunpack.c.l.b16 %v2878_v19  ;;  %v2679_v11 = vsel %vm627_vm5, %v2671_v37, %v2632_v47  ;;  %v2602_v25 = vrot.slane %v5056_v63, 3  ;;  %v5068_v59 = vor.u32 %v5478_v50, %v5067_v52  ;;  %v6694_v7 = vld [vmem:[#allocation2 + $0x78] sm:$0xee]  ;;  %v6703_v14 = vld [vmem:[#allocation2 + $0x48] sm:$0x77] }
 0x116   : > { %v2698_v46 = vsel %vm660_vm8, %v2693_v26, 0  ;;  %v2396_v0 = vsel %vm660_vm8, %v2391_v9, 0  ;;  %v2689_v17 = vsel %vm637_vm7, %v6674_v53, %v2649_v3  ;;  %v2913_v30 = vunpack.c.l.b16 %v2877_v33  ;;  %v6697_v13 = vld [vmem:[#allocation2 + $0xd8] sm:$0xee]  ;;  %v6713_v28 = vld [vmem:[#allocation2 + $0xa8] sm:$0xee] }
 0x117   : > { %v2696_v23 = vsel %vm660_vm8, %v2691_v39, 0  ;;  %v2695_v22 = vsel %vm317_vm2, %v2689_v17, %v2665_v21  ;;  %v2367_v49 = vsel %vm617_vm4, %v2294_v4, %v2310_v43  ;;  %v2604_v62 = vrot.slane %v5064_v24, 3 }
 0x118   : > { %v2375_v10 = vsel %vm627_vm5, %v2367_v49, %v2323_v40  ;;  %v6692_v47 = vpack.c.b16 %v2904_v27, %v2904_v27  ;;  %v2918_v15 = vpack.c.b16 %v2915_v36, %v2915_v36  ;;  %v2902_v1 = vunpack.c.l.b16 %v2875_v18  ;;  %v2871_v40 = vld [vmem:[#allocation2 + $0x18] sm:$0x77] }
 0x119   : > { %v2668_v16 = vsel %vm617_vm4, %v2602_v25, %v5068_v59  ;;  %v5076_v2 = vor.u32 %v5479_v45, %v5075_v60  ;;  %v2926_v31 = vunpack.c.l.b16 %v2880_v51  ;;  %v2914_v61 = vunpack.c.h.b16 %v2877_v33  ;;  %v6732_v25 = vld [vmem:[#allocation2 + $0x48] sm:$0xee] }
 0x11a   : > { %4998 = vmatmul.msk.bf16.vlgmr.msrb.gmra.mxu2 %vm656_vm9, %v6408_v6  ;;  %v2700_v55 = vsel %vm660_vm8, %v2695_v22, 0  ;;  %v2676_v54 = vsel %vm627_vm5, %v2668_v16, %v2631_v57  ;;  %v2916_v56 = vpack.c.b16 %v2913_v30, %v2913_v30  ;;  %v2893_v48 = vunpack.c.l.b16 %v2874_v12 }
 0x11b   : > { %2722 = vmatpush.bf16.msrb.mxu2 %v2698_v46  ;;  %4996 = vmatmul.msk.bf16.vlgmr.msrb.gmra.mxu0 %vm656_vm9, %v6408_v6  ;;  %v2924_v8 = vunpack.c.l.b16 %v2879_v58  ;;  %v2903_v20 = vunpack.c.h.b16 %v2875_v18  ;;  %v3168_v35 = vunpack.c.l.b16 %v6694_v7  ;;  %v2885_v32 = vunpack.c.l.b16 %v2872_v34 }
 0x11c   : > { %4997 = vmatmul.msk.bf16.vlgmr.msrb.gmra.mxu1 %vm656_vm9, %v6408_v6  ;;  %2432 = vmatpush.bf16.msrb.mxu0 %v2396_v0  ;;  %v2910_v5 = vrot.slane %v6692_v47, 2  ;;  %v2921_v57 = vrot.slane %v2918_v15, 7  ;;  %v6711_v42 = vpack.c.b16 %v2902_v1, %v2902_v1  ;;  %v3187_v41 = vunpack.c.l.b16 %v6697_v13 }
 0x11d   : > { %2708 = vmatpush.bf16.msrb.mxu1 %v2696_v23  ;;  %v2674_v4 = vsel %vm617_vm4, %v2604_v62, %v5076_v2  ;;  %v2929_v63 = vpack.c.b16 %v2926_v31, %v2926_v31  ;;  %v2917_v24 = vpack.c.b16 %v2914_v61, %v2914_v61  ;;  %v2891_v44 = vunpack.c.l.b16 %v6703_v14  ;;  %v3139_v62 = vld [vmem:[#allocation2 + $0x80] sm:$0xe] }
 0x11e   : > { %4999 = vmatmul.msk.bf16.vlgmr.msrb.gmra.mxu3 %vm656_vm9, %v6408_v6  ;;  %v2682_v19 = vsel %vm627_vm5, %v2674_v4, %v6674_v53  ;;  %v2919_v26 = vrot.slane %v2916_v56, 7  ;;  %v2925_v29 = vunpack.c.h.b16 %v2879_v58  ;;  %v2896_v3 = vpack.c.b16 %v2893_v48, %v2893_v48  ;;  %v6729_v53 = vld [vmem:[#allocation2 + $0x18] sm:$0xee]  ;;  %v3143_v2 = vld [vmem:[#allocation2 + $0xe0] sm:$0xe] }
 0x11f   : > { %2736 = vmatpush.bf16.msrb.mxu3 %v2700_v55  ;;  %2723 = vmatpush.bf16.msrb.mxu2 %v2679_v11  ;;  %v2927_v52 = vpack.c.b16 %v2924_v8, %v2924_v8  ;;  %v6722_v50 = vpack.c.b16 %v2903_v20, %v2903_v20  ;;  %v6724_v9 = vpack.c.b16 %v3168_v35, %v3168_v35  ;;  %v3179_v38 = vunpack.c.l.b16 %v6713_v28  ;;  %v5148_v56 = vld [vmem:[#allocation2 + $0xa8] sm:$0xc]  ;;  %v5496_v48 = vld [vmem:[#allocation2 + $0xb0] sm:$0x10]  ;;  %v5160_v4 = vld [vmem:[#allocation2 + $0xd8] sm:$0xc] }
 0x120   : > { %2433 = vmatpush.bf16.msrb.mxu0 %v2375_v10  ;;  %v2953_v21 = vsel %vm637_vm7, %v2910_v5, %v2921_v57  ;;  %v2908_v43 = vrot.slane %v6711_v42, 2  ;;  %v3190_v33 = vpack.c.b16 %v3187_v41, %v3187_v41  ;;  %v2888_v39 = vpack.c.b16 %v2885_v32, %v2885_v32  ;;  %v3141_v57 = vld [vmem:[#allocation2 + $0xb0] sm:$0xe] }
 0x121   : > { %2709 = vmatpush.bf16.msrb.mxu1 %v2676_v54  ;;  %v2959_v37 = vsel %vm317_vm2, %v2953_v21, %v2929_v63  ;;  %v2920_v27 = vrot.slane %v2917_v24, 7  ;;  %v2883_v36 = vunpack.c.l.b16 %v2871_v40  ;;  %v2894_v11 = vpack.c.b16 %v2891_v44, %v2891_v44  ;;  %v3413_v54 = vld [vmem:[#allocation2 + $0x84] sm:$0x11]  ;;  %v5498_v21 = vld [vmem:[#allocation2 + $0xdc] sm:$0xc] }
 0x122   : > { %v2949_v59 = vsel %vm637_vm7, %v2908_v43, %v2919_v26  ;;  %v2928_v18 = vpack.c.b16 %v2925_v29, %v2925_v29  ;;  %v2899_v46 = vrot.slane %v2896_v3, 5  ;;  %v2892_v0 = vunpack.c.h.b16 %v6703_v14  ;;  %v5499_v63 = vld [vmem:[#allocation2 + $0xe0] sm:$0x10]  ;;  %v5495_v3 = vld [vmem:[#allocation2 + $0xac] sm:$0xc] }
 0x123   : > { %2737 = vmatpush.bf16.msrb.mxu3 %v2682_v19  ;;  %v2955_v17 = vsel %vm317_vm2, %v2949_v59, %v2927_v52  ;;  %v2909_v45 = vrot.slane %v6722_v50, 2  ;;  %v3182_v51 = vpack.c.b16 %v3179_v38, %v3179_v38  ;;  %v3146_v30 = vunpack.c.l.b16 %v6729_v53 }
 0x124   : > { %v3174_v23 = vrot.slane %v6724_v9, 3  ;;  %v3193_v22 = vrot.slane %v3190_v33, 5  ;;  %v2884_v49 = vunpack.c.h.b16 %v2871_v40  ;;  %v3157_v60 = vunpack.c.l.b16 %v6732_v25  ;;  %v5162_v33 = vld [vmem:[#allocation2 + $0xe4] sm:$0x10] }
 0x125   : > { %v2964_v12 = vsel %vm660_vm8, %v2959_v37, 0  ;;  %v2951_v10 = vsel %vm637_vm7, %v2909_v45, %v2920_v27  ;;  %v2886_v47 = vpack.c.b16 %v2883_v36, %v2883_v36  ;;  %v2897_v15 = vrot.slane %v2894_v11, 5 }
 0x126   : > { %v2960_v58 = vsel %vm660_vm8, %v2955_v17, 0  ;;  %v2957_v1 = vsel %vm317_vm2, %v2951_v10, %v2928_v18  ;;  %v2938_v34 = vsel %vm617_vm4, %v2888_v39, %v2899_v46  ;;  %v2895_v16 = vpack.c.b16 %v2892_v0, %v2892_v0 }
 0x127   : > { %v3215_v31 = vsel %vm637_vm7, %v3174_v23, %v3182_v51  ;;  %v2946_v61 = vsel %vm627_vm5, %v2938_v34, %v2910_v5  ;;  %v3149_v55 = vpack.c.b16 %v3146_v30, %v3146_v30  ;;  %v3170_v14 = vunpack.c.l.b16 %v3139_v62  ;;  %v5490_v62 = vld [vmem:[#allocation2 + $0x20] sm:$0x10]  ;;  %v3137_v34 = vld [vmem:[#allocation2 + $0x50] sm:$0xe] }
 0x128   : > { %v3221_v8 = vsel %vm317_vm2, %v3215_v31, %v3193_v22  ;;  %v2887_v20 = vpack.c.b16 %v2884_v49, %v2884_v49  ;;  %v3160_v35 = vpack.c.b16 %v3157_v60, %v3157_v60  ;;  %v3188_v32 = vunpack.c.h.b16 %v6697_v13  ;;  %v5150_v13 = vld [vmem:[#allocation2 + $0xb4] sm:$0x10]  ;;  %v5124_v60 = vld [vmem:[#allocation2 + $0x18] sm:$0xc]  ;;  %v5489_v31 = vld [vmem:[#allocation2 + $0x1c] sm:$0xc] }
 0x129   : > { %v2962_v42 = vsel %vm660_vm8, %v2957_v1, 0  ;;  %v2932_v41 = vsel %vm617_vm4, %v2886_v47, %v2897_v15  ;;  %v3169_v5 = vunpack.c.h.b16 %v6694_v7  ;;  %v3189_v24 = vunpack.c.l.b16 %v3143_v2  ;;  %v3135_v1 = vld [vmem:[#allocation2 + $0x20] sm:$0xe] }
 0x12a   : > { %5050 = vmatmul.msk.bf16.vlgmr.msra.gmra.mxu2 %vm656_vm9, %v6408_v6  ;;  %v2940_v44 = vsel %vm627_vm5, %v2932_v41, %v2908_v43  ;;  %v2898_v19 = vrot.slane %v2895_v16, 5  ;;  %v3462_v26 = vunpack.c.l.b16 %v3413_v54  ;;  %v5149_v29 = vor.u32 %v5496_v48, %v5148_v56  ;;  %v5126_v48 = vld [vmem:[#allocation2 + $0x24] sm:$0x10]  ;;  %v5492_v41 = vld [vmem:[#allocation2 + $0x4c] sm:$0xc] }
 0x12b   : > { %3000 = vmatpush.bf16.msra.mxu2 %v2964_v12  ;;  %5000 = vmatmul.msk.bf16.vlgmr.msra.gmra.mxu0 %vm656_vm9, %v6408_v6  ;;  %v3152_v40 = vrot.slane %v3149_v55, 1  ;;  %v3180_v52 = vunpack.c.h.b16 %v6713_v28  ;;  %v6763_v38 = vpack.c.b16 %v3170_v14, %v3170_v14  ;;  %v3181_v7 = vunpack.c.l.b16 %v3141_v57  ;;  %v5493_v12 = vld [vmem:[#allocation2 + $0x50] sm:$0x10]  ;;  %v5138_v14 = vld [vmem:[#allocation2 + $0x54] sm:$0x10] }
 0x12c   : > { %5001 = vmatmul.msk.bf16.vlgmr.msra.gmra.mxu1 %vm656_vm9, %v6408_v6  ;;  %2972 = vmatpush.bf16.msra.mxu0 %v2960_v58  ;;  %v3163_v43 = vrot.slane %v3160_v35, 6  ;;  %v5161_v39 = vor.u32 %v5499_v63, %v5160_v4  ;;  %v3191_v37 = vpack.c.b16 %v3188_v32, %v3188_v32  ;;  %v3463_v27 = vunpack.c.h.b16 %v3413_v54 }
 0x12d   : > { %2986 = vmatpush.bf16.msra.mxu1 %v2962_v42  ;;  %v3226_v36 = vsel %vm660_vm8, %v3221_v8, 0  ;;  %v6770_v28 = vpack.c.b16 %v3169_v5, %v3169_v5  ;;  %v3192_v11 = vpack.c.b16 %v3189_v24, %v3189_v24  ;;  %v5153_v59 = vor.u32 %v5495_v3, %v5150_v13  ;;  %v5136_v8 = vld [vmem:[#allocation2 + $0x48] sm:$0xc] }
 0x12e   : > { %5051 = vmatmul.msk.bf16.vlgmr.msra.gmra.mxu3 %vm656_vm9, %v6408_v6  ;;  %v2935_v18 = vsel %vm617_vm4, %v2887_v20, %v2898_v19  ;;  %v3468_v46 = vpack.c.b16 %v3462_v26, %v3462_v26  ;;  %v3484_v0 = vrot.slane %v5149_v29, 1  ;;  %v5165_v17 = vor.u32 %v5498_v21, %v5162_v33  ;;  %v3411_v20 = vld [vmem:[#allocation2 + $0x78] sm:$0xcc] }
 0x12f   : > { %3238 = vmatpush.bf16.msra.mxu3 %v3226_v36  ;;  %3001 = vmatpush.bf16.msra.mxu2 %v2946_v61  ;;  %v2943_v51 = vsel %vm627_vm5, %v2935_v18, %v2909_v45  ;;  %v3183_v30 = vpack.c.b16 %v3180_v52, %v3180_v52  ;;  %v3176_v22 = vrot.slane %v6763_v38, 3  ;;  %v3184_v49 = vpack.c.b16 %v3181_v7, %v3181_v7  ;;  %v6800_v36 = vld [vmem:[#allocation2 + $0x7c] sm:$0x8] }
 0x130   : > { %2973 = vmatpush.bf16.msra.mxu0 %v2940_v44  ;;  %v3198_v10 = vsel %vm617_vm4, %v3152_v40, %v3163_v43  ;;  %v3500_v47 = vrot.slane %v5161_v39, 6  ;;  %v3194_v15 = vrot.slane %v3191_v37, 5  ;;  %v3469_v58 = vpack.c.b16 %v3463_v27, %v3463_v27 }
 0x131   : > { %2987 = vmatpush.bf16.msra.mxu1 %v2943_v51  ;;  %v3206_v50 = vsel %vm627_vm5, %v3198_v10, %v3174_v23  ;;  %v3175_v45 = vrot.slane %v6770_v28, 3  ;;  %v3195_v16 = vrot.slane %v3192_v11, 5  ;;  %v3485_v2 = vrot.slane %v5153_v59, 1  ;;  %v6802_v11 = vld [vmem:[#allocation2 + $0x84] sm:$0x30] }
 0x132   : > { %v3523_v61 = vsel %vm637_vm7, %v3468_v46, %v3484_v0  ;;  %v3501_v55 = vrot.slane %v5165_v17, 6  ;;  %v3147_v54 = vunpack.c.h.b16 %v6729_v53  ;;  %v3158_v56 = vunpack.c.h.b16 %v6732_v25  ;;  %v5510_v0 = vld [vmem:[#allocation2 + $0xac] sm:$0x8]  ;;  %v5213_v17 = vld [vmem:[#allocation2 + $0xb4] sm:$0x30] }
 0x133   : > { %3239 = vmatpush.bf16.msra.mxu3 %v3206_v50  ;;  %v3217_v9 = vsel %vm637_vm7, %v3175_v45, %v3183_v30  ;;  %v3219_v23 = vsel %vm637_vm7, %v3176_v22, %v3184_v49  ;;  %v3148_v35 = vunpack.c.l.b16 %v3135_v1  ;;  %v3159_v32 = vunpack.c.l.b16 %v3137_v34  ;;  %v5513_v49 = vld [vmem:[#allocation2 + $0xdc] sm:$0x8]  ;;  %v5497_v10 = vld [vmem:[#allocation2 + $0xb8] sm:$0x10]  ;;  %v5500_v34 = vld [vmem:[#allocation2 + $0xe8] sm:$0x10] }
 0x134   : > { %v3531_v57 = vsel %vm317_vm2, %v3523_v61, %v3500_v47  ;;  %v3223_v53 = vsel %vm317_vm2, %v3217_v9, %v3194_v15  ;;  %v5125_v42 = vor.u32 %v5490_v62, %v5124_v60  ;;  %v5137_v25 = vor.u32 %v5493_v12, %v5136_v8  ;;  %v5225_v60 = vld [vmem:[#allocation2 + $0xe4] sm:$0x30]  ;;  %v3414_v62 = vld [vmem:[#allocation2 + $0x8c] sm:$0x1]  ;;  %v5156_v12 = vld [vmem:[#allocation2 + $0xb0] sm:$0xc] }
 0x135   : > { %v3225_v4 = vsel %vm317_vm2, %v3219_v23, %v3195_v16  ;;  %v3526_v63 = vsel %vm637_vm7, %v3469_v58, %v3485_v2  ;;  %v5129_v5 = vor.u32 %v5489_v31, %v5126_v48  ;;  %v5141_v24 = vor.u32 %v5492_v41, %v5138_v14  ;;  %v5168_v47 = vld [vmem:[#allocation2 + $0xe0] sm:$0xc]  ;;  %v5199_v50 = vld [vmem:[#allocation2 + $0x78] sm:$0x8]  ;;  %v5211_v16 = vld [vmem:[#allocation2 + $0xa8] sm:$0x8] }
 0x136   : > { %v3533_v44 = vsel %vm317_vm2, %v3526_v63, %v3501_v55  ;;  %v3459_v19 = vunpack.c.l.b16 %v3411_v20  ;;  %v3150_v26 = vpack.c.b16 %v3147_v54, %v3147_v54  ;;  %v3161_v29 = vpack.c.b16 %v3158_v56, %v3158_v56  ;;  %v5511_v2 = vld [vmem:[#allocation2 + $0xb0] sm:$0x30]  ;;  %v5223_v56 = vld [vmem:[#allocation2 + $0xd8] sm:$0x8]  ;;  %v5514_v48 = vld [vmem:[#allocation2 + $0xe0] sm:$0x30] }
 0x137   : > { %v3536_v3 = vsel %vm660_vm8, %v3531_v57, 0  ;;  %v3151_v13 = vpack.c.b16 %v3148_v35, %v3148_v35  ;;  %v3162_v40 = vpack.c.b16 %v3159_v32, %v3159_v32  ;;  %v3228_v52 = vsel %vm660_vm8, %v3223_v53, 0  ;;  %v5512_v14 = vld [vmem:[#allocation2 + $0xb8] sm:$0x30]  ;;  %v5508_v35 = vld [vmem:[#allocation2 + $0x80] sm:$0x30] }
 0x138   : > { %v3230_v7 = vsel %vm660_vm8, %v3225_v4, 0  ;;  %v3436_v21 = vrot.slane %v5125_v42, 2  ;;  %v3452_v33 = vrot.slane %v5137_v25, 7  ;;  %v3538_v43 = vsel %vm660_vm8, %v3533_v44, 0  ;;  %v5231_v32 = vld [vmem:[#allocation2 + $0xe0] sm:$0x8] }
 0x139   : > { %v3437_v39 = vrot.slane %v5129_v5, 2  ;;  %v3453_v37 = vrot.slane %v5141_v24, 7  ;;  %v3460_v27 = vunpack.c.h.b16 %v3411_v20  ;;  %v3465_v59 = vpack.c.b16 %v3459_v19, %v3459_v19  ;;  %v5515_v57 = vld [vmem:[#allocation2 + $0xe8] sm:$0x30]  ;;  %v5207_v4 = vld [vmem:[#allocation2 + $0x80] sm:$0x8] }
 0x13a   : > { %5114 = vmatmul.msk.bf16.vlgmr.msrb.gmra.mxu2 %vm656_vm9, %v6408_v6  ;;  %v3153_v18 = vrot.slane %v3150_v26, 1  ;;  %v3164_v46 = vrot.slane %v3161_v29, 6  ;;  %v3154_v51 = vrot.slane %v3151_v13, 1  ;;  %v3165_v30 = vrot.slane %v3162_v40, 6  ;;  %v5509_v63 = vld [vmem:[#allocation2 + $0x88] sm:$0x30] }
 0x13b   : > { %3548 = vmatpush.bf16.msrb.mxu2 %v3536_v3  ;;  %5052 = vmatmul.msk.bf16.vlgmr.msrb.gmra.mxu0 %vm656_vm9, %v6408_v6  ;;  %v3505_v15 = vsel %vm617_vm4, %v3436_v21, %v3452_v33  ;;  %v3466_v58 = vpack.c.b16 %v3460_v27, %v3460_v27  ;;  %v5216_v1 = vor.u32 %v5510_v0, %v5213_v17  ;;  %v3464_v42 = vunpack.c.l.b16 %v3414_v62  ;;  %v5219_v28 = vld [vmem:[#allocation2 + $0xb0] sm:$0x8]  ;;  %v5501_v5 = vld [vmem:[#allocation2 + $0x1c] sm:$0x8]  ;;  %v5177_v26 = vld [vmem:[#allocation2 + $0x24] sm:$0x30] }
 0x13c   : > { %5113 = vmatmul.msk.bf16.vlgmr.msrb.gmra.mxu1 %vm656_vm9, %v6408_v6  ;;  %3252 = vmatpush.bf16.msrb.mxu0 %v3228_v52  ;;  %v3513_v31 = vsel %vm627_vm5, %v3505_v15, %v3465_v59  ;;  %v3201_v61 = vsel %vm617_vm4, %v3153_v18, %v3164_v46  ;;  %v3508_v55 = vsel %vm617_vm4, %v3437_v39, %v3453_v37  ;;  %v3412_v29 = vld [vmem:[#allocation2 + $0x80] sm:$0xc]  ;;  %v5144_v40 = vld [vmem:[#allocation2 + $0x50] sm:$0xc]  ;;  %v5502_v59 = vld [vmem:[#allocation2 + $0x20] sm:$0x30] }
 0x13d   : > { %3266 = vmatpush.bf16.msrb.mxu1 %v3230_v7  ;;  %v5204_v54 = vor.u32 %v6800_v36, %v6802_v11  ;;  %v3209_v9 = vsel %vm627_vm5, %v3201_v61, %v3175_v45  ;;  %v3204_v23 = vsel %vm617_vm4, %v3154_v51, %v3165_v30  ;;  %v5228_v8 = vor.u32 %v5513_v49, %v5225_v60  ;;  %v5132_v13 = vld [vmem:[#allocation2 + $0x20] sm:$0xc]  ;;  %v5175_v11 = vld [vmem:[#allocation2 + $0x18] sm:$0x8]  ;;  %v5503_v30 = vld [vmem:[#allocation2 + $0x28] sm:$0x30] }
 0x13e   : > { %5115 = vmatmul.msk.bf16.vlgmr.msrb.gmra.mxu3 %vm656_vm9, %v6408_v6  ;;  %v5157_v20 = vor.u32 %v5497_v10, %v5156_v12  ;;  %v3212_v53 = vsel %vm627_vm5, %v3204_v23, %v3176_v22  ;;  %v5169_v25 = vor.u32 %v5500_v34, %v5168_v47  ;;  %v5212_v41 = vor.u32 %v5511_v2, %v5211_v16  ;;  %v5491_v22 = vld [vmem:[#allocation2 + $0x28] sm:$0x10]  ;;  %v5183_v51 = vld [vmem:[#allocation2 + $0x20] sm:$0x8]  ;;  %v5189_v62 = vld [vmem:[#allocation2 + $0x54] sm:$0x30] }
 0x13f   : > { %3562 = vmatpush.bf16.msrb.mxu3 %v3538_v43  ;;  %3549 = vmatpush.bf16.msrb.mxu2 %v3513_v31  ;;  %v3516_v45 = vsel %vm627_vm5, %v3508_v55, %v3466_v58  ;;  %v3792_v24 = vrot.slane %v5216_v1, 2  ;;  %v5224_v44 = vor.u32 %v5514_v48, %v5223_v56  ;;  %v5220_v19 = vor.u32 %v5512_v14, %v5219_v28  ;;  %v5494_v43 = vld [vmem:[#allocation2 + $0x58] sm:$0x10]  ;;  %v5504_v16 = vld [vmem:[#allocation2 + $0x4c] sm:$0x8] }
 0x140   : > { %3253 = vmatpush.bf16.msrb.mxu0 %v3209_v9  ;;  %v5200_v3 = vor.u32 %v5508_v35, %v5199_v50  ;;  %v5232_v38 = vor.u32 %v5515_v57, %v5231_v32  ;;  %v3776_v52 = vrot.slane %v5204_v54, 5  ;;  %v3808_v7 = vrot.slane %v5228_v8, 7  ;;  %v5505_v2 = vld [vmem:[#allocation2 + $0x50] sm:$0x30]  ;;  %v5195_v48 = vld [vmem:[#allocation2 + $0x50] sm:$0x8] }
 0x141   : > { %3267 = vmatpush.bf16.msrb.mxu1 %v3212_v53  ;;  %v3486_v21 = vrot.slane %v5157_v20, 1  ;;  %v5208_v33 = vor.u32 %v5509_v63, %v5207_v4  ;;  %v3470_v39 = vpack.c.b16 %v3464_v42, %v3464_v42  ;;  %v3502_v37 = vrot.slane %v5169_v25, 6  ;;  %v5506_v14 = vld [vmem:[#allocation2 + $0x58] sm:$0x30]  ;;  %v5187_v35 = vld [vmem:[#allocation2 + $0x48] sm:$0x8] }
 0x142   : > { %v3791_v27 = vrot.slane %v5212_v41, 2  ;;  %v3461_v36 = vunpack.c.l.b16 %v3412_v29  ;;  %v3831_v18 = vsel %vm637_vm7, %v3776_v52, %v3792_v24  ;;  %v3807_v46 = vrot.slane %v5224_v44, 7 }
 0x143   : > { %3563 = vmatpush.bf16.msrb.mxu3 %v3516_v45  ;;  %v3793_v0 = vrot.slane %v5220_v19, 2  ;;  %v5180_v17 = vor.u32 %v5501_v5, %v5177_v26  ;;  %v3775_v49 = vrot.slane %v5200_v3, 5  ;;  %v3809_v60 = vrot.slane %v5232_v38, 7 }
 0x144   : > { %v5133_v12 = vor.u32 %v5491_v22, %v5132_v13  ;;  %v5145_v10 = vor.u32 %v5494_v43, %v5144_v40  ;;  %v3837_v47 = vsel %vm317_vm2, %v3831_v18, %v3808_v7  ;;  %v3529_v15 = vsel %vm637_vm7, %v3470_v39, %v3486_v21  ;;  %v8341_v13 = vld [vmem:[#allocation6_spill] sm:$0xff]  ;;  %v8342_v39 = vld [vmem:[#allocation8_spill] sm:$0xff] }
 0x145   : > { %v3777_v58 = vrot.slane %v5208_v33, 5  ;;  %v5176_v1 = vor.u32 %v5502_v59, %v5175_v11  ;;  %v3535_v34 = vsel %vm317_vm2, %v3529_v15, %v3502_v37  ;;  %v3829_v50 = vsel %vm637_vm7, %v3775_v49, %v3791_v27 }
 0x146   : > { %v5184_v31 = vor.u32 %v5503_v30, %v5183_v51  ;;  %v3835_v61 = vsel %vm317_vm2, %v3829_v50, %v3807_v46  ;;  %v3747_v54 = vrot.slane %v5180_v17, 3  ;;  %v5192_v56 = vor.u32 %v5504_v16, %v5189_v62 }
 0x147   : > { %v3833_v55 = vsel %vm637_vm7, %v3777_v58, %v3793_v0  ;;  %v3842_v9 = vsel %vm660_vm8, %v3837_v47, 0  ;;  %v3438_v8 = vrot.slane %v5133_v12, 2  ;;  %v3454_v20 = vrot.slane %v5145_v10, 7 }
 0x148   : > { %v3839_v23 = vsel %vm317_vm2, %v3833_v55, %v3809_v60  ;;  %v3540_v32 = vsel %vm660_vm8, %v3535_v34, 0  ;;  %v3467_v57 = vpack.c.b16 %v3461_v36, %v3461_v36  ;;  %v3746_v53 = vrot.slane %v5176_v1, 3 }
 0x149   : > { %v5188_v42 = vor.u32 %v5505_v2, %v5187_v35  ;;  %v3840_v25 = vsel %vm660_vm8, %v3835_v61, 0  ;;  %v3748_v41 = vrot.slane %v5184_v31, 3  ;;  %v5196_v4 = vor.u32 %v5506_v14, %v5195_v48 }
 0x14a   : > { %5118 = vmatmul.msk.bf16.vlgmr.msra.gmra.mxu2 %vm656_vm9, %v6408_v6  ;;  %v3844_v63 = vsel %vm660_vm8, %v3839_v23, 0  ;;  %v3815_v28 = vsel %vm617_vm4, %v3747_v54, %v5192_v56  ;;  %v3511_v45 = vsel %vm617_vm4, %v3438_v8, %v3454_v20 }
 0x14b   : > { %3866 = vmatpush.bf16.msra.mxu2 %v3842_v9  ;;  %5116 = vmatmul.msk.bf16.vlgmr.msra.gmra.mxu0 %vm656_vm9, %v6408_v6  ;;  %v3823_v5 = vsel %vm627_vm5, %v3815_v28, %v3776_v52  ;;  %v3519_v24 = vsel %vm627_vm5, %v3511_v45, %v3467_v57  ;;  %v3812_v44 = vsel %vm617_vm4, %v3746_v53, %v5188_v42 }
 0x14c   : > { %5117 = vmatmul.msk.bf16.vlgmr.msra.gmra.mxu1 %vm656_vm9, %v6408_v6  ;;  %3576 = vmatpush.bf16.msra.mxu0 %v3540_v32  ;;  %v3820_v19 = vsel %vm627_vm5, %v3812_v44, %v3775_v49  ;;  %v3818_v26 = vsel %vm617_vm4, %v3748_v41, %v5196_v4 }
 0x14d   : > { %3852 = vmatpush.bf16.msra.mxu1 %v3840_v25  ;;  %v3826_v29 = vsel %vm627_vm5, %v3818_v26, %v3777_v58 }
 0x14e   : > { %5119 = vmatmul.msk.bf16.vlgmr.msra.gmra.mxu3 %vm656_vm9, %v6408_v6 }
 0x14f   : > { %3880 = vmatpush.bf16.msra.mxu3 %v3844_v63  ;;  %3867 = vmatpush.bf16.msra.mxu2 %v3823_v5 }
 0x150   : > { %3577 = vmatpush.bf16.msra.mxu0 %v3519_v24 }
 0x151   : > { %3853 = vmatpush.bf16.msra.mxu1 %v3820_v19 }
 0x153   : > { %3881 = vmatpush.bf16.msra.mxu3 %v3826_v29 }
 0x15a   : > { %5170 = vmatmul.msk.bf16.vlgmr.msrb.gmra.mxu2 %vm656_vm9, %v6408_v6 }
 0x15b   : > { %5120 = vmatmul.msk.bf16.vlgmr.msrb.gmra.mxu0 %vm656_vm9, %v6408_v6 }
 0x15c   : > { %5121 = vmatmul.msk.bf16.vlgmr.msrb.gmra.mxu1 %vm656_vm9, %v6408_v6 }
 0x15e   : > { %5171 = vmatmul.msk.bf16.vlgmr.msrb.gmra.mxu3 %vm656_vm9, %v6408_v6 }
 0x168   : > { %v676_v3 = vpop.f32.mrf.mxu0 }
 0x169   : > { %v690_v38 = vpop.f32.mrf.mxu1  ;;  %v677_v22 = vadd.f32 %v676_v3, %v8341_v13 }
 0x16a   : > { %5234 = vmatmul.msk.bf16.vlgmr.msra.gmra.mxu2 %vm656_vm9, %v6408_v6  ;;  %v691_v40 = vadd.f32 %v690_v38, %v8341_v13 }
 0x16b   : > { %5172 = vmatmul.msk.bf16.vlgmr.msra.gmra.mxu0 %vm656_vm9, %v6408_v6  ;;  %v709_v33 = vmax.f32 %v677_v22, 0.0 }
 0x16c   : > { %5233 = vmatmul.msk.bf16.vlgmr.msra.gmra.mxu1 %vm656_vm9, %v6408_v6  ;;  %v6870_v52 = vpop.f32.mrf.mxu2  ;;  %v710_v43 = vmax.f32 %v691_v40, 0.0 }
 0x16d   : > { %v722_v18 = vrot.slane %v709_v33, 6 }
 0x16e   : > { %5235 = vmatmul.msk.bf16.vlgmr.msra.gmra.mxu3 %vm656_vm9, %v6408_v6  ;;  %v725_v46 = vrot.slane %v710_v43, 6 }
 0x170   : > { %v678_v7 = vpop.f32.mrf.mxu0 }
 0x171   : > { %v692_v21 = vpop.f32.mrf.mxu1  ;;  %v679_v37 = vadd.f32 %v678_v7, %v8342_v39  ;;  %v6876_v36 = vpop.f32.mrf.mxu3 }
 0x172   : > { %v693_v27 = vadd.f32 %v692_v21, %v8342_v39 }
 0x173   : > { %v712_v11 = vmax.f32 %v679_v37, 0.0 }
 0x174   : > { %v713_v59 = vmax.f32 %v693_v27, 0.0  ;;  %v6878_v51 = vpop.f32.mrf.mxu2 }
 0x175   : > { %v723_v0 = vrot.slane %v712_v11, 6 }
 0x176   : > { %v726_v17 = vrot.slane %v713_v59, 6 }
 0x177   : > { %v724_v6 = vsel %vm721_vm10, %v722_v18, %v723_v0 }
 0x178   : > { %v727_v30 = vsel %vm721_vm10, %v725_v46, %v726_v17  ;;  %v967_v49 = vpop.f32.mrf.mxu0  ;;  %v6882_v60 = vmax.f32 %v709_v33, %v724_v6 }
 0x179   : > { %v6884_v62 = vmax.f32 %v710_v43, %v727_v30  ;;  %v6886_v12 = vpop.f32.mrf.mxu3  ;;  %v981_v10 = vpop.f32.mrf.mxu1  ;;  %v968_v15 = vadd.f32 %v967_v49, %v8341_v13 }
 0x17a   : > { %v982_v1 = vadd.f32 %v981_v10, %v8341_v13 }
 0x17b   : > { %v5579_v47 = vpack.i.bf16 %v6884_v62, %v6882_v60  ;;  %v987_v50 = vmax.f32 %v968_v15, 0.0 }
 0x17c   : > { %v1263_v58 = vpop.f32.mrf.mxu2  ;;  %v988_v61 = vmax.f32 %v982_v1, 0.0 }
 0x17d   : > { %5580 = vrot.lane.b32.xlu1 %v5579_v47, %s5918_s9  ;;  %v1264_v56 = vadd.f32 %v1263_v58, %v8341_v13  ;;  %v1001_v14 = vrot.slane %v987_v50, 6 }
 0x17e   : > { %v1004_v8 = vrot.slane %v988_v61, 6 }
 0x17f   : > { %v1296_v53 = vmax.f32 %v1264_v56, 0.0 }
 0x180   : > { %v969_v34 = vpop.f32.mrf.mxu0 }
 0x181   : > { %v970_v16 = vadd.f32 %v969_v34, %v8342_v39  ;;  %v983_v2 = vpop.f32.mrf.mxu1  ;;  %v1277_v31 = vpop.f32.mrf.mxu3  ;;  %v1308_v26 = vrot.slane %v1296_v53, 6 }
 0x182   : > { %v984_v55 = vadd.f32 %v983_v2, %v8342_v39  ;;  %v1278_v35 = vadd.f32 %v1277_v31, %v8341_v13 }
 0x183   : > { %v990_v54 = vmax.f32 %v970_v16, 0.0 }
 0x184   : > { %v991_v48 = vmax.f32 %v984_v55, 0.0  ;;  %v1265_v23 = vpop.f32.mrf.mxu2  ;;  %v1297_v45 = vmax.f32 %v1278_v35, 0.0 }
 0x185   : > { %v1002_v9 = vrot.slane %v990_v54, 6  ;;  %v1266_v32 = vadd.f32 %v1265_v23, %v8342_v39 }
 0x186   : > { %v1005_v20 = vrot.slane %v991_v48, 6  ;;  %v1311_v22 = vrot.slane %v1297_v45, 6 }
 0x187   : > { %v1003_v57 = vsel %vm721_vm10, %v1001_v14, %v1002_v9  ;;  %v1299_v25 = vmax.f32 %v1266_v32, 0.0 }
 0x188   : > { %v1006_v42 = vsel %vm721_vm10, %v1004_v8, %v1005_v20  ;;  %v1291_v41 = vpop.f32.mrf.mxu0  ;;  %v6900_v4 = vmax.f32 %v987_v50, %v1003_v57 }
 0x189   : > { %v1279_v63 = vpop.f32.mrf.mxu3  ;;  %v1567_v28 = vpop.f32.mrf.mxu1  ;;  %v6902_v5 = vmax.f32 %v988_v61, %v1006_v42  ;;  %v1309_v24 = vrot.slane %v1299_v25, 6  ;;  %v6908_v3 = vadd.f32 %v1291_v41, %v8341_v13 }
 0x18a   : > { %v1280_v44 = vadd.f32 %v1279_v63, %v8342_v39  ;;  %v6913_v21 = vadd.f32 %v1567_v28, %v8341_v13 }
 0x18b   : > { %v5584_v19 = vpack.i.bf16 %v6902_v5, %v6900_v4  ;;  %v1310_v40 = vsel %vm721_vm10, %v1308_v26, %v1309_v24  ;;  %v1298_v37 = vmax.f32 %v6908_v3, 0.0 }
 0x18c   : > { %v1300_v29 = vmax.f32 %v1280_v44, 0.0  ;;  %v6918_v18 = vmax.f32 %v1296_v53, %v1310_v40  ;;  %v8308_v0 = vmax.f32 %v6913_v21, 0.0 }
 0x18d   : > { %5585 = vrot.lane.b32.xlu1 %v5584_v19, %s5918_s9  ;;  %v1581_v38 = vpop.f32.mrf.mxu2  ;;  %v1314_v47 = vrot.slane %v1298_v37, 6 }
 0x18e   : > { %v1312_v7 = vrot.slane %v1300_v29, 6  ;;  %v1582_v49 = vadd.f32 %v1581_v38, %v8341_v13  ;;  %v1612_v1 = vrot.slane %v8308_v0, 6 }
 0x190   : > { %v1313_v33 = vsel %vm721_vm10, %v1311_v22, %v1312_v7  ;;  %v1293_v43 = vpop.f32.mrf.mxu0  ;;  %v1601_v31 = vmax.f32 %v1582_v49, 0.0 }
 0x191   : > { %v1294_v27 = vadd.f32 %v1293_v43, %v8342_v39  ;;  %v1569_v11 = vpop.f32.mrf.mxu1  ;;  %v1595_v59 = vpop.f32.mrf.mxu3  ;;  %v6920_v46 = vmax.f32 %v1297_v45, %v1313_v33 }
 0x192   : > { %v1570_v17 = vadd.f32 %v1569_v11, %v8342_v39  ;;  %v1596_v50 = vadd.f32 %v1595_v59, %v8341_v13  ;;  %v1615_v8 = vrot.slane %v1601_v31, 6 }
 0x193   : > { %v1301_v6 = vmax.f32 %v1294_v27, 0.0  ;;  %v5589_v30 = vpack.i.bf16 %v6920_v46, %v6918_v18 }
 0x194   : > { %v1603_v10 = vmax.f32 %v1570_v17, 0.0  ;;  %v1602_v14 = vmax.f32 %v1596_v50, 0.0 }
 0x195   : > { %v1315_v15 = vrot.slane %v1301_v6, 6  ;;  %5590 = vrot.lane.b32.xlu0 %v5589_v30, %s5918_s9  ;;  %v1583_v58 = vpop.f32.mrf.mxu2 }
 0x196   : > { %v1613_v34 = vrot.slane %v1603_v10, 6  ;;  %v1584_v16 = vadd.f32 %v1583_v58, %v8342_v39  ;;  %v1618_v53 = vrot.slane %v1602_v14, 6 }
 0x197   : > { %v6935_v2 = vsel %vm721_vm10, %v1314_v47, %v1315_v15 }
 0x198   : > { %v6938_v61 = vsel %vm721_vm10, %v1612_v1, %v1613_v34  ;;  %v1604_v55 = vmax.f32 %v1584_v16, 0.0  ;;  %v1831_v54 = vpop.f32.mrf.mxu0 }
 0x199   : > { %v1597_v56 = vpop.f32.mrf.mxu3  ;;  %v1845_v48 = vpop.f32.mrf.mxu1  ;;  %v1832_v35 = vadd.f32 %v1831_v54, %v8341_v13 }
 0x19a   : > { %v1616_v9 = vrot.slane %v1604_v55, 6  ;;  %v1598_v23 = vadd.f32 %v1597_v56, %v8342_v39  ;;  %v1846_v32 = vadd.f32 %v1845_v48, %v8341_v13 }
 0x19b   : > { %v1864_v63 = vmax.f32 %v1832_v35, 0.0 }
 0x19c   : > { %v1605_v20 = vmax.f32 %v1598_v23, 0.0  ;;  %v1617_v42 = vsel %vm721_vm10, %v1615_v8, %v1616_v9  ;;  %v1865_v45 = vmax.f32 %v1846_v32, 0.0 }
 0x19d   : > { %v1859_v57 = vpop.f32.mrf.mxu2  ;;  %v6946_v26 = vmax.f32 %v1601_v31, %v1617_v42  ;;  %v1876_v43 = vrot.slane %v1864_v63, 6 }
 0x19e   : > { %v1619_v25 = vrot.slane %v1605_v20, 6  ;;  %v6951_v38 = vadd.f32 %v1859_v57, %v8341_v13  ;;  %v1879_v27 = vrot.slane %v1865_v45, 6 }
 0x1a0   : > { %v1620_v41 = vsel %vm721_vm10, %v1618_v53, %v1619_v25  ;;  %v1833_v28 = vpop.f32.mrf.mxu0  ;;  %v8307_v17 = vmax.f32 %v6951_v38, 0.0 }
 0x1a1   : > { %v1834_v24 = vadd.f32 %v1833_v28, %v8342_v39  ;;  %v1847_v44 = vpop.f32.mrf.mxu1  ;;  %v2097_v19 = vpop.f32.mrf.mxu3  ;;  %v6948_v29 = vmax.f32 %v1602_v14, %v1620_v41 }
 0x1a2   : > { %v1848_v22 = vadd.f32 %v1847_v44, %v8342_v39  ;;  %v6959_v30 = vadd.f32 %v2097_v19, %v8341_v13  ;;  %v1882_v31 = vrot.slane %v8307_v17, 6 }
 0x1a3   : > { %v1867_v40 = vmax.f32 %v1834_v24, 0.0  ;;  %v5594_v7 = vpack.i.bf16 %v6948_v29, %v6946_v26 }
 0x1a4   : > { %v1868_v33 = vmax.f32 %v1848_v22, 0.0  ;;  %v8306_v55 = vmax.f32 %v6959_v30, 0.0 }
 0x1a5   : > { %v1877_v11 = vrot.slane %v1867_v40, 6  ;;  %5595 = vrot.lane.b32.xlu0 %v5594_v7, %s5918_s9  ;;  %v1861_v59 = vpop.f32.mrf.mxu2 }
 0x1a6   : > { %v1880_v6 = vrot.slane %v1868_v33, 6  ;;  %v1862_v49 = vadd.f32 %v1861_v59, %v8342_v39  ;;  %v2142_v20 = vrot.slane %v8306_v55, 6 }
 0x1a7   : > { %v1878_v10 = vsel %vm721_vm10, %v1876_v43, %v1877_v11 }
 0x1a8   : > { %v1881_v47 = vsel %vm721_vm10, %v1879_v27, %v1880_v6  ;;  %v1869_v15 = vmax.f32 %v1862_v49, 0.0  ;;  %v2111_v58 = vpop.f32.mrf.mxu0  ;;  %v6964_v1 = vmax.f32 %v1864_v63, %v1878_v10 }
 0x1a9   : > { %v2099_v34 = vpop.f32.mrf.mxu3  ;;  %v2125_v50 = vpop.f32.mrf.mxu1  ;;  %v6966_v16 = vmax.f32 %v1865_v45, %v1881_v47  ;;  %v2112_v23 = vadd.f32 %v2111_v58, %v8341_v13 }
 0x1aa   : > { %v1883_v54 = vrot.slane %v1869_v15, 6  ;;  %v2100_v56 = vadd.f32 %v2099_v34, %v8342_v39  ;;  %v2126_v32 = vadd.f32 %v2125_v50, %v8341_v13 }
 0x1ab   : > { %v5599_v48 = vpack.i.bf16 %v6966_v16, %v6964_v1  ;;  %v2131_v42 = vmax.f32 %v2112_v23, 0.0 }
 0x1ac   : > { %v6975_v14 = vsel %vm721_vm10, %v1882_v31, %v1883_v54  ;;  %v2133_v9 = vmax.f32 %v2100_v56, 0.0  ;;  %v2132_v28 = vmax.f32 %v2126_v32, 0.0 }
 0x1ad   : > { %5600 = vrot.lane.b32.xlu2 %v5599_v48, %s5918_s9  ;;  %v2407_v8 = vpop.f32.mrf.mxu2  ;;  %v2145_v22 = vrot.slane %v2131_v42, 6 }
 0x1ae   : > { %v2143_v35 = vrot.slane %v2133_v9, 6  ;;  %v6987_v45 = vadd.f32 %v2407_v8, %v8341_v13  ;;  %v2148_v33 = vrot.slane %v2132_v28, 6 }
 0x1b0   : > { %v6983_v57 = vsel %vm721_vm10, %v2142_v20, %v2143_v35  ;;  %v2113_v53 = vpop.f32.mrf.mxu0  ;;  %v8305_v43 = vmax.f32 %v6987_v45, 0.0  ;;  %v8346_v3 = vmax.f32 %v6987_v45, 0.0 }
 0x1b1   : > { %v2114_v25 = vadd.f32 %v2113_v53, %v8342_v39  ;;  %v2127_v41 = vpop.f32.mrf.mxu1  ;;  %v2421_v63 = vpop.f32.mrf.mxu3 }
 0x1b2   : > { %v2128_v24 = vadd.f32 %v2127_v41, %v8342_v39  ;;  %v2452_v50 = vrot.slane %v8305_v43, 6  ;;  %v2422_v56 = vadd.f32 %v2421_v63, %v8341_v13 }
 0x1b3   : > { %v2134_v44 = vmax.f32 %v2114_v25, 0.0 }
 0x1b4   : > { %v2135_v19 = vmax.f32 %v2128_v24, 0.0  ;;  %v2441_v35 = vmax.f32 %v2422_v56, 0.0 }
 0x1b5   : > { %v2146_v40 = vrot.slane %v2134_v44, 6  ;;  %v2409_v7 = vpop.f32.mrf.mxu2 }
 0x1b6   : > { %v2149_v27 = vrot.slane %v2135_v19, 6  ;;  %v2410_v11 = vadd.f32 %v2409_v7, %v8342_v39  ;;  %v2455_v19 = vrot.slane %v2441_v35, 6 }
 0x1b7   : > { %v2147_v59 = vsel %vm721_vm10, %v2145_v22, %v2146_v40 }
 0x1b8   : > { %v2150_v6 = vsel %vm721_vm10, %v2148_v33, %v2149_v27  ;;  %v2443_v49 = vmax.f32 %v2410_v11, 0.0  ;;  %v2435_v10 = vpop.f32.mrf.mxu0  ;;  %v6994_v47 = vmax.f32 %v2131_v42, %v2147_v59 }
 0x1b9   : > { %v2423_v15 = vpop.f32.mrf.mxu3  ;;  %v2711_v58 = vpop.f32.mrf.mxu1  ;;  %v6996_v34 = vmax.f32 %v2132_v28, %v2150_v6  ;;  %v2436_v23 = vadd.f32 %v2435_v10, %v8341_v13 }
 0x1ba   : > { %v2453_v31 = vrot.slane %v2443_v49, 6  ;;  %v2424_v54 = vadd.f32 %v2423_v15, %v8342_v39  ;;  %v2712_v53 = vadd.f32 %v2711_v58, %v8341_v13 }
 0x1bb   : > { %v5604_v48 = vpack.i.bf16 %v6996_v34, %v6994_v47  ;;  %v2442_v32 = vmax.f32 %v2436_v23, 0.0 }
 0x1bc   : > { %v7005_v9 = vsel %vm721_vm10, %v2452_v50, %v2453_v31  ;;  %v2444_v8 = vmax.f32 %v2424_v54, 0.0  ;;  %v2744_v7 = vmax.f32 %v2712_v53, 0.0 }
 0x1bd   : > { %5605 = vrot.lane.b32.xlu2 %v5604_v48, %s5918_s9  ;;  %v2725_v20 = vpop.f32.mrf.mxu2  ;;  %v2458_v40 = vrot.slane %v2442_v32, 6 }
 0x1be   : > { %v2456_v25 = vrot.slane %v2444_v8, 6  ;;  %v2726_v41 = vadd.f32 %v2725_v20, %v8341_v13  ;;  %v2756_v50 = vrot.slane %v2744_v7, 6 }
 0x1c0   : > { %v2437_v42 = vpop.f32.mrf.mxu0  ;;  %v2457_v27 = vsel %vm721_vm10, %v2455_v19, %v2456_v25  ;;  %v2745_v11 = vmax.f32 %v2726_v41, 0.0 }
 0x1c1   : > { %v2438_v63 = vadd.f32 %v2437_v42, %v8342_v39  ;;  %v2713_v28 = vpop.f32.mrf.mxu1  ;;  %v2739_v24 = vpop.f32.mrf.mxu3  ;;  %v7019_v56 = vmax.f32 %v2441_v35, %v2457_v27 }
 0x1c2   : > { %v2714_v44 = vadd.f32 %v2713_v28, %v8342_v39  ;;  %v7015_v6 = vadd.f32 %v2739_v24, %v8341_v13  ;;  %v2759_v23 = vrot.slane %v2745_v11, 6 }
 0x1c3   : > { %v2445_v22 = vmax.f32 %v2438_v63, 0.0 }
 0x1c4   : > { %v2747_v33 = vmax.f32 %v2714_v44, 0.0  ;;  %v8304_v8 = vmax.f32 %v7015_v6, 0.0 }
 0x1c5   : > { %v2459_v59 = vrot.slane %v2445_v22, 6  ;;  %v2727_v49 = vpop.f32.mrf.mxu2 }
 0x1c6   : > { %v2757_v10 = vrot.slane %v2747_v33, 6  ;;  %v2728_v15 = vadd.f32 %v2727_v49, %v8342_v39 }
 0x1c7   : > { %v2460_v58 = vsel %vm721_vm10, %v2458_v40, %v2459_v59  ;;  %v2762_v40 = vrot.slane %v8304_v8, 6 }
 0x1c8   : > { %v2748_v31 = vmax.f32 %v2728_v15, 0.0  ;;  %v2975_v54 = vpop.f32.mrf.mxu0  ;;  %v7021_v48 = vmax.f32 %v2442_v32, %v2460_v58  ;;  %v2758_v42 = vsel %vm721_vm10, %v2756_v50, %v2757_v10 }
 0x1c9   : > { %v2741_v20 = vpop.f32.mrf.mxu3  ;;  %v2989_v53 = vpop.f32.mrf.mxu1  ;;  %v2976_v35 = vadd.f32 %v2975_v54, %v8341_v13  ;;  %v7032_v19 = vmax.f32 %v2744_v7, %v2758_v42 }
 0x1ca   : > { %v2760_v25 = vrot.slane %v2748_v31, 6  ;;  %v2742_v41 = vadd.f32 %v2741_v20, %v8342_v39  ;;  %v5609_v63 = vpack.i.bf16 %v7021_v48, %v7019_v56  ;;  %v2990_v32 = vadd.f32 %v2989_v53, %v8341_v13 }
 0x1cb   : > { %v3008_v10 = vmax.f32 %v2976_v35, 0.0 }
 0x1cc   : > { %v2761_v28 = vsel %vm721_vm10, %v2759_v23, %v2760_v25  ;;  %v2749_v24 = vmax.f32 %v2742_v41, 0.0  ;;  %5610 = vrot.lane.b32.xlu0 %v5609_v63, %s5918_s9  ;;  %v3009_v15 = vmax.f32 %v2990_v32, 0.0 }
 0x1cd   : > { %v3003_v44 = vpop.f32.mrf.mxu2  ;;  %v7034_v22 = vmax.f32 %v2745_v11, %v2761_v28  ;;  %v3020_v20 = vrot.slane %v3008_v10, 6 }
 0x1ce   : > { %v2763_v33 = vrot.slane %v2749_v24, 6  ;;  %v7046_v11 = vadd.f32 %v3003_v44, %v8341_v13  ;;  %v3023_v53 = vrot.slane %v3009_v15, 6 }
 0x1cf   : > { %v5614_v27 = vpack.i.bf16 %v7034_v22, %v7032_v19 }
 0x1d0   : > { %v7041_v59 = vsel %vm721_vm10, %v2762_v40, %v2763_v33  ;;  %v2977_v49 = vpop.f32.mrf.mxu0  ;;  %v8303_v41 = vmax.f32 %v7046_v11, 0.0 }
 0x1d1   : > { %v2978_v58 = vadd.f32 %v2977_v49, %v8342_v39  ;;  %v2991_v50 = vpop.f32.mrf.mxu1  ;;  %v3241_v7 = vpop.f32.mrf.mxu3  ;;  %5615 = vrot.lane.b32.xlu1 %v5614_v27, %s5918_s9 }
 0x1d2   : > { %v2992_v31 = vadd.f32 %v2991_v50, %v8342_v39  ;;  %v7051_v28 = vadd.f32 %v3241_v7, %v8341_v13 }
 0x1d3   : > { %v3011_v54 = vmax.f32 %v2978_v58, 0.0  ;;  %v3026_v58 = vrot.slane %v8303_v41, 6 }
 0x1d4   : > { %v3012_v23 = vmax.f32 %v2992_v31, 0.0  ;;  %v8302_v50 = vmax.f32 %v7051_v28, 0.0  ;;  %v8349_v45 = vmax.f32 %v7051_v28, 0.0 }
 0x1d5   : > { %v3021_v42 = vrot.slane %v3011_v54, 6  ;;  %v3005_v25 = vpop.f32.mrf.mxu2 }
 0x1d6   : > { %v3024_v63 = vrot.slane %v3012_v23, 6  ;;  %v3006_v24 = vadd.f32 %v3005_v25, %v8342_v39 }
 0x1d7   : > { %v3022_v35 = vsel %vm721_vm10, %v3020_v20, %v3021_v42 }
 0x1d8   : > { %v3025_v32 = vsel %vm721_vm10, %v3023_v53, %v3024_v63  ;;  %v3013_v44 = vmax.f32 %v3006_v24, 0.0  ;;  %v3255_v40 = vpop.f32.mrf.mxu0  ;;  %v7056_v33 = vmax.f32 %v3008_v10, %v3022_v35  ;;  %v3286_v53 = vrot.slane %v8302_v50, 6 }
 0x1d9   : > { %v3243_v27 = vpop.f32.mrf.mxu3  ;;  %v7058_v49 = vmax.f32 %v3009_v15, %v3025_v32  ;;  %v3269_v10 = vpop.f32.mrf.mxu1  ;;  %v3256_v63 = vadd.f32 %v3255_v40, %v8341_v13  ;;  %v707_v35 = vadd.f32 %v6878_v51, %v8342_v39 }
 0x1da   : > { %v3027_v7 = vrot.slane %v3013_v44, 6  ;;  %v3244_v31 = vadd.f32 %v3243_v27, %v8342_v39 }
 0x1db   : > { %v5619_v54 = vpack.i.bf16 %v7058_v49, %v7056_v33 }
 0x1dc   : > { %v7067_v23 = vsel %vm721_vm10, %v3026_v58, %v3027_v7  ;;  %v3277_v20 = vmax.f32 %v3244_v31, 0.0  ;;  %v705_v7 = vadd.f32 %v6870_v52, %v8341_v13  ;;  %v3275_v31 = vmax.f32 %v3256_v63, 0.0 }
 0x1dd   : > { %5620 = vrot.lane.b32.xlu1 %v5619_v54, %s5918_s9  ;;  %v3551_v15 = vpop.f32.mrf.mxu2  ;;  %v714_v54 = vmax.f32 %v707_v35, 0.0 }
 0x1de   : > { %v3287_v42 = vrot.slane %v3277_v20, 6  ;;  %v3552_v32 = vadd.f32 %v3551_v15, %v8341_v13  ;;  %v711_v8 = vmax.f32 %v705_v7, 0.0  ;;  %v3289_v51 = vrot.slane %v3275_v31, 6 }
 0x1df   : > { %v729_v15 = vrot.slane %v714_v54, 6  ;;  %v3270_v7 = vadd.f32 %v3269_v10, %v8341_v13 }
 0x1e0   : > { %v7073_v25 = vsel %vm721_vm10, %v3286_v53, %v3287_v42  ;;  %v3257_v24 = vpop.f32.mrf.mxu0  ;;  %v3584_v20 = vmax.f32 %v3552_v32, 0.0  ;;  %v743_v42 = vlaneseq }
 0x1e1   : > { %v3258_v44 = vadd.f32 %v3257_v24, %v8342_v39  ;;  %v3565_v27 = vpop.f32.mrf.mxu3  ;;  %v3271_v41 = vpop.f32.mrf.mxu1 }
 0x1e2   : > { %v3596_v55 = vrot.slane %v3584_v20, 6  ;;  %v7083_v17 = vand.u32 127, %v743_v42  ;;  %v3272_v52 = vadd.f32 %v3271_v41, %v8342_v39  ;;  %v3566_v32 = vadd.f32 %v3565_v27, %v8341_v13 }
 0x1e3   : > { %v3278_v58 = vmax.f32 %v3258_v44, 0.0 }
 0x1e4   : > { %v3279_v42 = vmax.f32 %v3272_v52, 0.0  ;;  %vm745_vm11 = vcmp.lt.s32.totalorder %v7083_v17, 112  ;;  %v3585_v41 = vmax.f32 %v3566_v32, 0.0 }
 0x1e5   : > { %v3553_v53 = vpop.f32.mrf.mxu2  ;;  %v3290_v50 = vrot.slane %v3278_v58, 6  ;;  %v728_v58 = vrot.slane %v711_v8, 6 }
 0x1e6   : > { %v3554_v40 = vadd.f32 %v3553_v53, %v8342_v39  ;;  %v3599_v52 = vrot.slane %v3585_v41, 6 }
 0x1e7   : > { %v3291_v44 = vsel %vm721_vm10, %v3289_v51, %v3290_v50 }
 0x1e8   : > { %v3587_v43 = vmax.f32 %v3554_v40, 0.0  ;;  %v7091_v54 = vmax.f32 %v3275_v31, %v3291_v44  ;;  %v3293_v44 = vrot.slane %v3279_v42, 6 }
 0x1e9   : > { %v3567_v24 = vpop.f32.mrf.mxu3 }
 0x1ea   : > { %v3597_v63 = vrot.slane %v3587_v43, 6  ;;  %v3568_v35 = vadd.f32 %v3567_v24, %v8342_v39  ;;  %v730_v43 = vsel %vm721_vm10, %v728_v58, %v729_v15 }
 0x1ec   : > { %v3598_v53 = vsel %vm721_vm10, %v3596_v55, %v3597_v63  ;;  %v3588_v40 = vmax.f32 %v3568_v35, 0.0  ;;  %v3276_v55 = vmax.f32 %v3270_v7, 0.0 }
 0x1ed   : > { %v7093_v0 = vmax.f32 %v3584_v20, %v3598_v53  ;;  %v736_v20 = vmax.f32 %v711_v8, %v730_v43  ;;  %v7119_v8 = vmax.f32 %v1298_v37, %v6935_v2  ;;  %v7139_v37 = vmax.f32 %v8346_v3, %v7005_v9 }
 0x1ee   : > { %v3600_v63 = vrot.slane %v3588_v40, 6  ;;  %v3292_v35 = vrot.slane %v3276_v55, 6  ;;  %v8343_v40 = vmax.f32 %v6913_v21, 0.0  ;;  %v8347_v21 = vmax.f32 %v7015_v6, 0.0 }
 0x1ef   : > { %v5581_v50 = vpop.permute.xlu1 %5580  ;;  %v5624_v27 = vpack.i.bf16 %v7093_v0, %v7091_v54  ;;  %v7158_v9 = vmax.f32 %v8349_v45, %v7073_v25 }
 0x1f0   : > { %v5583_v51 = vunpack.i.h.bf16 %v5581_v50  ;;  %v5582_v24 = vunpack.i.l.bf16 %v5581_v50  ;;  %v3601_v32 = vsel %vm721_vm10, %v3599_v52, %v3600_v63  ;;  %v3294_v58 = vsel %vm721_vm10, %v3292_v35, %v3293_v44 }
 0x1f1   : > { %5625 = vrot.lane.b32.xlu1 %v5624_v27, %s5918_s9  ;;  %v7109_v53 = vmax.f32 %v3585_v41, %v3601_v32  ;;  %v7111_v7 = vmax.f32 %v3276_v55, %v3294_v58  ;;  %v7124_v42 = vmax.f32 %v8343_v40, %v6938_v61  ;;  %v8344_v50 = vmax.f32 %v6951_v38, 0.0  ;;  %v3869_v38 = vpop.f32.mrf.mxu2 }
 0x1f2   : > { %v747_v10 = vsel %vm745_vm11, %v5582_v24, %v5583_v51  ;;  %v8345_v41 = vmax.f32 %v6959_v30, 0.0  ;;  %v7144_v2 = vmax.f32 %v8347_v21, %v7041_v59  ;;  %v8348_v30 = vmax.f32 %v7046_v11, 0.0 }
 0x1f3   : > { %v7103_v31 = vmax.f32 %v6882_v60, %v747_v10  ;;  %v5634_v60 = vpack.i.bf16 %v7111_v7, %v7109_v53  ;;  %v7129_v43 = vmax.f32 %v8344_v50, %v6975_v14  ;;  %v3855_v14 = vpop.f32.mrf.mxu1  ;;  %v3870_v52 = vadd.f32 %v3869_v38, %v8341_v13 }
 0x1f4   : > { %v7134_v27 = vmax.f32 %v8345_v41, %v6983_v57  ;;  %v7153_v57 = vmax.f32 %v8348_v30, %v7067_v23  ;;  %v956_v35 = vadd.f32 %v6886_v12, %v8342_v39  ;;  %v3856_v32 = vadd.f32 %v3855_v14, %v8341_v13 }
 0x1f5   : > { %v5629_v15 = vpack.i.bf16 %v7103_v31, %v736_v20  ;;  %v3889_v40 = vmax.f32 %v3870_v52, 0.0 }
 0x1f7   : > { %5630 = vrot.lane.b32.xlu2 %v5629_v15, %s5918_s9  ;;  %v3903_v41 = vrot.slane %v3889_v40, 6 }
 0x1f9   : > { %v3871_v63 = vpop.f32.mrf.mxu2 }
 0x1fa   : > { %v3872_v10 = vadd.f32 %v3871_v63, %v8342_v39 }
 0x1fb   : > { %v3857_v6 = vpop.f32.mrf.mxu1 }
 0x1fc   : > { %v3858_v15 = vadd.f32 %v3857_v6, %v8342_v39  ;;  %v3892_v58 = vmax.f32 %v3872_v10, 0.0 }
 0x1fe   : > { %v3904_v12 = vrot.slane %v3892_v58, 6 }
 0x1ff   : > { %5635 = vrot.lane.b32.xlu2 %v5634_v60, %s5918_s9 }
 0x200   : > { %v3905_v14 = vsel %vm721_vm10, %v3903_v41, %v3904_v12  ;;  %v3883_v12 = vpop.f32.mrf.mxu3  ;;  %v5586_v41 = vpop.permute.xlu1 %5585 }
 0x201   : > { %v7188_v45 = vmax.f32 %v3889_v40, %v3905_v14  ;;  %v5587_v14 = vunpack.i.l.bf16 %v5586_v41 }
 0x207   : > { %v7146_v61 = vpop.permute.xlu2 %5600 }
 0x217   : > { %v7148_v55 = vpop.permute.xlu2 %5605 }
 0x218   : > { %v5607_v58 = vunpack.i.l.bf16 %v7148_v55 }
 0x251   : > { %v7160_v59 = vpop.permute.xlu2 %5630 }
 0x252   : > { %v5632_v44 = vunpack.i.l.bf16 %v7160_v59 }
 0x254   : > { %v746_v11 = vsel %vm745_vm11, %v5583_v51, %v5632_v44  ;;  %v748_v28 = vsel %vm745_vm11, %v5632_v44, %v5582_v24  ;;  %v954_v51 = vadd.f32 %v6876_v36, %v8341_v13  ;;  %v3891_v24 = vmax.f32 %v3858_v15, 0.0  ;;  %v7198_v15 = vpop.permute.xlu0 %5590 }
 0x255   : > { %v7170_v23 = vmax.f32 %v736_v20, %v748_v28  ;;  %v750_v25 = vmax.f32 %v6884_v62, %v746_v11  ;;  %v989_v62 = vmax.f32 %v956_v35, 0.0  ;;  %v3888_v20 = vmax.f32 %v3856_v32, 0.0 }
 0x256   : > { %v986_v50 = vmax.f32 %v954_v51, 0.0  ;;  %v3901_v3 = vrot.slane %v3891_v24, 6  ;;  %v8311_v32 = vunpack.i.h.bf16 %v7148_v55 }
 0x257   : > { %763 = vrot.lane.b32.xlu2 %v750_v25, %s5921_s12  ;;  %v5644_v60 = vpack.i.bf16 %v7170_v23, %v7103_v31  ;;  %v999_v21 = vrot.slane %v989_v62, 6  ;;  %v3900_v38 = vrot.slane %v3888_v20, 6 }
 0x258   : > { %v998_v36 = vrot.slane %v986_v50, 6  ;;  %v2163_v51 = vsel %vm745_vm11, %v5607_v58, %v8311_v32 }
 0x259   : > { %5645 = vrot.lane.b32.xlu1 %v5644_v60, %s5920_s11  ;;  %5640 = vrot.lane.b32.xlu0 %v5644_v60, %s5919_s10  ;;  %v3902_v30 = vsel %vm721_vm10, %v3900_v38, %v3901_v3  ;;  %v2167_v24 = vmax.f32 %v6994_v47, %v2163_v51  ;;  %v3885_v3 = vpop.f32.mrf.mxu3  ;;  %v5588_v38 = vunpack.i.h.bf16 %v5586_v41 }
 0x25a   : > { %v1000_v63 = vsel %vm721_vm10, %v998_v36, %v999_v21  ;;  %v7191_v6 = vmax.f32 %v3888_v20, %v3902_v30  ;;  %v3886_v30 = vadd.f32 %v3885_v3, %v8342_v39 }
 0x25b   : > { %v1010_v44 = vmax.f32 %v986_v50, %v1000_v63 }
 0x25c   : > { %v5654_v10 = vpack.i.bf16 %v7188_v45, %v7191_v6  ;;  %v7200_v11 = vpop.permute.xlu0 %5595  ;;  %v3893_v51 = vmax.f32 %v3886_v30, 0.0  ;;  %v5592_v30 = vunpack.i.l.bf16 %v7198_v15 }
 0x25d   : > { %v5649_v52 = vpack.i.bf16 %v1010_v44, %v7170_v23 }
 0x25f   : > { %772 = vrot.lane.b32.xlu2 %v750_v25, %s5922_s17 }
 0x261   : > { %769 = vrot.lane.b32.xlu1 %v750_v25, %s5923_s20  ;;  %766 = vrot.lane.b32.xlu0 %v750_v25, %s5924_s21 }
 0x264   : > { %v7202_v28 = vpop.permute.xlu0 %5610 }
 0x265   : > { %v8309_v25 = vunpack.i.h.bf16 %v7202_v28  ;;  %v8310_v35 = vunpack.i.l.bf16 %v7202_v28 }
 0x267   : > { %5655 = vrot.lane.b32.xlu2 %v5654_v10, %s5918_s9  ;;  %v2473_v60 = vsel %vm745_vm11, %v8310_v35, %v8309_v25 }
 0x268   : > { %v2477_v40 = vmax.f32 %v7019_v56, %v2473_v60 }
 0x269   : > { %5650 = vrot.lane.b32.xlu0 %v5649_v52, %s5918_s9  ;;  %v3884_v52 = vadd.f32 %v3883_v12, %v8341_v13 }
 0x26a   : > { %v7222_v62 = vpack.i.bf16 %v2477_v40, %v2167_v24  ;;  %v3907_v24 = vrot.slane %v3893_v51, 6  ;;  %v5633_v51 = vunpack.i.h.bf16 %v7160_v59 }
 0x26b   : > { %v3890_v40 = vmax.f32 %v3884_v52, 0.0 }
 0x26d   : > { %v3906_v41 = vrot.slane %v3890_v40, 6 }
 0x26f   : > { %v3908_v12 = vsel %vm721_vm10, %v3906_v41, %v3907_v24 }
 0x270   : > { %v7247_v3 = vmax.f32 %v3890_v40, %v3908_v12 }
 0x2cb   : > { %v5641_v20 = vpop.permute.xlu0 %5640 }
 0x2cc   : > { %v5642_v24 = vunpack.i.l.bf16 %v5641_v20 }
 0x2d3   : > { %v767_v50 = vpop.permute.xlu0 %766 }
 0x2db   : > { %v5651_v21 = vpop.permute.xlu0 %5650 }
 0x2dc   : > { %v5653_v36 = vunpack.i.h.bf16 %v5651_v21 }
 0x2de   : > { %v1020_v63 = vsel %vm745_vm11, %v5653_v36, %v5587_v14  ;;  %v1021_v56 = vsel %vm745_vm11, %v5588_v38, %v5653_v36  ;;  %v5593_v36 = vunpack.i.h.bf16 %v7198_v15 }
 0x2df   : > { %v7229_v47 = vmax.f32 %v1010_v44, %v1020_v63  ;;  %v7232_v10 = vmax.f32 %v6902_v5, %v1021_v56  ;;  %v1019_v44 = vsel %vm745_vm11, %v5587_v14, %v5588_v38  ;;  %v5674_v38 = vpack.i.bf16 %v7247_v3, %v7144_v2  ;;  %v7263_v56 = vpop.permute.xlu1 %5615 }
 0x2e0   : > { %v1023_v5 = vmax.f32 %v6900_v4, %v1019_v44  ;;  %v1330_v4 = vsel %vm745_vm11, %v5592_v30, %v5593_v36 }
 0x2e1   : > { %v5669_v60 = vpack.i.bf16 %v7232_v10, %v7229_v47  ;;  %v7258_v14 = vmax.f32 %v6918_v18, %v1330_v4  ;;  %v786_v18 = vsel %vm785_vm12, %v7103_v31, %v5633_v51 }
 0x2e2   : > { %v788_v41 = vsel %vm787_vm13, %v786_v18, %v5642_v24 }
 0x2e3   : > { %5670 = vrot.lane.b32.xlu1 %v5669_v60, %s5920_s11  ;;  %5665 = vrot.lane.b32.xlu0 %v5669_v60, %s5919_s10  ;;  %v5679_v63 = vpack.i.bf16 %v7258_v14, %v7119_v8 }
 0x2e4   : > { %5660 = vrot.lane.b32.xlu2 %v5669_v60, %s5918_s9  ;;  %v7269_v60 = vpop.permute.xlu2 %5635 }
 0x2e7   : > { %v7265_v15 = vpop.permute.xlu1 %5620 }
 0x2eb   : > { %1042 = vrot.lane.b32.xlu1 %v1023_v5, %s5923_s20  ;;  %1039 = vrot.lane.b32.xlu0 %v1023_v5, %s5924_s21 }
 0x2ec   : > { %1036 = vrot.lane.b32.xlu2 %v1023_v5, %s5921_s12  ;;  %v764_v12 = vpop.permute.xlu2 %763 }
 0x2ef   : > { %v7267_v52 = vpop.permute.xlu1 %5625 }
 0x2f3   : > { %5675 = vrot.lane.b32.xlu1 %v5674_v38, %s5918_s9 }
 0x2f4   : > { %1045 = vrot.lane.b32.xlu2 %v1023_v5, %s5922_s17  ;;  %v5652_v5 = vunpack.i.l.bf16 %v5651_v21  ;;  %v773_v21 = vpop.permute.xlu2 %772 }
 0x2f6   : > { %v799_v4 = vsel %vm785_vm12, %v7170_v23, %v5652_v5 }
 0x2f7   : > { %v5646_v40 = vpop.permute.xlu1 %5645 }
 0x2f8   : > { %v5647_v44 = vunpack.i.l.bf16 %v5646_v40  ;;  %v5648_v31 = vunpack.i.h.bf16 %v5646_v40 }
 0x2fa   : > { %v790_v38 = vsel %vm789_vm14, %v788_v41, %v5647_v44 }
 0x2fb   : > { %5680 = vrot.lane.b32.xlu1 %v5679_v63, %s5918_s9  ;;  %v5643_v63 = vunpack.i.h.bf16 %v5641_v20  ;;  %v792_v59 = vsel %vm529_vm6, %v790_v38, %v764_v12 }
 0x2fc   : > { %v794_v35 = vsel %vm459_vm3, %v792_v59, %v767_v50 }
 0x2fd   : > { %v800_v32 = vsel %vm787_vm13, %v799_v4, %v5643_v63 }
 0x2fe   : > { %v801_v24 = vsel %vm789_vm14, %v800_v32, %v5648_v31 }
 0x2ff   : > { %v770_v25 = vpop.permute.xlu1 %769 }
 0x300   : > { %v796_v51 = vsel %vm389_vm1, %v794_v35, %v770_v25 }
 0x301   : > { %v798_v18 = vsel %vm319_vm0, %v796_v51, %v773_v21 }
 0x302   : > { %v7284_v44 = vpack.c.bf16 %v801_v24, %v798_v18 }
 0x304   : > { %803 = vst [vmem:[#allocation3] sm:$0x7] %v7284_v44 }
 0x355   : > { %v5671_v23 = vpop.permute.xlu1 %5670 }
 0x356   : > { %v5672_v59 = vunpack.i.l.bf16 %v5671_v23 }
 0x35d   : > { %v1043_v20 = vpop.permute.xlu1 %1042 }
 0x365   : > { %v7287_v41 = vpop.permute.xlu1 %5675 }
 0x36d   : > { %v7289_v5 = vpop.permute.xlu1 %5680 }
 0x36e   : > { %v5682_v50 = vunpack.i.l.bf16 %v7289_v5 }
 0x370   : > { %v1329_v25 = vsel %vm745_vm11, %v5593_v36, %v5682_v50  ;;  %v1331_v35 = vsel %vm745_vm11, %v5682_v50, %v5592_v30  ;;  %v5666_v30 = vpop.permute.xlu0 %5665 }
 0x371   : > { %v7297_v32 = vmax.f32 %v7119_v8, %v1331_v35  ;;  %v1333_v40 = vmax.f32 %v6920_v46, %v1329_v25  ;;  %v7311_v46 = vpop.permute.xlu2 %5655  ;;  %v5667_v4 = vunpack.i.l.bf16 %v5666_v30  ;;  %v5668_v35 = vunpack.i.h.bf16 %v5666_v30 }
 0x372   : > { %v5598_v30 = vunpack.i.h.bf16 %v7200_v11 }
 0x373   : > { %1346 = vrot.lane.b32.xlu1 %v1333_v40, %s5921_s12  ;;  %v5689_v12 = vpack.i.bf16 %v7297_v32, %v7258_v14  ;;  %v5694_v8 = vpack.i.bf16 %v7124_v42, %v7297_v32 }
 0x375   : > { %5690 = vrot.lane.b32.xlu0 %v5689_v12, %s5920_s11  ;;  %5685 = vrot.lane.b32.xlu2 %v5689_v12, %s5919_s10 }
 0x378   : > { %v1040_v21 = vpop.permute.xlu0 %1039 }
 0x379   : > { %v5661_v36 = vpop.permute.xlu2 %5660 }
 0x37a   : > { %v5662_v38 = vunpack.i.l.bf16 %v5661_v36  ;;  %v5663_v50 = vunpack.i.h.bf16 %v5661_v36 }
 0x37b   : > { %1355 = vrot.lane.b32.xlu1 %v1333_v40, %s5922_s17 }
 0x37c   : > { %v1058_v63 = vsel %vm785_vm12, %v7229_v47, %v5662_v38  ;;  %v1065_v12 = vsel %vm785_vm12, %v7232_v10, %v5663_v50  ;;  %v5673_v47 = vunpack.i.h.bf16 %v5671_v23 }
 0x37d   : > { %1352 = vrot.lane.b32.xlu0 %v1333_v40, %s5923_s20  ;;  %1349 = vrot.lane.b32.xlu2 %v1333_v40, %s5924_s21  ;;  %v1059_v31 = vsel %vm787_vm13, %v1058_v63, %v5667_v4  ;;  %v1066_v38 = vsel %vm787_vm13, %v1065_v12, %v5668_v35 }
 0x37e   : > { %v1060_v24 = vsel %vm789_vm14, %v1059_v31, %v5672_v59  ;;  %v1067_v63 = vsel %vm789_vm14, %v1066_v38, %v5673_v47  ;;  %v5683_v47 = vunpack.i.h.bf16 %v7289_v5 }
 0x381   : > { %v1037_v51 = vpop.permute.xlu2 %1036 }
 0x382   : > { %v1061_v18 = vsel %vm529_vm6, %v1060_v24, %v1037_v51  ;;  %v5597_v51 = vunpack.i.l.bf16 %v7200_v11  ;;  %v5603_v11 = vunpack.i.h.bf16 %v7146_v61 }
 0x383   : > { %v1062_v25 = vsel %vm459_vm3, %v1061_v18, %v1040_v21 }
 0x384   : > { %v1063_v40 = vsel %vm389_vm1, %v1062_v25, %v1043_v20 }
 0x385   : > { %5695 = vrot.lane.b32.xlu2 %v5694_v8, %s5918_s9 }
 0x389   : > { %v1046_v8 = vpop.permute.xlu2 %1045 }
 0x38a   : > { %v1064_v4 = vsel %vm319_vm0, %v1063_v40, %v1046_v8  ;;  %v5602_v40 = vunpack.i.l.bf16 %v7146_v61 }
 0x38b   : > { %v7325_v59 = vpack.c.bf16 %v1067_v63, %v1064_v4  ;;  %v1368_v63 = vsel %vm785_vm12, %v7258_v14, %v5683_v47 }
 0x38d   : > { %v7328_v36 = vrot.slane %v7325_v59, 5 }
 0x38f   : > { %1074 = vst [vmem:[#allocation3 + $0xc] sm:$0x8] %v7328_v36  ;;  %v1071_v20 = vrot.slane %v7328_v36, 4 }
 0x391   : > { %1075 = vst [vmem:[#allocation3 + $0x10] sm:$0x3] %v1071_v20 }
 0x3cf   : > { %v5686_v31 = vpop.permute.xlu2 %5685 }
 0x3d0   : > { %v5687_v38 = vunpack.i.l.bf16 %v5686_v31 }
 0x3d7   : > { %v1350_v10 = vpop.permute.xlu2 %1349 }
 0x3df   : > { %v5696_v23 = vpop.permute.xlu2 %5695 }
 0x3e0   : > { %v5698_v24 = vunpack.i.h.bf16 %v5696_v23 }
 0x3e2   : > { %v1634_v21 = vsel %vm745_vm11, %v5698_v24, %v5597_v51  ;;  %v1635_v18 = vsel %vm745_vm11, %v5598_v30, %v5698_v24 }
 0x3e3   : > { %v7341_v50 = vmax.f32 %v7124_v42, %v1634_v21  ;;  %v7344_v25 = vmax.f32 %v6948_v29, %v1635_v18  ;;  %v1633_v42 = vsel %vm745_vm11, %v5597_v51, %v5598_v30  ;;  %v1898_v29 = vsel %vm745_vm11, %v5602_v40, %v5603_v11 }
 0x3e4   : > { %v1637_v12 = vmax.f32 %v6946_v26, %v1633_v42  ;;  %v7362_v8 = vmax.f32 %v6964_v1, %v1898_v29  ;;  %v1369_v30 = vsel %vm787_vm13, %v1368_v63, %v5687_v38  ;;  %v5697_v18 = vunpack.i.l.bf16 %v5696_v23 }
 0x3e5   : > { %v5709_v35 = vpack.i.bf16 %v7344_v25, %v7341_v50  ;;  %v1347_v51 = vpop.permute.xlu1 %1346  ;;  %v5688_v29 = vunpack.i.h.bf16 %v5686_v31 }
 0x3e6   : > { %v5714_v61 = vpack.i.bf16 %v7362_v8, %v7129_v43  ;;  %v1375_v5 = vsel %vm785_vm12, %v7297_v32, %v5697_v18 }
 0x3e7   : > { %5710 = vrot.lane.b32.xlu0 %v5709_v35, %s5920_s11  ;;  %5705 = vrot.lane.b32.xlu2 %v5709_v35, %s5919_s10  ;;  %v5691_v26 = vpop.permute.xlu0 %5690  ;;  %v1376_v38 = vsel %vm787_vm13, %v1375_v5, %v5688_v29 }
 0x3e8   : > { %5700 = vrot.lane.b32.xlu1 %v5709_v35, %s5918_s9  ;;  %v5692_v4 = vunpack.i.l.bf16 %v5691_v26 }
 0x3ea   : > { %v1370_v1 = vsel %vm789_vm14, %v1369_v30, %v5692_v4 }
 0x3eb   : > { %v1371_v21 = vsel %vm529_vm6, %v1370_v1, %v1347_v51 }
 0x3ec   : > { %v1372_v35 = vsel %vm459_vm3, %v1371_v21, %v1350_v10 }
 0x3ef   : > { %1656 = vrot.lane.b32.xlu0 %v1637_v12, %s5923_s20  ;;  %1653 = vrot.lane.b32.xlu2 %v1637_v12, %s5924_s21  ;;  %v1353_v24 = vpop.permute.xlu0 %1352 }
 0x3f0   : > { %1650 = vrot.lane.b32.xlu1 %v1637_v12, %s5921_s12  ;;  %v1373_v42 = vsel %vm389_vm1, %v1372_v35, %v1353_v24 }
 0x3f7   : > { %5715 = vrot.lane.b32.xlu0 %v5714_v61, %s5918_s9  ;;  %v1356_v61 = vpop.permute.xlu1 %1355 }
 0x3f8   : > { %1659 = vrot.lane.b32.xlu1 %v1637_v12, %s5922_s17  ;;  %v5693_v12 = vunpack.i.h.bf16 %v5691_v26  ;;  %v1374_v47 = vsel %vm319_vm0, %v1373_v42, %v1356_v61 }
 0x3fa   : > { %v1377_v4 = vsel %vm789_vm14, %v1376_v38, %v5693_v12 }
 0x3fb   : > { %v7381_v63 = vpack.c.bf16 %v1377_v4, %v1374_v47 }
 0x3fd   : > { %v7384_v10 = vrot.slane %v7381_v63, 6 }
 0x3ff   : > { %1384 = vst [vmem:[#allocation3 + $0x1c] sm:$0xc] %v7384_v10  ;;  %v1381_v32 = vrot.slane %v7384_v10, 4 }
 0x401   : > { %1385 = vst [vmem:[#allocation3 + $0x20] sm:$0x1] %v1381_v32 }
 0x459   : > { %v5711_v14 = vpop.permute.xlu0 %5710 }
 0x45a   : > { %v5712_v12 = vunpack.i.l.bf16 %v5711_v14 }
 0x461   : > { %v1657_v23 = vpop.permute.xlu0 %1656 }
 0x469   : > { %v5716_v31 = vpop.permute.xlu0 %5715 }
 0x46a   : > { %v5717_v26 = vunpack.i.l.bf16 %v5716_v31 }
 0x46c   : > { %v1897_v30 = vsel %vm745_vm11, %v5603_v11, %v5717_v26  ;;  %v1899_v51 = vsel %vm745_vm11, %v5717_v26, %v5602_v40  ;;  %v5706_v40 = vpop.permute.xlu2 %5705 }
 0x46d   : > { %v1902_v1 = vmax.f32 %v7129_v43, %v1899_v51  ;;  %v1901_v24 = vmax.f32 %v6966_v16, %v1897_v30  ;;  %v5701_v43 = vpop.permute.xlu1 %5700  ;;  %v5707_v35 = vunpack.i.l.bf16 %v5706_v40  ;;  %v5708_v30 = vunpack.i.h.bf16 %v5706_v40 }
 0x46e   : > { %v5702_v16 = vunpack.i.l.bf16 %v5701_v43  ;;  %v5703_v29 = vunpack.i.h.bf16 %v5701_v43 }
 0x46f   : > { %1914 = vrot.lane.b32.xlu0 %v1901_v24, %s5921_s12  ;;  %v5724_v21 = vpack.i.bf16 %v1902_v1, %v7362_v8  ;;  %v5729_v11 = vpack.i.bf16 %v7134_v27, %v1902_v1 }
 0x470   : > { %v1672_v18 = vsel %vm785_vm12, %v7341_v50, %v5702_v16  ;;  %v1679_v4 = vsel %vm785_vm12, %v7344_v25, %v5703_v29 }
 0x471   : > { %5725 = vrot.lane.b32.xlu2 %v5724_v21, %s5920_s11  ;;  %5720 = vrot.lane.b32.xlu1 %v5724_v21, %s5919_s10  ;;  %v1673_v5 = vsel %vm787_vm13, %v1672_v18, %v5707_v35  ;;  %v5713_v21 = vunpack.i.h.bf16 %v5711_v14  ;;  %v5718_v35 = vunpack.i.h.bf16 %v5716_v31 }
 0x472   : > { %v1674_v61 = vsel %vm789_vm14, %v1673_v5, %v5712_v12 }
 0x474   : > { %v1654_v38 = vpop.permute.xlu2 %1653 }
 0x475   : > { %v1651_v42 = vpop.permute.xlu1 %1650 }
 0x476   : > { %v1675_v47 = vsel %vm529_vm6, %v1674_v61, %v1651_v42 }
 0x477   : > { %1923 = vrot.lane.b32.xlu0 %v1901_v24, %s5922_s17  ;;  %v1676_v26 = vsel %vm459_vm3, %v1675_v47, %v1654_v38 }
 0x478   : > { %v1677_v50 = vsel %vm389_vm1, %v1676_v26, %v1657_v23  ;;  %v1936_v23 = vsel %vm785_vm12, %v7362_v8, %v5718_v35 }
 0x479   : > { %1920 = vrot.lane.b32.xlu2 %v1901_v24, %s5923_s20  ;;  %1917 = vrot.lane.b32.xlu1 %v1901_v24, %s5924_s21  ;;  %v1680_v24 = vsel %vm787_vm13, %v1679_v4, %v5708_v30 }
 0x47a   : > { %v1681_v43 = vsel %vm789_vm14, %v1680_v24, %v5713_v21  ;;  %v8350_v21 = vunpack.i.h.bf16 %v7148_v55 }
 0x47d   : > { %v1660_v51 = vpop.permute.xlu1 %1659 }
 0x481   : > { %5730 = vrot.lane.b32.xlu1 %v5729_v11, %s5918_s9  ;;  %v1678_v11 = vsel %vm319_vm0, %v1677_v50, %v1660_v51 }
 0x482   : > { %v7417_v16 = vpack.c.bf16 %v1681_v43, %v1678_v11 }
 0x484   : > { %v1684_v18 = vrot.slane %v7417_v16, 7 }
 0x486   : > { %1686 = vst [vmem:[#allocation3 + $0x2c] sm:$0xe] %v1684_v18 }
 0x4cb   : > { %v5726_v42 = vpop.permute.xlu2 %5725 }
 0x4cc   : > { %v5727_v12 = vunpack.i.l.bf16 %v5726_v42  ;;  %v5728_v24 = vunpack.i.h.bf16 %v5726_v42 }
 0x4d3   : > { %v1921_v26 = vpop.permute.xlu2 %1920 }
 0x4e1   : > { %v1915_v29 = vpop.permute.xlu0 %1914 }
 0x4e3   : > { %v5721_v25 = vpop.permute.xlu1 %5720 }
 0x4e4   : > { %v5722_v40 = vunpack.i.l.bf16 %v5721_v25  ;;  %v5723_v51 = vunpack.i.h.bf16 %v5721_v25 }
 0x4e6   : > { %v1937_v14 = vsel %vm787_vm13, %v1936_v23, %v5722_v40 }
 0x4e7   : > { %v1938_v61 = vsel %vm789_vm14, %v1937_v14, %v5727_v12  ;;  %v5618_v12 = vunpack.i.h.bf16 %v7263_v56 }
 0x4e8   : > { %v1939_v47 = vsel %vm529_vm6, %v1938_v61, %v1915_v29  ;;  %v5617_v29 = vunpack.i.l.bf16 %v7263_v56 }
 0x4e9   : > { %v1924_v35 = vpop.permute.xlu0 %1923 }
 0x4eb   : > { %v1918_v5 = vpop.permute.xlu1 %1917 }
 0x4ec   : > { %v1940_v38 = vsel %vm459_vm3, %v1939_v47, %v1918_v5  ;;  %v2778_v47 = vsel %vm745_vm11, %v5617_v29, %v5618_v12 }
 0x4ed   : > { %v1941_v50 = vsel %vm389_vm1, %v1940_v38, %v1921_v26 }
 0x4ee   : > { %v1942_v23 = vsel %vm319_vm0, %v1941_v50, %v1924_v35 }
 0x4f3   : > { %v5731_v4 = vpop.permute.xlu1 %5730 }
 0x4f4   : > { %v5733_v30 = vunpack.i.h.bf16 %v5731_v4  ;;  %v5732_v31 = vunpack.i.l.bf16 %v5731_v4  ;;  %v7482_v4 = vmax.f32 %v7032_v19, %v2778_v47 }
 0x4f6   : > { %v2164_v8 = vsel %vm745_vm11, %v5733_v30, %v5607_v58  ;;  %v2165_v11 = vsel %vm745_vm11, %v8350_v21, %v5733_v30  ;;  %v1943_v43 = vsel %vm785_vm12, %v1902_v1, %v5732_v31  ;;  %v5622_v1 = vunpack.i.l.bf16 %v7265_v15  ;;  %v3579_v30 = vpop.f32.mrf.mxu0 }
 0x4f7   : > { %v7439_v40 = vmax.f32 %v7134_v27, %v2164_v8  ;;  %v2168_v25 = vmax.f32 %v6996_v34, %v2165_v11  ;;  %v1944_v42 = vsel %vm787_vm13, %v1943_v43, %v5723_v51  ;;  %v5623_v27 = vunpack.i.h.bf16 %v7265_v15 }
 0x4f8   : > { %v1945_v14 = vsel %vm789_vm14, %v1944_v42, %v5728_v24  ;;  %v3580_v24 = vadd.f32 %v3579_v30, %v8341_v13  ;;  %v8352_v30 = vunpack.i.h.bf16 %v7202_v28  ;;  %v5678_v15 = vunpack.i.h.bf16 %v7287_v41 }
 0x4f9   : > { %v7445_v58 = vpack.c.bf16 %v1945_v14, %v1942_v23  ;;  %v5744_v55 = vpack.i.bf16 %v2168_v25, %v7439_v40  ;;  %v5734_v5 = vpack.i.bf16 %v7139_v37, %v7439_v40  ;;  %v5749_v34 = vpack.i.bf16 %v7158_v9, %v2168_v25 }
 0x4fa   : > { %v3042_v61 = vsel %vm745_vm11, %v5622_v1, %v5623_v27 }
 0x4fb   : > { %1947 = vst [vmem:[#allocation3 + $0x3c] sm:$0x7] %v7445_v58  ;;  %5745 = vrot.lane.b32.xlu2 %v5744_v55, %s5920_s11  ;;  %5740 = vrot.lane.b32.xlu1 %v5744_v55, %s5919_s10  ;;  %v7479_v38 = vmax.f32 %v7056_v33, %v3042_v61  ;;  %v3586_v33 = vmax.f32 %v3580_v24, 0.0  ;;  %v8351_v61 = vunpack.i.l.bf16 %v7202_v28 }
 0x4fc   : > { %5735 = vrot.lane.b32.xlu0 %v5734_v5, %s5918_s9 }
 0x4fd   : > { %v5799_v26 = vpack.i.bf16 %v7482_v4, %v7479_v38  ;;  %v3602_v43 = vrot.slane %v3586_v33, 6 }
 0x4fe   : > { %v3581_v51 = vpop.f32.mrf.mxu0 }
 0x4ff   : > { %v3582_v50 = vadd.f32 %v3581_v51, %v8342_v39 }
 0x501   : > { %v3589_v8 = vmax.f32 %v3582_v50, 0.0 }
 0x503   : > { %5750 = vrot.lane.b32.xlu2 %v5749_v34, %s5918_s9  ;;  %5760 = vrot.lane.b32.xlu1 %v7222_v62, %s5921_s12  ;;  %v3603_v11 = vrot.slane %v3589_v8, 6 }
 0x505   : > { %v3604_v14 = vsel %vm721_vm10, %v3602_v43, %v3603_v11 }
 0x506   : > { %v7510_v24 = vmax.f32 %v3586_v33, %v3604_v14 }
 0x50b   : > { %5765 = vrot.lane.b32.xlu2 %v7222_v62, %s5924_s21  ;;  %5775 = vrot.lane.b32.xlu1 %v7222_v62, %s5922_s17 }
 0x513   : > { %5800 = vrot.lane.b32.xlu1 %v5799_v26, %s5919_s10 }
 0x555   : > { %v5746_v31 = vpop.permute.xlu2 %5745 }
 0x556   : > { %v5748_v55 = vunpack.i.h.bf16 %v5746_v31  ;;  %v5747_v14 = vunpack.i.l.bf16 %v5746_v31 }
 0x55d   : > { %v7489_v21 = vpop.permute.xlu2 %5750 }
 0x55e   : > { %v5752_v19 = vunpack.i.l.bf16 %v7489_v21 }
 0x560   : > { %v2209_v5 = vsel %vm785_vm12, %v2168_v25, %v5752_v19 }
 0x56d   : > { %v5741_v35 = vpop.permute.xlu1 %5740 }
 0x56e   : > { %v5743_v42 = vunpack.i.h.bf16 %v5741_v35  ;;  %v5736_v23 = vpop.permute.xlu0 %5735  ;;  %v5742_v33 = vunpack.i.l.bf16 %v5741_v35 }
 0x56f   : > { %v5738_v34 = vunpack.i.h.bf16 %v5736_v23 }
 0x570   : > { %v2210_v39 = vsel %vm787_vm13, %v2209_v5, %v5743_v42 }
 0x571   : > { %v2211_v13 = vsel %vm789_vm14, %v2210_v39, %v5748_v55  ;;  %v2474_v47 = vsel %vm745_vm11, %v5738_v34, %v8351_v61  ;;  %v2475_v51 = vsel %vm745_vm11, %v8352_v30, %v5738_v34  ;;  %v7534_v55 = vpop.permute.xlu2 %5765 }
 0x572   : > { %v7505_v50 = vmax.f32 %v7139_v37, %v2474_v47  ;;  %v7508_v25 = vmax.f32 %v7021_v48, %v2475_v51  ;;  %v5737_v37 = vunpack.i.l.bf16 %v5736_v23  ;;  %v5767_v35 = vunpack.i.l.bf16 %v7534_v55 }
 0x574   : > { %v5779_v8 = vpack.i.bf16 %v7508_v25, %v7505_v50  ;;  %v5754_v11 = vpack.i.bf16 %v7505_v50, %v7510_v24  ;;  %v5789_v48 = vpack.i.bf16 %v7508_v25, %v7153_v57  ;;  %v2202_v19 = vsel %vm785_vm12, %v7439_v40, %v5737_v37 }
 0x575   : > { %v7526_v28 = vpop.permute.xlu1 %5760 }
 0x576   : > { %5780 = vrot.lane.b32.xlu2 %v5779_v8, %s5919_s10  ;;  %5755 = vrot.lane.b32.xlu0 %v5754_v11, %s5918_s9  ;;  %v5762_v42 = vunpack.i.l.bf16 %v7526_v28 }
 0x57d   : > { %v7538_v23 = vpop.permute.xlu1 %5775 }
 0x57e   : > { %5805 = vrot.lane.b32.xlu2 %v5799_v26, %s5920_s11  ;;  %5770 = vrot.lane.b32.xlu0 %v7222_v62, %s5923_s20  ;;  %v2203_v62 = vsel %vm787_vm13, %v2202_v19, %v5742_v33  ;;  %v5777_v39 = vunpack.i.l.bf16 %v7538_v23  ;;  %v5753_v33 = vunpack.i.h.bf16 %v7489_v21 }
 0x57f   : > { %v2204_v5 = vsel %vm789_vm14, %v2203_v62, %v5747_v14  ;;  %v5627_v14 = vunpack.i.l.bf16 %v7267_v52 }
 0x586   : > { %5785 = vrot.lane.b32.xlu0 %v5779_v8, %s5920_s11  ;;  %v5677_v8 = vunpack.i.l.bf16 %v7287_v41 }
 0x58e   : > { %5790 = vrot.lane.b32.xlu0 %v5789_v48, %s5918_s9  ;;  %v2777_v48 = vsel %vm745_vm11, %v5618_v12, %v5677_v8  ;;  %v5637_v12 = vunpack.i.l.bf16 %v7269_v60 }
 0x58f   : > { %v2781_v19 = vmax.f32 %v7034_v22, %v2777_v48 }
 0x596   : > { %5795 = vrot.lane.b32.xlu0 %v5799_v26, %s5918_s9  ;;  %v2205_v26 = vsel %vm529_vm6, %v2204_v5, %v5762_v42  ;;  %v5628_v42 = vunpack.i.h.bf16 %v7267_v52 }
 0x597   : > { %v2206_v61 = vsel %vm459_vm3, %v2205_v26, %v5767_v35  ;;  %v3308_v26 = vsel %vm745_vm11, %v5753_v33, %v5627_v14  ;;  %v805_v35 = vrot.slane %v7284_v44, 5 }
 0x598   : > { %v7578_v22 = vmax.f32 %v7158_v9, %v3308_v26 }
 0x599   : > { %v806_v41 = vrot.slane %v805_v35, 4 }
 0x5d0   : > { %v5781_v17 = vpop.permute.xlu2 %5780 }
 0x5e8   : > { %v7530_v43 = vpop.permute.xlu0 %5755 }
 0x5e9   : > { %v5757_v21 = vunpack.i.l.bf16 %v7530_v43 }
 0x5eb   : > { %v3619_v9 = vsel %vm745_vm11, %v5757_v21, %v5628_v42 }
 0x5f0   : > { %v7541_v34 = vpop.permute.xlu0 %5770 }
 0x5f1   : > { %v5772_v40 = vunpack.i.l.bf16 %v7541_v34 }
 0x5f3   : > { %v2207_v31 = vsel %vm389_vm1, %v2206_v61, %v5772_v40  ;;  %v5638_v40 = vunpack.i.h.bf16 %v7269_v60  ;;  %v833_v60 = vrot.slane %v7284_v44, 7 }
 0x5f4   : > { %v2208_v47 = vsel %vm319_vm0, %v2207_v31, %v5777_v39  ;;  %v7600_v39 = vmax.f32 %v7510_v24, %v3619_v9  ;;  %v819_v31 = vrot.slane %v7284_v44, 6  ;;  %v5768_v9 = vunpack.i.h.bf16 %v7534_v55 }
 0x5f5   : > { %v7548_v30 = vpack.c.bf16 %v2211_v13, %v2208_v47  ;;  %v3617_v47 = vsel %vm745_vm11, %v5637_v12, %v5757_v21  ;;  %v3307_v24 = vsel %vm745_vm11, %v5627_v14, %v5638_v40 }
 0x5f8   : > { %v7550_v51 = vpop.permute.xlu0 %5785 }
 0x5f9   : > { %v5787_v26 = vunpack.i.l.bf16 %v7550_v51 }
 0x600   : > { %v7553_v11 = vpop.permute.xlu0 %5790 }
 0x601   : > { %v5792_v37 = vunpack.i.l.bf16 %v7553_v11 }
 0x603   : > { %v3041_v13 = vsel %vm745_vm11, %v5623_v27, %v5792_v37  ;;  %v3618_v27 = vsel %vm745_vm11, %v5628_v42, %v5637_v12  ;;  %v820_v42 = vrot.slane %v819_v31, 4 }
 0x604   : > { %v3045_v62 = vmax.f32 %v7058_v49, %v3041_v13  ;;  %v7581_v49 = vmax.f32 %v7093_v0, %v3618_v27  ;;  %v3309_v0 = vsel %vm745_vm11, %v5638_v40, %v5753_v33  ;;  %v3311_v33 = vmax.f32 %v7091_v54, %v3307_v24 }
 0x605   : > { %v7603_v61 = vmax.f32 %v7111_v7, %v3309_v0  ;;  %v3621_v7 = vmax.f32 %v7109_v53, %v3617_v47  ;;  %v5658_v13 = vunpack.i.h.bf16 %v7311_v46  ;;  %v5782_v27 = vunpack.i.l.bf16 %v5781_v17 }
 0x606   : > { %v5819_v5 = vpack.i.bf16 %v2781_v19, %v3045_v62  ;;  %v5834_v52 = vpack.i.bf16 %v7581_v49, %v7578_v22  ;;  %v5657_v19 = vunpack.i.l.bf16 %v7311_v46  ;;  %v3043_v62 = vsel %vm745_vm11, %v5792_v37, %v5622_v1 }
 0x607   : > { %v5854_v48 = vpack.i.bf16 %v7600_v39, %v7603_v61  ;;  %v7633_v53 = vmax.f32 %v7153_v57, %v3043_v62  ;;  %v2779_v37 = vsel %vm745_vm11, %v5677_v8, %v5617_v29  ;;  %v1386_v0 = vrot.slane %v7381_v63, 7 }
 0x608   : > { %5820 = vrot.lane.b32.xlu2 %v5819_v5, %s5923_s20  ;;  %5815 = vrot.lane.b32.xlu0 %v5819_v5, %s5924_s21  ;;  %v3922_v54 = vsel %vm745_vm11, %v5657_v19, %v5658_v13  ;;  %v3923_v14 = vsel %vm745_vm11, %v5678_v15, %v5657_v19  ;;  %v7651_v57 = vmax.f32 %v7144_v2, %v2779_v37  ;;  %v1090_v2 = vrot.slane %v7325_v59, 7 }
 0x609   : > { %5810 = vrot.lane.b32.xlu1 %v5819_v5, %s5921_s12  ;;  %v7636_v46 = vmax.f32 %v7191_v6, %v3922_v54  ;;  %v3921_v6 = vsel %vm745_vm11, %v5658_v13, %v5678_v15  ;;  %v7656_v56 = vmax.f32 %v7247_v3, %v3923_v14  ;;  %v7677_v3 = vpop.permute.xlu2 %5805 }
 0x60a   : > { %v3925_v29 = vmax.f32 %v7188_v45, %v3921_v6  ;;  %v5758_v45 = vunpack.i.h.bf16 %v7530_v43  ;;  %v5808_v6 = vunpack.i.h.bf16 %v7677_v3 }
 0x60b   : > { %v5879_v1 = vpack.i.bf16 %v7633_v53, %v7636_v46  ;;  %v5894_v8 = vpack.i.bf16 %v7656_v56, %v7651_v57 }
 0x60c   : > { %v2512_v12 = vsel %vm785_vm12, %v7505_v50, %v5758_v45  ;;  %v7694_v50 = vrot.slane %v7548_v30, 5 }
 0x60d   : > { %v2513_v21 = vsel %vm787_vm13, %v2512_v12, %v5782_v27 }
 0x60e   : > { %v2514_v43 = vsel %vm789_vm14, %v2513_v21, %v5787_v26  ;;  %2218 = vst [vmem:[#allocation3 + $0x48] sm:$0x8] %v7694_v50 }
 0x610   : > { %5825 = vrot.lane.b32.xlu2 %v5819_v5, %s5922_s17  ;;  %5835 = vrot.lane.b32.xlu0 %v5834_v52, %s5919_s10  ;;  %v1076_v5 = vrot.slane %v7325_v59, 6 }
 0x611   : > { %5840 = vrot.lane.b32.xlu1 %v5834_v52, %s5920_s11 }
 0x618   : > { %5830 = vrot.lane.b32.xlu2 %v5834_v52, %s5918_s9  ;;  %840 = vrot.lane.b32.xlu0 %v7284_v44, %s5921_s12  ;;  %v5849_v44 = vpack.i.bf16 %v3621_v7, %v3311_v33  ;;  %v1077_v52 = vrot.slane %v1076_v5, 4  ;;  %v5788_v33 = vunpack.i.h.bf16 %v7550_v51 }
 0x619   : > { %807 = vrot.lane.b32.xlu1 %v805_v35, %s5918_s9 }
 0x620   : > { %834 = vrot.lane.b32.xlu2 %v833_v60, %s5920_s11  ;;  %821 = vrot.lane.b32.xlu0 %v819_v31, %s5919_s10  ;;  %v5773_v31 = vunpack.i.h.bf16 %v7541_v34  ;;  %v5778_v34 = vunpack.i.h.bf16 %v7538_v23  ;;  %v5801_v23 = vpop.permute.xlu1 %5800 }
 0x621   : > { %5855 = vrot.lane.b32.xlu1 %v5854_v48, %s5918_s9  ;;  %v5803_v54 = vunpack.i.h.bf16 %v5801_v23  ;;  %v5802_v45 = vunpack.i.l.bf16 %v5801_v23 }
 0x628   : > { %5850 = vrot.lane.b32.xlu0 %v5849_v44, %s5924_s21  ;;  %5845 = vrot.lane.b32.xlu2 %v5849_v44, %s5921_s12 }
 0x629   : > { %5870 = vrot.lane.b32.xlu1 %v5849_v44, %s5922_s17 }
 0x630   : > { %5865 = vrot.lane.b32.xlu0 %v5854_v48, %s5919_s10  ;;  %5860 = vrot.lane.b32.xlu2 %v5849_v44, %s5923_s20  ;;  %v5796_v44 = vpop.permute.xlu0 %5795 }
 0x631   : > { %823 = vrot.lane.b32.xlu1 %v820_v42, %s5919_s10  ;;  %v5798_v62 = vunpack.i.h.bf16 %v5796_v44  ;;  %v1693_v42 = vrot.slane %v7417_v16, 5  ;;  %v5797_v15 = vunpack.i.l.bf16 %v5796_v44 }
 0x633   : > { %v1694_v27 = vrot.slane %v1693_v42, 4 }
 0x638   : > { %5875 = vrot.lane.b32.xlu2 %v5854_v48, %s5920_s11  ;;  %5880 = vrot.lane.b32.xlu0 %v5879_v1, %s5918_s9 }
 0x639   : > { %5890 = vrot.lane.b32.xlu1 %v5879_v1, %s5920_s11 }
 0x640   : > { %809 = vrot.lane.b32.xlu2 %v806_v41, %s5918_s9  ;;  %3938 = vrot.lane.b32.xlu0 %v3925_v29, %s5921_s12 }
 0x641   : > { %5895 = vrot.lane.b32.xlu1 %v5894_v8, %s5918_s9 }
 0x648   : > { %5885 = vrot.lane.b32.xlu2 %v5879_v1, %s5919_s10  ;;  %3941 = vrot.lane.b32.xlu0 %v3925_v29, %s5924_s21 }
 0x649   : > { %5900 = vrot.lane.b32.xlu1 %v5894_v8, %s5919_s10 }
 0x650   : > { %3944 = vrot.lane.b32.xlu2 %v3925_v29, %s5923_s20  ;;  %5905 = vrot.lane.b32.xlu0 %v5894_v8, %s5920_s11 }
 0x651   : > { %3947 = vrot.lane.b32.xlu1 %v3925_v29, %s5922_s17 }
 0x658   : > { %1091 = vrot.lane.b32.xlu2 %v1090_v2, %s5919_s10  ;;  %1097 = vrot.lane.b32.xlu0 %v7325_v59, %s5920_s11  ;;  %v5763_v59 = vunpack.i.h.bf16 %v7526_v28  ;;  %v5793_v28 = vunpack.i.h.bf16 %v7553_v11  ;;  %v5783_v11 = vunpack.i.h.bf16 %v5781_v17  ;;  %v3080_v17 = vsel %vm785_vm12, %v7479_v38, %v5797_v15 }
 0x659   : > { %1103 = vrot.lane.b32.xlu1 %v7328_v36, %s5921_s12  ;;  %v2215_v36 = vrot.slane %v7694_v50, 4 }
 0x65a   : > { %v2515_v40 = vsel %vm529_vm6, %v2514_v43, %v5763_v59  ;;  %v2519_v48 = vsel %vm785_vm12, %v7508_v25, %v5793_v28  ;;  %v5807_v43 = vunpack.i.l.bf16 %v7677_v3  ;;  %v1949_v3 = vrot.slane %v7445_v58, 5 }
 0x65b   : > { %v2516_v60 = vsel %vm459_vm3, %v2515_v40, %v5768_v9  ;;  %2219 = vst [vmem:[#allocation3 + $0x4c] sm:$0x3] %v2215_v36  ;;  %v2520_v24 = vsel %vm787_vm13, %v2519_v48, %v5783_v11 }
 0x65c   : > { %v2517_v47 = vsel %vm389_vm1, %v2516_v60, %v5773_v31  ;;  %v2521_v25 = vsel %vm789_vm14, %v2520_v24, %v5788_v33 }
 0x660   : > { %1105 = vrot.lane.b32.xlu2 %v1071_v20, %s5921_s12  ;;  %1078 = vrot.lane.b32.xlu0 %v1076_v5, %s5918_s9  ;;  %v1399_v20 = vrot.slane %v7381_v63, 5 }
 0x661   : > { %1080 = vrot.lane.b32.xlu1 %v1077_v52, %s5918_s9 }
 0x662   : > { %v7691_v35 = vpop.permute.xlu2 %5820  ;;  %v1400_v7 = vrot.slane %v1399_v20, 4 }
 0x668   : > { %1401 = vrot.lane.b32.xlu2 %v1399_v20, %s5920_s11  ;;  %1387 = vrot.lane.b32.xlu0 %v1386_v0, %s5918_s9 }
 0x669   : > { %1393 = vrot.lane.b32.xlu1 %v7381_v63, %s5919_s10  ;;  %v2518_v63 = vsel %vm319_vm0, %v2517_v47, %v5778_v34 }
 0x66a   : > { %v7711_v55 = vpop.permute.xlu2 %5825  ;;  %v7727_v19 = vpack.c.bf16 %v2521_v25, %v2518_v63 }
 0x66c   : > { %v7730_v51 = vrot.slane %v7727_v19, 6 }
 0x66e   : > { %2528 = vst [vmem:[#allocation3 + $0x58] sm:$0xc] %v7730_v51 }
 0x670   : > { %1415 = vrot.lane.b32.xlu2 %v1381_v32, %s5921_s12  ;;  %1403 = vrot.lane.b32.xlu0 %v1400_v7, %s5920_s11  ;;  %v2525_v32 = vrot.slane %v7730_v51, 4 }
 0x671   : > { %1413 = vrot.lane.b32.xlu1 %v7384_v10, %s5921_s12  ;;  %v2816_v10 = vsel %vm785_vm12, %v7482_v4, %v5798_v62  ;;  %v1707_v4 = vrot.slane %v7417_v16, 6  ;;  %v1977_v62 = vrot.slane %v7445_v58, 7 }
 0x672   : > { %v5831_v13 = vpop.permute.xlu2 %5830  ;;  %2529 = vst [vmem:[#allocation3 + $0x5c] sm:$0x1] %v2525_v32  ;;  %v2817_v1 = vsel %vm787_vm13, %v2816_v10, %v5803_v54  ;;  %v5827_v54 = vunpack.i.l.bf16 %v7711_v55 }
 0x673   : > { %v1708_v26 = vrot.slane %v1707_v4, 4  ;;  %v5833_v38 = vunpack.i.h.bf16 %v5831_v13  ;;  %v5832_v59 = vunpack.i.l.bf16 %v5831_v13 }
 0x675   : > { %v3656_v48 = vsel %vm785_vm12, %v7581_v49, %v5833_v38  ;;  %v3346_v11 = vsel %vm785_vm12, %v7578_v22, %v5832_v59  ;;  %v5822_v49 = vunpack.i.l.bf16 %v7691_v35 }
 0x678   : > { %1687 = vrot.lane.b32.xlu2 %v7417_v16, %s5918_s9  ;;  %1695 = vrot.lane.b32.xlu0 %v1693_v42, %s5919_s10  ;;  %v3081_v16 = vsel %vm787_vm13, %v3080_v17, %v5802_v45 }
 0x679   : > { %1721 = vrot.lane.b32.xlu1 %v1684_v18, %s5921_s12  ;;  %v2818_v18 = vsel %vm789_vm14, %v2817_v1, %v5808_v6  ;;  %v3082_v9 = vsel %vm789_vm14, %v3081_v16, %v5807_v43 }
 0x67a   : > { %v835_v37 = vpop.permute.xlu2 %834  ;;  %v5816_v14 = vpop.permute.xlu0 %5815 }
 0x67b   : > { %v836_v41 = vrot.slane %v835_v37, 4  ;;  %v5818_v29 = vunpack.i.h.bf16 %v5816_v14  ;;  %v5811_v8 = vpop.permute.xlu1 %5810  ;;  %v5817_v40 = vunpack.i.l.bf16 %v5816_v14 }
 0x67c   : > { %v5813_v2 = vunpack.i.h.bf16 %v5811_v8  ;;  %v5812_v21 = vunpack.i.l.bf16 %v5811_v8 }
 0x67d   : > { %v837_v5 = vsel %vm459_vm3, %v835_v37, %v836_v41  ;;  %v1963_v37 = vrot.slane %v7445_v58, 6 }
 0x67e   : > { %839 = vst [vmem:[#allocation3 + $0x8] sm:$0xe] %v837_v5  ;;  %v2819_v12 = vsel %vm529_vm6, %v2818_v18, %v5813_v2  ;;  %v3083_v60 = vsel %vm529_vm6, %v3082_v9, %v5812_v21  ;;  %v1950_v2 = vrot.slane %v1949_v3, 4 }
 0x67f   : > { %v7755_v52 = vsel %vm459_vm3, %v2819_v12, %v5818_v29  ;;  %v3084_v25 = vsel %vm459_vm3, %v3083_v60, %v5817_v40  ;;  %v1964_v17 = vrot.slane %v1963_v37, 4 }
 0x680   : > { %1709 = vrot.lane.b32.xlu2 %v1707_v4, %s5920_s11  ;;  %1711 = vrot.lane.b32.xlu0 %v1708_v26, %s5920_s11  ;;  %v3085_v10 = vsel %vm389_vm1, %v3084_v25, %v5822_v49 }
 0x681   : > { %1697 = vrot.lane.b32.xlu1 %v1694_v27, %s5919_s10  ;;  %v7789_v41 = vsel %vm319_vm0, %v3085_v10, %v5827_v54  ;;  %v2220_v27 = vrot.slane %v7548_v30, 6 }
 0x682   : > { %v5836_v20 = vpop.permute.xlu0 %5835  ;;  %v5846_v0 = vpop.permute.xlu2 %5845 }
 0x683   : > { %v5838_v28 = vunpack.i.h.bf16 %v5836_v20  ;;  %v5837_v31 = vunpack.i.l.bf16 %v5836_v20  ;;  %v5841_v47 = vpop.permute.xlu1 %5840  ;;  %v5848_v44 = vunpack.i.h.bf16 %v5846_v0  ;;  %v5847_v63 = vunpack.i.l.bf16 %v5846_v0 }
 0x684   : > { %v5843_v24 = vunpack.i.h.bf16 %v5841_v47  ;;  %v5842_v7 = vunpack.i.l.bf16 %v5841_v47  ;;  %v2221_v20 = vrot.slane %v2220_v27, 4 }
 0x685   : > { %v3657_v34 = vsel %vm787_vm13, %v3656_v48, %v5838_v28  ;;  %v3347_v33 = vsel %vm787_vm13, %v3346_v11, %v5837_v31  ;;  %v2543_v48 = vrot.slane %v7727_v19, 5  ;;  %v5823_v11 = vunpack.i.h.bf16 %v7691_v35 }
 0x686   : > { %v3658_v13 = vsel %vm789_vm14, %v3657_v34, %v5843_v24  ;;  %v3348_v23 = vsel %vm789_vm14, %v3347_v33, %v5842_v7  ;;  %v5828_v33 = vunpack.i.h.bf16 %v7711_v55 }
 0x687   : > { %v3659_v22 = vsel %vm529_vm6, %v3658_v13, %v5848_v44  ;;  %v7777_v42 = vsel %vm529_vm6, %v3348_v23, %v5847_v63  ;;  %v2234_v13 = vrot.slane %v7548_v30, 7  ;;  %v2821_v23 = vsel %vm389_vm1, %v7755_v52, %v5823_v11 }
 0x688   : > { %1951 = vrot.lane.b32.xlu2 %v1949_v3, %s5918_s9  ;;  %1978 = vrot.lane.b32.xlu0 %v1977_v62, %s5920_s11  ;;  %v2822_v62 = vsel %vm319_vm0, %v2821_v23, %v5828_v33 }
 0x689   : > { %1984 = vrot.lane.b32.xlu1 %v7445_v58, %s5921_s12 }
 0x68a   : > { %v841_v15 = vpop.permute.xlu0 %840  ;;  %v7785_v1 = vpop.permute.xlu2 %5860 }
 0x68b   : > { %v842_v14 = vrot.slane %v841_v15, 4  ;;  %v808_v4 = vpop.permute.xlu1 %807  ;;  %v5863_v59 = vunpack.i.h.bf16 %v7785_v1 }
 0x68c   : > { %v811_v6 = vrot.slane %v808_v4, 4 }
 0x68d   : > { %v843_v29 = vsel %vm529_vm6, %v841_v15, %v842_v14 }
 0x68e   : > { %845 = vst [vmem:[#allocation3 + $0xc] sm:$0x7] %v843_v29  ;;  %v813_v8 = vsel %vm319_vm0, %v808_v4, %v811_v6 }
 0x68f   : > { %817 = vst [vmem:[#allocation3] sm:$0x8] %v813_v8 }
 0x690   : > { %1967 = vrot.lane.b32.xlu2 %v1964_v17, %s5919_s10  ;;  %1953 = vrot.lane.b32.xlu0 %v1950_v2, %s5918_s9 }
 0x691   : > { %1965 = vrot.lane.b32.xlu1 %v1963_v37, %s5919_s10  ;;  %v2530_v37 = vrot.slane %v7727_v19, 7 }
 0x692   : > { %v822_v58 = vpop.permute.xlu0 %821  ;;  %v7796_v45 = vpop.permute.xlu2 %5875 }
 0x693   : > { %v825_v5 = vrot.slane %v822_v58, 4  ;;  %v7798_v18 = vpop.permute.xlu1 %5855  ;;  %v5878_v7 = vunpack.i.h.bf16 %v7796_v45 }
 0x694   : > { %v5858_v60 = vunpack.i.h.bf16 %v7798_v18 }
 0x695   : > { %v827_v12 = vsel %vm389_vm1, %v822_v58, %v825_v5 }
 0x696   : > { %831 = vst [vmem:[#allocation3 + $0x4] sm:$0xc] %v827_v12  ;;  %v3663_v24 = vsel %vm785_vm12, %v7600_v39, %v5858_v60  ;;  %v2544_v39 = vrot.slane %v2543_v48, 4 }
 0x698   : > { %2249 = vrot.lane.b32.xlu2 %v2215_v36, %s5921_s12  ;;  %2241 = vrot.lane.b32.xlu0 %v7548_v30, %s5920_s11 }
 0x699   : > { %2247 = vrot.lane.b32.xlu1 %v7694_v50, %s5921_s12 }
 0x69a   : > { %v7808_v26 = vpop.permute.xlu0 %5850  ;;  %v810_v16 = vpop.permute.xlu2 %809 }
 0x69b   : > { %v7811_v21 = vpop.permute.xlu1 %5870  ;;  %v5853_v43 = vunpack.i.h.bf16 %v7808_v26  ;;  %v812_v38 = vrot.slane %v810_v16, 4 }
 0x69c   : > { %v5873_v36 = vunpack.i.h.bf16 %v7811_v21 }
 0x69d   : > { %v3660_v40 = vsel %vm459_vm3, %v3659_v22, %v5853_v43  ;;  %v814_v9 = vsel %vm319_vm0, %v810_v16, %v812_v38  ;;  %v5852_v43 = vunpack.i.l.bf16 %v7808_v26 }
 0x69e   : > { %v3661_v50 = vsel %vm389_vm1, %v3660_v40, %v5863_v59  ;;  %818 = vst [vmem:[#allocation3 + $0x4] sm:$0x3] %v814_v9 }
 0x69f   : > { %v3662_v0 = vsel %vm319_vm0, %v3661_v50, %v5873_v36  ;;  %v3350_v26 = vsel %vm459_vm3, %v7777_v42, %v5852_v43  ;;  %v5872_v42 = vunpack.i.l.bf16 %v7811_v21 }
 0x6a0   : > { %2224 = vrot.lane.b32.xlu2 %v2221_v20, %s5918_s9  ;;  %2222 = vrot.lane.b32.xlu0 %v2220_v27, %s5918_s9  ;;  %v5857_v27 = vunpack.i.l.bf16 %v7798_v18 }
 0x6a1   : > { %2537 = vrot.lane.b32.xlu1 %v7727_v19, %s5919_s10 }
 0x6a2   : > { %v7825_v28 = vpop.permute.xlu0 %5865  ;;  %v7827_v31 = vpop.permute.xlu2 %5885  ;;  %v3353_v18 = vsel %vm785_vm12, %v7603_v61, %v5857_v27 }
 0x6a3   : > { %v824_v47 = vpop.permute.xlu1 %823  ;;  %v5868_v3 = vunpack.i.h.bf16 %v7825_v28  ;;  %v5888_v22 = vunpack.i.h.bf16 %v7827_v31  ;;  %v5867_v38 = vunpack.i.l.bf16 %v7825_v28  ;;  %v5887_v27 = vunpack.i.l.bf16 %v7827_v31 }
 0x6a4   : > { %v826_v34 = vrot.slane %v824_v47, 4 }
 0x6a5   : > { %v3664_v44 = vsel %vm787_vm13, %v3663_v24, %v5868_v3 }
 0x6a6   : > { %v828_v63 = vsel %vm389_vm1, %v824_v47, %v826_v34  ;;  %v3665_v25 = vsel %vm789_vm14, %v3664_v44, %v5878_v7  ;;  %v5862_v47 = vunpack.i.l.bf16 %v7785_v1 }
 0x6a7   : > { %832 = vst [vmem:[#allocation3 + $0x8] sm:$0x1] %v828_v63  ;;  %v7842_v35 = vpack.c.bf16 %v3665_v25, %v3662_v0 }
 0x6a8   : > { %2545 = vrot.lane.b32.xlu2 %v2543_v48, %s5920_s11  ;;  %2235 = vrot.lane.b32.xlu0 %v2234_v13, %s5919_s10  ;;  %v5877_v48 = vunpack.i.l.bf16 %v7796_v45  ;;  %v3351_v11 = vsel %vm389_vm1, %v3350_v26, %v5862_v47 }
 0x6a9   : > { %2547 = vrot.lane.b32.xlu1 %v2544_v39, %s5920_s11  ;;  %v3352_v63 = vsel %vm319_vm0, %v3351_v11, %v5872_v42 }
 0x6aa   : > { %v7848_v55 = vpop.permute.xlu2 %3944  ;;  %v7850_v49 = vpop.permute.xlu0 %5880 }
 0x6ab   : > { %v7852_v30 = vpop.permute.xlu1 %5890  ;;  %v5883_v52 = vunpack.i.h.bf16 %v7850_v49 }
 0x6ac   : > { %v5893_v10 = vunpack.i.h.bf16 %v7852_v30 }
 0x6ad   : > { %v3087_v54 = vsel %vm785_vm12, %v7633_v53, %v5883_v52 }
 0x6ae   : > { %v3088_v15 = vsel %vm787_vm13, %v3087_v54, %v5888_v22 }
 0x6af   : > { %v3089_v14 = vsel %vm789_vm14, %v3088_v15, %v5893_v10 }
 0x6b0   : > { %v7863_v4 = vpack.c.bf16 %v3089_v14, %v7789_v41  ;;  %2531 = vrot.lane.b32.xlu0 %v2530_v37, %s5918_s9  ;;  %v5882_v14 = vunpack.i.l.bf16 %v7850_v49 }
 0x6b2   : > { %3091 = vst [vmem:[#allocation3 + $0x78] sm:$0x7] %v7863_v4  ;;  %v1092_v6 = vpop.permute.xlu2 %1091  ;;  %v7867_v29 = vpop.permute.xlu0 %3938  ;;  %v3960_v49 = vsel %vm785_vm12, %v7636_v46, %v5882_v14 }
 0x6b3   : > { %v7869_v8 = vpop.permute.xlu1 %5895  ;;  %v1093_v17 = vrot.slane %v1092_v6, 4 }
 0x6b4   : > { %v5897_v12 = vunpack.i.l.bf16 %v7869_v8 }
 0x6b5   : > { %v1094_v53 = vsel %vm389_vm1, %v1092_v6, %v1093_v17 }
 0x6b6   : > { %1096 = vst [vmem:[#allocation3 + $0x14] sm:$0xe] %v1094_v53  ;;  %v2823_v40 = vsel %vm785_vm12, %v7651_v57, %v5897_v12  ;;  %v3354_v57 = vsel %vm787_vm13, %v3353_v18, %v5867_v38  ;;  %v3961_v38 = vsel %vm787_vm13, %v3960_v49, %v5887_v27 }
 0x6b7   : > { %v3355_v34 = vsel %vm789_vm14, %v3354_v57, %v5877_v48  ;;  %v3121_v48 = vrot.slane %v7863_v4, 7 }
 0x6b8   : > { %v7905_v23 = vpack.c.bf16 %v3355_v34, %v3352_v63 }
 0x6ba   : > { %v1106_v2 = vpop.permute.xlu2 %1105  ;;  %v7872_v19 = vpop.permute.xlu0 %3941  ;;  %v7913_v22 = vrot.slane %v7905_v23, 5 }
 0x6bb   : > { %v7874_v58 = vpop.permute.xlu1 %5900  ;;  %v1108_v41 = vrot.slane %v1106_v2, 4 }
 0x6bc   : > { %v5902_v16 = vunpack.i.l.bf16 %v7874_v58  ;;  %v3359_v37 = vrot.slane %v7913_v22, 4  ;;  %3362 = vst [vmem:[#allocation3 + $0x84] sm:$0x8] %v7913_v22  ;;  %v5903_v31 = vunpack.i.h.bf16 %v7874_v58 }
 0x6bd   : > { %v1110_v5 = vsel %vm529_vm6, %v1106_v2, %v1108_v41  ;;  %v3093_v41 = vrot.slane %v7863_v4, 5 }
 0x6be   : > { %1114 = vst [vmem:[#allocation3 + $0x1c] sm:$0x3] %v1110_v5  ;;  %v2824_v0 = vsel %vm787_vm13, %v2823_v40, %v5902_v16 }
 0x6bf   : > { %3363 = vst [vmem:[#allocation3 + $0x88] sm:$0x3] %v3359_v37  ;;  %v3094_v43 = vrot.slane %v3093_v41, 4 }
 0x6c2   : > { %v1402_v59 = vpop.permute.xlu2 %1401  ;;  %v7882_v36 = vpop.permute.xlu0 %5905 }
 0x6c3   : > { %v7886_v9 = vpop.permute.xlu1 %3947  ;;  %v1405_v50 = vrot.slane %v1402_v59, 4  ;;  %v5907_v20 = vunpack.i.l.bf16 %v7882_v36  ;;  %v5908_v47 = vunpack.i.h.bf16 %v7882_v36 }
 0x6c5   : > { %v1407_v60 = vsel %vm459_vm3, %v1402_v59, %v1405_v50  ;;  %v2825_v28 = vsel %vm789_vm14, %v2824_v0, %v5907_v20  ;;  %v3107_v50 = vrot.slane %v7863_v4, 6  ;;  %v5892_v20 = vunpack.i.l.bf16 %v7852_v30 }
 0x6c6   : > { %1411 = vst [vmem:[#allocation3 + $0x24] sm:$0x8] %v1407_v60  ;;  %v2826_v3 = vpack.c.bf16 %v2825_v28, %v2822_v62  ;;  %v5898_v0 = vunpack.i.h.bf16 %v7869_v8 }
 0x6c7   : > { %v3962_v28 = vsel %vm789_vm14, %v3961_v38, %v5892_v20  ;;  %v3674_v38 = vrot.slane %v7842_v35, 7 }
 0x6c8   : > { %2831 = vrot.lane.b32.xlu2 %v2826_v3, %s5918_s9  ;;  %v2837_v61 = vrot.slane %v2826_v3, 5  ;;  %v2851_v24 = vrot.slane %v2826_v3, 6  ;;  %v2828_v7 = vrot.slane %v2826_v3, 7  ;;  %v3963_v30 = vsel %vm529_vm6, %v3962_v28, %v7867_v29 }
 0x6c9   : > { %v3967_v58 = vsel %vm785_vm12, %v7656_v56, %v5898_v0  ;;  %v3964_v11 = vsel %vm459_vm3, %v3963_v30, %v7872_v19  ;;  %v3108_v56 = vrot.slane %v3107_v50, 4 }
 0x6ca   : > { %v1416_v33 = vpop.permute.xlu2 %1415  ;;  %v1098_v44 = vpop.permute.xlu0 %1097  ;;  %2839 = vrot.lane.b32.xlu0 %v2837_v61, %s5919_s10  ;;  %v2852_v1 = vrot.slane %v2851_v24, 4  ;;  %2830 = vst [vmem:[#allocation3 + $0x68] sm:$0xe] %v2828_v7  ;;  %v2838_v15 = vrot.slane %v2837_v61, 4  ;;  %v3968_v36 = vsel %vm787_vm13, %v3967_v58, %v5903_v31  ;;  %v3378_v61 = vrot.slane %v7905_v23, 7 }
 0x6cb   : > { %v1104_v45 = vpop.permute.xlu1 %1103  ;;  %v1418_v25 = vrot.slane %v1416_v33, 4  ;;  %v1099_v13 = vrot.slane %v1098_v44, 4  ;;  %v3969_v29 = vsel %vm789_vm14, %v3968_v36, %v5908_v47 }
 0x6cc   : > { %v1107_v39 = vrot.slane %v1104_v45, 4  ;;  %2855 = vrot.lane.b32.xlu1 %v2852_v1, %s5920_s11 }
 0x6cd   : > { %v1420_v21 = vsel %vm529_vm6, %v1416_v33, %v1418_v25  ;;  %v1100_v62 = vsel %vm459_vm3, %v1098_v44, %v1099_v13 }
 0x6ce   : > { %v1109_v52 = vsel %vm529_vm6, %v1104_v45, %v1107_v39  ;;  %1424 = vst [vmem:[#allocation3 + $0x2c] sm:$0x1] %v1420_v21 }
 0x6cf   : > { %1113 = vst [vmem:[#allocation3 + $0x18] sm:$0x8] %v1109_v52 }
 0x6d0   : > { %1102 = vst [vmem:[#allocation3 + $0x18] sm:$0x7] %v1100_v62  ;;  %2865 = vrot.lane.b32.xlu2 %v2828_v7, %s5921_s12 }
 0x6d2   : > { %v1688_v10 = vpop.permute.xlu2 %1687  ;;  %v1079_v54 = vpop.permute.xlu0 %1078  ;;  %3128 = vrot.lane.b32.xlu0 %v7863_v4, %s5921_s12 }
 0x6d3   : > { %v1081_v6 = vpop.permute.xlu1 %1080  ;;  %v1689_v17 = vrot.slane %v1688_v10, 4  ;;  %v1082_v53 = vrot.slane %v1079_v54, 4 }
 0x6d4   : > { %v1083_v2 = vrot.slane %v1081_v6, 4  ;;  %2841 = vrot.lane.b32.xlu1 %v2838_v15, %s5919_s10 }
 0x6d5   : > { %v1690_v5 = vsel %vm319_vm0, %v1688_v10, %v1689_v17  ;;  %v1084_v12 = vsel %vm319_vm0, %v1079_v54, %v1082_v53  ;;  %v3364_v17 = vrot.slane %v7905_v23, 6 }
 0x6d6   : > { %v1085_v16 = vsel %vm319_vm0, %v1081_v6, %v1083_v2  ;;  %1692 = vst [vmem:[#allocation3 + $0x30] sm:$0x7] %v1690_v5 }
 0x6d7   : > { %1089 = vst [vmem:[#allocation3 + $0x14] sm:$0x1] %v1085_v16  ;;  %v3365_v49 = vrot.slane %v3364_v17, 4 }
 0x6d8   : > { %1088 = vst [vmem:[#allocation3 + $0x10] sm:$0xc] %v1084_v12  ;;  %2853 = vrot.lane.b32.xlu2 %v2851_v24, %s5920_s11  ;;  %v3965_v24 = vsel %vm389_vm1, %v3964_v11, %v7848_v55 }
 0x6d9   : > { %v3966_v19 = vsel %vm319_vm0, %v3965_v24, %v7886_v9 }
 0x6da   : > { %v1710_v59 = vpop.permute.xlu2 %1709  ;;  %v1388_v40 = vpop.permute.xlu0 %1387  ;;  %3097 = vrot.lane.b32.xlu0 %v3094_v43, %s5918_s9  ;;  %v7959_v44 = vpack.c.bf16 %v3969_v29, %v3966_v19 }
 0x6db   : > { %v1394_v46 = vpop.permute.xlu1 %1393  ;;  %v1713_v18 = vrot.slane %v1710_v59, 4  ;;  %v1389_v26 = vrot.slane %v1388_v40, 4 }
 0x6dc   : > { %v1395_v60 = vrot.slane %v1394_v46, 4  ;;  %3109 = vrot.lane.b32.xlu1 %v3107_v50, %s5919_s10  ;;  %v3972_v9 = vrot.slane %v7959_v44, 7  ;;  %v3995_v47 = vrot.slane %v7959_v44, 6 }
 0x6dd   : > { %v1715_v57 = vsel %vm459_vm3, %v1710_v59, %v1713_v18  ;;  %v1390_v3 = vsel %vm319_vm0, %v1388_v40, %v1389_v26 }
 0x6de   : > { %v1396_v8 = vsel %vm389_vm1, %v1394_v46, %v1395_v60  ;;  %1719 = vst [vmem:[#allocation3 + $0x34] sm:$0xc] %v1715_v57 }
 0x6df   : > { %1398 = vst [vmem:[#allocation3 + $0x24] sm:$0x7] %v1396_v8 }
 0x6e0   : > { %1392 = vst [vmem:[#allocation3 + $0x20] sm:$0xe] %v1390_v3  ;;  %3122 = vrot.lane.b32.xlu2 %v3121_v48, %s5920_s11 }
 0x6e1   : > { %3974 = vst [vmem:[#allocation3 + $0xa4] sm:$0xe] %v3972_v9 }
 0x6e2   : > { %v1952_v4 = vpop.permute.xlu2 %1951  ;;  %v1404_v7 = vpop.permute.xlu0 %1403  ;;  %3379 = vrot.lane.b32.xlu0 %v3378_v61, %s5919_s10 }
 0x6e3   : > { %v1414_v42 = vpop.permute.xlu1 %1413  ;;  %v1955_v34 = vrot.slane %v1952_v4, 4  ;;  %v1406_v33 = vrot.slane %v1404_v7, 4 }
 0x6e4   : > { %v1417_v1 = vrot.slane %v1414_v42, 4  ;;  %3111 = vrot.lane.b32.xlu1 %v3108_v56, %s5919_s10  ;;  %v3996_v56 = vrot.slane %v3995_v47, 4 }
 0x6e5   : > { %v1957_v63 = vsel %vm319_vm0, %v1952_v4, %v1955_v34  ;;  %v1408_v55 = vsel %vm459_vm3, %v1404_v7, %v1406_v33 }
 0x6e6   : > { %v1419_v45 = vsel %vm529_vm6, %v1414_v42, %v1417_v1  ;;  %1961 = vst [vmem:[#allocation3 + $0x3c] sm:$0x8] %v1957_v63  ;;  %v3981_v42 = vrot.slane %v7959_v44, 5 }
 0x6e7   : > { %1423 = vst [vmem:[#allocation3 + $0x28] sm:$0xc] %v1419_v45  ;;  %v5520_v1 = vld [vmem:[#allocation3 + $0x20] sm:$0xff] }
 0x6e8   : > { %1412 = vst [vmem:[#allocation3 + $0x28] sm:$0x3] %v1408_v55  ;;  %3095 = vrot.lane.b32.xlu2 %v3093_v41, %s5918_s9 }
 0x6ea   : > { %v1968_v25 = vpop.permute.xlu2 %1967  ;;  %v1696_v13 = vpop.permute.xlu0 %1695  ;;  %3393 = vrot.lane.b32.xlu0 %v3359_v37, %s5921_s12  ;;  %v3687_v37 = vrot.slane %v7842_v35, 5 }
 0x6eb   : > { %v1722_v39 = vpop.permute.xlu1 %1721  ;;  %v1970_v21 = vrot.slane %v1968_v25, 4  ;;  %v1699_v62 = vrot.slane %v1696_v13, 4 }
 0x6ec   : > { %v1723_v52 = vrot.slane %v1722_v39, 4  ;;  %3385 = vrot.lane.b32.xlu1 %v7905_v23, %s5920_s11  ;;  %v7990_v23 = vrot.slane %v7842_v35, 6 }
 0x6ed   : > { %v1972_v10 = vsel %vm389_vm1, %v1968_v25, %v1970_v21  ;;  %v1701_v54 = vsel %vm389_vm1, %v1696_v13, %v1699_v62  ;;  %v5519_v25 = vld [vmem:[#allocation3 + $0x18] sm:$0xff]  ;;  %v5518_v62 = vld [vmem:[#allocation3 + $0x10] sm:$0xff] }
 0x6ee   : > { %v1724_v15 = vsel %vm529_vm6, %v1722_v39, %v1723_v52  ;;  %1976 = vst [vmem:[#allocation3 + $0x44] sm:$0x1] %v1972_v10  ;;  %v3669_v28 = vrot.slane %v7990_v23, 4 }
 0x6ef   : > { %1726 = vst [vmem:[#allocation3 + $0x38] sm:$0xe] %v1724_v15  ;;  %v5521_v7 = vld [vmem:[#allocation3 + $0x28] sm:$0xff] }
 0x6f0   : > { %1705 = vst [vmem:[#allocation3 + $0x30] sm:$0x8] %v1701_v54  ;;  %3391 = vrot.lane.b32.xlu2 %v7913_v22, %s5921_s12  ;;  %v5517_v15 = vld [vmem:[#allocation3 + $0x8] sm:$0xff] }
 0x6f1   : > { %3672 = vst [vmem:[#allocation3 + $0x94] sm:$0xc] %v7990_v23 }
 0x6f2   : > { %v2250_v14 = vpop.permute.xlu2 %2249  ;;  %v1712_v6 = vpop.permute.xlu0 %1711  ;;  %3689 = vrot.lane.b32.xlu0 %v3687_v37, %s5920_s11  ;;  %3673 = vst [vmem:[#allocation3 + $0x98] sm:$0x1] %v3669_v28 }
 0x6f3   : > { %v1698_v53 = vpop.permute.xlu1 %1697  ;;  %v2252_v2 = vrot.slane %v2250_v14, 4  ;;  %v1714_v41 = vrot.slane %v1712_v6, 4 }
 0x6f4   : > { %v1700_v5 = vrot.slane %v1698_v53, 4  ;;  %3366 = vrot.lane.b32.xlu1 %v3364_v17, %s5918_s9 }
 0x6f5   : > { %v2254_v12 = vsel %vm529_vm6, %v2250_v14, %v2252_v2  ;;  %v1716_v22 = vsel %vm459_vm3, %v1712_v6, %v1714_v41  ;;  %v5516_v6 = vld [vmem:[#allocation3] sm:$0xff] }
 0x6f6   : > { %v1702_v16 = vsel %vm389_vm1, %v1698_v53, %v1700_v5  ;;  %2258 = vst [vmem:[#allocation3 + $0x58] sm:$0x3] %v2254_v12 }
 0x6f7   : > { %1706 = vst [vmem:[#allocation3 + $0x34] sm:$0x3] %v1702_v16 }
 0x6f8   : > { %1720 = vst [vmem:[#allocation3 + $0x38] sm:$0x1] %v1716_v22  ;;  %3368 = vrot.lane.b32.xlu2 %v3365_v49, %s5918_s9 }
 0x6fa   : > { %v2225_v27 = vpop.permute.xlu2 %2224  ;;  %v1979_v43 = vpop.permute.xlu0 %1978  ;;  %3975 = vrot.lane.b32.xlu0 %v7959_v44, %s5918_s9  ;;  %v3688_v44 = vrot.slane %v3687_v37, 4 }
 0x6fb   : > { %v1985_v59 = vpop.permute.xlu1 %1984  ;;  %v2227_v40 = vrot.slane %v2225_v27, 4  ;;  %v1980_v50 = vrot.slane %v1979_v43, 4 }
 0x6fc   : > { %v1986_v20 = vrot.slane %v1985_v59, 4  ;;  %3675 = vrot.lane.b32.xlu1 %v3674_v38, %s5918_s9 }
 0x6fd   : > { %v2229_v0 = vsel %vm319_vm0, %v2225_v27, %v2227_v40  ;;  %v1981_v46 = vsel %vm459_vm3, %v1979_v43, %v1980_v50  ;;  %v4037_v18 = vld [vmem:[#allocation3 + $0x58] sm:$0x3]  ;;  %v230_v43 = vld [vmem:[%s8285_s3 + $0x10] sm:$0xff] }
 0x6fe   : > { %v1987_v26 = vsel %vm529_vm6, %v1985_v59, %v1986_v20  ;;  %2233 = vst [vmem:[#allocation3 + $0x50] sm:$0x1] %v2229_v0  ;;  %v4098_v31 = vunpack.c.l.b16 %v4037_v18  ;;  %v5522_v36 = vld [vmem:[#allocation3 + $0x30] sm:$0xff]  ;;  %v4045_v38 = vunpack.c.l.b16 %v230_v43  ;;  %v5240_v0 = vld [vmem:[%s8285_s3 + $0x8] sm:$0xf0] }
 0x6ff   : > { %1989 = vst [vmem:[#allocation3 + $0x48] sm:$0x7] %v1987_v26  ;;  %v5523_v60 = vld [vmem:[#allocation3 + $0x38] sm:$0xff]  ;;  %v5433_v20 = vld [vmem:[%s8285_s3 + $0x4] sm:$0xf] }
 0x700   : > { %1983 = vst [vmem:[#allocation3 + $0x44] sm:$0xe] %v1981_v46  ;;  %3681 = vrot.lane.b32.xlu2 %v7842_v35, %s5919_s10  ;;  %v4110_v57 = vpack.c.b16 %v4098_v31, %v4098_v31  ;;  %4132 = vmatpush.bf16.msrb.mxu0 %v5523_v60  ;;  %v8057_v18 = vpack.c.b16 %v4045_v38, %v4045_v38 }
 0x702   : > { %v2546_v3 = vpop.permute.xlu2 %2545  ;;  %v1954_v30 = vpop.permute.xlu0 %1953  ;;  %3997 = vrot.lane.b32.xlu0 %v3995_v47, %s5920_s11  ;;  %v4130_v8 = vsel %vm721_vm10, %v4110_v57, 0  ;;  %v8062_v47 = vor.u32 %v5433_v20, %v5240_v0 }
 0x703   : > { %v1966_v48 = vpop.permute.xlu1 %1965  ;;  %v2549_v58 = vrot.slane %v2546_v3, 4  ;;  %v1956_v11 = vrot.slane %v1954_v30, 4  ;;  %4154 = vmatpush.bf16.msrb.mxu1 %v4130_v8 }
 0x704   : > { %v1969_v61 = vrot.slane %v1966_v48, 4  ;;  %4009 = vrot.lane.b32.xlu1 %v3972_v9, %s5921_s12  ;;  %4133 = vmatpush.bf16.msrb.mxu0 %v5522_v36  ;;  %v3982_v9 = vrot.slane %v3981_v42, 4 }
 0x705   : > { %v2551_v29 = vsel %vm459_vm3, %v2546_v3, %v2549_v58  ;;  %v1958_v24 = vsel %vm319_vm0, %v1954_v30, %v1956_v11 }
 0x706   : > { %v1971_v4 = vsel %vm389_vm1, %v1966_v48, %v1969_v61  ;;  %2555 = vst [vmem:[#allocation3 + $0x60] sm:$0x8] %v2551_v29 }
 0x707   : > { %1975 = vst [vmem:[#allocation3 + $0x40] sm:$0xc] %v1971_v4  ;;  %v5532_v11 = vld [vmem:[#allocation3 + $0x44] sm:$0xff] }
 0x708   : > { %1962 = vst [vmem:[#allocation3 + $0x40] sm:$0x3] %v1958_v24  ;;  %2557 = vrot.lane.b32.xlu2 %v7730_v51, %s5921_s12  ;;  %4134 = vmatpush.bf16.msrb.mxu0 %v5521_v7  ;;  %v5238_v51 = vld [vmem:[%s8285_s3] sm:$0xf]  ;;  %v4303_v24 = vrot.slane %v5532_v11, 2 }
 0x70a   : > { %v2242_v19 = vpop.permute.xlu0 %2241  ;;  %3999 = vrot.lane.b32.xlu0 %v3996_v56, %s5920_s11 }
 0x70b   : > { %v2248_v34 = vpop.permute.xlu1 %2247  ;;  %v2243_v33 = vrot.slane %v2242_v19, 4 }
 0x70c   : > { %v2251_v63 = vrot.slane %v2248_v34, 4  ;;  %3983 = vrot.lane.b32.xlu1 %v3981_v42, %s5919_s10  ;;  %4135 = vmatpush.bf16.msrb.mxu0 %v5520_v1 }
 0x70d   : > { %v2244_v55 = vsel %vm459_vm3, %v2242_v19, %v2243_v33  ;;  %v4046_v19 = vunpack.c.h.b16 %v230_v43 }
 0x70e   : > { %v2253_v45 = vsel %vm529_vm6, %v2248_v34, %v2251_v63  ;;  %2246 = vst [vmem:[#allocation3 + $0x54] sm:$0x7] %v2244_v55  ;;  %v5530_v34 = vld [vmem:[#allocation3 + $0x34] sm:$0xff] }
 0x70f   : > { %2257 = vst [vmem:[#allocation3 + $0x54] sm:$0x8] %v2253_v45  ;;  %v5524_v31 = vld [vmem:[#allocation3 + $0x40] sm:$0xff] }
 0x710   : > { %3985 = vrot.lane.b32.xlu2 %v3982_v9, %s5919_s10  ;;  %4136 = vmatpush.bf16.msrb.mxu0 %v5519_v25  ;;  %v5531_v29 = vld [vmem:[#allocation3 + $0x3c] sm:$0xff]  ;;  %v8076_v9 = vpack.c.b16 %v4046_v19, %v4046_v19 }
 0x711   : > { %v4301_v7 = vrot.slane %v5531_v29, 2 }
 0x712   : > { %v2223_v13 = vpop.permute.xlu0 %2222  ;;  %2559 = vrot.lane.b32.xlu0 %v2525_v32, %s5921_s12  ;;  %v5434_v32 = vld [vmem:[%s8285_s3 + $0x4] sm:$0xf0] }
 0x713   : > { %v2538_v39 = vpop.permute.xlu1 %2537  ;;  %v2226_v21 = vrot.slane %v2223_v13, 4  ;;  %v8041_v53 = vor.u32 %v5434_v32, %v5238_v51  ;;  %v4304_v55 = vsel %vm627_vm5, %v4301_v7, %v4303_v24  ;;  %v5527_v32 = vld [vmem:[#allocation3 + $0x1c] sm:$0xf0] }
 0x714   : > { %v2539_v52 = vrot.slane %v2538_v39, 4  ;;  %3691 = vrot.lane.b32.xlu1 %v3688_v44, %s5920_s11  ;;  %4137 = vmatpush.bf16.msrb.mxu0 %v5518_v62  ;;  %v4299_v44 = vrot.slane %v5530_v34, 2 }
 0x715   : > { %v2228_v10 = vsel %vm319_vm0, %v2223_v13, %v2226_v21 }
 0x716   : > { %v2540_v54 = vsel %vm389_vm1, %v2538_v39, %v2539_v52  ;;  %2232 = vst [vmem:[#allocation3 + $0x4c] sm:$0xc] %v2228_v10  ;;  %v5534_v46 = vld [vmem:[#allocation3 + $0x54] sm:$0xff]  ;;  %v5529_v39 = vld [vmem:[#allocation3 + $0x2c] sm:$0xff]  ;;  %v4302_v62 = vsel %vm627_vm5, %v4299_v44, %v4301_v7 }
 0x717   : > { %2542 = vst [vmem:[#allocation3 + $0x60] sm:$0x7] %v2540_v54  ;;  %v4307_v57 = vrot.slane %v5534_v46, 2  ;;  %v4297_v54 = vrot.slane %v5529_v39, 2 }
 0x718   : > { %3701 = vrot.lane.b32.xlu2 %v7990_v23, %s5921_s12  ;;  %4138 = vmatpush.bf16.msrb.mxu0 %v5517_v15  ;;  %v5528_v15 = vld [vmem:[#allocation3 + $0x24] sm:$0xff] }
 0x71a   : > { %v2236_v35 = vpop.permute.xlu0 %2235  ;;  %3703 = vrot.lane.b32.xlu0 %v3669_v28, %s5921_s12 }
 0x71b   : > { %v2548_v37 = vpop.permute.xlu1 %2547  ;;  %v2237_v14 = vrot.slane %v2236_v35, 4 }
 0x71c   : > { %v2550_v17 = vrot.slane %v2548_v37, 4  ;;  %4139 = vmatpush.bf16.msrb.mxu0 %v5516_v6 }
 0x71d   : > { %v2238_v2 = vsel %vm389_vm1, %v2236_v35, %v2237_v14  ;;  %v5525_v59 = vld [vmem:[#allocation3 + $0x48] sm:$0xff]  ;;  %v4300_v14 = vsel %vm627_vm5, %v4297_v54, %v4299_v44 }
 0x71e   : > { %v2552_v41 = vsel %vm459_vm3, %v2548_v37, %v2550_v17  ;;  %2240 = vst [vmem:[#allocation3 + $0x50] sm:$0xe] %v2238_v2  ;;  %v5292_v17 = vld [vmem:[#allocation3 + $0x1c] sm:$0xc] }
 0x71f   : > { %2556 = vst [vmem:[#allocation3 + $0x64] sm:$0x3] %v2552_v41  ;;  %4140 = vmatmul.bf16.vlgmr.msrb.gmra.mxu0 %v8041_v53 }
 0x722   : > { %v2532_v5 = vpop.permute.xlu0 %2531  ;;  %v2832_v12 = vpop.permute.xlu2 %2831 }
 0x723   : > { %v2533_v22 = vrot.slane %v2532_v5, 4  ;;  %v2833_v16 = vrot.slane %v2832_v12, 4 }
 0x725   : > { %v2534_v49 = vsel %vm319_vm0, %v2532_v5, %v2533_v22  ;;  %v2834_v23 = vsel %vm319_vm0, %v2832_v12, %v2833_v16  ;;  %v5526_v27 = vld [vmem:[#allocation3 + $0x50] sm:$0xff]  ;;  %v4295_v5 = vrot.slane %v5528_v15, 2  ;;  %v5293_v12 = vor.u32 %v5527_v32, %v5292_v17 }
 0x726   : > { %2536 = vst [vmem:[#allocation3 + $0x5c] sm:$0xe] %v2534_v49  ;;  %4155 = vmatpush.bf16.msrb.mxu1 %v5526_v27  ;;  %v5533_v28 = vld [vmem:[#allocation3 + $0x4c] sm:$0xff] }
 0x727   : > { %2836 = vst [vmem:[#allocation3 + $0x6c] sm:$0x7] %v2834_v23  ;;  %v4305_v8 = vrot.slane %v5533_v28, 2  ;;  %v4298_v16 = vsel %vm627_vm5, %v4295_v5, %v4297_v54  ;;  %v4294_v38 = vrot.slane %v5293_v12, 2 }
 0x729   : > { %v4308_v61 = vsel %vm627_vm5, %v4305_v8, %v4307_v57  ;;  %v4306_v4 = vsel %vm627_vm5, %v4303_v24, %v4305_v8  ;;  %v4296_v0 = vsel %vm627_vm5, %v4294_v38, %v4295_v5 }
 0x72a   : > { %v2866_v40 = vpop.permute.xlu2 %2865  ;;  %4156 = vmatpush.bf16.msrb.mxu1 %v5525_v59 }
 0x72b   : > { %v2867_v50 = vrot.slane %v2866_v40, 4 }
 0x72d   : > { %v2868_v26 = vsel %vm529_vm6, %v2866_v40, %v2867_v50  ;;  %v8060_v60 = vld [vmem:[#allocation3 + $0x5c] sm:$0xff] }
 0x72e   : > { %2870 = vst [vmem:[#allocation3 + $0x74] sm:$0xe] %v2868_v26  ;;  %4157 = vmatpush.bf16.msrb.mxu1 %v5524_v31  ;;  %v4309_v3 = vrot.slane %v8060_v60, 2 }
 0x72f   : > { %4145 = vmatmul.bf16.gmra.mxu0 %v8057_v18 }
 0x730   : > { %v4310_v30 = vsel %vm627_vm5, %v4307_v57, %v4309_v3 }
 0x731   : > { %5288 = vmatmul.msk.bf16.vlgmr.msrb.gmra.mxu1 %vm4122_vm15, %v8062_v47  ;;  %4331 = vmatpush.bf16.msrb.mxu2 %v4310_v30 }
 0x732   : > { %v2854_v48 = vpop.permute.xlu2 %2853 }
 0x733   : > { %v2857_v58 = vrot.slane %v2854_v48, 4 }
 0x735   : > { %v2859_v36 = vsel %vm459_vm3, %v2854_v48, %v2857_v58  ;;  %4332 = vmatpush.bf16.msrb.mxu2 %v4308_v61 }
 0x736   : > { %2863 = vst [vmem:[#allocation3 + $0x70] sm:$0xc] %v2859_v36 }
 0x739   : > { %4333 = vmatpush.bf16.msrb.mxu2 %v4306_v4 }
 0x73a   : > { %v3123_v56 = vpop.permute.xlu2 %3122 }
 0x73b   : > { %v3124_v42 = vrot.slane %v3123_v56, 4 }
 0x73c   : > { %v2840_v33 = vpop.permute.xlu0 %2839 }
 0x73d   : > { %v3125_v1 = vsel %vm459_vm3, %v3123_v56, %v3124_v42  ;;  %v2843_v63 = vrot.slane %v2840_v33, 4  ;;  %4334 = vmatpush.bf16.msrb.mxu2 %v4304_v55 }
 0x73e   : > { %3127 = vst [vmem:[#allocation3 + $0x80] sm:$0xe] %v3125_v1  ;;  %v2856_v45 = vpop.permute.xlu1 %2855 }
 0x73f   : > { %v2845_v25 = vsel %vm389_vm1, %v2840_v33, %v2843_v63  ;;  %v2858_v13 = vrot.slane %v2856_v45, 4 }
 0x740   : > { %2849 = vst [vmem:[#allocation3 + $0x6c] sm:$0x8] %v2845_v25 }
 0x741   : > { %v2860_v21 = vsel %vm459_vm3, %v2856_v45, %v2858_v13  ;;  %5289 = vmatmul.msk.bf16.gmra.mxu1 %vm4122_vm15, %v8076_v9  ;;  %4335 = vmatpush.bf16.msrb.mxu2 %v4302_v62 }
 0x742   : > { %2864 = vst [vmem:[#allocation3 + $0x74] sm:$0x1] %v2860_v21  ;;  %v3096_v52 = vpop.permute.xlu2 %3095 }
 0x743   : > { %v3099_v10 = vrot.slane %v3096_v52, 4 }
 0x744   : > { %v3129_v51 = vpop.permute.xlu0 %3128 }
 0x745   : > { %v3101_v35 = vsel %vm319_vm0, %v3096_v52, %v3099_v10  ;;  %v3130_v37 = vrot.slane %v3129_v51, 4  ;;  %4336 = vmatpush.bf16.msrb.mxu2 %v4300_v14 }
 0x746   : > { %3105 = vst [vmem:[#allocation3 + $0x78] sm:$0x8] %v3101_v35  ;;  %v2842_v6 = vpop.permute.xlu1 %2841 }
 0x747   : > { %v3131_v2 = vsel %vm529_vm6, %v3129_v51, %v3130_v37  ;;  %v2844_v41 = vrot.slane %v2842_v6, 4 }
 0x748   : > { %3133 = vst [vmem:[#allocation3 + $0x84] sm:$0x7] %v3131_v2 }
 0x749   : > { %v2846_v22 = vsel %vm389_vm1, %v2842_v6, %v2844_v41  ;;  %v4234_v49 = vld [vmem:[#allocation3 + $0x74] sm:$0xf]  ;;  %4337 = vmatpush.bf16.msrb.mxu2 %v4298_v16 }
 0x74a   : > { %2850 = vst [vmem:[#allocation3 + $0x70] sm:$0x3] %v2846_v22  ;;  %v3392_v23 = vpop.permute.xlu2 %3391  ;;  %v4280_v27 = vunpack.c.l.b16 %v4234_v49 }
 0x74b   : > { %v3395_v43 = vrot.slane %v3392_v23, 4 }
 0x74c   : > { %v3098_v59 = vpop.permute.xlu0 %3097  ;;  %v4292_v40 = vpack.c.b16 %v4280_v27, %v4280_v27 }
 0x74d   : > { %v3397_v50 = vsel %vm529_vm6, %v3392_v23, %v3395_v43  ;;  %v3100_v20 = vrot.slane %v3098_v59, 4  ;;  %v5545_v46 = vld [vmem:[#allocation3 + $0x74] sm:$0xff]  ;;  %4338 = vmatpush.bf16.msrb.mxu2 %v4296_v0 }
 0x74e   : > { %3401 = vst [vmem:[#allocation3 + $0x90] sm:$0x8] %v3397_v50  ;;  %v3110_v26 = vpop.permute.xlu1 %3109  ;;  %v4315_v31 = vrot.slane %v4292_v40, 2  ;;  %4506 = vmatpush.bf16.msra.mxu1 %v5545_v46 }
 0x74f   : > { %v3102_v28 = vsel %vm319_vm0, %v3098_v59, %v3100_v20  ;;  %v3113_v57 = vrot.slane %v3110_v26, 4 }
 0x750   : > { %3106 = vst [vmem:[#allocation3 + $0x7c] sm:$0x3] %v3102_v28  ;;  %v4329_v30 = vsel %vm721_vm10, %v4315_v31, 0  ;;  %4339 = vmatmul.bf16.vlgmr.msrb.gmra.mxu2 %v8041_v53 }
 0x751   : > { %v3115_v8 = vsel %vm389_vm1, %v3110_v26, %v3113_v57  ;;  %4353 = vmatpush.bf16.msrb.mxu3 %v4329_v30  ;;  %v5544_v48 = vld [vmem:[#allocation3 + $0x6c] sm:$0xff] }
 0x752   : > { %v8094_v58 = vld [vmem:[#allocation3 + $0x6c] sm:$0xff]  ;;  %3119 = vst [vmem:[#allocation3 + $0x7c] sm:$0xc] %v3115_v8  ;;  %v3369_v11 = vpop.permute.xlu2 %3368  ;;  %4507 = vmatpush.bf16.msra.mxu1 %v5544_v48 }
 0x753   : > { %v3371_v36 = vrot.slane %v3369_v11, 4  ;;  %v4313_v61 = vrot.slane %v8094_v58, 2 }
 0x754   : > { %v3380_v29 = vpop.permute.xlu0 %3379 }
 0x755   : > { %v3373_v24 = vsel %vm319_vm0, %v3369_v11, %v3371_v36  ;;  %v3381_v4 = vrot.slane %v3380_v29, 4  ;;  %v4316_v7 = vsel %vm627_vm5, %v4313_v61, %v4315_v31 }
 0x756   : > { %3377 = vst [vmem:[#allocation3 + $0x8c] sm:$0x1] %v3373_v24  ;;  %v3112_v56 = vpop.permute.xlu1 %3111  ;;  %4354 = vmatpush.bf16.msrb.mxu3 %v4316_v7 }
 0x757   : > { %v3382_v19 = vsel %vm389_vm1, %v3380_v29, %v3381_v4  ;;  %v3114_v42 = vrot.slane %v3112_v56, 4 }
 0x758   : > { %3384 = vst [vmem:[#allocation3 + $0x8c] sm:$0xe] %v3382_v19 }
 0x759   : > { %v3116_v34 = vsel %vm389_vm1, %v3112_v56, %v3114_v42  ;;  %v5553_v56 = vld [vmem:[#allocation3 + $0x78] sm:$0xff] }
 0x75a   : > { %3120 = vst [vmem:[#allocation3 + $0x80] sm:$0x1] %v3116_v34  ;;  %v3682_v33 = vpop.permute.xlu2 %3681 }
 0x75b   : > { %v3683_v1 = vrot.slane %v3682_v33, 4 }
 0x75c   : > { %v3394_v63 = vpop.permute.xlu0 %3393 }
 0x75d   : > { %v3684_v55 = vsel %vm389_vm1, %v3682_v33, %v3683_v1  ;;  %v3396_v45 = vrot.slane %v3394_v63, 4 }
 0x75e   : > { %3686 = vst [vmem:[#allocation3 + $0x9c] sm:$0x7] %v3684_v55  ;;  %v3386_v25 = vpop.permute.xlu1 %3385  ;;  %v4674_v55 = vrot.slane %v5553_v56, 2 }
 0x75f   : > { %v3398_v13 = vsel %vm529_vm6, %v3394_v63, %v3396_v45  ;;  %v3387_v44 = vrot.slane %v3386_v25, 4  ;;  %v5552_v45 = vld [vmem:[#allocation3 + $0x70] sm:$0xff] }
 0x760   : > { %3402 = vst [vmem:[#allocation3 + $0x94] sm:$0x3] %v3398_v13  ;;  %4344 = vmatmul.bf16.gmra.mxu2 %v8057_v18 }
 0x761   : > { %v3388_v39 = vsel %vm459_vm3, %v3386_v25, %v3387_v44  ;;  %v5554_v29 = vld [vmem:[#allocation3 + $0x80] sm:$0xff] }
 0x762   : > { %3390 = vst [vmem:[#allocation3 + $0x90] sm:$0x7] %v3388_v39  ;;  %v2558_v21 = vpop.permute.xlu2 %2557  ;;  %v4676_v7 = vrot.slane %v5554_v29, 2 }
 0x763   : > { %v2561_v62 = vrot.slane %v2558_v21, 4 }
 0x764   : > { %v3690_v52 = vpop.permute.xlu0 %3689  ;;  %v4677_v39 = vsel %vm627_vm5, %v4674_v55, %v4676_v7 }
 0x765   : > { %v2563_v10 = vsel %vm529_vm6, %v2558_v21, %v2561_v62  ;;  %v3693_v54 = vrot.slane %v3690_v52, 4 }
 0x766   : > { %2567 = vst [vmem:[#allocation3 + $0x64] sm:$0xc] %v2563_v10  ;;  %v3367_v15 = vpop.permute.xlu1 %3366 }
 0x767   : > { %v3695_v51 = vsel %vm459_vm3, %v3690_v52, %v3693_v54  ;;  %v3370_v32 = vrot.slane %v3367_v15, 4  ;;  %v4672_v52 = vrot.slane %v5552_v45, 2 }
 0x768   : > { %3699 = vst [vmem:[#allocation3 + $0x9c] sm:$0x8] %v3695_v51 }
 0x769   : > { %v3372_v35 = vsel %vm319_vm0, %v3367_v15, %v3370_v32  ;;  %v5556_v50 = vld [vmem:[#allocation3 + $0x90] sm:$0xff]  ;;  %v4675_v51 = vsel %vm627_vm5, %v4672_v52, %v4674_v55 }
 0x76a   : > { %3376 = vst [vmem:[#allocation3 + $0x88] sm:$0xc] %v3372_v35  ;;  %v3986_v37 = vpop.permute.xlu2 %3985  ;;  %v4680_v26 = vrot.slane %v5556_v50, 2  ;;  %v4433_v32 = vld [vmem:[#allocation3 + $0x94] sm:$0x3] }
 0x76b   : > { %v3988_v14 = vrot.slane %v3986_v37, 4 }
 0x76c   : > { %v3976_v6 = vpop.permute.xlu0 %3975 }
 0x76d   : > { %v3990_v17 = vsel %vm389_vm1, %v3986_v37, %v3988_v14  ;;  %v3977_v2 = vrot.slane %v3976_v6, 4 }
 0x76e   : > { %3994 = vst [vmem:[#allocation3 + $0xac] sm:$0x3] %v3990_v17  ;;  %v3676_v41 = vpop.permute.xlu1 %3675 }
 0x76f   : > { %v3978_v5 = vsel %vm319_vm0, %v3976_v6, %v3977_v2  ;;  %v3677_v12 = vrot.slane %v3676_v41, 4 }
 0x770   : > { %3980 = vst [vmem:[#allocation3 + $0xa8] sm:$0x7] %v3978_v5 }
 0x771   : > { %v3678_v22 = vsel %vm319_vm0, %v3676_v41, %v3677_v12  ;;  %v5555_v46 = vld [vmem:[#allocation3 + $0x88] sm:$0xff]  ;;  %v4479_v41 = vunpack.c.l.b16 %v4433_v32 }
 0x772   : > { %3680 = vst [vmem:[#allocation3 + $0x98] sm:$0xe] %v3678_v22  ;;  %v3702_v16 = vpop.permute.xlu2 %3701  ;;  %v4678_v8 = vrot.slane %v5555_v46, 2  ;;  %v5550_v22 = vld [vmem:[#allocation3 + $0x60] sm:$0xff] }
 0x773   : > { %v3705_v49 = vrot.slane %v3702_v16, 4  ;;  %v5547_v29 = vld [vmem:[#allocation3 + $0x84] sm:$0xff] }
 0x774   : > { %v3998_v23 = vpop.permute.xlu0 %3997  ;;  %v4681_v4 = vsel %vm627_vm5, %v4678_v8, %v4680_v26  ;;  %v4679_v34 = vsel %vm627_vm5, %v4676_v7, %v4678_v8  ;;  %v5548_v8 = vld [vmem:[#allocation3 + $0x8c] sm:$0xff] }
 0x775   : > { %v3707_v27 = vsel %vm529_vm6, %v3702_v16, %v3705_v49  ;;  %v4001_v43 = vrot.slane %v3998_v23, 4  ;;  %v5549_v49 = vld [vmem:[#allocation3 + $0x58] sm:$0xf0] }
 0x776   : > { %3711 = vst [vmem:[#allocation3 + $0xa0] sm:$0xc] %v3707_v27  ;;  %v4010_v38 = vpop.permute.xlu1 %4009 }
 0x777   : > { %v4003_v59 = vsel %vm459_vm3, %v3998_v23, %v4001_v43  ;;  %v4011_v40 = vrot.slane %v4010_v38, 4  ;;  %v5542_v43 = vld [vmem:[#allocation3 + $0x5c] sm:$0xff] }
 0x778   : > { %4007 = vst [vmem:[#allocation3 + $0xac] sm:$0xc] %v4003_v59  ;;  %v5384_v59 = vld [vmem:[#allocation3 + $0x58] sm:$0xc] }
 0x779   : > { %v4012_v20 = vsel %vm529_vm6, %v4010_v38, %v4011_v40  ;;  %v8116_v0 = vld [vmem:[#allocation3 + $0x98] sm:$0xff]  ;;  %v4491_v38 = vpack.c.b16 %v4479_v41, %v4479_v41  ;;  %v4668_v40 = vrot.slane %v5550_v22, 2  ;;  %v5385_v50 = vor.u32 %v5549_v49, %v5384_v59 }
 0x77a   : > { %4014 = vst [vmem:[#allocation3 + $0xb0] sm:$0xe] %v4012_v20  ;;  %v4682_v31 = vrot.slane %v8116_v0, 2 }
 0x77c   : > { %v4000_v28 = vpop.permute.xlu0 %3999  ;;  %v4683_v30 = vsel %vm627_vm5, %v4680_v26, %v4682_v31  ;;  %v5541_v26 = vld [vmem:[#allocation3 + $0x54] sm:$0xff] }
 0x77d   : > { %v4002_v57 = vrot.slane %v4000_v28, 4  ;;  %4704 = vmatpush.bf16.msra.mxu0 %v4683_v30 }
 0x77e   : > { %v3984_v48 = vpop.permute.xlu1 %3983 }
 0x77f   : > { %v4004_v11 = vsel %vm459_vm3, %v4000_v28, %v4002_v57  ;;  %v3987_v36 = vrot.slane %v3984_v48, 4  ;;  %v4667_v28 = vrot.slane %v5385_v50, 2 }
 0x780   : > { %4008 = vst [vmem:[#allocation3 + $0xb0] sm:$0x1] %v4004_v11 }
 0x781   : > { %v3989_v24 = vsel %vm389_vm1, %v3984_v48, %v3987_v36  ;;  %4705 = vmatpush.bf16.msra.mxu0 %v4681_v4  ;;  %v4669_v30 = vsel %vm627_vm5, %v4667_v28, %v4668_v40  ;;  %v5539_v36 = vld [vmem:[#allocation3 + $0x44] sm:$0xff]  ;;  %v5546_v4 = vld [vmem:[#allocation3 + $0x7c] sm:$0xff] }
 0x782   : > { %3993 = vst [vmem:[#allocation3 + $0xa8] sm:$0x8] %v3989_v24  ;;  %v5538_v24 = vld [vmem:[#allocation3 + $0x3c] sm:$0xff] }
 0x784   : > { %v2560_v19 = vpop.permute.xlu0 %2559 }
 0x785   : > { %v2562_v42 = vrot.slane %v2560_v19, 4  ;;  %4706 = vmatpush.bf16.msra.mxu0 %v4679_v34 }
 0x786   : > { %v3692_v33 = vpop.permute.xlu1 %3691 }
 0x787   : > { %v2564_v1 = vsel %vm529_vm6, %v2560_v19, %v2562_v42  ;;  %v3694_v63 = vrot.slane %v3692_v33, 4  ;;  %v4608_v25 = vld [vmem:[#allocation3 + $0xb0] sm:$0xf] }
 0x788   : > { %2568 = vst [vmem:[#allocation3 + $0x68] sm:$0x1] %v2564_v1  ;;  %v4654_v13 = vunpack.c.l.b16 %v4608_v25 }
 0x789   : > { %v3696_v44 = vsel %vm459_vm3, %v3692_v33, %v3694_v63  ;;  %4707 = vmatpush.bf16.msra.mxu0 %v4677_v39  ;;  %v5559_v62 = vld [vmem:[#allocation3 + $0xa8] sm:$0xff] }
 0x78a   : > { %3700 = vst [vmem:[#allocation3 + $0xa0] sm:$0x3] %v3696_v44  ;;  %v4666_v21 = vpack.c.b16 %v4654_v13, %v4654_v13  ;;  %v4686_v37 = vrot.slane %v5559_v62, 2  ;;  %v8354_v33 = vld [vmem:[#allocation7_spill] sm:$0xff] }
 0x78c   : > { %v3704_v10 = vpop.permute.xlu0 %3703  ;;  %v4688_v54 = vrot.slane %v4666_v21, 2 }
 0x78d   : > { %v3706_v15 = vrot.slane %v3704_v10, 4  ;;  %4708 = vmatpush.bf16.msra.mxu0 %v4675_v51 }
 0x78e   : > { %v4702_v35 = vsel %vm721_vm10, %v4688_v54, 0  ;;  %v4689_v16 = vsel %vm627_vm5, %v4686_v37, %v4688_v54 }
 0x78f   : > { %v3708_v14 = vsel %vm529_vm6, %v3704_v10, %v3706_v15  ;;  %4726 = vmatpush.bf16.msra.mxu2 %v4702_v35  ;;  %v5543_v6 = vld [vmem:[#allocation3 + $0x64] sm:$0xff] }
 0x790   : > { %v5536_v17 = vld [vmem:[#allocation3 + $0x64] sm:$0xff]  ;;  %3712 = vst [vmem:[#allocation3 + $0xa4] sm:$0x1] %v3708_v14  ;;  %4508 = vmatpush.bf16.msra.mxu1 %v5543_v6 }
 0x791   : > { %v5551_v2 = vld [vmem:[#allocation3 + $0x68] sm:$0xff]  ;;  %v4311_v5 = vrot.slane %v5536_v17, 2 }
 0x792   : > { %v4670_v12 = vrot.slane %v5551_v2, 2 }
 0x793   : > { %4727 = vmatpush.bf16.msra.mxu2 %v4689_v16  ;;  %v4314_v23 = vsel %vm627_vm5, %v4311_v5, %v4313_v61  ;;  %v4312_v20 = vsel %vm627_vm5, %v4309_v3, %v4311_v5  ;;  %v4504_v61 = vsel %vm721_vm10, %v4491_v38, 0  ;;  %v5540_v3 = vld [vmem:[#allocation3 + $0x4c] sm:$0xff] }
 0x794   : > { %v4673_v27 = vsel %vm627_vm5, %v4670_v12, %v4672_v52  ;;  %4355 = vmatpush.bf16.msrb.mxu3 %v4314_v23  ;;  %4509 = vmatpush.bf16.msra.mxu1 %v5542_v43  ;;  %v4671_v46 = vsel %vm627_vm5, %v4668_v40, %v4670_v12 }
 0x795   : > { %4709 = vmatpush.bf16.msra.mxu0 %v4673_v27 }
 0x797   : > { %v5558_v58 = vld [vmem:[#allocation3 + $0xa0] sm:$0xff] }
 0x798   : > { %4356 = vmatpush.bf16.msrb.mxu3 %v4312_v20  ;;  %4510 = vmatpush.bf16.msra.mxu1 %v5541_v26  ;;  %v4684_v57 = vrot.slane %v5558_v58, 2 }
 0x799   : > { %4710 = vmatpush.bf16.msra.mxu0 %v4671_v46 }
 0x79a   : > { %v4687_v60 = vsel %vm627_vm5, %v4684_v57, %v4686_v37  ;;  %v4685_v11 = vsel %vm627_vm5, %v4682_v31, %v4684_v57  ;;  %v8353_v31 = vld [vmem:[#allocation5_spill] sm:$0xff] }
 0x79b   : > { %5334 = vmatmul.msk.bf16.vlgmr.msrb.gmra.mxu3 %vm4122_vm15, %v8062_v47  ;;  %4728 = vmatpush.bf16.msra.mxu2 %v4687_v60 }
 0x79c   : > { %4528 = vmatpush.bf16.msra.mxu3 %v4504_v61  ;;  %v4141_v48 = vpop.f32.mrf.mxu0  ;;  %4511 = vmatpush.bf16.msra.mxu1 %v5540_v3 }
 0x79d   : > { %4711 = vmatpush.bf16.msra.mxu0 %v4669_v30  ;;  %v4142_v56 = vadd.f32 %v4141_v48, %v8353_v31 }
 0x79f   : > { %4729 = vmatpush.bf16.msra.mxu2 %v4685_v11 }
 0x7a0   : > { %4529 = vmatpush.bf16.msra.mxu3 %v5548_v8  ;;  %4712 = vmatmul.bf16.vlgmr.msra.gmra.mxu0 %v8041_v53 }
 0x7a1   : > { %4512 = vmatpush.bf16.msra.mxu1 %v5539_v36 }
 0x7a2   : > { %5426 = vmatmul.msk.bf16.vlgmr.msra.gmra.mxu2 %vm4122_vm15, %v8062_v47 }
 0x7a4   : > { %4530 = vmatpush.bf16.msra.mxu3 %v5547_v29  ;;  %v4143_v7 = vpop.f32.mrf.mxu0 }
 0x7a5   : > { %4513 = vmatpush.bf16.msra.mxu1 %v5538_v24  ;;  %v4144_v1 = vadd.f32 %v4143_v7, %v8354_v33 }
 0x7a8   : > { %4531 = vmatpush.bf16.msra.mxu3 %v5546_v4  ;;  %4514 = vmatmul.bf16.vlgmr.msra.gmra.mxu1 %v8041_v53  ;;  %v8355_v53 = vld [vmem:[#allocation4_spill] sm:$0xff] }
 0x7ab   : > { %5335 = vmatmul.msk.bf16.gmra.mxu3 %vm4122_vm15, %v8076_v9 }
 0x7ac   : > { %v4146_v0 = vpop.f32.mrf.mxu0 }
 0x7ad   : > { %v4147_v45 = vadd.f32 %v4146_v0, %v8355_v53 }
 0x7ae   : > { %v4159_v19 = vpop.f32.mrf.mxu1 }
 0x7af   : > { %v4160_v42 = vadd.f32 %v4159_v19, %v4142_v56 }
 0x7b0   : > { %4717 = vmatmul.bf16.gmra.mxu0 %v8057_v18 }
 0x7b1   : > { %v4168_v52 = vmax.f32 %v4160_v42, 0.0 }
 0x7b2   : > { %5427 = vmatmul.msk.bf16.gmra.mxu2 %vm4122_vm15, %v8076_v9 }
 0x7b4   : > { %v4148_v34 = vpop.f32.mrf.mxu0 }
 0x7b6   : > { %v4161_v63 = vpop.f32.mrf.mxu1 }
 0x7b7   : > { %v4162_v55 = vadd.f32 %v4161_v63, %v4144_v1 }
 0x7b8   : > { %4519 = vmatmul.bf16.gmra.mxu1 %v8057_v18 }
 0x7b9   : > { %v4169_v13 = vmax.f32 %v4162_v55, 0.0 }
 0x7bb   : > { %5380 = vmatmul.msk.bf16.vlgmr.msra.gmra.mxu3 %vm4122_vm15, %v8062_v47  ;;  %v4173_v21 = vrot.slane %v4169_v13, 4 }
 0x7be   : > { %v4164_v25 = vpop.f32.mrf.mxu1 }
 0x7bf   : > { %v4165_v44 = vadd.f32 %v4164_v25, %v4147_v45 }
 0x7c1   : > { %v4170_v39 = vmax.f32 %v4165_v44, 0.0 }
 0x7c3   : > { %v4174_v62 = vrot.slane %v4170_v39, 4 }
 0x7c5   : > { %v4175_v10 = vsel %vm317_vm2, %v4173_v21, %v4174_v62  ;;  %v8165_v54 = vmax.f32 %v4169_v13, %v4174_v62 }
 0x7c6   : > { %v8167_v15 = vmax.f32 %v4168_v52, %v4175_v10  ;;  %v4166_v51 = vpop.f32.mrf.mxu1 }
 0x7cb   : > { %5381 = vmatmul.msk.bf16.gmra.mxu3 %vm4122_vm15, %v8076_v9 }
 0x7d3   : > { %v4340_v18 = vpop.f32.mrf.mxu2 }
 0x7d4   : > { %v4341_v23 = vadd.f32 %v4340_v18, %v8353_v31 }
 0x7db   : > { %v4342_v47 = vpop.f32.mrf.mxu2 }
 0x7dc   : > { %v4343_v5 = vadd.f32 %v4342_v47, %v8354_v33 }
 0x7e3   : > { %v4345_v32 = vpop.f32.mrf.mxu2 }
 0x7e4   : > { %v4346_v16 = vadd.f32 %v4345_v32, %v8355_v53 }
 0x7eb   : > { %v4347_v35 = vpop.f32.mrf.mxu2 }
 0x81d   : > { %v4713_v37 = vpop.f32.mrf.mxu0 }
 0x81e   : > { %v4358_v14 = vpop.f32.mrf.mxu3  ;;  %v4714_v3 = vadd.f32 %v4713_v37, %v8353_v31 }
 0x81f   : > { %v4359_v59 = vadd.f32 %v4358_v14, %v4341_v23 }
 0x821   : > { %v4367_v58 = vmax.f32 %v4359_v59, 0.0 }
 0x825   : > { %v4715_v6 = vpop.f32.mrf.mxu0  ;;  %v4515_v17 = vpop.f32.mrf.mxu1 }
 0x826   : > { %v4360_v2 = vpop.f32.mrf.mxu3  ;;  %v4731_v41 = vpop.f32.mrf.mxu2  ;;  %v4716_v40 = vadd.f32 %v4715_v6, %v8354_v33  ;;  %v4516_v39 = vadd.f32 %v4515_v17, %v8353_v31 }
 0x827   : > { %v4361_v12 = vadd.f32 %v4360_v2, %v4343_v5  ;;  %v4732_v24 = vadd.f32 %v4731_v41, %v4714_v3 }
 0x829   : > { %v4368_v43 = vmax.f32 %v4361_v12, 0.0  ;;  %v4740_v56 = vmax.f32 %v4732_v24, 0.0 }
 0x82b   : > { %v4372_v20 = vrot.slane %v4368_v43, 4 }
 0x82d   : > { %v4718_v22 = vpop.f32.mrf.mxu0  ;;  %v4517_v49 = vpop.f32.mrf.mxu1 }
 0x82e   : > { %v4363_v9 = vpop.f32.mrf.mxu3  ;;  %v4733_v27 = vpop.f32.mrf.mxu2  ;;  %v4719_v28 = vadd.f32 %v4718_v22, %v8355_v53  ;;  %v4518_v25 = vadd.f32 %v4517_v49, %v8354_v33 }
 0x82f   : > { %v4364_v38 = vadd.f32 %v4363_v9, %v4346_v16  ;;  %v4734_v26 = vadd.f32 %v4733_v27, %v4716_v40 }
 0x831   : > { %v4369_v50 = vmax.f32 %v4364_v38, 0.0  ;;  %v4741_v36 = vmax.f32 %v4734_v26, 0.0 }
 0x833   : > { %v4373_v46 = vrot.slane %v4369_v50, 4  ;;  %v4745_v7 = vrot.slane %v4741_v36, 4 }
 0x835   : > { %v4720_v61 = vpop.f32.mrf.mxu0  ;;  %v4374_v57 = vsel %vm317_vm2, %v4372_v20, %v4373_v46  ;;  %v4378_v30 = vmax.f32 %v4368_v43, %v4373_v46  ;;  %v4520_v60 = vpop.f32.mrf.mxu1 }
 0x836   : > { %v4377_v8 = vmax.f32 %v4367_v58, %v4374_v57  ;;  %v4365_v48 = vpop.f32.mrf.mxu3  ;;  %v4736_v11 = vpop.f32.mrf.mxu2  ;;  %v4521_v44 = vadd.f32 %v4520_v60, %v8355_v53 }
 0x837   : > { %v4737_v29 = vadd.f32 %v4736_v11, %v4719_v28  ;;  %4381 = vrot.lane.b32.xlu2 %v4378_v30, %s5918_s9 }
 0x838   : > { %4379 = vrot.lane.b32.xlu1 %v4377_v8, %s5918_s9 }
 0x839   : > { %v4742_v4 = vmax.f32 %v4737_v29, 0.0 }
 0x83b   : > { %v4746_v0 = vrot.slane %v4742_v4, 4 }
 0x83d   : > { %v4747_v19 = vsel %vm317_vm2, %v4745_v7, %v4746_v0  ;;  %v4751_v42 = vmax.f32 %v4741_v36, %v4746_v0  ;;  %v4522_v34 = vpop.f32.mrf.mxu1 }
 0x83e   : > { %v4750_v1 = vmax.f32 %v4740_v56, %v4747_v19  ;;  %v4533_v63 = vpop.f32.mrf.mxu3  ;;  %v4738_v55 = vpop.f32.mrf.mxu2 }
 0x83f   : > { %4180 = vrot.lane.b32.xlu2 %v8167_v15, %s5918_s9  ;;  %v4534_v10 = vadd.f32 %v4533_v63, %v4516_v39 }
 0x840   : > { %4754 = vrot.lane.b32.xlu1 %v4751_v42, %s5918_s9  ;;  %4752 = vrot.lane.b32.xlu0 %v4750_v1, %s5918_s9 }
 0x841   : > { %v4542_v32 = vmax.f32 %v4534_v10, 0.0 }
 0x846   : > { %v4535_v45 = vpop.f32.mrf.mxu3 }
 0x847   : > { %v4536_v13 = vadd.f32 %v4535_v45, %v4518_v25 }
 0x848   : > { %4182 = vrot.lane.b32.xlu0 %v8165_v54, %s5918_s9 }
 0x849   : > { %v4543_v62 = vmax.f32 %v4536_v13, 0.0 }
 0x84b   : > { %v4547_v18 = vrot.slane %v4543_v62, 4 }
 0x84e   : > { %v4538_v21 = vpop.f32.mrf.mxu3 }
 0x84f   : > { %v4539_v52 = vadd.f32 %v4538_v21, %v4521_v44 }
 0x851   : > { %v4544_v51 = vmax.f32 %v4539_v52, 0.0 }
 0x853   : > { %v4548_v47 = vrot.slane %v4544_v51, 4 }
 0x855   : > { %v4549_v35 = vsel %vm317_vm2, %v4547_v18, %v4548_v47  ;;  %v4553_v37 = vmax.f32 %v4543_v62, %v4548_v47 }
 0x856   : > { %v4552_v14 = vmax.f32 %v4542_v32, %v4549_v35  ;;  %v4540_v6 = vpop.f32.mrf.mxu3 }
 0x857   : > { %4556 = vrot.lane.b32.xlu1 %v4553_v37, %s5918_s9 }
 0x858   : > { %4554 = vrot.lane.b32.xlu0 %v4552_v14, %s5918_s9 }
 0x891   : > { %v4382_v33 = vpop.permute.xlu2 %4381 }
 0x892   : > { %v8193_v53 = vmax.f32 %v4378_v30, %v4382_v33 }
 0x894   : > { %4389 = vrot.lane.b32.xlu0 %v8193_v53, %s5918_s9 }
 0x899   : > { %v4181_v31 = vpop.permute.xlu2 %4180 }
 0x89a   : > { %v8198_v17 = vmax.f32 %v8167_v15, %v4181_v31 }
 0x89c   : > { %4188 = vrot.lane.b32.xlu1 %v8198_v17, %s5918_s9 }
 0x8a4   : > { %4395 = vrot.lane.b32.xlu1 %v8193_v53, %s5919_s10 }
 0x8aa   : > { %v4380_v2 = vpop.permute.xlu1 %4379 }
 0x8ab   : > { %v4383_v41 = vmax.f32 %v4377_v8, %v4380_v2 }
 0x8ad   : > { %4399 = vrot.lane.b32.xlu1 %v4383_v41, %s5920_s11  ;;  %4393 = vrot.lane.b32.xlu0 %v4383_v41, %s5919_s10 }
 0x8b2   : > { %v4755_v5 = vpop.permute.xlu1 %4754  ;;  %v4753_v12 = vpop.permute.xlu0 %4752 }
 0x8b3   : > { %v4757_v22 = vmax.f32 %v4751_v42, %v4755_v5  ;;  %v4756_v16 = vmax.f32 %v4750_v1, %v4753_v12 }
 0x8b5   : > { %4768 = vrot.lane.b32.xlu0 %v4757_v22, %s5919_s10  ;;  %4760 = vrot.lane.b32.xlu1 %v4756_v16, %s5918_s9 }
 0x8ba   : > { %v4183_v15 = vpop.permute.xlu0 %4182 }
 0x8bb   : > { %v8209_v49 = vmax.f32 %v8165_v54, %v4183_v15 }
 0x8bd   : > { %4772 = vrot.lane.b32.xlu0 %v4756_v16, %s5920_s11  ;;  %4774 = vrot.lane.b32.xlu1 %v4757_v22, %s5920_s11 }
 0x8be   : > { %4190 = vrot.lane.b32.xlu2 %v8209_v49, %s5918_s9 }
 0x8c5   : > { %4194 = vrot.lane.b32.xlu1 %v8198_v17, %s5919_s10 }
 0x8c6   : > { %4387 = vrot.lane.b32.xlu2 %v4383_v41, %s5918_s9 }
 0x8c9   : > { %v4557_v23 = vpop.permute.xlu1 %4556 }
 0x8ca   : > { %v8218_v9 = vmax.f32 %v4553_v37, %v4557_v23  ;;  %v4555_v54 = vpop.permute.xlu0 %4554 }
 0x8cb   : > { %v4558_v27 = vmax.f32 %v4552_v14, %v4555_v54 }
 0x8cc   : > { %4564 = vrot.lane.b32.xlu0 %v8218_v9, %s5918_s9 }
 0x8cd   : > { %4570 = vrot.lane.b32.xlu1 %v8218_v9, %s5919_s10 }
 0x8ce   : > { %4762 = vrot.lane.b32.xlu2 %v4757_v22, %s5918_s9 }
 0x8d4   : > { %4568 = vrot.lane.b32.xlu0 %v4558_v27, %s5919_s10 }
 0x8d5   : > { %4574 = vrot.lane.b32.xlu1 %v4558_v27, %s5920_s11 }
 0x8d6   : > { %4766 = vrot.lane.b32.xlu2 %v4756_v16, %s5919_s10 }
 0x8dc   : > { %4202 = vrot.lane.b32.xlu0 %v8209_v49, %s5920_s11 }
 0x8de   : > { %4401 = vrot.lane.b32.xlu2 %v8193_v53, %s5920_s11 }
 0x8e6   : > { %4562 = vrot.lane.b32.xlu2 %v4558_v27, %s5918_s9 }
 0x8ee   : > { %4196 = vrot.lane.b32.xlu2 %v8209_v49, %s5919_s10  ;;  %s224_s10 = scalar_lea.vmem %s8287_s5, %s5431_s7 }
 0x8f6   : > { %4200 = vrot.lane.b32.xlu2 %v8198_v17, %s5920_s11 }
 0x8fe   : > { %4576 = vrot.lane.b32.xlu2 %v8218_v9, %s5920_s11 }
 0x906   : > { %v4390_v59 = vpop.permute.xlu0 %4389 }
 0x907   : > { %v4406_v7 = vsel %vm785_vm12, %v8193_v53, %v4390_v59 }
 0x90e   : > { %v4189_v43 = vpop.permute.xlu1 %4188 }
 0x90f   : > { %v4206_v18 = vsel %vm785_vm12, %v8198_v17, %v4189_v43 }
 0x916   : > { %v4396_v38 = vpop.permute.xlu1 %4395 }
 0x917   : > { %v4408_v0 = vsel %vm787_vm13, %v4406_v7, %v4396_v38 }
 0x918   : > { %v4191_v40 = vpop.permute.xlu2 %4190 }
 0x919   : > { %v4207_v17 = vsel %vm785_vm12, %v8209_v49, %v4191_v40 }
 0x91f   : > { %v4400_v50 = vpop.permute.xlu1 %4399  ;;  %v4394_v20 = vpop.permute.xlu0 %4393 }
 0x920   : > { %v4388_v46 = vpop.permute.xlu2 %4387 }
 0x921   : > { %v4405_v26 = vsel %vm785_vm12, %v4383_v41, %v4388_v46 }
 0x922   : > { %v4407_v58 = vsel %vm787_vm13, %v4405_v26, %v4394_v20 }
 0x923   : > { %v4409_v61 = vsel %vm789_vm14, %v4407_v58, %v4400_v50 }
 0x924   : > { %4786 = vrot.lane.b32.xlu0 %v4409_v61, %s5921_s12 }
 0x927   : > { %v4761_v28 = vpop.permute.xlu1 %4760  ;;  %v4769_v57 = vpop.permute.xlu0 %4768 }
 0x928   : > { %v4763_v30 = vpop.permute.xlu2 %4762  ;;  %v4778_v11 = vsel %vm785_vm12, %v4756_v16, %v4761_v28 }
 0x929   : > { %v4779_v60 = vsel %vm785_vm12, %v4757_v22, %v4763_v30 }
 0x92a   : > { %v4781_v3 = vsel %vm787_vm13, %v4779_v60, %v4769_v57 }
 0x92f   : > { %v4775_v8 = vpop.permute.xlu1 %4774  ;;  %v4773_v48 = vpop.permute.xlu0 %4772 }
 0x930   : > { %v4783_v36 = vsel %vm789_vm14, %v4781_v3, %v4775_v8  ;;  %v4767_v29 = vpop.permute.xlu2 %4766 }
 0x931   : > { %v4780_v24 = vsel %vm787_vm13, %v4778_v11, %v4767_v29  ;;  %4796 = vrot.lane.b32.xlu0 %v4783_v36, %s5921_s12 }
 0x932   : > { %v4782_v4 = vsel %vm789_vm14, %v4780_v24, %v4773_v48 }
 0x933   : > { %4794 = vrot.lane.b32.xlu2 %v4782_v4, %s5921_s12 }
 0x937   : > { %v4195_v1 = vpop.permute.xlu1 %4194 }
 0x938   : > { %v4402_v56 = vpop.permute.xlu2 %4401  ;;  %v4208_v47 = vsel %vm787_vm13, %v4206_v18, %v4195_v1 }
 0x939   : > { %v4410_v19 = vsel %vm789_vm14, %v4408_v0, %v4402_v56 }
 0x93a   : > { %4788 = vrot.lane.b32.xlu1 %v4410_v19, %s5921_s12 }
 0x93e   : > { %v4565_v63 = vpop.permute.xlu0 %4564 }
 0x93f   : > { %v4571_v45 = vpop.permute.xlu1 %4570  ;;  %v4581_v14 = vsel %vm785_vm12, %v8218_v9, %v4565_v63 }
 0x940   : > { %v4563_v42 = vpop.permute.xlu2 %4562  ;;  %v4583_v6 = vsel %vm787_vm13, %v4581_v14, %v4571_v45 }
 0x941   : > { %v4580_v44 = vsel %vm785_vm12, %v4558_v27, %v4563_v42 }
 0x946   : > { %v4569_v25 = vpop.permute.xlu0 %4568 }
 0x947   : > { %v4582_v39 = vsel %vm787_vm13, %v4580_v44, %v4569_v25  ;;  %v4575_v21 = vpop.permute.xlu1 %4574 }
 0x948   : > { %v4197_v34 = vpop.permute.xlu2 %4196  ;;  %v4584_v62 = vsel %vm789_vm14, %v4582_v39, %v4575_v21 }
 0x949   : > { %v4209_v2 = vsel %vm787_vm13, %v4207_v17, %v4197_v34 }
 0x94e   : > { %v4203_v10 = vpop.permute.xlu0 %4202 }
 0x94f   : > { %v4211_v41 = vsel %vm789_vm14, %v4209_v2, %v4203_v10 }
 0x950   : > { %v4201_v55 = vpop.permute.xlu2 %4200 }
 0x951   : > { %v4210_v32 = vsel %vm789_vm14, %v4208_v47, %v4201_v55 }
 0x958   : > { %v4577_v13 = vpop.permute.xlu2 %4576 }
 0x959   : > { %v4585_v33 = vsel %vm789_vm14, %v4583_v6, %v4577_v13 }
 0x98d   : > { %v4795_v52 = vpop.permute.xlu2 %4794 }
 0x98e   : > { %v4802_v51 = vsel %vm529_vm6, %v4584_v62, %v4795_v52 }
 0x98f   : > { %4805 = vst [vmem:[%s224_s10 + $0x8] sm:$0xff] %v4802_v51 }
 0x996   : > { %v4787_v35 = vpop.permute.xlu0 %4786 }
 0x997   : > { %v4800_v37 = vsel %vm529_vm6, %v4210_v32, %v4787_v35 }
 0x998   : > { %4804 = vst [vmem:[%s224_s10] sm:$0xff] %v4800_v37 }
 0x9a3   : > { %v4797_v53 = vpop.permute.xlu0 %4796 }
 0x9a4   : > { %v4803_v31 = vsel %vm529_vm6, %v4585_v33, %v4797_v53 }
 0x9a5   : > { %4807 = vst [vmem:[%s224_s10 + $0x18] sm:$0xf] %v4803_v31 }
 0x9ac   : > { %v4789_v5 = vpop.permute.xlu1 %4788 }
 0x9ad   : > { %v4801_v12 = vsel %vm529_vm6, %v4211_v41, %v4789_v5 }
 0x9ae   : > { %4806 = vst [vmem:[%s224_s10 + $0x10] sm:$0xf] %v4801_v12 }
 0x9af PF: > { %s15_s18 = sadd.s32 1, %s5915_s18  }
 0x9b0   : > { %p12_p4 = scmp.ge.s32.totalorder %s15_s18, 4  }
 0x9b2   :  { %14 = sbr.rel (!%p12_p4) target bundleno = 1 (0x1), region = 74 }

</bundles_post_ra>
